<compile_context>
chip_gen: v6e
topology: v6e:2x2x1
jax: 0.10.0
libtpu: 0.0.40
codegen_flags: <defaults>
</compile_context>

<pallas_src>
import functools

import jax
import jax.numpy as jnp
from jax.experimental import pallas as pl
from jax.experimental.pallas import tpu as pltpu

RNET_IMAGE_CHANNELS = 4  # replaced conv1 input channels
_BN_EPS = 1e-5
_LANE = 128
_SUBLANE = 8


# ---------------------------------------------------------------------------
# Helpers
# ---------------------------------------------------------------------------
def _round_up(x, m):
    return ((x + m - 1) // m) * m


def _pick_tile(padded, base, cap):
    """Largest multiple of `base` that divides `padded` and is <= cap."""
    t = min(cap, padded)
    t -= t % base
    while t > base and padded % t:
        t -= base
    return max(t, base)


def _vmem_limit_bytes():
    cap = 64 * 1024 * 1024  # conservative fallback (v7x-sized VMEM)
    try:
        cap = int(getattr(pltpu.get_tpu_info(), "vmem_capacity_bytes", cap))
    except Exception:
        pass
    return int(max(min(cap * 3 // 4, 96 * 1024 * 1024), 16 * 1024 * 1024))


_VMEM_LIMIT = _vmem_limit_bytes()
_CP_MM = pltpu.CompilerParams(
    dimension_semantics=("parallel", "parallel", "arbitrary"),
    vmem_limit_bytes=_VMEM_LIMIT,
)
_CP_2D = pltpu.CompilerParams(
    dimension_semantics=("parallel", "arbitrary"),
    vmem_limit_bytes=_VMEM_LIMIT,
)
_CP_1D = pltpu.CompilerParams(vmem_limit_bytes=_VMEM_LIMIT)


# ---------------------------------------------------------------------------
# Pallas kernel 1: tiled matmul with fused shift / residual / ReLU epilogue
# ---------------------------------------------------------------------------
def _matmul_bias_kernel(x_ref, w_ref, b_ref, *rest, relu, has_residual):
    if has_residual:
        r_ref, o_ref, acc_ref = rest
    else:
        o_ref, acc_ref = rest
        r_ref = None
    k = pl.program_id(2)

    @pl.when(k == 0)
    def _init():
        acc_ref[...] = jnp.zeros_like(acc_ref)

    acc_ref[...] += jnp.dot(x_ref[...], w_ref[...],
                            preferred_element_type=jnp.float32)

    @pl.when(k == pl.num_programs(2) - 1)
    def _finalize():
        out = acc_ref[...] + b_ref[...]          # folded-BN shift / linear bias (f32)
        if r_ref is not None:
            out = out + r_ref[...].astype(jnp.float32)   # fused residual add
        if relu:
            out = jnp.maximum(out, 0.0)
        o_ref[...] = out.astype(o_ref.dtype)


def matmul_bias(x, w_p, bias_p, *, relu=False, residual=None,
                out_dtype=jnp.bfloat16, tm_cap=256, tn_cap=512, tk_cap=2048):
    """(M,K) @ (Kp,Np) in bf16 on the MXU, f32 accumulate, + shift (+residual)(+ReLU).

    w_p   : (Kp, Np) bf16, pre-padded to 128-multiples, BN scale already folded in.
    bias_p: (1, Np)  f32 shift/bias, pre-padded.
    Returns (M, Np): rows sliced back to M, channels kept padded (lane-dense).
    """
    M, K = x.shape
    Kp, Np = w_p.shape
    assert Kp == _round_up(K, _LANE) and Np % _LANE == 0

    Mp = _round_up(max(M, _SUBLANE), _SUBLANE)
    tm = _pick_tile(Mp, _SUBLANE, tm_cap)
    tn = _pick_tile(Np, _LANE, tn_cap)
    tk = _pick_tile(Kp, _LANE, tk_cap)

    xp = x.astype(jnp.bfloat16)
    if Mp != M or Kp != K:
        xp = jnp.pad(xp, ((0, Mp - M), (0, Kp - K)))

    operands = [xp, w_p, bias_p]
    in_specs = [
        pl.BlockSpec((tm, tk), lambda i, j, k: (i, k)),
        pl.BlockSpec((tk, tn), lambda i, j, k: (k, j)),
        pl.BlockSpec((1, tn), lambda i, j, k: (0, j)),   # resident across i and k
    ]
    has_res = residual is not None
    if has_res:
        r = residual.astype(jnp.bfloat16)
        assert r.shape[1] == Np
        if r.shape[0] != Mp:
            r = jnp.pad(r, ((0, Mp - r.shape[0]), (0, 0)))
        operands.append(r)
        in_specs.append(pl.BlockSpec((tm, tn), lambda i, j, k: (i, j)))

    kern = functools.partial(_matmul_bias_kernel, relu=relu, has_residual=has_res)
    out = pl.pallas_call(
        kern,
        out_shape=jax.ShapeDtypeStruct((Mp, Np), out_dtype),
        grid=(Mp // tm, Np // tn, Kp // tk),
        in_specs=in_specs,
        out_specs=pl.BlockSpec((tm, tn), lambda i, j, k: (i, j)),
        scratch_shapes=[pltpu.VMEM((tm, tn), jnp.float32)],
        compiler_params=_CP_MM,
    )(*operands)
    return out if Mp == M else out[:M]


# ---------------------------------------------------------------------------
# Pallas kernel 2: running max over pooling taps (pipelined reduction)
# ---------------------------------------------------------------------------
def _maxpool_kernel(x_ref, o_ref):
    t = pl.program_id(1)

    @pl.when(t == 0)
    def _init():
        o_ref[...] = jnp.full_like(o_ref, -jnp.inf)

    o_ref[...] = jnp.maximum(o_ref[...], x_ref[0])


def max_over_taps(taps):
    """taps: (T, M, C) -> (M, C) elementwise max, reduced over the tap grid axis."""
    T, M, C = taps.shape
    Mp = _round_up(max(M, _SUBLANE), _SUBLANE)
    tm = _pick_tile(Mp, _SUBLANE, 512)
    taps_p = jnp.pad(taps, ((0, 0), (0, Mp - M), (0, 0))) if Mp != M else taps
    out = pl.pallas_call(
        _maxpool_kernel,
        out_shape=jax.ShapeDtypeStruct((Mp, C), taps.dtype),
        grid=(Mp // tm, T),
        in_specs=[pl.BlockSpec((1, tm, C), lambda m, t: (t, m, 0))],
        out_specs=pl.BlockSpec((tm, C), lambda m, t: (m, 0)),
        compiler_params=_CP_2D,
    )(taps_p)
    return out if Mp == M else out[:M]


# ---------------------------------------------------------------------------
# Pallas kernel 3: fused head (GAP + float MLP + combined MLP), single launch
# ---------------------------------------------------------------------------
def _head_kernel(feat_ref, flt_ref, wf1_ref, bf1_ref, wf2_ref, bf2_ref,
                 wci_ref, wcf_ref, bc1_ref, wc2_ref, bc2_ref, o_ref):
    # Global average pool over spatial positions (fused GAP).
    img = jnp.mean(feat_ref[...].astype(jnp.float32), axis=1)               # (B, 512)
    # float_fc: Linear(3,32)+ReLU, Linear(32,32)+ReLU (input zero-padded 3->8).
    f = jnp.dot(flt_ref[...], wf1_ref[...], preferred_element_type=jnp.float32)
    f = jnp.maximum(f + bf1_ref[...], 0.0)
    f = jnp.dot(f, wf2_ref[...], preferred_element_type=jnp.float32)
    f = jnp.maximum(f + bf2_ref[...], 0.0)                                   # (B, 32)
    # fc_combined[0] on concat([img, f]) == img @ W_img + f @ W_flt  (concat avoided)
    h = jnp.dot(img, wci_ref[...], preferred_element_type=jnp.float32)
    h = h + jnp.dot(f, wcf_ref[...], preferred_element_type=jnp.float32)
    h = jnp.maximum(h + bc1_ref[...], 0.0)                                   # (B, 128)
    o_ref[...] = (jnp.dot(h, wc2_ref[...], preferred_element_type=jnp.float32)
                  + bc2_ref[...])                                            # (B, 1)


def _full_spec(arr):
    nd = arr.ndim
    return pl.BlockSpec(arr.shape, lambda i, _nd=nd: (0,) * _nd)


def head_forward(feat_nhwc, float_value, hp):
    B, H, W, C = feat_nhwc.shape
    feat = feat_nhwc.reshape(B, H * W, C)
    flt = jnp.pad(float_value.astype(jnp.float32),
                  ((0, 0), (0, 8 - float_value.shape[1])))
    args = (feat, flt, hp["wf1"], hp["bf1"], hp["wf2"], hp["bf2"],
            hp["wci"], hp["wcf"], hp["bc1"], hp["wc2"], hp["bc2"])
    return pl.pallas_call(
        _head_kernel,
        out_shape=jax.ShapeDtypeStruct((B, 1), jnp.float32),
        grid=(1,),
        in_specs=[_full_spec(a) for a in args],
        out_specs=pl.BlockSpec((B, 1), lambda i: (0, 0)),
        compiler_params=_CP_1D,
    )(*args)


# ---------------------------------------------------------------------------
# Conv / pool glue (reshape + slicing only; all heavy compute stays in Pallas)
# ---------------------------------------------------------------------------
def _im2col(x, kh, kw, stride, pad):
    B, H, W, C = x.shape
    if pad:
        x = jnp.pad(x, ((0, 0), (pad, pad), (pad, pad), (0, 0)))
    Ho = (H + 2 * pad - kh) // stride + 1
    Wo = (W + 2 * pad - kw) // stride + 1
    if kh == 1 and kw == 1:
        patches = x[:, ::stride, ::stride, :]
    else:
        cols = []
        for i in range(kh):
            for j in range(kw):
                cols.append(x[:, i:i + (Ho - 1) * stride + 1:stride,
                               j:j + (Wo - 1) * stride + 1:stride, :])
        patches = jnp.concatenate(cols, axis=-1)         # (B, Ho, Wo, kh*kw*C) bf16
    return patches.reshape(B * Ho * Wo, kh * kw * C), B, Ho, Wo


def conv_bn(x, cp, *, stride, pad, relu, residual=None):
    """x: NHWC bf16 (channels may carry zero padding to 128-multiples).
    BN scale folded into cp['w']; shift in cp['b']; residual/ReLU fused in epilogue.
    Returns NHWC bf16 with channels padded to cp['cout_p'] (padded channels are 0)."""
    kh, kw, cout_p = cp["kh"], cp["kw"], cp["cout_p"]
    patches, B, Ho, Wo = _im2col(x, kh, kw, stride, pad)
    res2d = residual.reshape(B * Ho * Wo, cout_p) if residual is not None else None
    out = matmul_bias(patches, cp["w"], cp["b"], relu=relu, residual=res2d,
                      out_dtype=jnp.bfloat16)
    return out.reshape(B, Ho, Wo, cout_p)


def maxpool_3x3_s2_p1(x):
    B, H, W, C = x.shape
    xp = jnp.pad(x, ((0, 0), (1, 1), (1, 1), (0, 0)), constant_values=-jnp.inf)
    Ho = (H + 2 - 3) // 2 + 1
    Wo = (W + 2 - 3) // 2 + 1
    taps = [xp[:, i:i + (Ho - 1) * 2 + 1:2,
                  j:j + (Wo - 1) * 2 + 1:2, :].reshape(B * Ho * Wo, C)
            for i in range(3) for j in range(3)]
    out = max_over_taps(jnp.stack(taps, axis=0))
    return out.reshape(B, Ho, Wo, C)


# ---------------------------------------------------------------------------
# Parameter initialization (deterministic, synthetic; BN folded at build time)
# ---------------------------------------------------------------------------
def _bn_fold(key, c):
    k1, k2, k3, k4 = jax.random.split(key, 4)
    gamma = 1.0 + 0.1 * jax.random.normal(k1, (c,), jnp.float32)
    beta = 0.1 * jax.random.normal(k2, (c,), jnp.float32)
    mean = 0.1 * jax.random.normal(k3, (c,), jnp.float32)
    var = 0.9 + 0.2 * jax.random.uniform(k4, (c,), jnp.float32)
    scale = gamma / jnp.sqrt(var + _BN_EPS)
    shift = beta - mean * scale
    return scale, shift


def _conv_bn_params(key, kh, kw, cin, cout, cin_store=None):
    """cin: real input channels (weight init / fan-in).  cin_store: channel count the
    incoming activation actually carries (>= cin; extra channels are zero, so the
    corresponding weight rows are zero)."""
    cin_store = cin if cin_store is None else cin_store
    k1, k2 = jax.random.split(key)
    fan_in = kh * kw * cin
    w = jax.random.normal(k1, (kh, kw, cin, cout), jnp.float32) * (2.0 / fan_in) ** 0.5
    scale, shift = _bn_fold(k2, cout)
    w = w * scale                                   # fold BN scale into the weights
    Np = _round_up(cout, _LANE)                     # lane-dense output channels
    K = kh * kw * cin_store
    Kp = _round_up(K, _LANE)
    w_full = jnp.zeros((kh, kw, cin_store, Np), jnp.float32)
    w_full = w_full.at[:, :, :cin, :cout].set(w)
    w_p = jnp.zeros((Kp, Np), jnp.bfloat16).at[:K, :].set(
        w_full.reshape(K, Np).astype(jnp.bfloat16))
    b_p = jnp.zeros((1, Np), jnp.float32).at[0, :cout].set(shift)
    return {"kh": kh, "kw": kw, "cout_p": Np, "w": w_p, "b": b_p}


def _linear_params(key, cin, cout, pad_in=None):
    k1, k2 = jax.random.split(key)
    w = jax.random.normal(k1, (cin, cout), jnp.float32) * (1.0 / cin) ** 0.5
    b = 0.01 * jax.random.normal(k2, (cout,), jnp.float32)
    if pad_in is not None and pad_in > cin:
        w = jnp.pad(w, ((0, pad_in - cin), (0, 0)))
    return w, b.reshape(1, cout)


def init_params(key):
    keys = iter(jax.random.split(key, 64))
    p = {"conv1": _conv_bn_params(next(keys), 7, 7, RNET_IMAGE_CHANNELS, 64)}

    layers = []
    cin = 64
    cin_p = p["conv1"]["cout_p"]          # activations carry padded channels
    for cout, stride in [(64, 1), (128, 2), (256, 2), (512, 2)]:
        cout_p = _round_up(cout, _LANE)
        blocks = []
        for bi in range(2):
            s = stride if bi == 0 else 1
            in_c = cin if bi == 0 else cout
            in_p = cin_p if bi == 0 else cout_p
            blk = {
                "stride": s,
                "conv1": _conv_bn_params(next(keys), 3, 3, in_c, cout,
                                         cin_store=in_p),
            }
            blk["conv2"] = _conv_bn_params(next(keys), 3, 3, cout, cout,
                                           cin_store=blk["conv1"]["cout_p"])
            if bi == 0 and (s != 1 or in_c != cout):
                blk["down"] = _conv_bn_params(next(keys), 1, 1, in_c, cout,
                                              cin_store=in_p)
            blocks.append(blk)
        layers.append(blocks)
        cin, cin_p = cout, cout_p
    p["layers"] = layers

    head = {}
    head["wf1"], head["bf1"] = _linear_params(next(keys), 3, 32, pad_in=8)
    head["wf2"], head["bf2"] = _linear_params(next(keys), 32, 32)
    wc, head["bc1"] = _linear_params(next(keys), 512 + 32, 128)
    head["wci"], head["wcf"] = wc[:512], wc[512:]
    head["wc2"], head["bc2"] = _linear_params(next(keys), 128, 1)
    p["head"] = head
    return p


# ---------------------------------------------------------------------------
# Model forward
# ---------------------------------------------------------------------------
def basic_block(x, blk):
    out = conv_bn(x, blk["conv1"], stride=blk["stride"], pad=1, relu=True)
    if "down" in blk:
        identity = conv_bn(x, blk["down"], stride=blk["stride"], pad=0, relu=False)
    else:
        identity = x
    # second conv: BN shift + residual add + ReLU fused in the matmul epilogue
    return conv_bn(out, blk["conv2"], stride=1, pad=1, relu=True, residual=identity)


def resnet18_features(x_nhwc, p):
    x = conv_bn(x_nhwc, p["conv1"], stride=2, pad=3, relu=True)
    x = maxpool_3x3_s2_p1(x)
    for blocks in p["layers"]:
        for blk in blocks:
            x = basic_block(x, blk)
    return x                      # (B, H', W', 512) bf16; GAP fused into the head


def model_forward(image_nchw, float_value, p):
    # PyTorch NCHW -> NHWC once at entry; activations kept in bfloat16.
    x = jnp.transpose(image_nchw, (0, 2, 3, 1)).astype(jnp.bfloat16)
    feat = resnet18_features(x, p)
    return head_forward(feat, float_value, p["head"])     # (B, 1) f32


# ---------------------------------------------------------------------------
if __name__ == "__main__":
    key = jax.random.PRNGKey(0)
    k_param, k_img, k_flt = jax.random.split(key, 3)

    params = init_params(k_param)

    B, C, H, W = 2, RNET_IMAGE_CHANNELS, 16, 16
    image = jax.random.normal(k_img, (B, C, H, W), jnp.float32)   # NCHW like PyTorch
    float_value = jax.random.normal(k_flt, (B, 3), jnp.float32)

    fwd = jax.jit(functools.partial(model_forward, p=params))
    out = fwd(image, float_value)
    out = jax.block_until_ready(out)
    assert out.shape == (B, 1) and out.dtype == jnp.float32
    assert bool(jnp.all(jnp.isfinite(out)))
    print("KERNEL_OK")
</pallas_src>

<mosaic_0001>
module attributes {stable_mosaic.version = 11 : i64} {
  func.func @_matmul_bias_kernel(%arg0: i32, %arg1: i32, %arg2: i32, %arg3: memref<128x256xbf16, #tpu.memory_space<vmem>>, %arg4: memref<256x128xbf16, #tpu.memory_space<vmem>>, %arg5: memref<1x128xf32, #tpu.memory_space<vmem>>, %arg6: memref<128x128xbf16, #tpu.memory_space<vmem>>, %arg7: memref<128x128xf32, #tpu.memory_space<vmem>>) attributes {dimension_semantics = [#tpu.dimension_semantics<parallel>, #tpu.dimension_semantics<parallel>, #tpu.dimension_semantics<arbitrary>], iteration_bounds = array<i64: 1, 1, 1>, scalar_prefetch = 0 : i64, scratch_operands = 1 : i64, tpu.core_type = #tpu.core_type<tc>, window_params = [{transform_indices = @transform_0, window_bounds = array<i64: 128, 256>}, {transform_indices = @transform_1, window_bounds = array<i64: 256, 128>}, {transform_indices = @transform_2, window_bounds = array<i64: 1, 128>}, {transform_indices = @transform_3, window_bounds = array<i64: 128, 128>}]} {
    %c0_i32 = arith.constant 0 : i32
    %0 = arith.cmpi eq, %arg2, %c0_i32 : i32
    %1 = arith.extui %0 : i1 to i32
    %c0_i32_0 = arith.constant 0 : i32
    %2 = arith.cmpi ne, %1, %c0_i32_0 : i32
    scf.if %2 {
      %cst_10 = arith.constant 0.000000e+00 : f32
      %12 = vector.broadcast %cst_10 : f32 to vector<128x128xf32>
      %c0_11 = arith.constant 0 : index
      %c0_12 = arith.constant 0 : index
      %13 = vector.load %arg7[%c0_11, %c0_12] : memref<128x128xf32, #tpu.memory_space<vmem>>, vector<128x128xf32>
      tpu.vector_store %arg7[%c0_11, %c0_12], %12 {strides = array<i32>} : memref<128x128xf32, #tpu.memory_space<vmem>>, vector<128x128xf32>,
    } else {
    }
    %c0 = arith.constant 0 : index
    %c0_1 = arith.constant 0 : index
    %3 = vector.load %arg7[%c0, %c0_1] : memref<128x128xf32, #tpu.memory_space<vmem>>, vector<128x128xf32>
    %c0_2 = arith.constant 0 : index
    %c0_3 = arith.constant 0 : index
    %4 = vector.load %arg3[%c0_2, %c0_3] : memref<128x256xbf16, #tpu.memory_space<vmem>>, vector<128x256xbf16>
    %c0_4 = arith.constant 0 : index
    %c0_5 = arith.constant 0 : index
    %5 = vector.load %arg4[%c0_4, %c0_5] : memref<256x128xbf16, #tpu.memory_space<vmem>>, vector<256x128xbf16>
    %cst = arith.constant dense<0.000000e+00> : vector<128x128xf32>
    %6 = tpu.matmul %4, %5, %cst {dimension_numbers = #tpu.dot_dimension_numbers<[1], [0], [0], [1], [0, 0, 1, 1], [], []>} : vector<128x256xbf16>, vector<256x128xbf16>, vector<128x128xf32> -> vector<128x128xf32>
    %7 = arith.addf %3, %6 : vector<128x128xf32>
    %c0_6 = arith.constant 0 : index
    %c0_7 = arith.constant 0 : index
    %8 = vector.load %arg7[%c0_6, %c0_7] : memref<128x128xf32, #tpu.memory_space<vmem>>, vector<128x128xf32>
    tpu.vector_store %arg7[%c0_6, %c0_7], %7 {strides = array<i32>} : memref<128x128xf32, #tpu.memory_space<vmem>>, vector<128x128xf32>,
    %c0_i32_8 = arith.constant 0 : i32
    %9 = arith.cmpi eq, %arg2, %c0_i32_8 : i32
    %10 = arith.extui %9 : i1 to i32
    %c0_i32_9 = arith.constant 0 : i32
    %11 = arith.cmpi ne, %10, %c0_i32_9 : i32
    scf.if %11 {
      %c0_10 = arith.constant 0 : index
      %c0_11 = arith.constant 0 : index
      %12 = vector.load %arg7[%c0_10, %c0_11] : memref<128x128xf32, #tpu.memory_space<vmem>>, vector<128x128xf32>
      %c0_12 = arith.constant 0 : index
      %c0_13 = arith.constant 0 : index
      %13 = vector.load %arg5[%c0_12, %c0_13] : memref<1x128xf32, #tpu.memory_space<vmem>>, vector<1x128xf32>
      %14 = vector.broadcast %13 : vector<1x128xf32> to vector<128x128xf32>
      %15 = arith.addf %12, %14 : vector<128x128xf32>
      %cst_14 = arith.constant 0.000000e+00 : f32
      %16 = vector.broadcast %cst_14 : f32 to vector<128x128xf32>
      %17 = arith.maximumf %15, %16 : vector<128x128xf32>
      %18 = arith.truncf %17 : vector<128x128xf32> to vector<128x128xbf16>
      %c0_15 = arith.constant 0 : index
      %c0_16 = arith.constant 0 : index
      %19 = vector.load %arg6[%c0_15, %c0_16] : memref<128x128xbf16, #tpu.memory_space<vmem>>, vector<128x128xbf16>
      tpu.vector_store %arg6[%c0_15, %c0_16], %18 {strides = array<i32>} : memref<128x128xbf16, #tpu.memory_space<vmem>>, vector<128x128xbf16>,
    } else {
    }
    return
  }
  func.func @transform_0(%arg0: i32, %arg1: i32, %arg2: i32) -> (i32, i32) {
    %c0_i32 = arith.constant 0 : i32
    return %arg0, %arg2 : i32, i32
  }
  func.func @transform_1(%arg0: i32, %arg1: i32, %arg2: i32) -> (i32, i32) {
    %c0_i32 = arith.constant 0 : i32
    return %arg2, %arg1 : i32, i32
  }
  func.func @transform_2(%arg0: i32, %arg1: i32, %arg2: i32) -> (i32, i32) {
    %c0_i32 = arith.constant 0 : i32
    %c0_i32_0 = arith.constant 0 : i32
    return %c0_i32, %arg1 : i32, i32
  }
  func.func @transform_3(%arg0: i32, %arg1: i32, %arg2: i32) -> (i32, i32) {
    %c0_i32 = arith.constant 0 : i32
    return %arg0, %arg1 : i32, i32
  }
}

module attributes {stable_mosaic.version = 11 : i64} {
  func.func @_maxpool_kernel(%arg0: i32, %arg1: i32, %arg2: memref<1x32x128xbf16, #tpu.memory_space<vmem>>, %arg3: memref<32x128xbf16, #tpu.memory_space<vmem>>) attributes {dimension_semantics = [#tpu.dimension_semantics<parallel>, #tpu.dimension_semantics<arbitrary>], iteration_bounds = array<i64: 1, 9>, scalar_prefetch = 0 : i64, scratch_operands = 0 : i64, tpu.core_type = #tpu.core_type<tc>, window_params = [{transform_indices = @transform_0, window_bounds = array<i64: 1, 32, 128>}, {transform_indices = @transform_1, window_bounds = array<i64: 32, 128>}]} {
    %c0_i32 = arith.constant 0 : i32
    %0 = arith.cmpi eq, %arg1, %c0_i32 : i32
    %1 = arith.extui %0 : i1 to i32
    %c0_i32_0 = arith.constant 0 : i32
    %2 = arith.cmpi ne, %1, %c0_i32_0 : i32
    scf.if %2 {
      %cst = arith.constant 0xFF80 : bf16
      %8 = vector.broadcast %cst : bf16 to vector<32x128xbf16>
      %c0_7 = arith.constant 0 : index
      %c0_8 = arith.constant 0 : index
      %9 = vector.load %arg3[%c0_7, %c0_8] : memref<32x128xbf16, #tpu.memory_space<vmem>>, vector<32x128xbf16>
      tpu.vector_store %arg3[%c0_7, %c0_8], %8 {strides = array<i32>} : memref<32x128xbf16, #tpu.memory_space<vmem>>, vector<32x128xbf16>,
    } else {
    }
    %c0 = arith.constant 0 : index
    %c0_1 = arith.constant 0 : index
    %3 = vector.load %arg3[%c0, %c0_1] : memref<32x128xbf16, #tpu.memory_space<vmem>>, vector<32x128xbf16>
    %c0_2 = arith.constant 0 : index
    %c0_3 = arith.constant 0 : index
    %c0_4 = arith.constant 0 : index
    %4 = vector.load %arg2[%c0_2, %c0_3, %c0_4] : memref<1x32x128xbf16, #tpu.memory_space<vmem>>, vector<1x32x128xbf16>
    %5 = vector.shape_cast %4 : vector<1x32x128xbf16> to vector<32x128xbf16>
    %6 = arith.maximumf %3, %5 : vector<32x128xbf16>
    %c0_5 = arith.constant 0 : index
    %c0_6 = arith.constant 0 : index
    %7 = vector.load %arg3[%c0_5, %c0_6] : memref<32x128xbf16, #tpu.memory_space<vmem>>, vector<32x128xbf16>
    tpu.vector_store %arg3[%c0_5, %c0_6], %6 {strides = array<i32>} : memref<32x128xbf16, #tpu.memory_space<vmem>>, vector<32x128xbf16>,
    return
  }
  func.func @transform_0(%arg0: i32, %arg1: i32) -> (i32, i32, i32) {
    %c0_i32 = arith.constant 0 : i32
    %c0_i32_0 = arith.constant 0 : i32
    return %arg1, %arg0, %c0_i32 : i32, i32, i32
  }
  func.func @transform_1(%arg0: i32, %arg1: i32) -> (i32, i32) {
    %c0_i32 = arith.constant 0 : i32
    %c0_i32_0 = arith.constant 0 : i32
    return %arg0, %c0_i32 : i32, i32
  }
}

module attributes {stable_mosaic.version = 11 : i64} {
  func.func @_matmul_bias_kernel(%arg0: i32, %arg1: i32, %arg2: i32, %arg3: memref<32x1152xbf16, #tpu.memory_space<vmem>>, %arg4: memref<1152x128xbf16, #tpu.memory_space<vmem>>, %arg5: memref<1x128xf32, #tpu.memory_space<vmem>>, %arg6: memref<32x128xbf16, #tpu.memory_space<vmem>>, %arg7: memref<32x128xf32, #tpu.memory_space<vmem>>) attributes {dimension_semantics = [#tpu.dimension_semantics<parallel>, #tpu.dimension_semantics<parallel>, #tpu.dimension_semantics<arbitrary>], iteration_bounds = array<i64: 1, 1, 1>, scalar_prefetch = 0 : i64, scratch_operands = 1 : i64, tpu.core_type = #tpu.core_type<tc>, window_params = [{transform_indices = @transform_0, window_bounds = array<i64: 32, 1152>}, {transform_indices = @transform_1, window_bounds = array<i64: 1152, 128>}, {transform_indices = @transform_2, window_bounds = array<i64: 1, 128>}, {transform_indices = @transform_3, window_bounds = array<i64: 32, 128>}]} {
    %c0_i32 = arith.constant 0 : i32
    %0 = arith.cmpi eq, %arg2, %c0_i32 : i32
    %1 = arith.extui %0 : i1 to i32
    %c0_i32_0 = arith.constant 0 : i32
    %2 = arith.cmpi ne, %1, %c0_i32_0 : i32
    scf.if %2 {
      %cst_10 = arith.constant 0.000000e+00 : f32
      %12 = vector.broadcast %cst_10 : f32 to vector<32x128xf32>
      %c0_11 = arith.constant 0 : index
      %c0_12 = arith.constant 0 : index
      %13 = vector.load %arg7[%c0_11, %c0_12] : memref<32x128xf32, #tpu.memory_space<vmem>>, vector<32x128xf32>
      tpu.vector_store %arg7[%c0_11, %c0_12], %12 {strides = array<i32>} : memref<32x128xf32, #tpu.memory_space<vmem>>, vector<32x128xf32>,
    } else {
    }
    %c0 = arith.constant 0 : index
    %c0_1 = arith.constant 0 : index
    %3 = vector.load %arg7[%c0, %c0_1] : memref<32x128xf32, #tpu.memory_space<vmem>>, vector<32x128xf32>
    %c0_2 = arith.constant 0 : index
    %c0_3 = arith.constant 0 : index
    %4 = vector.load %arg3[%c0_2, %c0_3] : memref<32x1152xbf16, #tpu.memory_space<vmem>>, vector<32x1152xbf16>
    %c0_4 = arith.constant 0 : index
    %c0_5 = arith.constant 0 : index
    %5 = vector.load %arg4[%c0_4, %c0_5] : memref<1152x128xbf16, #tpu.memory_space<vmem>>, vector<1152x128xbf16>
    %cst = arith.constant dense<0.000000e+00> : vector<32x128xf32>
    %6 = tpu.matmul %4, %5, %cst {dimension_numbers = #tpu.dot_dimension_numbers<[1], [0], [0], [1], [0, 0, 1, 1], [], []>} : vector<32x1152xbf16>, vector<1152x128xbf16>, vector<32x128xf32> -> vector<32x128xf32>
    %7 = arith.addf %3, %6 : vector<32x128xf32>
    %c0_6 = arith.constant 0 : index
    %c0_7 = arith.constant 0 : index
    %8 = vector.load %arg7[%c0_6, %c0_7] : memref<32x128xf32, #tpu.memory_space<vmem>>, vector<32x128xf32>
    tpu.vector_store %arg7[%c0_6, %c0_7], %7 {strides = array<i32>} : memref<32x128xf32, #tpu.memory_space<vmem>>, vector<32x128xf32>,
    %c0_i32_8 = arith.constant 0 : i32
    %9 = arith.cmpi eq, %arg2, %c0_i32_8 : i32
    %10 = arith.extui %9 : i1 to i32
    %c0_i32_9 = arith.constant 0 : i32
    %11 = arith.cmpi ne, %10, %c0_i32_9 : i32
    scf.if %11 {
      %c0_10 = arith.constant 0 : index
      %c0_11 = arith.constant 0 : index
      %12 = vector.load %arg7[%c0_10, %c0_11] : memref<32x128xf32, #tpu.memory_space<vmem>>, vector<32x128xf32>
      %c0_12 = arith.constant 0 : index
      %c0_13 = arith.constant 0 : index
      %13 = vector.load %arg5[%c0_12, %c0_13] : memref<1x128xf32, #tpu.memory_space<vmem>>, vector<1x128xf32>
      %14 = vector.broadcast %13 : vector<1x128xf32> to vector<32x128xf32>
      %15 = arith.addf %12, %14 : vector<32x128xf32>
      %cst_14 = arith.constant 0.000000e+00 : f32
      %16 = vector.broadcast %cst_14 : f32 to vector<32x128xf32>
      %17 = arith.maximumf %15, %16 : vector<32x128xf32>
      %18 = arith.truncf %17 : vector<32x128xf32> to vector<32x128xbf16>
      %c0_15 = arith.constant 0 : index
      %c0_16 = arith.constant 0 : index
      %19 = vector.load %arg6[%c0_15, %c0_16] : memref<32x128xbf16, #tpu.memory_space<vmem>>, vector<32x128xbf16>
      tpu.vector_store %arg6[%c0_15, %c0_16], %18 {strides = array<i32>} : memref<32x128xbf16, #tpu.memory_space<vmem>>, vector<32x128xbf16>,
    } else {
    }
    return
  }
  func.func @transform_0(%arg0: i32, %arg1: i32, %arg2: i32) -> (i32, i32) {
    %c0_i32 = arith.constant 0 : i32
    return %arg0, %arg2 : i32, i32
  }
  func.func @transform_1(%arg0: i32, %arg1: i32, %arg2: i32) -> (i32, i32) {
    %c0_i32 = arith.constant 0 : i32
    return %arg2, %arg1 : i32, i32
  }
  func.func @transform_2(%arg0: i32, %arg1: i32, %arg2: i32) -> (i32, i32) {
    %c0_i32 = arith.constant 0 : i32
    %c0_i32_0 = arith.constant 0 : i32
    return %c0_i32, %arg1 : i32, i32
  }
  func.func @transform_3(%arg0: i32, %arg1: i32, %arg2: i32) -> (i32, i32) {
    %c0_i32 = arith.constant 0 : i32
    return %arg0, %arg1 : i32, i32
  }
}

module attributes {stable_mosaic.version = 11 : i64} {
  func.func @_matmul_bias_kernel(%arg0: i32, %arg1: i32, %arg2: i32, %arg3: memref<32x1152xbf16, #tpu.memory_space<vmem>>, %arg4: memref<1152x128xbf16, #tpu.memory_space<vmem>>, %arg5: memref<1x128xf32, #tpu.memory_space<vmem>>, %arg6: memref<32x128xbf16, #tpu.memory_space<vmem>>, %arg7: memref<32x128xbf16, #tpu.memory_space<vmem>>, %arg8: memref<32x128xf32, #tpu.memory_space<vmem>>) attributes {dimension_semantics = [#tpu.dimension_semantics<parallel>, #tpu.dimension_semantics<parallel>, #tpu.dimension_semantics<arbitrary>], iteration_bounds = array<i64: 1, 1, 1>, scalar_prefetch = 0 : i64, scratch_operands = 1 : i64, tpu.core_type = #tpu.core_type<tc>, window_params = [{transform_indices = @transform_0, window_bounds = array<i64: 32, 1152>}, {transform_indices = @transform_1, window_bounds = array<i64: 1152, 128>}, {transform_indices = @transform_2, window_bounds = array<i64: 1, 128>}, {transform_indices = @transform_3, window_bounds = array<i64: 32, 128>}, {transform_indices = @transform_4, window_bounds = array<i64: 32, 128>}]} {
    %c0_i32 = arith.constant 0 : i32
    %0 = arith.cmpi eq, %arg2, %c0_i32 : i32
    %1 = arith.extui %0 : i1 to i32
    %c0_i32_0 = arith.constant 0 : i32
    %2 = arith.cmpi ne, %1, %c0_i32_0 : i32
    scf.if %2 {
      %cst_10 = arith.constant 0.000000e+00 : f32
      %12 = vector.broadcast %cst_10 : f32 to vector<32x128xf32>
      %c0_11 = arith.constant 0 : index
      %c0_12 = arith.constant 0 : index
      %13 = vector.load %arg8[%c0_11, %c0_12] : memref<32x128xf32, #tpu.memory_space<vmem>>, vector<32x128xf32>
      tpu.vector_store %arg8[%c0_11, %c0_12], %12 {strides = array<i32>} : memref<32x128xf32, #tpu.memory_space<vmem>>, vector<32x128xf32>,
    } else {
    }
    %c0 = arith.constant 0 : index
    %c0_1 = arith.constant 0 : index
    %3 = vector.load %arg8[%c0, %c0_1] : memref<32x128xf32, #tpu.memory_space<vmem>>, vector<32x128xf32>
    %c0_2 = arith.constant 0 : index
    %c0_3 = arith.constant 0 : index
    %4 = vector.load %arg3[%c0_2, %c0_3] : memref<32x1152xbf16, #tpu.memory_space<vmem>>, vector<32x1152xbf16>
    %c0_4 = arith.constant 0 : index
    %c0_5 = arith.constant 0 : index
    %5 = vector.load %arg4[%c0_4, %c0_5] : memref<1152x128xbf16, #tpu.memory_space<vmem>>, vector<1152x128xbf16>
    %cst = arith.constant dense<0.000000e+00> : vector<32x128xf32>
    %6 = tpu.matmul %4, %5, %cst {dimension_numbers = #tpu.dot_dimension_numbers<[1], [0], [0], [1], [0, 0, 1, 1], [], []>} : vector<32x1152xbf16>, vector<1152x128xbf16>, vector<32x128xf32> -> vector<32x128xf32>
    %7 = arith.addf %3, %6 : vector<32x128xf32>
    %c0_6 = arith.constant 0 : index
    %c0_7 = arith.constant 0 : index
    %8 = vector.load %arg8[%c0_6, %c0_7] : memref<32x128xf32, #tpu.memory_space<vmem>>, vector<32x128xf32>
    tpu.vector_store %arg8[%c0_6, %c0_7], %7 {strides = array<i32>} : memref<32x128xf32, #tpu.memory_space<vmem>>, vector<32x128xf32>,
    %c0_i32_8 = arith.constant 0 : i32
    %9 = arith.cmpi eq, %arg2, %c0_i32_8 : i32
    %10 = arith.extui %9 : i1 to i32
    %c0_i32_9 = arith.constant 0 : i32
    %11 = arith.cmpi ne, %10, %c0_i32_9 : i32
    scf.if %11 {
      %c0_10 = arith.constant 0 : index
      %c0_11 = arith.constant 0 : index
      %12 = vector.load %arg8[%c0_10, %c0_11] : memref<32x128xf32, #tpu.memory_space<vmem>>, vector<32x128xf32>
      %c0_12 = arith.constant 0 : index
      %c0_13 = arith.constant 0 : index
      %13 = vector.load %arg5[%c0_12, %c0_13] : memref<1x128xf32, #tpu.memory_space<vmem>>, vector<1x128xf32>
      %14 = vector.broadcast %13 : vector<1x128xf32> to vector<32x128xf32>
      %15 = arith.addf %12, %14 : vector<32x128xf32>
      %c0_14 = arith.constant 0 : index
      %c0_15 = arith.constant 0 : index
      %16 = vector.load %arg6[%c0_14, %c0_15] : memref<32x128xbf16, #tpu.memory_space<vmem>>, vector<32x128xbf16>
      %17 = arith.extf %16 : vector<32x128xbf16> to vector<32x128xf32>
      %18 = arith.addf %15, %17 : vector<32x128xf32>
      %cst_16 = arith.constant 0.000000e+00 : f32
      %19 = vector.broadcast %cst_16 : f32 to vector<32x128xf32>
      %20 = arith.maximumf %18, %19 : vector<32x128xf32>
      %21 = arith.truncf %20 : vector<32x128xf32> to vector<32x128xbf16>
      %c0_17 = arith.constant 0 : index
      %c0_18 = arith.constant 0 : index
      %22 = vector.load %arg7[%c0_17, %c0_18] : memref<32x128xbf16, #tpu.memory_space<vmem>>, vector<32x128xbf16>
      tpu.vector_store %arg7[%c0_17, %c0_18], %21 {strides = array<i32>} : memref<32x128xbf16, #tpu.memory_space<vmem>>, vector<32x128xbf16>,
    } else {
    }
    return
  }
  func.func @transform_0(%arg0: i32, %arg1: i32, %arg2: i32) -> (i32, i32) {
    %c0_i32 = arith.constant 0 : i32
    return %arg0, %arg2 : i32, i32
  }
  func.func @transform_1(%arg0: i32, %arg1: i32, %arg2: i32) -> (i32, i32) {
    %c0_i32 = arith.constant 0 : i32
    return %arg2, %arg1 : i32, i32
  }
  func.func @transform_2(%arg0: i32, %arg1: i32, %arg2: i32) -> (i32, i32) {
    %c0_i32 = arith.constant 0 : i32
    %c0_i32_0 = arith.constant 0 : i32
    return %c0_i32, %arg1 : i32, i32
  }
  func.func @transform_3(%arg0: i32, %arg1: i32, %arg2: i32) -> (i32, i32) {
    %c0_i32 = arith.constant 0 : i32
    return %arg0, %arg1 : i32, i32
  }
  func.func @transform_4(%arg0: i32, %arg1: i32, %arg2: i32) -> (i32, i32) {
    %c0_i32 = arith.constant 0 : i32
    return %arg0, %arg1 : i32, i32
  }
}

module attributes {stable_mosaic.version = 11 : i64} {
  func.func @_matmul_bias_kernel(%arg0: i32, %arg1: i32, %arg2: i32, %arg3: memref<8x1152xbf16, #tpu.memory_space<vmem>>, %arg4: memref<1152x128xbf16, #tpu.memory_space<vmem>>, %arg5: memref<1x128xf32, #tpu.memory_space<vmem>>, %arg6: memref<8x128xbf16, #tpu.memory_space<vmem>>, %arg7: memref<8x128xf32, #tpu.memory_space<vmem>>) attributes {dimension_semantics = [#tpu.dimension_semantics<parallel>, #tpu.dimension_semantics<parallel>, #tpu.dimension_semantics<arbitrary>], iteration_bounds = array<i64: 1, 1, 1>, scalar_prefetch = 0 : i64, scratch_operands = 1 : i64, tpu.core_type = #tpu.core_type<tc>, window_params = [{transform_indices = @transform_0, window_bounds = array<i64: 8, 1152>}, {transform_indices = @transform_1, window_bounds = array<i64: 1152, 128>}, {transform_indices = @transform_2, window_bounds = array<i64: 1, 128>}, {transform_indices = @transform_3, window_bounds = array<i64: 8, 128>}]} {
    %c0_i32 = arith.constant 0 : i32
    %0 = arith.cmpi eq, %arg2, %c0_i32 : i32
    %1 = arith.extui %0 : i1 to i32
    %c0_i32_0 = arith.constant 0 : i32
    %2 = arith.cmpi ne, %1, %c0_i32_0 : i32
    scf.if %2 {
      %cst_10 = arith.constant 0.000000e+00 : f32
      %12 = vector.broadcast %cst_10 : f32 to vector<8x128xf32>
      %c0_11 = arith.constant 0 : index
      %c0_12 = arith.constant 0 : index
      %13 = vector.load %arg7[%c0_11, %c0_12] : memref<8x128xf32, #tpu.memory_space<vmem>>, vector<8x128xf32>
      tpu.vector_store %arg7[%c0_11, %c0_12], %12 {strides = array<i32>} : memref<8x128xf32, #tpu.memory_space<vmem>>, vector<8x128xf32>,
    } else {
    }
    %c0 = arith.constant 0 : index
    %c0_1 = arith.constant 0 : index
    %3 = vector.load %arg7[%c0, %c0_1] : memref<8x128xf32, #tpu.memory_space<vmem>>, vector<8x128xf32>
    %c0_2 = arith.constant 0 : index
    %c0_3 = arith.constant 0 : index
    %4 = vector.load %arg3[%c0_2, %c0_3] : memref<8x1152xbf16, #tpu.memory_space<vmem>>, vector<8x1152xbf16>
    %c0_4 = arith.constant 0 : index
    %c0_5 = arith.constant 0 : index
    %5 = vector.load %arg4[%c0_4, %c0_5] : memref<1152x128xbf16, #tpu.memory_space<vmem>>, vector<1152x128xbf16>
    %cst = arith.constant dense<0.000000e+00> : vector<8x128xf32>
    %6 = tpu.matmul %4, %5, %cst {dimension_numbers = #tpu.dot_dimension_numbers<[1], [0], [0], [1], [0, 0, 1, 1], [], []>} : vector<8x1152xbf16>, vector<1152x128xbf16>, vector<8x128xf32> -> vector<8x128xf32>
    %7 = arith.addf %3, %6 : vector<8x128xf32>
    %c0_6 = arith.constant 0 : index
    %c0_7 = arith.constant 0 : index
    %8 = vector.load %arg7[%c0_6, %c0_7] : memref<8x128xf32, #tpu.memory_space<vmem>>, vector<8x128xf32>
    tpu.vector_store %arg7[%c0_6, %c0_7], %7 {strides = array<i32>} : memref<8x128xf32, #tpu.memory_space<vmem>>, vector<8x128xf32>,
    %c0_i32_8 = arith.constant 0 : i32
    %9 = arith.cmpi eq, %arg2, %c0_i32_8 : i32
    %10 = arith.extui %9 : i1 to i32
    %c0_i32_9 = arith.constant 0 : i32
    %11 = arith.cmpi ne, %10, %c0_i32_9 : i32
    scf.if %11 {
      %c0_10 = arith.constant 0 : index
      %c0_11 = arith.constant 0 : index
      %12 = vector.load %arg7[%c0_10, %c0_11] : memref<8x128xf32, #tpu.memory_space<vmem>>, vector<8x128xf32>
      %c0_12 = arith.constant 0 : index
      %c0_13 = arith.constant 0 : index
      %13 = vector.load %arg5[%c0_12, %c0_13] : memref<1x128xf32, #tpu.memory_space<vmem>>, vector<1x128xf32>
      %14 = vector.broadcast %13 : vector<1x128xf32> to vector<8x128xf32>
      %15 = arith.addf %12, %14 : vector<8x128xf32>
      %cst_14 = arith.constant 0.000000e+00 : f32
      %16 = vector.broadcast %cst_14 : f32 to vector<8x128xf32>
      %17 = arith.maximumf %15, %16 : vector<8x128xf32>
      %18 = arith.truncf %17 : vector<8x128xf32> to vector<8x128xbf16>
      %c0_15 = arith.constant 0 : index
      %c0_16 = arith.constant 0 : index
      %19 = vector.load %arg6[%c0_15, %c0_16] : memref<8x128xbf16, #tpu.memory_space<vmem>>, vector<8x128xbf16>
      tpu.vector_store %arg6[%c0_15, %c0_16], %18 {strides = array<i32>} : memref<8x128xbf16, #tpu.memory_space<vmem>>, vector<8x128xbf16>,
    } else {
    }
    return
  }
  func.func @transform_0(%arg0: i32, %arg1: i32, %arg2: i32) -> (i32, i32) {
    %c0_i32 = arith.constant 0 : i32
    return %arg0, %arg2 : i32, i32
  }
  func.func @transform_1(%arg0: i32, %arg1: i32, %arg2: i32) -> (i32, i32) {
    %c0_i32 = arith.constant 0 : i32
    return %arg2, %arg1 : i32, i32
  }
  func.func @transform_2(%arg0: i32, %arg1: i32, %arg2: i32) -> (i32, i32) {
    %c0_i32 = arith.constant 0 : i32
    %c0_i32_0 = arith.constant 0 : i32
    return %c0_i32, %arg1 : i32, i32
  }
  func.func @transform_3(%arg0: i32, %arg1: i32, %arg2: i32) -> (i32, i32) {
    %c0_i32 = arith.constant 0 : i32
    return %arg0, %arg1 : i32, i32
  }
}

module attributes {stable_mosaic.version = 11 : i64} {
  func.func @_matmul_bias_kernel(%arg0: i32, %arg1: i32, %arg2: i32, %arg3: memref<8x128xbf16, #tpu.memory_space<vmem>>, %arg4: memref<128x128xbf16, #tpu.memory_space<vmem>>, %arg5: memref<1x128xf32, #tpu.memory_space<vmem>>, %arg6: memref<8x128xbf16, #tpu.memory_space<vmem>>, %arg7: memref<8x128xf32, #tpu.memory_space<vmem>>) attributes {dimension_semantics = [#tpu.dimension_semantics<parallel>, #tpu.dimension_semantics<parallel>, #tpu.dimension_semantics<arbitrary>], iteration_bounds = array<i64: 1, 1, 1>, scalar_prefetch = 0 : i64, scratch_operands = 1 : i64, tpu.core_type = #tpu.core_type<tc>, window_params = [{transform_indices = @transform_0, window_bounds = array<i64: 8, 128>}, {transform_indices = @transform_1, window_bounds = array<i64: 128, 128>}, {transform_indices = @transform_2, window_bounds = array<i64: 1, 128>}, {transform_indices = @transform_3, window_bounds = array<i64: 8, 128>}]} {
    %c0_i32 = arith.constant 0 : i32
    %0 = arith.cmpi eq, %arg2, %c0_i32 : i32
    %1 = arith.extui %0 : i1 to i32
    %c0_i32_0 = arith.constant 0 : i32
    %2 = arith.cmpi ne, %1, %c0_i32_0 : i32
    scf.if %2 {
      %cst_10 = arith.constant 0.000000e+00 : f32
      %12 = vector.broadcast %cst_10 : f32 to vector<8x128xf32>
      %c0_11 = arith.constant 0 : index
      %c0_12 = arith.constant 0 : index
      %13 = vector.load %arg7[%c0_11, %c0_12] : memref<8x128xf32, #tpu.memory_space<vmem>>, vector<8x128xf32>
      tpu.vector_store %arg7[%c0_11, %c0_12], %12 {strides = array<i32>} : memref<8x128xf32, #tpu.memory_space<vmem>>, vector<8x128xf32>,
    } else {
    }
    %c0 = arith.constant 0 : index
    %c0_1 = arith.constant 0 : index
    %3 = vector.load %arg7[%c0, %c0_1] : memref<8x128xf32, #tpu.memory_space<vmem>>, vector<8x128xf32>
    %c0_2 = arith.constant 0 : index
    %c0_3 = arith.constant 0 : index
    %4 = vector.load %arg3[%c0_2, %c0_3] : memref<8x128xbf16, #tpu.memory_space<vmem>>, vector<8x128xbf16>
    %c0_4 = arith.constant 0 : index
    %c0_5 = arith.constant 0 : index
    %5 = vector.load %arg4[%c0_4, %c0_5] : memref<128x128xbf16, #tpu.memory_space<vmem>>, vector<128x128xbf16>
    %cst = arith.constant dense<0.000000e+00> : vector<8x128xf32>
    %6 = tpu.matmul %4, %5, %cst {dimension_numbers = #tpu.dot_dimension_numbers<[1], [0], [0], [1], [0, 0, 1, 1], [], []>} : vector<8x128xbf16>, vector<128x128xbf16>, vector<8x128xf32> -> vector<8x128xf32>
    %7 = arith.addf %3, %6 : vector<8x128xf32>
    %c0_6 = arith.constant 0 : index
    %c0_7 = arith.constant 0 : index
    %8 = vector.load %arg7[%c0_6, %c0_7] : memref<8x128xf32, #tpu.memory_space<vmem>>, vector<8x128xf32>
    tpu.vector_store %arg7[%c0_6, %c0_7], %7 {strides = array<i32>} : memref<8x128xf32, #tpu.memory_space<vmem>>, vector<8x128xf32>,
    %c0_i32_8 = arith.constant 0 : i32
    %9 = arith.cmpi eq, %arg2, %c0_i32_8 : i32
    %10 = arith.extui %9 : i1 to i32
    %c0_i32_9 = arith.constant 0 : i32
    %11 = arith.cmpi ne, %10, %c0_i32_9 : i32
    scf.if %11 {
      %c0_10 = arith.constant 0 : index
      %c0_11 = arith.constant 0 : index
      %12 = vector.load %arg7[%c0_10, %c0_11] : memref<8x128xf32, #tpu.memory_space<vmem>>, vector<8x128xf32>
      %c0_12 = arith.constant 0 : index
      %c0_13 = arith.constant 0 : index
      %13 = vector.load %arg5[%c0_12, %c0_13] : memref<1x128xf32, #tpu.memory_space<vmem>>, vector<1x128xf32>
      %14 = vector.broadcast %13 : vector<1x128xf32> to vector<8x128xf32>
      %15 = arith.addf %12, %14 : vector<8x128xf32>
      %16 = arith.truncf %15 : vector<8x128xf32> to vector<8x128xbf16>
      %c0_14 = arith.constant 0 : index
      %c0_15 = arith.constant 0 : index
      %17 = vector.load %arg6[%c0_14, %c0_15] : memref<8x128xbf16, #tpu.memory_space<vmem>>, vector<8x128xbf16>
      tpu.vector_store %arg6[%c0_14, %c0_15], %16 {strides = array<i32>} : memref<8x128xbf16, #tpu.memory_space<vmem>>, vector<8x128xbf16>,
    } else {
    }
    return
  }
  func.func @transform_0(%arg0: i32, %arg1: i32, %arg2: i32) -> (i32, i32) {
    %c0_i32 = arith.constant 0 : i32
    return %arg0, %arg2 : i32, i32
  }
  func.func @transform_1(%arg0: i32, %arg1: i32, %arg2: i32) -> (i32, i32) {
    %c0_i32 = arith.constant 0 : i32
    return %arg2, %arg1 : i32, i32
  }
  func.func @transform_2(%arg0: i32, %arg1: i32, %arg2: i32) -> (i32, i32) {
    %c0_i32 = arith.constant 0 : i32
    %c0_i32_0 = arith.constant 0 : i32
    return %c0_i32, %arg1 : i32, i32
  }
  func.func @transform_3(%arg0: i32, %arg1: i32, %arg2: i32) -> (i32, i32) {
    %c0_i32 = arith.constant 0 : i32
    return %arg0, %arg1 : i32, i32
  }
}

module attributes {stable_mosaic.version = 11 : i64} {
  func.func @_matmul_bias_kernel(%arg0: i32, %arg1: i32, %arg2: i32, %arg3: memref<8x1152xbf16, #tpu.memory_space<vmem>>, %arg4: memref<1152x128xbf16, #tpu.memory_space<vmem>>, %arg5: memref<1x128xf32, #tpu.memory_space<vmem>>, %arg6: memref<8x128xbf16, #tpu.memory_space<vmem>>, %arg7: memref<8x128xbf16, #tpu.memory_space<vmem>>, %arg8: memref<8x128xf32, #tpu.memory_space<vmem>>) attributes {dimension_semantics = [#tpu.dimension_semantics<parallel>, #tpu.dimension_semantics<parallel>, #tpu.dimension_semantics<arbitrary>], iteration_bounds = array<i64: 1, 1, 1>, scalar_prefetch = 0 : i64, scratch_operands = 1 : i64, tpu.core_type = #tpu.core_type<tc>, window_params = [{transform_indices = @transform_0, window_bounds = array<i64: 8, 1152>}, {transform_indices = @transform_1, window_bounds = array<i64: 1152, 128>}, {transform_indices = @transform_2, window_bounds = array<i64: 1, 128>}, {transform_indices = @transform_3, window_bounds = array<i64: 8, 128>}, {transform_indices = @transform_4, window_bounds = array<i64: 8, 128>}]} {
    %c0_i32 = arith.constant 0 : i32
    %0 = arith.cmpi eq, %arg2, %c0_i32 : i32
    %1 = arith.extui %0 : i1 to i32
    %c0_i32_0 = arith.constant 0 : i32
    %2 = arith.cmpi ne, %1, %c0_i32_0 : i32
    scf.if %2 {
      %cst_10 = arith.constant 0.000000e+00 : f32
      %12 = vector.broadcast %cst_10 : f32 to vector<8x128xf32>
      %c0_11 = arith.constant 0 : index
      %c0_12 = arith.constant 0 : index
      %13 = vector.load %arg8[%c0_11, %c0_12] : memref<8x128xf32, #tpu.memory_space<vmem>>, vector<8x128xf32>
      tpu.vector_store %arg8[%c0_11, %c0_12], %12 {strides = array<i32>} : memref<8x128xf32, #tpu.memory_space<vmem>>, vector<8x128xf32>,
    } else {
    }
    %c0 = arith.constant 0 : index
    %c0_1 = arith.constant 0 : index
    %3 = vector.load %arg8[%c0, %c0_1] : memref<8x128xf32, #tpu.memory_space<vmem>>, vector<8x128xf32>
    %c0_2 = arith.constant 0 : index
    %c0_3 = arith.constant 0 : index
    %4 = vector.load %arg3[%c0_2, %c0_3] : memref<8x1152xbf16, #tpu.memory_space<vmem>>, vector<8x1152xbf16>
    %c0_4 = arith.constant 0 : index
    %c0_5 = arith.constant 0 : index
    %5 = vector.load %arg4[%c0_4, %c0_5] : memref<1152x128xbf16, #tpu.memory_space<vmem>>, vector<1152x128xbf16>
    %cst = arith.constant dense<0.000000e+00> : vector<8x128xf32>
    %6 = tpu.matmul %4, %5, %cst {dimension_numbers = #tpu.dot_dimension_numbers<[1], [0], [0], [1], [0, 0, 1, 1], [], []>} : vector<8x1152xbf16>, vector<1152x128xbf16>, vector<8x128xf32> -> vector<8x128xf32>
    %7 = arith.addf %3, %6 : vector<8x128xf32>
    %c0_6 = arith.constant 0 : index
    %c0_7 = arith.constant 0 : index
    %8 = vector.load %arg8[%c0_6, %c0_7] : memref<8x128xf32, #tpu.memory_space<vmem>>, vector<8x128xf32>
    tpu.vector_store %arg8[%c0_6, %c0_7], %7 {strides = array<i32>} : memref<8x128xf32, #tpu.memory_space<vmem>>, vector<8x128xf32>,
    %c0_i32_8 = arith.constant 0 : i32
    %9 = arith.cmpi eq, %arg2, %c0_i32_8 : i32
    %10 = arith.extui %9 : i1 to i32
    %c0_i32_9 = arith.constant 0 : i32
    %11 = arith.cmpi ne, %10, %c0_i32_9 : i32
    scf.if %11 {
      %c0_10 = arith.constant 0 : index
      %c0_11 = arith.constant 0 : index
      %12 = vector.load %arg8[%c0_10, %c0_11] : memref<8x128xf32, #tpu.memory_space<vmem>>, vector<8x128xf32>
      %c0_12 = arith.constant 0 : index
      %c0_13 = arith.constant 0 : index
      %13 = vector.load %arg5[%c0_12, %c0_13] : memref<1x128xf32, #tpu.memory_space<vmem>>, vector<1x128xf32>
      %14 = vector.broadcast %13 : vector<1x128xf32> to vector<8x128xf32>
      %15 = arith.addf %12, %14 : vector<8x128xf32>
      %c0_14 = arith.constant 0 : index
      %c0_15 = arith.constant 0 : index
      %16 = vector.load %arg6[%c0_14, %c0_15] : memref<8x128xbf16, #tpu.memory_space<vmem>>, vector<8x128xbf16>
      %17 = arith.extf %16 : vector<8x128xbf16> to vector<8x128xf32>
      %18 = arith.addf %15, %17 : vector<8x128xf32>
      %cst_16 = arith.constant 0.000000e+00 : f32
      %19 = vector.broadcast %cst_16 : f32 to vector<8x128xf32>
      %20 = arith.maximumf %18, %19 : vector<8x128xf32>
      %21 = arith.truncf %20 : vector<8x128xf32> to vector<8x128xbf16>
      %c0_17 = arith.constant 0 : index
      %c0_18 = arith.constant 0 : index
      %22 = vector.load %arg7[%c0_17, %c0_18] : memref<8x128xbf16, #tpu.memory_space<vmem>>, vector<8x128xbf16>
      tpu.vector_store %arg7[%c0_17, %c0_18], %21 {strides = array<i32>} : memref<8x128xbf16, #tpu.memory_space<vmem>>, vector<8x128xbf16>,
    } else {
    }
    return
  }
  func.func @transform_0(%arg0: i32, %arg1: i32, %arg2: i32) -> (i32, i32) {
    %c0_i32 = arith.constant 0 : i32
    return %arg0, %arg2 : i32, i32
  }
  func.func @transform_1(%arg0: i32, %arg1: i32, %arg2: i32) -> (i32, i32) {
    %c0_i32 = arith.constant 0 : i32
    return %arg2, %arg1 : i32, i32
  }
  func.func @transform_2(%arg0: i32, %arg1: i32, %arg2: i32) -> (i32, i32) {
    %c0_i32 = arith.constant 0 : i32
    %c0_i32_0 = arith.constant 0 : i32
    return %c0_i32, %arg1 : i32, i32
  }
  func.func @transform_3(%arg0: i32, %arg1: i32, %arg2: i32) -> (i32, i32) {
    %c0_i32 = arith.constant 0 : i32
    return %arg0, %arg1 : i32, i32
  }
  func.func @transform_4(%arg0: i32, %arg1: i32, %arg2: i32) -> (i32, i32) {
    %c0_i32 = arith.constant 0 : i32
    return %arg0, %arg1 : i32, i32
  }
}

module attributes {stable_mosaic.version = 11 : i64} {
  func.func @_matmul_bias_kernel(%arg0: i32, %arg1: i32, %arg2: i32, %arg3: memref<8x1152xbf16, #tpu.memory_space<vmem>>, %arg4: memref<1152x256xbf16, #tpu.memory_space<vmem>>, %arg5: memref<1x256xf32, #tpu.memory_space<vmem>>, %arg6: memref<8x256xbf16, #tpu.memory_space<vmem>>, %arg7: memref<8x256xf32, #tpu.memory_space<vmem>>) attributes {dimension_semantics = [#tpu.dimension_semantics<parallel>, #tpu.dimension_semantics<parallel>, #tpu.dimension_semantics<arbitrary>], iteration_bounds = array<i64: 1, 1, 1>, scalar_prefetch = 0 : i64, scratch_operands = 1 : i64, tpu.core_type = #tpu.core_type<tc>, window_params = [{transform_indices = @transform_0, window_bounds = array<i64: 8, 1152>}, {transform_indices = @transform_1, window_bounds = array<i64: 1152, 256>}, {transform_indices = @transform_2, window_bounds = array<i64: 1, 256>}, {transform_indices = @transform_3, window_bounds = array<i64: 8, 256>}]} {
    %c0_i32 = arith.constant 0 : i32
    %0 = arith.cmpi eq, %arg2, %c0_i32 : i32
    %1 = arith.extui %0 : i1 to i32
    %c0_i32_0 = arith.constant 0 : i32
    %2 = arith.cmpi ne, %1, %c0_i32_0 : i32
    scf.if %2 {
      %cst_10 = arith.constant 0.000000e+00 : f32
      %12 = vector.broadcast %cst_10 : f32 to vector<8x256xf32>
      %c0_11 = arith.constant 0 : index
      %c0_12 = arith.constant 0 : index
      %13 = vector.load %arg7[%c0_11, %c0_12] : memref<8x256xf32, #tpu.memory_space<vmem>>, vector<8x256xf32>
      tpu.vector_store %arg7[%c0_11, %c0_12], %12 {strides = array<i32>} : memref<8x256xf32, #tpu.memory_space<vmem>>, vector<8x256xf32>,
    } else {
    }
    %c0 = arith.constant 0 : index
    %c0_1 = arith.constant 0 : index
    %3 = vector.load %arg7[%c0, %c0_1] : memref<8x256xf32, #tpu.memory_space<vmem>>, vector<8x256xf32>
    %c0_2 = arith.constant 0 : index
    %c0_3 = arith.constant 0 : index
    %4 = vector.load %arg3[%c0_2, %c0_3] : memref<8x1152xbf16, #tpu.memory_space<vmem>>, vector<8x1152xbf16>
    %c0_4 = arith.constant 0 : index
    %c0_5 = arith.constant 0 : index
    %5 = vector.load %arg4[%c0_4, %c0_5] : memref<1152x256xbf16, #tpu.memory_space<vmem>>, vector<1152x256xbf16>
    %cst = arith.constant dense<0.000000e+00> : vector<8x256xf32>
    %6 = tpu.matmul %4, %5, %cst {dimension_numbers = #tpu.dot_dimension_numbers<[1], [0], [0], [1], [0, 0, 1, 1], [], []>} : vector<8x1152xbf16>, vector<1152x256xbf16>, vector<8x256xf32> -> vector<8x256xf32>
    %7 = arith.addf %3, %6 : vector<8x256xf32>
    %c0_6 = arith.constant 0 : index
    %c0_7 = arith.constant 0 : index
    %8 = vector.load %arg7[%c0_6, %c0_7] : memref<8x256xf32, #tpu.memory_space<vmem>>, vector<8x256xf32>
    tpu.vector_store %arg7[%c0_6, %c0_7], %7 {strides = array<i32>} : memref<8x256xf32, #tpu.memory_space<vmem>>, vector<8x256xf32>,
    %c0_i32_8 = arith.constant 0 : i32
    %9 = arith.cmpi eq, %arg2, %c0_i32_8 : i32
    %10 = arith.extui %9 : i1 to i32
    %c0_i32_9 = arith.constant 0 : i32
    %11 = arith.cmpi ne, %10, %c0_i32_9 : i32
    scf.if %11 {
      %c0_10 = arith.constant 0 : index
      %c0_11 = arith.constant 0 : index
      %12 = vector.load %arg7[%c0_10, %c0_11] : memref<8x256xf32, #tpu.memory_space<vmem>>, vector<8x256xf32>
      %c0_12 = arith.constant 0 : index
      %c0_13 = arith.constant 0 : index
      %13 = vector.load %arg5[%c0_12, %c0_13] : memref<1x256xf32, #tpu.memory_space<vmem>>, vector<1x256xf32>
      %14 = vector.broadcast %13 : vector<1x256xf32> to vector<8x256xf32>
      %15 = arith.addf %12, %14 : vector<8x256xf32>
      %cst_14 = arith.constant 0.000000e+00 : f32
      %16 = vector.broadcast %cst_14 : f32 to vector<8x256xf32>
      %17 = arith.maximumf %15, %16 : vector<8x256xf32>
      %18 = arith.truncf %17 : vector<8x256xf32> to vector<8x256xbf16>
      %c0_15 = arith.constant 0 : index
      %c0_16 = arith.constant 0 : index
      %19 = vector.load %arg6[%c0_15, %c0_16] : memref<8x256xbf16, #tpu.memory_space<vmem>>, vector<8x256xbf16>
      tpu.vector_store %arg6[%c0_15, %c0_16], %18 {strides = array<i32>} : memref<8x256xbf16, #tpu.memory_space<vmem>>, vector<8x256xbf16>,
    } else {
    }
    return
  }
  func.func @transform_0(%arg0: i32, %arg1: i32, %arg2: i32) -> (i32, i32) {
    %c0_i32 = arith.constant 0 : i32
    return %arg0, %arg2 : i32, i32
  }
  func.func @transform_1(%arg0: i32, %arg1: i32, %arg2: i32) -> (i32, i32) {
    %c0_i32 = arith.constant 0 : i32
    return %arg2, %arg1 : i32, i32
  }
  func.func @transform_2(%arg0: i32, %arg1: i32, %arg2: i32) -> (i32, i32) {
    %c0_i32 = arith.constant 0 : i32
    %c0_i32_0 = arith.constant 0 : i32
    return %c0_i32, %arg1 : i32, i32
  }
  func.func @transform_3(%arg0: i32, %arg1: i32, %arg2: i32) -> (i32, i32) {
    %c0_i32 = arith.constant 0 : i32
    return %arg0, %arg1 : i32, i32
  }
}

module attributes {stable_mosaic.version = 11 : i64} {
  func.func @_matmul_bias_kernel(%arg0: i32, %arg1: i32, %arg2: i32, %arg3: memref<8x128xbf16, #tpu.memory_space<vmem>>, %arg4: memref<128x256xbf16, #tpu.memory_space<vmem>>, %arg5: memref<1x256xf32, #tpu.memory_space<vmem>>, %arg6: memref<8x256xbf16, #tpu.memory_space<vmem>>, %arg7: memref<8x256xf32, #tpu.memory_space<vmem>>) attributes {dimension_semantics = [#tpu.dimension_semantics<parallel>, #tpu.dimension_semantics<parallel>, #tpu.dimension_semantics<arbitrary>], iteration_bounds = array<i64: 1, 1, 1>, scalar_prefetch = 0 : i64, scratch_operands = 1 : i64, tpu.core_type = #tpu.core_type<tc>, window_params = [{transform_indices = @transform_0, window_bounds = array<i64: 8, 128>}, {transform_indices = @transform_1, window_bounds = array<i64: 128, 256>}, {transform_indices = @transform_2, window_bounds = array<i64: 1, 256>}, {transform_indices = @transform_3, window_bounds = array<i64: 8, 256>}]} {
    %c0_i32 = arith.constant 0 : i32
    %0 = arith.cmpi eq, %arg2, %c0_i32 : i32
    %1 = arith.extui %0 : i1 to i32
    %c0_i32_0 = arith.constant 0 : i32
    %2 = arith.cmpi ne, %1, %c0_i32_0 : i32
    scf.if %2 {
      %cst_10 = arith.constant 0.000000e+00 : f32
      %12 = vector.broadcast %cst_10 : f32 to vector<8x256xf32>
      %c0_11 = arith.constant 0 : index
      %c0_12 = arith.constant 0 : index
      %13 = vector.load %arg7[%c0_11, %c0_12] : memref<8x256xf32, #tpu.memory_space<vmem>>, vector<8x256xf32>
      tpu.vector_store %arg7[%c0_11, %c0_12], %12 {strides = array<i32>} : memref<8x256xf32, #tpu.memory_space<vmem>>, vector<8x256xf32>,
    } else {
    }
    %c0 = arith.constant 0 : index
    %c0_1 = arith.constant 0 : index
    %3 = vector.load %arg7[%c0, %c0_1] : memref<8x256xf32, #tpu.memory_space<vmem>>, vector<8x256xf32>
    %c0_2 = arith.constant 0 : index
    %c0_3 = arith.constant 0 : index
    %4 = vector.load %arg3[%c0_2, %c0_3] : memref<8x128xbf16, #tpu.memory_space<vmem>>, vector<8x128xbf16>
    %c0_4 = arith.constant 0 : index
    %c0_5 = arith.constant 0 : index
    %5 = vector.load %arg4[%c0_4, %c0_5] : memref<128x256xbf16, #tpu.memory_space<vmem>>, vector<128x256xbf16>
    %cst = arith.constant dense<0.000000e+00> : vector<8x256xf32>
    %6 = tpu.matmul %4, %5, %cst {dimension_numbers = #tpu.dot_dimension_numbers<[1], [0], [0], [1], [0, 0, 1, 1], [], []>} : vector<8x128xbf16>, vector<128x256xbf16>, vector<8x256xf32> -> vector<8x256xf32>
    %7 = arith.addf %3, %6 : vector<8x256xf32>
    %c0_6 = arith.constant 0 : index
    %c0_7 = arith.constant 0 : index
    %8 = vector.load %arg7[%c0_6, %c0_7] : memref<8x256xf32, #tpu.memory_space<vmem>>, vector<8x256xf32>
    tpu.vector_store %arg7[%c0_6, %c0_7], %7 {strides = array<i32>} : memref<8x256xf32, #tpu.memory_space<vmem>>, vector<8x256xf32>,
    %c0_i32_8 = arith.constant 0 : i32
    %9 = arith.cmpi eq, %arg2, %c0_i32_8 : i32
    %10 = arith.extui %9 : i1 to i32
    %c0_i32_9 = arith.constant 0 : i32
    %11 = arith.cmpi ne, %10, %c0_i32_9 : i32
    scf.if %11 {
      %c0_10 = arith.constant 0 : index
      %c0_11 = arith.constant 0 : index
      %12 = vector.load %arg7[%c0_10, %c0_11] : memref<8x256xf32, #tpu.memory_space<vmem>>, vector<8x256xf32>
      %c0_12 = arith.constant 0 : index
      %c0_13 = arith.constant 0 : index
      %13 = vector.load %arg5[%c0_12, %c0_13] : memref<1x256xf32, #tpu.memory_space<vmem>>, vector<1x256xf32>
      %14 = vector.broadcast %13 : vector<1x256xf32> to vector<8x256xf32>
      %15 = arith.addf %12, %14 : vector<8x256xf32>
      %16 = arith.truncf %15 : vector<8x256xf32> to vector<8x256xbf16>
      %c0_14 = arith.constant 0 : index
      %c0_15 = arith.constant 0 : index
      %17 = vector.load %arg6[%c0_14, %c0_15] : memref<8x256xbf16, #tpu.memory_space<vmem>>, vector<8x256xbf16>
      tpu.vector_store %arg6[%c0_14, %c0_15], %16 {strides = array<i32>} : memref<8x256xbf16, #tpu.memory_space<vmem>>, vector<8x256xbf16>,
    } else {
    }
    return
  }
  func.func @transform_0(%arg0: i32, %arg1: i32, %arg2: i32) -> (i32, i32) {
    %c0_i32 = arith.constant 0 : i32
    return %arg0, %arg2 : i32, i32
  }
  func.func @transform_1(%arg0: i32, %arg1: i32, %arg2: i32) -> (i32, i32) {
    %c0_i32 = arith.constant 0 : i32
    return %arg2, %arg1 : i32, i32
  }
  func.func @transform_2(%arg0: i32, %arg1: i32, %arg2: i32) -> (i32, i32) {
    %c0_i32 = arith.constant 0 : i32
    %c0_i32_0 = arith.constant 0 : i32
    return %c0_i32, %arg1 : i32, i32
  }
  func.func @transform_3(%arg0: i32, %arg1: i32, %arg2: i32) -> (i32, i32) {
    %c0_i32 = arith.constant 0 : i32
    return %arg0, %arg1 : i32, i32
  }
}

module attributes {stable_mosaic.version = 11 : i64} {
  func.func @_matmul_bias_kernel(%arg0: i32, %arg1: i32, %arg2: i32, %arg3: memref<8x1152xbf16, #tpu.memory_space<vmem>>, %arg4: memref<1152x256xbf16, #tpu.memory_space<vmem>>, %arg5: memref<1x256xf32, #tpu.memory_space<vmem>>, %arg6: memref<8x256xbf16, #tpu.memory_space<vmem>>, %arg7: memref<8x256xbf16, #tpu.memory_space<vmem>>, %arg8: memref<8x256xf32, #tpu.memory_space<vmem>>) attributes {dimension_semantics = [#tpu.dimension_semantics<parallel>, #tpu.dimension_semantics<parallel>, #tpu.dimension_semantics<arbitrary>], iteration_bounds = array<i64: 1, 1, 2>, scalar_prefetch = 0 : i64, scratch_operands = 1 : i64, tpu.core_type = #tpu.core_type<tc>, window_params = [{transform_indices = @transform_0, window_bounds = array<i64: 8, 1152>}, {transform_indices = @transform_1, window_bounds = array<i64: 1152, 256>}, {transform_indices = @transform_2, window_bounds = array<i64: 1, 256>}, {transform_indices = @transform_3, window_bounds = array<i64: 8, 256>}, {transform_indices = @transform_4, window_bounds = array<i64: 8, 256>}]} {
    %c0_i32 = arith.constant 0 : i32
    %0 = arith.cmpi eq, %arg2, %c0_i32 : i32
    %1 = arith.extui %0 : i1 to i32
    %c0_i32_0 = arith.constant 0 : i32
    %2 = arith.cmpi ne, %1, %c0_i32_0 : i32
    scf.if %2 {
      %cst_9 = arith.constant 0.000000e+00 : f32
      %12 = vector.broadcast %cst_9 : f32 to vector<8x256xf32>
      %c0_10 = arith.constant 0 : index
      %c0_11 = arith.constant 0 : index
      %13 = vector.load %arg8[%c0_10, %c0_11] : memref<8x256xf32, #tpu.memory_space<vmem>>, vector<8x256xf32>
      tpu.vector_store %arg8[%c0_10, %c0_11], %12 {strides = array<i32>} : memref<8x256xf32, #tpu.memory_space<vmem>>, vector<8x256xf32>,
    } else {
    }
    %c0 = arith.constant 0 : index
    %c0_1 = arith.constant 0 : index
    %3 = vector.load %arg8[%c0, %c0_1] : memref<8x256xf32, #tpu.memory_space<vmem>>, vector<8x256xf32>
    %c0_2 = arith.constant 0 : index
    %c0_3 = arith.constant 0 : index
    %4 = vector.load %arg3[%c0_2, %c0_3] : memref<8x1152xbf16, #tpu.memory_space<vmem>>, vector<8x1152xbf16>
    %c0_4 = arith.constant 0 : index
    %c0_5 = arith.constant 0 : index
    %5 = vector.load %arg4[%c0_4, %c0_5] : memref<1152x256xbf16, #tpu.memory_space<vmem>>, vector<1152x256xbf16>
    %cst = arith.constant dense<0.000000e+00> : vector<8x256xf32>
    %6 = tpu.matmul %4, %5, %cst {dimension_numbers = #tpu.dot_dimension_numbers<[1], [0], [0], [1], [0, 0, 1, 1], [], []>} : vector<8x1152xbf16>, vector<1152x256xbf16>, vector<8x256xf32> -> vector<8x256xf32>
    %7 = arith.addf %3, %6 : vector<8x256xf32>
    %c0_6 = arith.constant 0 : index
    %c0_7 = arith.constant 0 : index
    %8 = vector.load %arg8[%c0_6, %c0_7] : memref<8x256xf32, #tpu.memory_space<vmem>>, vector<8x256xf32>
    tpu.vector_store %arg8[%c0_6, %c0_7], %7 {strides = array<i32>} : memref<8x256xf32, #tpu.memory_space<vmem>>, vector<8x256xf32>,
    %c1_i32 = arith.constant 1 : i32
    %9 = arith.cmpi eq, %arg2, %c1_i32 : i32
    %10 = arith.extui %9 : i1 to i32
    %c0_i32_8 = arith.constant 0 : i32
    %11 = arith.cmpi ne, %10, %c0_i32_8 : i32
    scf.if %11 {
      %c0_9 = arith.constant 0 : index
      %c0_10 = arith.constant 0 : index
      %12 = vector.load %arg8[%c0_9, %c0_10] : memref<8x256xf32, #tpu.memory_space<vmem>>, vector<8x256xf32>
      %c0_11 = arith.constant 0 : index
      %c0_12 = arith.constant 0 : index
      %13 = vector.load %arg5[%c0_11, %c0_12] : memref<1x256xf32, #tpu.memory_space<vmem>>, vector<1x256xf32>
      %14 = vector.broadcast %13 : vector<1x256xf32> to vector<8x256xf32>
      %15 = arith.addf %12, %14 : vector<8x256xf32>
      %c0_13 = arith.constant 0 : index
      %c0_14 = arith.constant 0 : index
      %16 = vector.load %arg6[%c0_13, %c0_14] : memref<8x256xbf16, #tpu.memory_space<vmem>>, vector<8x256xbf16>
      %17 = arith.extf %16 : vector<8x256xbf16> to vector<8x256xf32>
      %18 = arith.addf %15, %17 : vector<8x256xf32>
      %cst_15 = arith.constant 0.000000e+00 : f32
      %19 = vector.broadcast %cst_15 : f32 to vector<8x256xf32>
      %20 = arith.maximumf %18, %19 : vector<8x256xf32>
      %21 = arith.truncf %20 : vector<8x256xf32> to vector<8x256xbf16>
      %c0_16 = arith.constant 0 : index
      %c0_17 = arith.constant 0 : index
      %22 = vector.load %arg7[%c0_16, %c0_17] : memref<8x256xbf16, #tpu.memory_space<vmem>>, vector<8x256xbf16>
      tpu.vector_store %arg7[%c0_16, %c0_17], %21 {strides = array<i32>} : memref<8x256xbf16, #tpu.memory_space<vmem>>, vector<8x256xbf16>,
    } else {
    }
    return
  }
  func.func @transform_0(%arg0: i32, %arg1: i32, %arg2: i32) -> (i32, i32) {
    %c0_i32 = arith.constant 0 : i32
    return %arg0, %arg2 : i32, i32
  }
  func.func @transform_1(%arg0: i32, %arg1: i32, %arg2: i32) -> (i32, i32) {
    %c0_i32 = arith.constant 0 : i32
    return %arg2, %arg1 : i32, i32
  }
  func.func @transform_2(%arg0: i32, %arg1: i32, %arg2: i32) -> (i32, i32) {
    %c0_i32 = arith.constant 0 : i32
    %c0_i32_0 = arith.constant 0 : i32
    return %c0_i32, %arg1 : i32, i32
  }
  func.func @transform_3(%arg0: i32, %arg1: i32, %arg2: i32) -> (i32, i32) {
    %c0_i32 = arith.constant 0 : i32
    return %arg0, %arg1 : i32, i32
  }
  func.func @transform_4(%arg0: i32, %arg1: i32, %arg2: i32) -> (i32, i32) {
    %c0_i32 = arith.constant 0 : i32
    return %arg0, %arg1 : i32, i32
  }
}

module attributes {stable_mosaic.version = 11 : i64} {
  func.func @_matmul_bias_kernel(%arg0: i32, %arg1: i32, %arg2: i32, %arg3: memref<8x1152xbf16, #tpu.memory_space<vmem>>, %arg4: memref<1152x256xbf16, #tpu.memory_space<vmem>>, %arg5: memref<1x256xf32, #tpu.memory_space<vmem>>, %arg6: memref<8x256xbf16, #tpu.memory_space<vmem>>, %arg7: memref<8x256xf32, #tpu.memory_space<vmem>>) attributes {dimension_semantics = [#tpu.dimension_semantics<parallel>, #tpu.dimension_semantics<parallel>, #tpu.dimension_semantics<arbitrary>], iteration_bounds = array<i64: 1, 1, 2>, scalar_prefetch = 0 : i64, scratch_operands = 1 : i64, tpu.core_type = #tpu.core_type<tc>, window_params = [{transform_indices = @transform_0, window_bounds = array<i64: 8, 1152>}, {transform_indices = @transform_1, window_bounds = array<i64: 1152, 256>}, {transform_indices = @transform_2, window_bounds = array<i64: 1, 256>}, {transform_indices = @transform_3, window_bounds = array<i64: 8, 256>}]} {
    %c0_i32 = arith.constant 0 : i32
    %0 = arith.cmpi eq, %arg2, %c0_i32 : i32
    %1 = arith.extui %0 : i1 to i32
    %c0_i32_0 = arith.constant 0 : i32
    %2 = arith.cmpi ne, %1, %c0_i32_0 : i32
    scf.if %2 {
      %cst_9 = arith.constant 0.000000e+00 : f32
      %12 = vector.broadcast %cst_9 : f32 to vector<8x256xf32>
      %c0_10 = arith.constant 0 : index
      %c0_11 = arith.constant 0 : index
      %13 = vector.load %arg7[%c0_10, %c0_11] : memref<8x256xf32, #tpu.memory_space<vmem>>, vector<8x256xf32>
      tpu.vector_store %arg7[%c0_10, %c0_11], %12 {strides = array<i32>} : memref<8x256xf32, #tpu.memory_space<vmem>>, vector<8x256xf32>,
    } else {
    }
    %c0 = arith.constant 0 : index
    %c0_1 = arith.constant 0 : index
    %3 = vector.load %arg7[%c0, %c0_1] : memref<8x256xf32, #tpu.memory_space<vmem>>, vector<8x256xf32>
    %c0_2 = arith.constant 0 : index
    %c0_3 = arith.constant 0 : index
    %4 = vector.load %arg3[%c0_2, %c0_3] : memref<8x1152xbf16, #tpu.memory_space<vmem>>, vector<8x1152xbf16>
    %c0_4 = arith.constant 0 : index
    %c0_5 = arith.constant 0 : index
    %5 = vector.load %arg4[%c0_4, %c0_5] : memref<1152x256xbf16, #tpu.memory_space<vmem>>, vector<1152x256xbf16>
    %cst = arith.constant dense<0.000000e+00> : vector<8x256xf32>
    %6 = tpu.matmul %4, %5, %cst {dimension_numbers = #tpu.dot_dimension_numbers<[1], [0], [0], [1], [0, 0, 1, 1], [], []>} : vector<8x1152xbf16>, vector<1152x256xbf16>, vector<8x256xf32> -> vector<8x256xf32>
    %7 = arith.addf %3, %6 : vector<8x256xf32>
    %c0_6 = arith.constant 0 : index
    %c0_7 = arith.constant 0 : index
    %8 = vector.load %arg7[%c0_6, %c0_7] : memref<8x256xf32, #tpu.memory_space<vmem>>, vector<8x256xf32>
    tpu.vector_store %arg7[%c0_6, %c0_7], %7 {strides = array<i32>} : memref<8x256xf32, #tpu.memory_space<vmem>>, vector<8x256xf32>,
    %c1_i32 = arith.constant 1 : i32
    %9 = arith.cmpi eq, %arg2, %c1_i32 : i32
    %10 = arith.extui %9 : i1 to i32
    %c0_i32_8 = arith.constant 0 : i32
    %11 = arith.cmpi ne, %10, %c0_i32_8 : i32
    scf.if %11 {
      %c0_9 = arith.constant 0 : index
      %c0_10 = arith.constant 0 : index
      %12 = vector.load %arg7[%c0_9, %c0_10] : memref<8x256xf32, #tpu.memory_space<vmem>>, vector<8x256xf32>
      %c0_11 = arith.constant 0 : index
      %c0_12 = arith.constant 0 : index
      %13 = vector.load %arg5[%c0_11, %c0_12] : memref<1x256xf32, #tpu.memory_space<vmem>>, vector<1x256xf32>
      %14 = vector.broadcast %13 : vector<1x256xf32> to vector<8x256xf32>
      %15 = arith.addf %12, %14 : vector<8x256xf32>
      %cst_13 = arith.constant 0.000000e+00 : f32
      %16 = vector.broadcast %cst_13 : f32 to vector<8x256xf32>
      %17 = arith.maximumf %15, %16 : vector<8x256xf32>
      %18 = arith.truncf %17 : vector<8x256xf32> to vector<8x256xbf16>
      %c0_14 = arith.constant 0 : index
      %c0_15 = arith.constant 0 : index
      %19 = vector.load %arg6[%c0_14, %c0_15] : memref<8x256xbf16, #tpu.memory_space<vmem>>, vector<8x256xbf16>
      tpu.vector_store %arg6[%c0_14, %c0_15], %18 {strides = array<i32>} : memref<8x256xbf16, #tpu.memory_space<vmem>>, vector<8x256xbf16>,
    } else {
    }
    return
  }
  func.func @transform_0(%arg0: i32, %arg1: i32, %arg2: i32) -> (i32, i32) {
    %c0_i32 = arith.constant 0 : i32
    return %arg0, %arg2 : i32, i32
  }
  func.func @transform_1(%arg0: i32, %arg1: i32, %arg2: i32) -> (i32, i32) {
    %c0_i32 = arith.constant 0 : i32
    return %arg2, %arg1 : i32, i32
  }
  func.func @transform_2(%arg0: i32, %arg1: i32, %arg2: i32) -> (i32, i32) {
    %c0_i32 = arith.constant 0 : i32
    %c0_i32_0 = arith.constant 0 : i32
    return %c0_i32, %arg1 : i32, i32
  }
  func.func @transform_3(%arg0: i32, %arg1: i32, %arg2: i32) -> (i32, i32) {
    %c0_i32 = arith.constant 0 : i32
    return %arg0, %arg1 : i32, i32
  }
}

module attributes {stable_mosaic.version = 11 : i64} {
  func.func @_matmul_bias_kernel(%arg0: i32, %arg1: i32, %arg2: i32, %arg3: memref<8x1152xbf16, #tpu.memory_space<vmem>>, %arg4: memref<1152x512xbf16, #tpu.memory_space<vmem>>, %arg5: memref<1x512xf32, #tpu.memory_space<vmem>>, %arg6: memref<8x512xbf16, #tpu.memory_space<vmem>>, %arg7: memref<8x512xf32, #tpu.memory_space<vmem>>) attributes {dimension_semantics = [#tpu.dimension_semantics<parallel>, #tpu.dimension_semantics<parallel>, #tpu.dimension_semantics<arbitrary>], iteration_bounds = array<i64: 1, 1, 2>, scalar_prefetch = 0 : i64, scratch_operands = 1 : i64, tpu.core_type = #tpu.core_type<tc>, window_params = [{transform_indices = @transform_0, window_bounds = array<i64: 8, 1152>}, {transform_indices = @transform_1, window_bounds = array<i64: 1152, 512>}, {transform_indices = @transform_2, window_bounds = array<i64: 1, 512>}, {transform_indices = @transform_3, window_bounds = array<i64: 8, 512>}]} {
    %c0_i32 = arith.constant 0 : i32
    %0 = arith.cmpi eq, %arg2, %c0_i32 : i32
    %1 = arith.extui %0 : i1 to i32
    %c0_i32_0 = arith.constant 0 : i32
    %2 = arith.cmpi ne, %1, %c0_i32_0 : i32
    scf.if %2 {
      %cst_9 = arith.constant 0.000000e+00 : f32
      %12 = vector.broadcast %cst_9 : f32 to vector<8x512xf32>
      %c0_10 = arith.constant 0 : index
      %c0_11 = arith.constant 0 : index
      %13 = vector.load %arg7[%c0_10, %c0_11] : memref<8x512xf32, #tpu.memory_space<vmem>>, vector<8x512xf32>
      tpu.vector_store %arg7[%c0_10, %c0_11], %12 {strides = array<i32>} : memref<8x512xf32, #tpu.memory_space<vmem>>, vector<8x512xf32>,
    } else {
    }
    %c0 = arith.constant 0 : index
    %c0_1 = arith.constant 0 : index
    %3 = vector.load %arg7[%c0, %c0_1] : memref<8x512xf32, #tpu.memory_space<vmem>>, vector<8x512xf32>
    %c0_2 = arith.constant 0 : index
    %c0_3 = arith.constant 0 : index
    %4 = vector.load %arg3[%c0_2, %c0_3] : memref<8x1152xbf16, #tpu.memory_space<vmem>>, vector<8x1152xbf16>
    %c0_4 = arith.constant 0 : index
    %c0_5 = arith.constant 0 : index
    %5 = vector.load %arg4[%c0_4, %c0_5] : memref<1152x512xbf16, #tpu.memory_space<vmem>>, vector<1152x512xbf16>
    %cst = arith.constant dense<0.000000e+00> : vector<8x512xf32>
    %6 = tpu.matmul %4, %5, %cst {dimension_numbers = #tpu.dot_dimension_numbers<[1], [0], [0], [1], [0, 0, 1, 1], [], []>} : vector<8x1152xbf16>, vector<1152x512xbf16>, vector<8x512xf32> -> vector<8x512xf32>
    %7 = arith.addf %3, %6 : vector<8x512xf32>
    %c0_6 = arith.constant 0 : index
    %c0_7 = arith.constant 0 : index
    %8 = vector.load %arg7[%c0_6, %c0_7] : memref<8x512xf32, #tpu.memory_space<vmem>>, vector<8x512xf32>
    tpu.vector_store %arg7[%c0_6, %c0_7], %7 {strides = array<i32>} : memref<8x512xf32, #tpu.memory_space<vmem>>, vector<8x512xf32>,
    %c1_i32 = arith.constant 1 : i32
    %9 = arith.cmpi eq, %arg2, %c1_i32 : i32
    %10 = arith.extui %9 : i1 to i32
    %c0_i32_8 = arith.constant 0 : i32
    %11 = arith.cmpi ne, %10, %c0_i32_8 : i32
    scf.if %11 {
      %c0_9 = arith.constant 0 : index
      %c0_10 = arith.constant 0 : index
      %12 = vector.load %arg7[%c0_9, %c0_10] : memref<8x512xf32, #tpu.memory_space<vmem>>, vector<8x512xf32>
      %c0_11 = arith.constant 0 : index
      %c0_12 = arith.constant 0 : index
      %13 = vector.load %arg5[%c0_11, %c0_12] : memref<1x512xf32, #tpu.memory_space<vmem>>, vector<1x512xf32>
      %14 = vector.broadcast %13 : vector<1x512xf32> to vector<8x512xf32>
      %15 = arith.addf %12, %14 : vector<8x512xf32>
      %cst_13 = arith.constant 0.000000e+00 : f32
      %16 = vector.broadcast %cst_13 : f32 to vector<8x512xf32>
      %17 = arith.maximumf %15, %16 : vector<8x512xf32>
      %18 = arith.truncf %17 : vector<8x512xf32> to vector<8x512xbf16>
      %c0_14 = arith.constant 0 : index
      %c0_15 = arith.constant 0 : index
      %19 = vector.load %arg6[%c0_14, %c0_15] : memref<8x512xbf16, #tpu.memory_space<vmem>>, vector<8x512xbf16>
      tpu.vector_store %arg6[%c0_14, %c0_15], %18 {strides = array<i32>} : memref<8x512xbf16, #tpu.memory_space<vmem>>, vector<8x512xbf16>,
    } else {
    }
    return
  }
  func.func @transform_0(%arg0: i32, %arg1: i32, %arg2: i32) -> (i32, i32) {
    %c0_i32 = arith.constant 0 : i32
    return %arg0, %arg2 : i32, i32
  }
  func.func @transform_1(%arg0: i32, %arg1: i32, %arg2: i32) -> (i32, i32) {
    %c0_i32 = arith.constant 0 : i32
    return %arg2, %arg1 : i32, i32
  }
  func.func @transform_2(%arg0: i32, %arg1: i32, %arg2: i32) -> (i32, i32) {
    %c0_i32 = arith.constant 0 : i32
    %c0_i32_0 = arith.constant 0 : i32
    return %c0_i32, %arg1 : i32, i32
  }
  func.func @transform_3(%arg0: i32, %arg1: i32, %arg2: i32) -> (i32, i32) {
    %c0_i32 = arith.constant 0 : i32
    return %arg0, %arg1 : i32, i32
  }
}

module attributes {stable_mosaic.version = 11 : i64} {
  func.func @_matmul_bias_kernel(%arg0: i32, %arg1: i32, %arg2: i32, %arg3: memref<8x256xbf16, #tpu.memory_space<vmem>>, %arg4: memref<256x512xbf16, #tpu.memory_space<vmem>>, %arg5: memref<1x512xf32, #tpu.memory_space<vmem>>, %arg6: memref<8x512xbf16, #tpu.memory_space<vmem>>, %arg7: memref<8x512xf32, #tpu.memory_space<vmem>>) attributes {dimension_semantics = [#tpu.dimension_semantics<parallel>, #tpu.dimension_semantics<parallel>, #tpu.dimension_semantics<arbitrary>], iteration_bounds = array<i64: 1, 1, 1>, scalar_prefetch = 0 : i64, scratch_operands = 1 : i64, tpu.core_type = #tpu.core_type<tc>, window_params = [{transform_indices = @transform_0, window_bounds = array<i64: 8, 256>}, {transform_indices = @transform_1, window_bounds = array<i64: 256, 512>}, {transform_indices = @transform_2, window_bounds = array<i64: 1, 512>}, {transform_indices = @transform_3, window_bounds = array<i64: 8, 512>}]} {
    %c0_i32 = arith.constant 0 : i32
    %0 = arith.cmpi eq, %arg2, %c0_i32 : i32
    %1 = arith.extui %0 : i1 to i32
    %c0_i32_0 = arith.constant 0 : i32
    %2 = arith.cmpi ne, %1, %c0_i32_0 : i32
    scf.if %2 {
      %cst_10 = arith.constant 0.000000e+00 : f32
      %12 = vector.broadcast %cst_10 : f32 to vector<8x512xf32>
      %c0_11 = arith.constant 0 : index
      %c0_12 = arith.constant 0 : index
      %13 = vector.load %arg7[%c0_11, %c0_12] : memref<8x512xf32, #tpu.memory_space<vmem>>, vector<8x512xf32>
      tpu.vector_store %arg7[%c0_11, %c0_12], %12 {strides = array<i32>} : memref<8x512xf32, #tpu.memory_space<vmem>>, vector<8x512xf32>,
    } else {
    }
    %c0 = arith.constant 0 : index
    %c0_1 = arith.constant 0 : index
    %3 = vector.load %arg7[%c0, %c0_1] : memref<8x512xf32, #tpu.memory_space<vmem>>, vector<8x512xf32>
    %c0_2 = arith.constant 0 : index
    %c0_3 = arith.constant 0 : index
    %4 = vector.load %arg3[%c0_2, %c0_3] : memref<8x256xbf16, #tpu.memory_space<vmem>>, vector<8x256xbf16>
    %c0_4 = arith.constant 0 : index
    %c0_5 = arith.constant 0 : index
    %5 = vector.load %arg4[%c0_4, %c0_5] : memref<256x512xbf16, #tpu.memory_space<vmem>>, vector<256x512xbf16>
    %cst = arith.constant dense<0.000000e+00> : vector<8x512xf32>
    %6 = tpu.matmul %4, %5, %cst {dimension_numbers = #tpu.dot_dimension_numbers<[1], [0], [0], [1], [0, 0, 1, 1], [], []>} : vector<8x256xbf16>, vector<256x512xbf16>, vector<8x512xf32> -> vector<8x512xf32>
    %7 = arith.addf %3, %6 : vector<8x512xf32>
    %c0_6 = arith.constant 0 : index
    %c0_7 = arith.constant 0 : index
    %8 = vector.load %arg7[%c0_6, %c0_7] : memref<8x512xf32, #tpu.memory_space<vmem>>, vector<8x512xf32>
    tpu.vector_store %arg7[%c0_6, %c0_7], %7 {strides = array<i32>} : memref<8x512xf32, #tpu.memory_space<vmem>>, vector<8x512xf32>,
    %c0_i32_8 = arith.constant 0 : i32
    %9 = arith.cmpi eq, %arg2, %c0_i32_8 : i32
    %10 = arith.extui %9 : i1 to i32
    %c0_i32_9 = arith.constant 0 : i32
    %11 = arith.cmpi ne, %10, %c0_i32_9 : i32
    scf.if %11 {
      %c0_10 = arith.constant 0 : index
      %c0_11 = arith.constant 0 : index
      %12 = vector.load %arg7[%c0_10, %c0_11] : memref<8x512xf32, #tpu.memory_space<vmem>>, vector<8x512xf32>
      %c0_12 = arith.constant 0 : index
      %c0_13 = arith.constant 0 : index
      %13 = vector.load %arg5[%c0_12, %c0_13] : memref<1x512xf32, #tpu.memory_space<vmem>>, vector<1x512xf32>
      %14 = vector.broadcast %13 : vector<1x512xf32> to vector<8x512xf32>
      %15 = arith.addf %12, %14 : vector<8x512xf32>
      %16 = arith.truncf %15 : vector<8x512xf32> to vector<8x512xbf16>
      %c0_14 = arith.constant 0 : index
      %c0_15 = arith.constant 0 : index
      %17 = vector.load %arg6[%c0_14, %c0_15] : memref<8x512xbf16, #tpu.memory_space<vmem>>, vector<8x512xbf16>
      tpu.vector_store %arg6[%c0_14, %c0_15], %16 {strides = array<i32>} : memref<8x512xbf16, #tpu.memory_space<vmem>>, vector<8x512xbf16>,
    } else {
    }
    return
  }
  func.func @transform_0(%arg0: i32, %arg1: i32, %arg2: i32) -> (i32, i32) {
    %c0_i32 = arith.constant 0 : i32
    return %arg0, %arg2 : i32, i32
  }
  func.func @transform_1(%arg0: i32, %arg1: i32, %arg2: i32) -> (i32, i32) {
    %c0_i32 = arith.constant 0 : i32
    return %arg2, %arg1 : i32, i32
  }
  func.func @transform_2(%arg0: i32, %arg1: i32, %arg2: i32) -> (i32, i32) {
    %c0_i32 = arith.constant 0 : i32
    %c0_i32_0 = arith.constant 0 : i32
    return %c0_i32, %arg1 : i32, i32
  }
  func.func @transform_3(%arg0: i32, %arg1: i32, %arg2: i32) -> (i32, i32) {
    %c0_i32 = arith.constant 0 : i32
    return %arg0, %arg1 : i32, i32
  }
}

module attributes {stable_mosaic.version = 11 : i64} {
  func.func @_matmul_bias_kernel(%arg0: i32, %arg1: i32, %arg2: i32, %arg3: memref<8x1536xbf16, #tpu.memory_space<vmem>>, %arg4: memref<1536x512xbf16, #tpu.memory_space<vmem>>, %arg5: memref<1x512xf32, #tpu.memory_space<vmem>>, %arg6: memref<8x512xbf16, #tpu.memory_space<vmem>>, %arg7: memref<8x512xbf16, #tpu.memory_space<vmem>>, %arg8: memref<8x512xf32, #tpu.memory_space<vmem>>) attributes {dimension_semantics = [#tpu.dimension_semantics<parallel>, #tpu.dimension_semantics<parallel>, #tpu.dimension_semantics<arbitrary>], iteration_bounds = array<i64: 1, 1, 3>, scalar_prefetch = 0 : i64, scratch_operands = 1 : i64, tpu.core_type = #tpu.core_type<tc>, window_params = [{transform_indices = @transform_0, window_bounds = array<i64: 8, 1536>}, {transform_indices = @transform_1, window_bounds = array<i64: 1536, 512>}, {transform_indices = @transform_2, window_bounds = array<i64: 1, 512>}, {transform_indices = @transform_3, window_bounds = array<i64: 8, 512>}, {transform_indices = @transform_4, window_bounds = array<i64: 8, 512>}]} {
    %c0_i32 = arith.constant 0 : i32
    %0 = arith.cmpi eq, %arg2, %c0_i32 : i32
    %1 = arith.extui %0 : i1 to i32
    %c0_i32_0 = arith.constant 0 : i32
    %2 = arith.cmpi ne, %1, %c0_i32_0 : i32
    scf.if %2 {
      %cst_9 = arith.constant 0.000000e+00 : f32
      %12 = vector.broadcast %cst_9 : f32 to vector<8x512xf32>
      %c0_10 = arith.constant 0 : index
      %c0_11 = arith.constant 0 : index
      %13 = vector.load %arg8[%c0_10, %c0_11] : memref<8x512xf32, #tpu.memory_space<vmem>>, vector<8x512xf32>
      tpu.vector_store %arg8[%c0_10, %c0_11], %12 {strides = array<i32>} : memref<8x512xf32, #tpu.memory_space<vmem>>, vector<8x512xf32>,
    } else {
    }
    %c0 = arith.constant 0 : index
    %c0_1 = arith.constant 0 : index
    %3 = vector.load %arg8[%c0, %c0_1] : memref<8x512xf32, #tpu.memory_space<vmem>>, vector<8x512xf32>
    %c0_2 = arith.constant 0 : index
    %c0_3 = arith.constant 0 : index
    %4 = vector.load %arg3[%c0_2, %c0_3] : memref<8x1536xbf16, #tpu.memory_space<vmem>>, vector<8x1536xbf16>
    %c0_4 = arith.constant 0 : index
    %c0_5 = arith.constant 0 : index
    %5 = vector.load %arg4[%c0_4, %c0_5] : memref<1536x512xbf16, #tpu.memory_space<vmem>>, vector<1536x512xbf16>
    %cst = arith.constant dense<0.000000e+00> : vector<8x512xf32>
    %6 = tpu.matmul %4, %5, %cst {dimension_numbers = #tpu.dot_dimension_numbers<[1], [0], [0], [1], [0, 0, 1, 1], [], []>} : vector<8x1536xbf16>, vector<1536x512xbf16>, vector<8x512xf32> -> vector<8x512xf32>
    %7 = arith.addf %3, %6 : vector<8x512xf32>
    %c0_6 = arith.constant 0 : index
    %c0_7 = arith.constant 0 : index
    %8 = vector.load %arg8[%c0_6, %c0_7] : memref<8x512xf32, #tpu.memory_space<vmem>>, vector<8x512xf32>
    tpu.vector_store %arg8[%c0_6, %c0_7], %7 {strides = array<i32>} : memref<8x512xf32, #tpu.memory_space<vmem>>, vector<8x512xf32>,
    %c2_i32 = arith.constant 2 : i32
    %9 = arith.cmpi eq, %arg2, %c2_i32 : i32
    %10 = arith.extui %9 : i1 to i32
    %c0_i32_8 = arith.constant 0 : i32
    %11 = arith.cmpi ne, %10, %c0_i32_8 : i32
    scf.if %11 {
      %c0_9 = arith.constant 0 : index
      %c0_10 = arith.constant 0 : index
      %12 = vector.load %arg8[%c0_9, %c0_10] : memref<8x512xf32, #tpu.memory_space<vmem>>, vector<8x512xf32>
      %c0_11 = arith.constant 0 : index
      %c0_12 = arith.constant 0 : index
      %13 = vector.load %arg5[%c0_11, %c0_12] : memref<1x512xf32, #tpu.memory_space<vmem>>, vector<1x512xf32>
      %14 = vector.broadcast %13 : vector<1x512xf32> to vector<8x512xf32>
      %15 = arith.addf %12, %14 : vector<8x512xf32>
      %c0_13 = arith.constant 0 : index
      %c0_14 = arith.constant 0 : index
      %16 = vector.load %arg6[%c0_13, %c0_14] : memref<8x512xbf16, #tpu.memory_space<vmem>>, vector<8x512xbf16>
      %17 = arith.extf %16 : vector<8x512xbf16> to vector<8x512xf32>
      %18 = arith.addf %15, %17 : vector<8x512xf32>
      %cst_15 = arith.constant 0.000000e+00 : f32
      %19 = vector.broadcast %cst_15 : f32 to vector<8x512xf32>
      %20 = arith.maximumf %18, %19 : vector<8x512xf32>
      %21 = arith.truncf %20 : vector<8x512xf32> to vector<8x512xbf16>
      %c0_16 = arith.constant 0 : index
      %c0_17 = arith.constant 0 : index
      %22 = vector.load %arg7[%c0_16, %c0_17] : memref<8x512xbf16, #tpu.memory_space<vmem>>, vector<8x512xbf16>
      tpu.vector_store %arg7[%c0_16, %c0_17], %21 {strides = array<i32>} : memref<8x512xbf16, #tpu.memory_space<vmem>>, vector<8x512xbf16>,
    } else {
    }
    return
  }
  func.func @transform_0(%arg0: i32, %arg1: i32, %arg2: i32) -> (i32, i32) {
    %c0_i32 = arith.constant 0 : i32
    return %arg0, %arg2 : i32, i32
  }
  func.func @transform_1(%arg0: i32, %arg1: i32, %arg2: i32) -> (i32, i32) {
    %c0_i32 = arith.constant 0 : i32
    return %arg2, %arg1 : i32, i32
  }
  func.func @transform_2(%arg0: i32, %arg1: i32, %arg2: i32) -> (i32, i32) {
    %c0_i32 = arith.constant 0 : i32
    %c0_i32_0 = arith.constant 0 : i32
    return %c0_i32, %arg1 : i32, i32
  }
  func.func @transform_3(%arg0: i32, %arg1: i32, %arg2: i32) -> (i32, i32) {
    %c0_i32 = arith.constant 0 : i32
    return %arg0, %arg1 : i32, i32
  }
  func.func @transform_4(%arg0: i32, %arg1: i32, %arg2: i32) -> (i32, i32) {
    %c0_i32 = arith.constant 0 : i32
    return %arg0, %arg1 : i32, i32
  }
}

module attributes {stable_mosaic.version = 11 : i64} {
  func.func @_matmul_bias_kernel(%arg0: i32, %arg1: i32, %arg2: i32, %arg3: memref<8x1536xbf16, #tpu.memory_space<vmem>>, %arg4: memref<1536x512xbf16, #tpu.memory_space<vmem>>, %arg5: memref<1x512xf32, #tpu.memory_space<vmem>>, %arg6: memref<8x512xbf16, #tpu.memory_space<vmem>>, %arg7: memref<8x512xf32, #tpu.memory_space<vmem>>) attributes {dimension_semantics = [#tpu.dimension_semantics<parallel>, #tpu.dimension_semantics<parallel>, #tpu.dimension_semantics<arbitrary>], iteration_bounds = array<i64: 1, 1, 3>, scalar_prefetch = 0 : i64, scratch_operands = 1 : i64, tpu.core_type = #tpu.core_type<tc>, window_params = [{transform_indices = @transform_0, window_bounds = array<i64: 8, 1536>}, {transform_indices = @transform_1, window_bounds = array<i64: 1536, 512>}, {transform_indices = @transform_2, window_bounds = array<i64: 1, 512>}, {transform_indices = @transform_3, window_bounds = array<i64: 8, 512>}]} {
    %c0_i32 = arith.constant 0 : i32
    %0 = arith.cmpi eq, %arg2, %c0_i32 : i32
    %1 = arith.extui %0 : i1 to i32
    %c0_i32_0 = arith.constant 0 : i32
    %2 = arith.cmpi ne, %1, %c0_i32_0 : i32
    scf.if %2 {
      %cst_9 = arith.constant 0.000000e+00 : f32
      %12 = vector.broadcast %cst_9 : f32 to vector<8x512xf32>
      %c0_10 = arith.constant 0 : index
      %c0_11 = arith.constant 0 : index
      %13 = vector.load %arg7[%c0_10, %c0_11] : memref<8x512xf32, #tpu.memory_space<vmem>>, vector<8x512xf32>
      tpu.vector_store %arg7[%c0_10, %c0_11], %12 {strides = array<i32>} : memref<8x512xf32, #tpu.memory_space<vmem>>, vector<8x512xf32>,
    } else {
    }
    %c0 = arith.constant 0 : index
    %c0_1 = arith.constant 0 : index
    %3 = vector.load %arg7[%c0, %c0_1] : memref<8x512xf32, #tpu.memory_space<vmem>>, vector<8x512xf32>
    %c0_2 = arith.constant 0 : index
    %c0_3 = arith.constant 0 : index
    %4 = vector.load %arg3[%c0_2, %c0_3] : memref<8x1536xbf16, #tpu.memory_space<vmem>>, vector<8x1536xbf16>
    %c0_4 = arith.constant 0 : index
    %c0_5 = arith.constant 0 : index
    %5 = vector.load %arg4[%c0_4, %c0_5] : memref<1536x512xbf16, #tpu.memory_space<vmem>>, vector<1536x512xbf16>
    %cst = arith.constant dense<0.000000e+00> : vector<8x512xf32>
    %6 = tpu.matmul %4, %5, %cst {dimension_numbers = #tpu.dot_dimension_numbers<[1], [0], [0], [1], [0, 0, 1, 1], [], []>} : vector<8x1536xbf16>, vector<1536x512xbf16>, vector<8x512xf32> -> vector<8x512xf32>
    %7 = arith.addf %3, %6 : vector<8x512xf32>
    %c0_6 = arith.constant 0 : index
    %c0_7 = arith.constant 0 : index
    %8 = vector.load %arg7[%c0_6, %c0_7] : memref<8x512xf32, #tpu.memory_space<vmem>>, vector<8x512xf32>
    tpu.vector_store %arg7[%c0_6, %c0_7], %7 {strides = array<i32>} : memref<8x512xf32, #tpu.memory_space<vmem>>, vector<8x512xf32>,
    %c2_i32 = arith.constant 2 : i32
    %9 = arith.cmpi eq, %arg2, %c2_i32 : i32
    %10 = arith.extui %9 : i1 to i32
    %c0_i32_8 = arith.constant 0 : i32
    %11 = arith.cmpi ne, %10, %c0_i32_8 : i32
    scf.if %11 {
      %c0_9 = arith.constant 0 : index
      %c0_10 = arith.constant 0 : index
      %12 = vector.load %arg7[%c0_9, %c0_10] : memref<8x512xf32, #tpu.memory_space<vmem>>, vector<8x512xf32>
      %c0_11 = arith.constant 0 : index
      %c0_12 = arith.constant 0 : index
      %13 = vector.load %arg5[%c0_11, %c0_12] : memref<1x512xf32, #tpu.memory_space<vmem>>, vector<1x512xf32>
      %14 = vector.broadcast %13 : vector<1x512xf32> to vector<8x512xf32>
      %15 = arith.addf %12, %14 : vector<8x512xf32>
      %cst_13 = arith.constant 0.000000e+00 : f32
      %16 = vector.broadcast %cst_13 : f32 to vector<8x512xf32>
      %17 = arith.maximumf %15, %16 : vector<8x512xf32>
      %18 = arith.truncf %17 : vector<8x512xf32> to vector<8x512xbf16>
      %c0_14 = arith.constant 0 : index
      %c0_15 = arith.constant 0 : index
      %19 = vector.load %arg6[%c0_14, %c0_15] : memref<8x512xbf16, #tpu.memory_space<vmem>>, vector<8x512xbf16>
      tpu.vector_store %arg6[%c0_14, %c0_15], %18 {strides = array<i32>} : memref<8x512xbf16, #tpu.memory_space<vmem>>, vector<8x512xbf16>,
    } else {
    }
    return
  }
  func.func @transform_0(%arg0: i32, %arg1: i32, %arg2: i32) -> (i32, i32) {
    %c0_i32 = arith.constant 0 : i32
    return %arg0, %arg2 : i32, i32
  }
  func.func @transform_1(%arg0: i32, %arg1: i32, %arg2: i32) -> (i32, i32) {
    %c0_i32 = arith.constant 0 : i32
    return %arg2, %arg1 : i32, i32
  }
  func.func @transform_2(%arg0: i32, %arg1: i32, %arg2: i32) -> (i32, i32) {
    %c0_i32 = arith.constant 0 : i32
    %c0_i32_0 = arith.constant 0 : i32
    return %c0_i32, %arg1 : i32, i32
  }
  func.func @transform_3(%arg0: i32, %arg1: i32, %arg2: i32) -> (i32, i32) {
    %c0_i32 = arith.constant 0 : i32
    return %arg0, %arg1 : i32, i32
  }
}

module attributes {stable_mosaic.version = 11 : i64} {
  func.func @_head_kernel(%arg0: i32, %arg1: memref<2x1x512xbf16, #tpu.memory_space<vmem>>, %arg2: memref<2x8xf32, #tpu.memory_space<vmem>>, %arg3: memref<8x32xf32, #tpu.memory_space<vmem>>, %arg4: memref<1x32xf32, #tpu.memory_space<vmem>>, %arg5: memref<32x32xf32, #tpu.memory_space<vmem>>, %arg6: memref<1x32xf32, #tpu.memory_space<vmem>>, %arg7: memref<512x128xf32, #tpu.memory_space<vmem>>, %arg8: memref<32x128xf32, #tpu.memory_space<vmem>>, %arg9: memref<1x128xf32, #tpu.memory_space<vmem>>, %arg10: memref<128x1xf32, #tpu.memory_space<vmem>>, %arg11: memref<1x1xf32, #tpu.memory_space<vmem>>, %arg12: memref<2x1xf32, #tpu.memory_space<vmem>>) attributes {dimension_semantics = [#tpu.dimension_semantics<arbitrary>], iteration_bounds = array<i64: 1>, scalar_prefetch = 0 : i64, scratch_operands = 0 : i64, tpu.core_type = #tpu.core_type<tc>, window_params = [{pipeline_mode = #tpu.pipeline_mode<synchronous>, transform_indices = @transform_0, window_bounds = array<i64: 2, 1, 512>}, {pipeline_mode = #tpu.pipeline_mode<synchronous>, transform_indices = @transform_1, window_bounds = array<i64: 2, 8>}, {pipeline_mode = #tpu.pipeline_mode<synchronous>, transform_indices = @transform_2, window_bounds = array<i64: 8, 32>}, {pipeline_mode = #tpu.pipeline_mode<synchronous>, transform_indices = @transform_3, window_bounds = array<i64: 1, 32>}, {pipeline_mode = #tpu.pipeline_mode<synchronous>, transform_indices = @transform_4, window_bounds = array<i64: 32, 32>}, {pipeline_mode = #tpu.pipeline_mode<synchronous>, transform_indices = @transform_5, window_bounds = array<i64: 1, 32>}, {pipeline_mode = #tpu.pipeline_mode<synchronous>, transform_indices = @transform_6, window_bounds = array<i64: 512, 128>}, {pipeline_mode = #tpu.pipeline_mode<synchronous>, transform_indices = @transform_7, window_bounds = array<i64: 32, 128>}, {pipeline_mode = #tpu.pipeline_mode<synchronous>, transform_indices = @transform_8, window_bounds = array<i64: 1, 128>}, {pipeline_mode = #tpu.pipeline_mode<synchronous>, transform_indices = @transform_9, window_bounds = array<i64: 128, 1>}, {pipeline_mode = #tpu.pipeline_mode<synchronous>, transform_indices = @transform_10, window_bounds = array<i64: 1, 1>}, {pipeline_mode = #tpu.pipeline_mode<synchronous>, transform_indices = @transform_11, window_bounds = array<i64: 2, 1>}]} {
    %c0 = arith.constant 0 : index
    %c0_0 = arith.constant 0 : index
    %c0_1 = arith.constant 0 : index
    %0 = vector.load %arg1[%c0, %c0_0, %c0_1] : memref<2x1x512xbf16, #tpu.memory_space<vmem>>, vector<2x1x512xbf16>
    %1 = arith.extf %0 : vector<2x1x512xbf16> to vector<2x1x512xf32>
    %cst = arith.constant dense<0.000000e+00> : vector<2x512xf32>
    %2 = vector.multi_reduction <add>, %1, %cst [1] : vector<2x1x512xf32> to vector<2x512xf32>
    %cst_2 = arith.constant 1.000000e+00 : f32
    %3 = vector.broadcast %cst_2 : f32 to vector<2x512xf32>
    %4 = arith.divf %2, %3 : vector<2x512xf32>
    %c0_3 = arith.constant 0 : index
    %c0_4 = arith.constant 0 : index
    %5 = vector.load %arg2[%c0_3, %c0_4] : memref<2x8xf32, #tpu.memory_space<vmem>>, vector<2x8xf32>
    %c0_5 = arith.constant 0 : index
    %c0_6 = arith.constant 0 : index
    %6 = vector.load %arg3[%c0_5, %c0_6] : memref<8x32xf32, #tpu.memory_space<vmem>>, vector<8x32xf32>
    %cst_7 = arith.constant dense<0.000000e+00> : vector<2x32xf32>
    %7 = tpu.matmul %5, %6, %cst_7 {dimension_numbers = #tpu.dot_dimension_numbers<[1], [0], [0], [1], [0, 0, 1, 1], [], []>} : vector<2x8xf32>, vector<8x32xf32>, vector<2x32xf32> -> vector<2x32xf32>
    %c0_8 = arith.constant 0 : index
    %c0_9 = arith.constant 0 : index
    %8 = vector.load %arg4[%c0_8, %c0_9] : memref<1x32xf32, #tpu.memory_space<vmem>>, vector<1x32xf32>
    %9 = vector.broadcast %8 : vector<1x32xf32> to vector<2x32xf32>
    %10 = arith.addf %7, %9 : vector<2x32xf32>
    %cst_10 = arith.constant 0.000000e+00 : f32
    %11 = vector.broadcast %cst_10 : f32 to vector<2x32xf32>
    %12 = arith.maximumf %10, %11 : vector<2x32xf32>
    %c0_11 = arith.constant 0 : index
    %c0_12 = arith.constant 0 : index
    %13 = vector.load %arg5[%c0_11, %c0_12] : memref<32x32xf32, #tpu.memory_space<vmem>>, vector<32x32xf32>
    %cst_13 = arith.constant dense<0.000000e+00> : vector<2x32xf32>
    %14 = tpu.matmul %12, %13, %cst_13 {dimension_numbers = #tpu.dot_dimension_numbers<[1], [0], [0], [1], [0, 0, 1, 1], [], []>} : vector<2x32xf32>, vector<32x32xf32>, vector<2x32xf32> -> vector<2x32xf32>
    %c0_14 = arith.constant 0 : index
    %c0_15 = arith.constant 0 : index
    %15 = vector.load %arg6[%c0_14, %c0_15] : memref<1x32xf32, #tpu.memory_space<vmem>>, vector<1x32xf32>
    %16 = vector.broadcast %15 : vector<1x32xf32> to vector<2x32xf32>
    %17 = arith.addf %14, %16 : vector<2x32xf32>
    %cst_16 = arith.constant 0.000000e+00 : f32
    %18 = vector.broadcast %cst_16 : f32 to vector<2x32xf32>
    %19 = arith.maximumf %17, %18 : vector<2x32xf32>
    %c0_17 = arith.constant 0 : index
    %c0_18 = arith.constant 0 : index
    %20 = vector.load %arg7[%c0_17, %c0_18] : memref<512x128xf32, #tpu.memory_space<vmem>>, vector<512x128xf32>
    %cst_19 = arith.constant dense<0.000000e+00> : vector<2x128xf32>
    %21 = tpu.matmul %4, %20, %cst_19 {dimension_numbers = #tpu.dot_dimension_numbers<[1], [0], [0], [1], [0, 0, 1, 1], [], []>} : vector<2x512xf32>, vector<512x128xf32>, vector<2x128xf32> -> vector<2x128xf32>
    %c0_20 = arith.constant 0 : index
    %c0_21 = arith.constant 0 : index
    %22 = vector.load %arg8[%c0_20, %c0_21] : memref<32x128xf32, #tpu.memory_space<vmem>>, vector<32x128xf32>
    %cst_22 = arith.constant dense<0.000000e+00> : vector<2x128xf32>
    %23 = tpu.matmul %19, %22, %cst_22 {dimension_numbers = #tpu.dot_dimension_numbers<[1], [0], [0], [1], [0, 0, 1, 1], [], []>} : vector<2x32xf32>, vector<32x128xf32>, vector<2x128xf32> -> vector<2x128xf32>
    %24 = arith.addf %21, %23 : vector<2x128xf32>
    %c0_23 = arith.constant 0 : index
    %c0_24 = arith.constant 0 : index
    %25 = vector.load %arg9[%c0_23, %c0_24] : memref<1x128xf32, #tpu.memory_space<vmem>>, vector<1x128xf32>
    %26 = vector.broadcast %25 : vector<1x128xf32> to vector<2x128xf32>
    %27 = arith.addf %24, %26 : vector<2x128xf32>
    %cst_25 = arith.constant 0.000000e+00 : f32
    %28 = vector.broadcast %cst_25 : f32 to vector<2x128xf32>
    %29 = arith.maximumf %27, %28 : vector<2x128xf32>
    %c0_26 = arith.constant 0 : index
    %c0_27 = arith.constant 0 : index
    %30 = vector.load %arg10[%c0_26, %c0_27] : memref<128x1xf32, #tpu.memory_space<vmem>>, vector<128x1xf32>
    %cst_28 = arith.constant dense<0.000000e+00> : vector<2x1xf32>
    %31 = tpu.matmul %29, %30, %cst_28 {dimension_numbers = #tpu.dot_dimension_numbers<[1], [0], [0], [1], [0, 0, 1, 1], [], []>} : vector<2x128xf32>, vector<128x1xf32>, vector<2x1xf32> -> vector<2x1xf32>
    %c0_29 = arith.constant 0 : index
    %c0_30 = arith.constant 0 : index
    %32 = vector.load %arg11[%c0_29, %c0_30] : memref<1x1xf32, #tpu.memory_space<vmem>>, vector<1x1xf32>
    %33 = vector.broadcast %32 : vector<1x1xf32> to vector<2x1xf32>
    %34 = arith.addf %31, %33 : vector<2x1xf32>
    %c0_31 = arith.constant 0 : index
    %c0_32 = arith.constant 0 : index
    %35 = vector.load %arg12[%c0_31, %c0_32] : memref<2x1xf32, #tpu.memory_space<vmem>>, vector<2x1xf32>
    tpu.vector_store %arg12[%c0_31, %c0_32], %34 {strides = array<i32>} : memref<2x1xf32, #tpu.memory_space<vmem>>, vector<2x1xf32>,
    return
  }
  func.func @transform_0(%arg0: i32) -> (i32, i32, i32) {
    %c0_i32 = arith.constant 0 : i32
    %c0_i32_0 = arith.constant 0 : i32
    %c0_i32_1 = arith.constant 0 : i32
    %c0_i32_2 = arith.constant 0 : i32
    return %c0_i32, %c0_i32_0, %c0_i32_1 : i32, i32, i32
  }
  func.func @transform_1(%arg0: i32) -> (i32, i32) {
    %c0_i32 = arith.constant 0 : i32
    %c0_i32_0 = arith.constant 0 : i32
    %c0_i32_1 = arith.constant 0 : i32
    return %c0_i32, %c0_i32_0 : i32, i32
  }
  func.func @transform_2(%arg0: i32) -> (i32, i32) {
    %c0_i32 = arith.constant 0 : i32
    %c0_i32_0 = arith.constant 0 : i32
    %c0_i32_1 = arith.constant 0 : i32
    return %c0_i32, %c0_i32_0 : i32, i32
  }
  func.func @transform_3(%arg0: i32) -> (i32, i32) {
    %c0_i32 = arith.constant 0 : i32
    %c0_i32_0 = arith.constant 0 : i32
    %c0_i32_1 = arith.constant 0 : i32
    return %c0_i32, %c0_i32_0 : i32, i32
  }
  func.func @transform_4(%arg0: i32) -> (i32, i32) {
    %c0_i32 = arith.constant 0 : i32
    %c0_i32_0 = arith.constant 0 : i32
    %c0_i32_1 = arith.constant 0 : i32
    return %c0_i32, %c0_i32_0 : i32, i32
  }
  func.func @transform_5(%arg0: i32) -> (i32, i32) {
    %c0_i32 = arith.constant 0 : i32
    %c0_i32_0 = arith.constant 0 : i32
    %c0_i32_1 = arith.constant 0 : i32
    return %c0_i32, %c0_i32_0 : i32, i32
  }
  func.func @transform_6(%arg0: i32) -> (i32, i32) {
    %c0_i32 = arith.constant 0 : i32
    %c0_i32_0 = arith.constant 0 : i32
    %c0_i32_1 = arith.constant 0 : i32
    return %c0_i32, %c0_i32_0 : i32, i32
  }
  func.func @transform_7(%arg0: i32) -> (i32, i32) {
    %c0_i32 = arith.constant 0 : i32
    %c0_i32_0 = arith.constant 0 : i32
    %c0_i32_1 = arith.constant 0 : i32
    return %c0_i32, %c0_i32_0 : i32, i32
  }
  func.func @transform_8(%arg0: i32) -> (i32, i32) {
    %c0_i32 = arith.constant 0 : i32
    %c0_i32_0 = arith.constant 0 : i32
    %c0_i32_1 = arith.constant 0 : i32
    return %c0_i32, %c0_i32_0 : i32, i32
  }
  func.func @transform_9(%arg0: i32) -> (i32, i32) {
    %c0_i32 = arith.constant 0 : i32
    %c0_i32_0 = arith.constant 0 : i32
    %c0_i32_1 = arith.constant 0 : i32
    return %c0_i32, %c0_i32_0 : i32, i32
  }
  func.func @transform_10(%arg0: i32) -> (i32, i32) {
    %c0_i32 = arith.constant 0 : i32
    %c0_i32_0 = arith.constant 0 : i32
    %c0_i32_1 = arith.constant 0 : i32
    return %c0_i32, %c0_i32_0 : i32, i32
  }
  func.func @transform_11(%arg0: i32) -> (i32, i32) {
    %c0_i32 = arith.constant 0 : i32
    %c0_i32_0 = arith.constant 0 : i32
    %c0_i32_1 = arith.constant 0 : i32
    return %c0_i32, %c0_i32_0 : i32, i32
  }
}

</mosaic_0001>

<bundles_post_ra>
// kernel: model_forward.22
= control target key start
LH: loop header
LB: loop body
LE: loop exit
PB: predicated region body
PF: predicated region fallthrough
CT: control target
= control target key end

     0   :  { %s939_s1 = inlined_call_operand.vmem [shape: bf16[256,128], index: 1, kind: input, shape index: {}]   ;;  %s940_s0 = inlined_call_operand.vmem [shape: bf16[128,256], index: 0, kind: input, shape index: {}]   ;;  %s941_s2 = inlined_call_operand.vmem [shape: f32[1,128], index: 2, kind: input, shape index: {}]   ;;  %s942_s3 = inlined_call_operand.vmem [shape: bf16[128,128], index: 3, kind: output, shape index: {}]  }
   0x1   :  { %v738_v0 = vld [vmem:[%s939_s1 + $0x78] sm:$0xff]   ;;  %v740_v2 = vld [vmem:[%s939_s1 + $0x70] sm:$0xff]   ;;  %v742_v4 = vld [vmem:[%s939_s1 + $0x68] sm:$0xff]  }
   0x2   :  { %v739_v1 = vld [vmem:[%s939_s1 + $0x38] sm:$0xff]   ;;  %658 = vmatprep.subr.bf16.mxu0 %v738_v0  ;;  %722 = vmatprep.subr.bf16.mxu1 %v738_v0  ;;  %v741_v3 = vld [vmem:[%s939_s1 + $0x30] sm:$0xff]   ;;  %v743_v5 = vld [vmem:[%s939_s1 + $0x28] sm:$0xff]  }
   0x3   :  { %659 = vmatpush3.bf16.msra.mxu0 %v739_v1  ;;  %730 = vmatpush3.bf16.msra.mxu1 %v739_v1  ;;  %v744_v6 = vld [vmem:[%s939_s1 + $0x60] sm:$0xff]   ;;  %v746_v8 = vld [vmem:[%s939_s1 + $0x58] sm:$0xff]   ;;  %v748_v10 = vld [vmem:[%s939_s1 + $0x50] sm:$0xff]  }
   0x4   :  { %660 = vmatprep.subr.bf16.mxu0 %v740_v2  ;;  %723 = vmatprep.subr.bf16.mxu1 %v740_v2  ;;  %v745_v7 = vld [vmem:[%s939_s1 + $0x20] sm:$0xff]   ;;  %v747_v9 = vld [vmem:[%s939_s1 + $0x18] sm:$0xff]   ;;  %v749_v13 = vld [vmem:[%s939_s1 + $0x10] sm:$0xff]  }
   0x5   :  { %v756_v11 = vld [vmem:[%s940_s0 + $0x4] ss:$8 sps:$4 sm:$0xff]   ;;  %v754_v18 = vld [vmem:[%s940_s0] ss:$8 sps:$4 sm:$0xff]   ;;  %v760_v20 = vld [vmem:[%s940_s0 + $0x14] ss:$8 sps:$4 sm:$0xff]  }
   0x6   :  { %v759_v12 = vld [vmem:[%s940_s0 + $0x44] ss:$8 sps:$4 sm:$0xff]   ;;  %307 = vmatprep.mubr.bf16.mxu0 %v756_v11  ;;  %v757_v19 = vld [vmem:[%s940_s0 + $0x40] ss:$8 sps:$4 sm:$0xff]   ;;  %v762_v21 = vld [vmem:[%s940_s0 + $0x54] ss:$8 sps:$4 sm:$0xff]  }
   0x7   :  { %661 = vmatpush3.bf16.msra.mxu0 %v741_v3  ;;  %731 = vmatpush3.bf16.msra.mxu1 %v741_v3  ;;  %v750_v14 = vld [vmem:[%s939_s1 + $0x48] sm:$0xff]   ;;  %v752_v16 = vld [vmem:[%s939_s1 + $0x40] sm:$0xff]   ;;  %v764_v22 = vld [vmem:[%s940_s0 + $0x10] ss:$8 sps:$4 sm:$0xff]  }
   0x8   :  { %662 = vmatprep.subr.bf16.mxu0 %v742_v4  ;;  %724 = vmatprep.subr.bf16.mxu1 %v742_v4  ;;  %v751_v15 = vld [vmem:[%s939_s1 + $0x8] sm:$0xff]   ;;  %v753_v17 = vld [vmem:[%s939_s1] sm:$0xff]   ;;  %v765_v23 = vld [vmem:[%s940_s0 + $0x50] ss:$8 sps:$4 sm:$0xff]  }
   0x9   :  { %339 = vmatprep.mubr.bf16.mxu1 %v759_v12  ;;  %v766_v24 = vld [vmem:[%s940_s0 + $0x24] ss:$8 sps:$4 sm:$0xff]   ;;  %v770_v26 = vld [vmem:[%s940_s0 + $0x20] ss:$8 sps:$4 sm:$0xff]   ;;  %v772_v28 = vld [vmem:[%s940_s0 + $0x34] ss:$8 sps:$4 sm:$0xff]  }
   0xa   :  { %v768_v25 = vld [vmem:[%s940_s0 + $0x64] ss:$8 sps:$4 sm:$0xff]   ;;  %v771_v27 = vld [vmem:[%s940_s0 + $0x60] ss:$8 sps:$4 sm:$0xff]   ;;  %v774_v29 = vld [vmem:[%s940_s0 + $0x74] ss:$8 sps:$4 sm:$0xff]  }
   0xb   :  { %663 = vmatpush3.bf16.msra.mxu0 %v743_v5  ;;  %732 = vmatpush3.bf16.msra.mxu1 %v743_v5  ;;  %v776_v30 = vld [vmem:[%s940_s0 + $0x30] ss:$8 sps:$4 sm:$0xff]   ;;  %v897_v37 = vld [vmem:[%s941_s2] ss:$0 sm:$0xff] }
   0xc   :  { %664 = vmatprep.subr.bf16.mxu0 %v744_v6  ;;  %725 = vmatprep.subr.bf16.mxu1 %v744_v6  ;;  %v777_v31 = vld [vmem:[%s940_s0 + $0x70] ss:$8 sps:$4 sm:$0xff]  }
   0xf   :  { %665 = vmatpush3.bf16.msra.mxu0 %v745_v7  ;;  %733 = vmatpush3.bf16.msra.mxu1 %v745_v7 }
  0x10   :  { %666 = vmatprep.subr.bf16.mxu0 %v746_v8  ;;  %726 = vmatprep.subr.bf16.mxu1 %v746_v8 }
  0x13   :  { %667 = vmatpush3.bf16.msra.mxu0 %v747_v9  ;;  %734 = vmatpush3.bf16.msra.mxu1 %v747_v9 }
  0x14   :  { %668 = vmatprep.subr.bf16.mxu0 %v748_v10  ;;  %727 = vmatprep.subr.bf16.mxu1 %v748_v10 }
  0x17   :  { %669 = vmatpush3.bf16.msra.mxu0 %v749_v13  ;;  %735 = vmatpush3.bf16.msra.mxu1 %v749_v13 }
  0x18   :  { %670 = vmatprep.subr.bf16.mxu0 %v750_v14  ;;  %728 = vmatprep.subr.bf16.mxu1 %v750_v14 }
  0x1b   :  { %671 = vmatpush3.bf16.msra.mxu0 %v751_v15  ;;  %736 = vmatpush3.bf16.msra.mxu1 %v751_v15 }
  0x1c   :  { %672 = vmatprep.subr.bf16.mxu0 %v752_v16  ;;  %729 = vmatprep.subr.bf16.mxu1 %v752_v16 }
  0x1f   :  { %673 = vmatpush3.bf16.msra.mxu0 %v753_v17  ;;  %737 = vmatpush3.bf16.msra.mxu1 %v753_v17 }
  0x22   :  { %308 = vmatmul.mubr.bf16.vlgmr.msra.gmra.mxu0 %v754_v18  ;;  %340 = vmatmul.mubr.bf16.vlgmr.msra.gmra.mxu1 %v757_v19 }
  0x23   :  { %315 = vmatprep.mubr.bf16.mxu0 %v760_v20  ;;  %347 = vmatprep.mubr.bf16.mxu1 %v762_v21 }
  0x2a   :  { %316 = vmatmul.mubr.bf16.gmra.mxu0 %v764_v22  ;;  %348 = vmatmul.mubr.bf16.gmra.mxu1 %v765_v23 }
  0x2b   :  { %323 = vmatprep.mubr.bf16.mxu0 %v766_v24  ;;  %355 = vmatprep.mubr.bf16.mxu1 %v768_v25 }
  0x32   :  { %324 = vmatmul.mubr.bf16.gmra.mxu0 %v770_v26  ;;  %356 = vmatmul.mubr.bf16.gmra.mxu1 %v771_v27 }
  0x33   :  { %331 = vmatprep.mubr.bf16.mxu0 %v772_v28  ;;  %363 = vmatprep.mubr.bf16.mxu1 %v774_v29 }
  0x3a   :  { %332 = vmatmul.mubr.bf16.gmra.mxu0 %v776_v30  ;;  %364 = vmatmul.mubr.bf16.gmra.mxu1 %v777_v31 }
  0xe2   :  { %v674_v32 = vpop.f32.mrf.mxu0  ;;  %v698_v33 = vpop.f32.mrf.mxu1 }
  0xe4   :  { %v675_v34 = vpop.f32.mrf.mxu0  ;;  %v699_v35 = vpop.f32.mrf.mxu1 }
  0xe5   :  { %v676_v36 = vadd.f32 %v675_v34, %v674_v32  ;;  %v700_v38 = vadd.f32 %v699_v35, %v698_v33 }
  0xe6   :  { %v677_v39 = vpop.f32.mrf.mxu0  ;;  %v701_v40 = vpop.f32.mrf.mxu1 }
  0xe7   :  { %v430_v41 = vadd.f32 %v676_v36, %v897_v37  ;;  %v438_v42 = vadd.f32 %v700_v38, %v897_v37 }
  0xe8   :  { %v678_v43 = vpop.f32.mrf.mxu0  ;;  %v702_v44 = vpop.f32.mrf.mxu1 }
  0xe9   :  { %v679_v45 = vadd.f32 %v678_v43, %v677_v39  ;;  %v703_v46 = vadd.f32 %v702_v44, %v701_v40  ;;  %v446_v51 = vmax.f32 %v430_v41, 0.0  ;;  %v454_v52 = vmax.f32 %v438_v42, 0.0 }
  0xea   :  { %v680_v47 = vpop.f32.mrf.mxu0  ;;  %v704_v48 = vpop.f32.mrf.mxu1 }
  0xeb   :  { %v431_v49 = vadd.f32 %v679_v45, %v897_v37  ;;  %v439_v50 = vadd.f32 %v703_v46, %v897_v37 }
  0xec   :  { %v681_v53 = vpop.f32.mrf.mxu0  ;;  %v705_v54 = vpop.f32.mrf.mxu1 }
  0xed   :  { %v447_v55 = vmax.f32 %v431_v49, 0.0  ;;  %v455_v56 = vmax.f32 %v439_v50, 0.0  ;;  %v682_v57 = vadd.f32 %v681_v53, %v680_v47  ;;  %v706_v58 = vadd.f32 %v705_v54, %v704_v48 }
  0xee   :  { %v683_v59 = vpop.f32.mrf.mxu0  ;;  %v707_v60 = vpop.f32.mrf.mxu1 }
  0xef   :  { %v614_v61 = vpack.c.bf16 %v447_v55, %v446_v51  ;;  %v634_v62 = vpack.c.bf16 %v455_v56, %v454_v52  ;;  %v432_v63 = vadd.f32 %v682_v57, %v897_v37  ;;  %v440_v0 = vadd.f32 %v706_v58, %v897_v37 }
  0xf0   :  { %v684_v1 = vpop.f32.mrf.mxu0  ;;  %v708_v2 = vpop.f32.mrf.mxu1 }
  0xf1   :  { %615 = vst [vmem:[%s942_s3] sm:$0xff] %v614_v61   ;;  %654 = vst [vmem:[%s942_s3 + $0x20] sm:$0xff] %v634_v62   ;;  %v685_v3 = vadd.f32 %v684_v1, %v683_v59  ;;  %v709_v4 = vadd.f32 %v708_v2, %v707_v60  ;;  %v448_v9 = vmax.f32 %v432_v63, 0.0  ;;  %v456_v10 = vmax.f32 %v440_v0, 0.0 }
  0xf2   :  { %v686_v5 = vpop.f32.mrf.mxu0  ;;  %v710_v6 = vpop.f32.mrf.mxu1 }
  0xf3   :  { %v433_v7 = vadd.f32 %v685_v3, %v897_v37  ;;  %v441_v8 = vadd.f32 %v709_v4, %v897_v37 }
  0xf4   :  { %v687_v11 = vpop.f32.mrf.mxu0  ;;  %v711_v12 = vpop.f32.mrf.mxu1 }
  0xf5   :  { %v449_v13 = vmax.f32 %v433_v7, 0.0  ;;  %v457_v14 = vmax.f32 %v441_v8, 0.0  ;;  %v688_v15 = vadd.f32 %v687_v11, %v686_v5  ;;  %v712_v16 = vadd.f32 %v711_v12, %v710_v6 }
  0xf6   :  { %v689_v17 = vpop.f32.mrf.mxu0  ;;  %v713_v18 = vpop.f32.mrf.mxu1 }
  0xf7   :  { %v619_v19 = vpack.c.bf16 %v449_v13, %v448_v9  ;;  %v639_v20 = vpack.c.bf16 %v457_v14, %v456_v10  ;;  %v434_v21 = vadd.f32 %v688_v15, %v897_v37  ;;  %v442_v22 = vadd.f32 %v712_v16, %v897_v37 }
  0xf8   :  { %v690_v23 = vpop.f32.mrf.mxu0  ;;  %v714_v24 = vpop.f32.mrf.mxu1 }
  0xf9   :  { %651 = vst [vmem:[%s942_s3 + $0x8] sm:$0xff] %v619_v19   ;;  %655 = vst [vmem:[%s942_s3 + $0x28] sm:$0xff] %v639_v20   ;;  %v691_v25 = vadd.f32 %v690_v23, %v689_v17  ;;  %v715_v26 = vadd.f32 %v714_v24, %v713_v18  ;;  %v450_v31 = vmax.f32 %v434_v21, 0.0  ;;  %v458_v32 = vmax.f32 %v442_v22, 0.0 }
  0xfa   :  { %v692_v27 = vpop.f32.mrf.mxu0  ;;  %v716_v28 = vpop.f32.mrf.mxu1 }
  0xfb   :  { %v435_v29 = vadd.f32 %v691_v25, %v897_v37  ;;  %v443_v30 = vadd.f32 %v715_v26, %v897_v37 }
  0xfc   :  { %v693_v33 = vpop.f32.mrf.mxu0  ;;  %v717_v34 = vpop.f32.mrf.mxu1 }
  0xfd   :  { %v451_v35 = vmax.f32 %v435_v29, 0.0  ;;  %v459_v36 = vmax.f32 %v443_v30, 0.0  ;;  %v694_v38 = vadd.f32 %v693_v33, %v692_v27  ;;  %v718_v39 = vadd.f32 %v717_v34, %v716_v28 }
  0xfe   :  { %v695_v40 = vpop.f32.mrf.mxu0  ;;  %v719_v41 = vpop.f32.mrf.mxu1 }
  0xff   :  { %v624_v42 = vpack.c.bf16 %v451_v35, %v450_v31  ;;  %v644_v43 = vpack.c.bf16 %v459_v36, %v458_v32  ;;  %v436_v46 = vadd.f32 %v694_v38, %v897_v37  ;;  %v444_v47 = vadd.f32 %v718_v39, %v897_v37 }
 0x100   :  { %v696_v44 = vpop.f32.mrf.mxu0  ;;  %v720_v45 = vpop.f32.mrf.mxu1 }
 0x101   :  { %652 = vst [vmem:[%s942_s3 + $0x10] sm:$0xff] %v624_v42   ;;  %656 = vst [vmem:[%s942_s3 + $0x30] sm:$0xff] %v644_v43   ;;  %v697_v48 = vadd.f32 %v696_v44, %v695_v40  ;;  %v721_v49 = vadd.f32 %v720_v45, %v719_v41  ;;  %v452_v52 = vmax.f32 %v436_v46, 0.0  ;;  %v460_v53 = vmax.f32 %v444_v47, 0.0 }
 0x103   :  { %v437_v50 = vadd.f32 %v697_v48, %v897_v37  ;;  %v445_v51 = vadd.f32 %v721_v49, %v897_v37 }
 0x105   :  { %v453_v54 = vmax.f32 %v437_v50, 0.0  ;;  %v461_v55 = vmax.f32 %v445_v51, 0.0 }
 0x107   :  { %v629_v56 = vpack.c.bf16 %v453_v54, %v452_v52  ;;  %v649_v57 = vpack.c.bf16 %v461_v55, %v460_v53 }
 0x109   :  { %653 = vst [vmem:[%s942_s3 + $0x18] sm:$0xff] %v629_v56   ;;  %657 = vst [vmem:[%s942_s3 + $0x38] sm:$0xff] %v649_v57  }

// kernel: model_forward.23
= control target key start
LH: loop header
LB: loop body
LE: loop exit
PB: predicated region body
PF: predicated region fallthrough
CT: control target
= control target key end

     0   :  { %s324_s6 = smov 0   ;;  %s326_s7 = smov 0   ;;  %s384_s0 = inlined_call_operand.vmem [shape: bf16[9,32,128], index: 0, kind: input, shape index: {}]   ;;  %s385_s1 = inlined_call_operand.vmem [shape: bf16[32,128], index: 1, kind: output, shape index: {}]  }
   0x1   :  { %s328_s8 = smov 0  }
   0x2 LB: > { %s20_s9 = sadd.s32 1, %s307_s7  ;;  %p242_p0 = scmp.ge.s32.totalorder %s311_s8, 1  ;;  %s311_s8 = sphi %s328_s8, %s11_s8   ;;  %s307_s7 = sphi %s326_s7, %s387_s7   ;;  %s303_s6 = sphi %s324_s6, %s386_s6  }
   0x3   : > { %p21_p1 = scmp.ge.s32.totalorder %s20_s9, 9  ;;  %p106_p2 = scmp.lt.s32.totalorder %s311_s8, 10 }
   0x5   : > { %s389_s9 = smov (%p21_p1, %s20_s9), 0  ;;  %p107_p3 = pnand %p242_p0, %p106_p2 }
   0x6   : > { %p131_p4 = scmp.lt.s32.totalorder (!%p107_p3), %s303_s6, 8  ;;  %p245_p5 = scmp.ne.s32.totalorder (!%p107_p3), %s303_s6, 0 }
   0x7   : > { %110 = sbr.rel (%p107_p3) target bundleno = 33 (0x21), region = 24 }
   0xc   : > { %s132_s10 = scalar_select %p131_p4, %s303_s6, 8 }
   0xd   : > { %150 = sbr.rel (%p245_p5) target bundleno = 21 (0x15), region = 28 }
   0xe   : > { %s250_s11 = sshll.u32 %s132_s10, 4 }
   0xf   : > { %s138_s14 = scalar_lea.vmem %s384_s0, %s250_s11 }
  0x12   : > { %v313_v0 = vmov 4286644096  }
  0x13   : > { %151 = vst [vmem:[%s385_s1] sm:$0xf] %v313_v0  ;;  %152 = vst [vmem:[%s385_s1 + $0x4] sm:$0xf] %v313_v0 }
  0x14   : > { %153 = vst [vmem:[%s385_s1 + $0x8] sm:$0xf] %v313_v0  ;;  %154 = vst [vmem:[%s385_s1 + $0xc] sm:$0xf] %v313_v0 }
  0x15 PF: > { %v159_v3 = vld [vmem:[%s138_s14] sm:$0xf]  ;;  %v160_v4 = vld [vmem:[%s138_s14 + $0x4] sm:$0xf]  ;;  %v161_v9 = vld [vmem:[%s138_s14 + $0x8] sm:$0xf] }
  0x16   : > { %v162_v10 = vld [vmem:[%s138_s14 + $0xc] sm:$0xf] }
  0x1a   : > { %v155_v1 = vld [vmem:[%s385_s1] sm:$0xf]  ;;  %v156_v2 = vld [vmem:[%s385_s1 + $0x4] sm:$0xf] }
  0x1b   : > { %v163_v5 = vmax.bf16 %v159_v3, %v155_v1  ;;  %v157_v6 = vld [vmem:[%s385_s1 + $0x8] sm:$0xf]  ;;  %v158_v7 = vld [vmem:[%s385_s1 + $0xc] sm:$0xf]  ;;  %v164_v8 = vmax.bf16 %v160_v4, %v156_v2 }
  0x1c   : > { %v165_v11 = vmax.bf16 %v161_v9, %v157_v6  ;;  %v166_v12 = vmax.bf16 %v162_v10, %v158_v7 }
  0x1d   : > { %v261_v13 = vcombine.low %v163_v5, %v164_v8 }
  0x1e   : > { %v262_v14 = vcombine.low %v165_v11, %v166_v12 }
  0x1f   : > { %255 = vst [vmem:[%s385_s1] sm:$0xff] %v261_v13  }
  0x20   : > { %263 = vst [vmem:[%s385_s1 + $0x8] sm:$0xff] %v262_v14  }
  0x21 PF: > { %s11_s8 = sadd.s32 1, %s311_s8   ;;  %s386_s6 = smov %s307_s7 }
  0x22   : > { %p8_p6 = scmp.ge.s32.totalorder %s11_s8, 11   ;;  %s387_s7 = smov %s389_s9 }
  0x24   :  { %10 = sbr.rel (!%p8_p6) target bundleno = 2 (0x2), region = 58 }

// kernel: model_forward.24
= control target key start
LH: loop header
LB: loop body
LE: loop exit
PB: predicated region body
PF: predicated region fallthrough
CT: control target
= control target key end

     0   :  { %s1663_s1 = inlined_call_operand.vmem [shape: bf16[1152,128], index: 1, kind: input, shape index: {}]   ;;  %s1664_s0 = inlined_call_operand.vmem [shape: bf16[32,1152], index: 0, kind: input, shape index: {}]   ;;  %s1665_s2 = inlined_call_operand.vmem [shape: f32[1,128], index: 2, kind: input, shape index: {}]   ;;  %s1666_s3 = inlined_call_operand.vmem [shape: bf16[32,128], index: 3, kind: output, shape index: {}]  }
   0x1   :  { %v1266_v0 = vld [vmem:[%s1663_s1 + $0x78] sm:$0xff]   ;;  %v1270_v4 = vld [vmem:[%s1663_s1 + $0x70] sm:$0xff]   ;;  %v1274_v8 = vld [vmem:[%s1663_s1 + $0x68] sm:$0xff]  }
   0x2   :  { %v1267_v1 = vld [vmem:[%s1663_s1 + $0xf8] sm:$0xff]   ;;  %1124 = vmatprep.subr.bf16.mxu0 %v1266_v0  ;;  %v1271_v5 = vld [vmem:[%s1663_s1 + $0xf0] sm:$0xff]   ;;  %v1275_v9 = vld [vmem:[%s1663_s1 + $0xe8] sm:$0xff]  }
   0x3   :  { %v1268_v2 = vld [vmem:[%s1663_s1 + $0x38] sm:$0xff]   ;;  %1152 = vmatprep.subr.bf16.mxu1 %v1267_v1  ;;  %v1272_v6 = vld [vmem:[%s1663_s1 + $0x30] sm:$0xff]   ;;  %v1276_v10 = vld [vmem:[%s1663_s1 + $0x28] sm:$0xff]  }
   0x4   :  { %v1269_v3 = vld [vmem:[%s1663_s1 + $0xb8] sm:$0xff]   ;;  %1125 = vmatpush3.bf16.msra.mxu0 %v1268_v2  ;;  %v1273_v7 = vld [vmem:[%s1663_s1 + $0xb0] sm:$0xff]   ;;  %v1277_v11 = vld [vmem:[%s1663_s1 + $0xa8] sm:$0xff]  }
   0x5   :  { %1153 = vmatpush3.bf16.msra.mxu1 %v1269_v3  ;;  %1126 = vmatprep.subr.bf16.mxu0 %v1270_v4  ;;  %v1278_v12 = vld [vmem:[%s1663_s1 + $0x60] sm:$0xff]   ;;  %v1282_v16 = vld [vmem:[%s1663_s1 + $0x58] sm:$0xff]   ;;  %v1286_v20 = vld [vmem:[%s1663_s1 + $0x50] sm:$0xff]  }
   0x6   :  { %1154 = vmatprep.subr.bf16.mxu1 %v1271_v5  ;;  %v1279_v13 = vld [vmem:[%s1663_s1 + $0xe0] sm:$0xff]   ;;  %v1283_v17 = vld [vmem:[%s1663_s1 + $0xd8] sm:$0xff]   ;;  %v1287_v21 = vld [vmem:[%s1663_s1 + $0xd0] sm:$0xff]  }
   0x7   :  { %v1280_v14 = vld [vmem:[%s1663_s1 + $0x20] sm:$0xff]   ;;  %v1284_v18 = vld [vmem:[%s1663_s1 + $0x18] sm:$0xff]   ;;  %v1288_v22 = vld [vmem:[%s1663_s1 + $0x10] sm:$0xff]  }
   0x8   :  { %1127 = vmatpush3.bf16.msra.mxu0 %v1272_v6  ;;  %v1281_v15 = vld [vmem:[%s1663_s1 + $0xa0] sm:$0xff]   ;;  %v1285_v19 = vld [vmem:[%s1663_s1 + $0x98] sm:$0xff]   ;;  %v1289_v23 = vld [vmem:[%s1663_s1 + $0x90] sm:$0xff]  }
   0x9   :  { %1155 = vmatpush3.bf16.msra.mxu1 %v1273_v7  ;;  %1128 = vmatprep.subr.bf16.mxu0 %v1274_v8  ;;  %v1290_v24 = vld [vmem:[%s1663_s1 + $0x48] sm:$0xff]   ;;  %v1294_v28 = vld [vmem:[%s1663_s1 + $0x40] sm:$0xff]   ;;  %v1304_v36 = vld [vmem:[%s1663_s1 + $0x178] sm:$0xff]  }
   0xa   :  { %1156 = vmatprep.subr.bf16.mxu1 %v1275_v9  ;;  %v1291_v25 = vld [vmem:[%s1663_s1 + $0xc8] sm:$0xff]   ;;  %v1295_v29 = vld [vmem:[%s1663_s1 + $0xc0] sm:$0xff]   ;;  %v1305_v37 = vld [vmem:[%s1663_s1 + $0x138] sm:$0xff]  }
   0xb   :  { %v1292_v26 = vld [vmem:[%s1663_s1 + $0x8] sm:$0xff]   ;;  %v1296_v30 = vld [vmem:[%s1663_s1] sm:$0xff]   ;;  %v1306_v38 = vld [vmem:[%s1663_s1 + $0x1f8] sm:$0xff]  }
   0xc   :  { %1129 = vmatpush3.bf16.msra.mxu0 %v1276_v10  ;;  %v1293_v27 = vld [vmem:[%s1663_s1 + $0x88] sm:$0xff]   ;;  %v1297_v31 = vld [vmem:[%s1663_s1 + $0x80] sm:$0xff]   ;;  %v1307_v39 = vld [vmem:[%s1663_s1 + $0x1b8] sm:$0xff]  }
   0xd   :  { %1157 = vmatpush3.bf16.msra.mxu1 %v1277_v11  ;;  %1130 = vmatprep.subr.bf16.mxu0 %v1278_v12  ;;  %v1298_v32 = vld [vmem:[%s1664_s0] ss:$36 sps:$4 sm:$0xff]   ;;  %v1301_v34 = vld [vmem:[%s1664_s0 + $0x8] ss:$36 sps:$4 sm:$0xff]   ;;  %v1308_v40 = vld [vmem:[%s1663_s1 + $0x170] sm:$0xff]  }
   0xe   :  { %1158 = vmatprep.subr.bf16.mxu1 %v1279_v13  ;;  %v1300_v33 = vld [vmem:[%s1664_s0 + $0x4] ss:$36 sps:$4 sm:$0xff]   ;;  %v1303_v35 = vld [vmem:[%s1664_s0 + $0xc] ss:$36 sps:$4 sm:$0xff]   ;;  %v1320_v52 = vld [vmem:[%s1663_s1 + $0x158] sm:$0xff]  }
   0xf   :  { %747 = vmatprep.mubr.bf16.mxu0 %v1300_v33  ;;  %796 = vmatprep.mubr.bf16.mxu1 %v1303_v35  ;;  %v1309_v41 = vld [vmem:[%s1663_s1 + $0x130] sm:$0xff]   ;;  %v1312_v44 = vld [vmem:[%s1663_s1 + $0x168] sm:$0xff]   ;;  %v1316_v48 = vld [vmem:[%s1663_s1 + $0x160] sm:$0xff]  }
  0x10   :  { %1131 = vmatpush3.bf16.msra.mxu0 %v1280_v14  ;;  %v1310_v42 = vld [vmem:[%s1663_s1 + $0x1f0] sm:$0xff]   ;;  %v1313_v45 = vld [vmem:[%s1663_s1 + $0x128] sm:$0xff]   ;;  %v1317_v49 = vld [vmem:[%s1663_s1 + $0x120] sm:$0xff]  }
  0x11   :  { %1159 = vmatpush3.bf16.msra.mxu1 %v1281_v15  ;;  %1132 = vmatprep.subr.bf16.mxu0 %v1282_v16  ;;  %v1311_v43 = vld [vmem:[%s1663_s1 + $0x1b0] sm:$0xff]   ;;  %v1314_v46 = vld [vmem:[%s1663_s1 + $0x1e8] sm:$0xff]   ;;  %v1318_v50 = vld [vmem:[%s1663_s1 + $0x1e0] sm:$0xff]  }
  0x12   :  { %1160 = vmatprep.subr.bf16.mxu1 %v1283_v17  ;;  %v1315_v47 = vld [vmem:[%s1663_s1 + $0x1a8] sm:$0xff]   ;;  %v1319_v51 = vld [vmem:[%s1663_s1 + $0x1a0] sm:$0xff]   ;;  %v1321_v53 = vld [vmem:[%s1663_s1 + $0x118] sm:$0xff]  }
  0x13   :  { %v1322_v54 = vld [vmem:[%s1664_s0 + $0x4c] ss:$36 sps:$4 sm:$0xff]   ;;  %v1324_v55 = vld [vmem:[%s1664_s0 + $0x54] ss:$36 sps:$4 sm:$0xff]   ;;  %v1338_v4 = vld [vmem:[%s1663_s1 + $0x140] sm:$0xff]  }
  0x14   :  { %1133 = vmatpush3.bf16.msra.mxu0 %v1284_v18  ;;  %v1326_v56 = vld [vmem:[%s1663_s1 + $0x1d8] sm:$0xff]   ;;  %v1327_v57 = vld [vmem:[%s1664_s0 + $0x48] ss:$36 sps:$4 sm:$0xff]   ;;  %v1328_v58 = vld [vmem:[%s1664_s0 + $0x50] ss:$36 sps:$4 sm:$0xff]  }
  0x15   :  { %1161 = vmatpush3.bf16.msra.mxu1 %v1285_v19  ;;  %1134 = vmatprep.subr.bf16.mxu0 %v1286_v20  ;;  %v1329_v59 = vld [vmem:[%s1663_s1 + $0x198] sm:$0xff]   ;;  %v1330_v60 = vld [vmem:[%s1663_s1 + $0x150] sm:$0xff]   ;;  %v1334_v0 = vld [vmem:[%s1663_s1 + $0x148] sm:$0xff]  }
  0x16   :  { %1162 = vmatprep.subr.bf16.mxu1 %v1287_v21  ;;  %v1331_v61 = vld [vmem:[%s1663_s1 + $0x110] sm:$0xff]   ;;  %v1335_v1 = vld [vmem:[%s1663_s1 + $0x108] sm:$0xff]   ;;  %v1339_v5 = vld [vmem:[%s1663_s1 + $0x100] sm:$0xff]  }
  0x17   :  { %v1332_v62 = vld [vmem:[%s1663_s1 + $0x1d0] sm:$0xff]   ;;  %v1336_v2 = vld [vmem:[%s1663_s1 + $0x1c8] sm:$0xff]   ;;  %v1340_v6 = vld [vmem:[%s1663_s1 + $0x1c0] sm:$0xff]  }
  0x18   :  { %1135 = vmatpush3.bf16.msra.mxu0 %v1288_v22  ;;  %v1333_v63 = vld [vmem:[%s1663_s1 + $0x190] sm:$0xff]   ;;  %v1337_v3 = vld [vmem:[%s1663_s1 + $0x188] sm:$0xff]   ;;  %v1344_v9 = vld [vmem:[%s1663_s1 + $0x180] sm:$0xff]  }
  0x19   :  { %1163 = vmatpush3.bf16.msra.mxu1 %v1289_v23  ;;  %1136 = vmatprep.subr.bf16.mxu0 %v1290_v24  ;;  %v1341_v7 = vld [vmem:[%s1664_s0 + $0x10] ss:$36 sps:$4 sm:$0xff]   ;;  %v1345_v10 = vld [vmem:[%s1663_s1 + $0x238] sm:$0xff]   ;;  %v1353_v16 = vld [vmem:[%s1663_s1 + $0x228] sm:$0xff]  }
  0x1a   :  { %1164 = vmatprep.subr.bf16.mxu1 %v1291_v25  ;;  %v1343_v8 = vld [vmem:[%s1664_s0 + $0x14] ss:$36 sps:$4 sm:$0xff]   ;;  %v1348_v12 = vld [vmem:[%s1664_s0 + $0x1c] ss:$36 sps:$4 sm:$0xff]   ;;  %v1354_v17 = vld [vmem:[%s1664_s0 + $0x64] ss:$36 sps:$4 sm:$0xff]  }
  0x1b   :  { %v1346_v11 = vld [vmem:[%s1664_s0 + $0x18] ss:$36 sps:$4 sm:$0xff]   ;;  %v1349_v13 = vld [vmem:[%s1663_s1 + $0x230] sm:$0xff]   ;;  %v1356_v18 = vld [vmem:[%s1664_s0 + $0x60] ss:$36 sps:$4 sm:$0xff]  }
  0x1c   :  { %1137 = vmatpush3.bf16.msra.mxu0 %v1292_v26  ;;  %v1350_v14 = vld [vmem:[%s1664_s0 + $0x5c] ss:$36 sps:$4 sm:$0xff]   ;;  %v1359_v22 = vld [vmem:[%s1663_s1 + $0x210] sm:$0xff]   ;;  %v1360_v23 = vld [vmem:[%s1663_s1 + $0x208] sm:$0xff]  }
  0x1d   :  { %1165 = vmatpush3.bf16.msra.mxu1 %v1293_v27  ;;  %1138 = vmatprep.subr.bf16.mxu0 %v1294_v28  ;;  %v1352_v15 = vld [vmem:[%s1664_s0 + $0x58] ss:$36 sps:$4 sm:$0xff]   ;;  %v1357_v19 = vld [vmem:[%s1663_s1 + $0x220] sm:$0xff]   ;;  %v1363_v25 = vld [vmem:[%s1664_s0 + $0x68] ss:$36 sps:$4 sm:$0xff]  }
  0x1e   :  { %1166 = vmatprep.subr.bf16.mxu1 %v1295_v29  ;;  %v1358_v20 = vld [vmem:[%s1663_s1 + $0x218] sm:$0xff]   ;;  %v1362_v21 = vld [vmem:[%s1664_s0 + $0x20] ss:$36 sps:$4 sm:$0xff]  }
  0x1f   :  { %v1361_v24 = vld [vmem:[%s1663_s1 + $0x200] sm:$0xff]  }
  0x20   :  { %1139 = vmatpush3.bf16.msra.mxu0 %v1296_v30 }
  0x21   :  { %1167 = vmatpush3.bf16.msra.mxu1 %v1297_v31  ;;  %1180 = vmatprep.subr.bf16.mxu0 %v1304_v36 }
  0x22   :  { %1208 = vmatprep.subr.bf16.mxu1 %v1306_v38 }
  0x23   :  { %748 = vmatmul.mubr.bf16.vlgmr.msra.gmra.mxu0 %v1298_v32 }
  0x24   :  { %797 = vmatmul.mubr.bf16.vlgmr.msra.gmra.mxu1 %v1301_v34  ;;  %1181 = vmatpush3.bf16.msra.mxu0 %v1305_v37 }
  0x25   :  { %1209 = vmatpush3.bf16.msra.mxu1 %v1307_v39  ;;  %1182 = vmatprep.subr.bf16.mxu0 %v1308_v40 }
  0x26   :  { %1210 = vmatprep.subr.bf16.mxu1 %v1310_v42  ;;  %755 = vmatprep.mubr.bf16.mxu0 %v1322_v54 }
  0x27   :  { %804 = vmatprep.mubr.bf16.mxu1 %v1324_v55 }
  0x28   :  { %1183 = vmatpush3.bf16.msra.mxu0 %v1309_v41 }
  0x29   :  { %1211 = vmatpush3.bf16.msra.mxu1 %v1311_v43  ;;  %1184 = vmatprep.subr.bf16.mxu0 %v1312_v44 }
  0x2a   :  { %1212 = vmatprep.subr.bf16.mxu1 %v1314_v46 }
  0x2b   :  { %756 = vmatmul.mubr.bf16.gmra.mxu0 %v1327_v57 }
  0x2c   :  { %1185 = vmatpush3.bf16.msra.mxu0 %v1313_v45  ;;  %805 = vmatmul.mubr.bf16.gmra.mxu1 %v1328_v58 }
  0x2d   :  { %1213 = vmatpush3.bf16.msra.mxu1 %v1315_v47  ;;  %1186 = vmatprep.subr.bf16.mxu0 %v1316_v48 }
  0x2e   :  { %1214 = vmatprep.subr.bf16.mxu1 %v1318_v50  ;;  %845 = vmatprep.mubr.bf16.mxu0 %v1343_v8 }
  0x2f   :  { %894 = vmatprep.mubr.bf16.mxu1 %v1348_v12 }
  0x30   :  { %1187 = vmatpush3.bf16.msra.mxu0 %v1317_v49 }
  0x31   :  { %1215 = vmatpush3.bf16.msra.mxu1 %v1319_v51  ;;  %1188 = vmatprep.subr.bf16.mxu0 %v1320_v52 }
  0x32   :  { %1216 = vmatprep.subr.bf16.mxu1 %v1326_v56 }
  0x34   :  { %1189 = vmatpush3.bf16.msra.mxu0 %v1321_v53 }
  0x35   :  { %1217 = vmatpush3.bf16.msra.mxu1 %v1329_v59  ;;  %1190 = vmatprep.subr.bf16.mxu0 %v1330_v60 }
  0x36   :  { %1218 = vmatprep.subr.bf16.mxu1 %v1332_v62 }
  0x38   :  { %1191 = vmatpush3.bf16.msra.mxu0 %v1331_v61 }
  0x39   :  { %1219 = vmatpush3.bf16.msra.mxu1 %v1333_v63  ;;  %1192 = vmatprep.subr.bf16.mxu0 %v1334_v0 }
  0x3a   :  { %1220 = vmatprep.subr.bf16.mxu1 %v1336_v2 }
  0x3c   :  { %1193 = vmatpush3.bf16.msra.mxu0 %v1335_v1 }
  0x3d   :  { %1221 = vmatpush3.bf16.msra.mxu1 %v1337_v3  ;;  %1194 = vmatprep.subr.bf16.mxu0 %v1338_v4 }
  0x3e   :  { %1222 = vmatprep.subr.bf16.mxu1 %v1340_v6 }
  0x40   :  { %1195 = vmatpush3.bf16.msra.mxu0 %v1339_v5 }
  0x41   :  { %1223 = vmatpush3.bf16.msra.mxu1 %v1344_v9  ;;  %1246 = vmatprep.subr.bf16.mxu0 %v1345_v10 }
  0x43   :  { %846 = vmatmul.mubr.bf16.vlgmr.msra.gmra.mxu0 %v1341_v7 }
  0x44   :  { %1247 = vmatpush3.bf16.msra.mxu0 %v1345_v10  ;;  %895 = vmatmul.mubr.bf16.vlgmr.msra.gmra.mxu1 %v1346_v11 }
  0x45   :  { %1248 = vmatprep.subr.bf16.mxu0 %v1349_v13  ;;  %853 = vmatprep.mubr.bf16.mxu0 %v1350_v14 }
  0x46   :  { %902 = vmatprep.mubr.bf16.mxu1 %v1354_v17 }
  0x48   :  { %1249 = vmatpush3.bf16.msra.mxu0 %v1349_v13 }
  0x49   :  { %1250 = vmatprep.subr.bf16.mxu0 %v1353_v16 }
  0x4b   :  { %854 = vmatmul.mubr.bf16.gmra.mxu0 %v1352_v15 }
  0x4c   :  { %1251 = vmatpush3.bf16.msra.mxu0 %v1353_v16  ;;  %903 = vmatmul.mubr.bf16.gmra.mxu1 %v1356_v18 }
  0x4d   :  { %1252 = vmatprep.subr.bf16.mxu0 %v1357_v19  ;;  %1262 = vmatprep.mubr.bf16.mxu0 %v1362_v21 }
  0x50   :  { %1253 = vmatpush3.bf16.msra.mxu0 %v1357_v19 }
  0x51   :  { %1254 = vmatprep.subr.bf16.mxu0 %v1358_v20 }
  0x54   :  { %1255 = vmatpush3.bf16.msra.mxu0 %v1358_v20 }
  0x55   :  { %1256 = vmatprep.subr.bf16.mxu0 %v1359_v22 }
  0x58   :  { %1257 = vmatpush3.bf16.msra.mxu0 %v1359_v22  ;;  %v1104_v22 = vld [vmem:[%s1665_s2] ss:$0 sm:$0xff] }
  0x59   :  { %1258 = vmatprep.subr.bf16.mxu0 %v1360_v23 }
  0x5c   :  { %1259 = vmatpush3.bf16.msra.mxu0 %v1360_v23 }
  0x5d   :  { %1260 = vmatprep.subr.bf16.mxu0 %v1361_v24 }
  0x60   :  { %1261 = vmatpush3.bf16.msra.mxu0 %v1361_v24 }
  0x63   :  { %1263 = vmatmul.mubr.bf16.vlgmr.msra.gmra.mxu0 %v1363_v25 }
  0xe3   :  { %v1140_v26 = vpop.f32.mrf.mxu0 }
  0xe4   :  { %v1168_v27 = vpop.f32.mrf.mxu1 }
  0xe5   :  { %v1141_v28 = vpop.f32.mrf.mxu0 }
  0xe6   :  { %v1169_v29 = vpop.f32.mrf.mxu1  ;;  %v1142_v57 = vadd.f32 %v1141_v28, %v1140_v26 }
  0xe7   :  { %v1143_v30 = vpop.f32.mrf.mxu0  ;;  %v1170_v58 = vadd.f32 %v1169_v29, %v1168_v27 }
  0xe8   :  { %v1171_v31 = vpop.f32.mrf.mxu1 }
  0xe9   :  { %v1144_v32 = vpop.f32.mrf.mxu0  ;;  %v799_v2 = vadd.f32 %v1170_v58, %v1142_v57 }
  0xea   :  { %v1172_v34 = vpop.f32.mrf.mxu1  ;;  %v1145_v3 = vadd.f32 %v1144_v32, %v1143_v30 }
  0xeb   :  { %v1146_v33 = vpop.f32.mrf.mxu0  ;;  %v1173_v4 = vadd.f32 %v1172_v34, %v1171_v31 }
  0xec   :  { %v1174_v35 = vpop.f32.mrf.mxu1 }
  0xed   :  { %v1147_v36 = vpop.f32.mrf.mxu0  ;;  %v802_v13 = vadd.f32 %v1173_v4, %v1145_v3 }
  0xee   :  { %v1175_v37 = vpop.f32.mrf.mxu1  ;;  %v1148_v55 = vadd.f32 %v1147_v36, %v1146_v33 }
  0xef   :  { %v1149_v38 = vpop.f32.mrf.mxu0  ;;  %v1176_v56 = vadd.f32 %v1175_v37, %v1174_v35 }
  0xf0   :  { %v1177_v39 = vpop.f32.mrf.mxu1 }
  0xf1   :  { %v1150_v40 = vpop.f32.mrf.mxu0  ;;  %v807_v62 = vadd.f32 %v1176_v56, %v1148_v55 }
  0xf2   :  { %v1178_v42 = vpop.f32.mrf.mxu1  ;;  %v1151_v63 = vadd.f32 %v1150_v40, %v1149_v38 }
  0xf3   :  { %v1179_v0 = vadd.f32 %v1178_v42, %v1177_v39 }
  0xf5   :  { %v810_v9 = vadd.f32 %v1179_v0, %v1151_v63 }
 0x103   :  { %v1196_v41 = vpop.f32.mrf.mxu0 }
 0x104   :  { %v1224_v44 = vpop.f32.mrf.mxu1 }
 0x105   :  { %v1197_v43 = vpop.f32.mrf.mxu0 }
 0x106   :  { %v1225_v46 = vpop.f32.mrf.mxu1  ;;  %v1198_v1 = vadd.f32 %v1197_v43, %v1196_v41 }
 0x107   :  { %v1199_v45 = vpop.f32.mrf.mxu0  ;;  %v1226_v11 = vadd.f32 %v1225_v46, %v1224_v44 }
 0x108   :  { %v1227_v48 = vpop.f32.mrf.mxu1  ;;  %v848_v10 = vadd.f32 %v1198_v1, %v799_v2 }
 0x109   :  { %v1200_v47 = vpop.f32.mrf.mxu0 }
 0x10a   :  { %v1228_v50 = vpop.f32.mrf.mxu1  ;;  %v1201_v12 = vadd.f32 %v1200_v47, %v1199_v45  ;;  %v897_v21 = vadd.f32 %v1226_v11, %v848_v10 }
 0x10b   :  { %v1202_v49 = vpop.f32.mrf.mxu0  ;;  %v1229_v19 = vadd.f32 %v1228_v50, %v1227_v48 }
 0x10c   :  { %v1230_v52 = vpop.f32.mrf.mxu1  ;;  %v851_v18 = vadd.f32 %v1201_v12, %v802_v13 }
 0x10d   :  { %v1203_v51 = vpop.f32.mrf.mxu0 }
 0x10e   :  { %v1231_v54 = vpop.f32.mrf.mxu1  ;;  %v1204_v59 = vadd.f32 %v1203_v51, %v1202_v49  ;;  %v900_v29 = vadd.f32 %v1229_v19, %v851_v18 }
 0x10f   :  { %v1205_v53 = vpop.f32.mrf.mxu0  ;;  %v1232_v6 = vadd.f32 %v1231_v54, %v1230_v52 }
 0x110   :  { %v1233_v61 = vpop.f32.mrf.mxu1  ;;  %v856_v5 = vadd.f32 %v1204_v59, %v807_v62 }
 0x111   :  { %v1206_v60 = vpop.f32.mrf.mxu0 }
 0x112   :  { %v1207_v7 = vadd.f32 %v1206_v60, %v1205_v53  ;;  %v1234_v8 = vpop.f32.mrf.mxu1  ;;  %v905_v16 = vadd.f32 %v1232_v6, %v856_v5 }
 0x113   :  { %v1235_v15 = vadd.f32 %v1234_v8, %v1233_v61 }
 0x114   :  { %v859_v14 = vadd.f32 %v1207_v7, %v810_v9 }
 0x116   :  { %v908_v25 = vadd.f32 %v1235_v15, %v859_v14 }
 0x123   :  { %v1264_v17 = vpop.f32.mrf.mxu0 }
 0x124   :  { %v954_v20 = vadd.f32 %v1264_v17, %v905_v16 }
 0x125   :  { %v945_v23 = vpop.f32.mrf.mxu0 }
 0x126   :  { %v946_v24 = vadd.f32 %v945_v23, %v897_v21  ;;  %v984_v27 = vadd.f32 %v1104_v22, %v954_v20 }
 0x127   :  { %v1265_v26 = vpop.f32.mrf.mxu0 }
 0x128   :  { %v957_v28 = vadd.f32 %v1265_v26, %v908_v25  ;;  %v982_v31 = vadd.f32 %v1104_v22, %v946_v24  ;;  %v988_v34 = vmax.f32 %v984_v27, 0.0 }
 0x129   :  { %v948_v30 = vpop.f32.mrf.mxu0 }
 0x12a   :  { %v985_v32 = vadd.f32 %v1104_v22, %v957_v28  ;;  %v949_v33 = vadd.f32 %v948_v30, %v900_v29  ;;  %v986_v37 = vmax.f32 %v982_v31, 0.0 }
 0x12c   :  { %v989_v35 = vmax.f32 %v985_v32, 0.0  ;;  %v983_v36 = vadd.f32 %v1104_v22, %v949_v33 }
 0x12e   :  { %v1121_v38 = vpack.c.bf16 %v989_v35, %v988_v34  ;;  %v987_v39 = vmax.f32 %v983_v36, 0.0 }
 0x130   :  { %1123 = vst [vmem:[%s1666_s3 + $0x8] sm:$0xff] %v1121_v38   ;;  %v1116_v40 = vpack.c.bf16 %v987_v39, %v986_v37 }
 0x132   :  { %1117 = vst [vmem:[%s1666_s3] sm:$0xff] %v1116_v40  }

// kernel: model_forward.25
= control target key start
LH: loop header
LB: loop body
LE: loop exit
PB: predicated region body
PF: predicated region fallthrough
CT: control target
= control target key end

     0   :  { %s1698_s1 = inlined_call_operand.vmem [shape: bf16[1152,128], index: 1, kind: input, shape index: {}]   ;;  %s1699_s0 = inlined_call_operand.vmem [shape: bf16[32,1152], index: 0, kind: input, shape index: {}]   ;;  %s1700_s2 = inlined_call_operand.vmem [shape: f32[1,128], index: 2, kind: input, shape index: {}]   ;;  %s1701_s3 = inlined_call_operand.vmem [shape: bf16[32,128], index: 3, kind: input, shape index: {}]   ;;  %s1702_s4 = inlined_call_operand.vmem [shape: bf16[32,128], index: 4, kind: output, shape index: {}]  }
   0x1   :  { %v1290_v0 = vld [vmem:[%s1698_s1 + $0x78] sm:$0xff]   ;;  %v1294_v4 = vld [vmem:[%s1698_s1 + $0x70] sm:$0xff]   ;;  %v1298_v8 = vld [vmem:[%s1698_s1 + $0x68] sm:$0xff]  }
   0x2   :  { %v1291_v1 = vld [vmem:[%s1698_s1 + $0xf8] sm:$0xff]   ;;  %1148 = vmatprep.subr.bf16.mxu0 %v1290_v0  ;;  %v1295_v5 = vld [vmem:[%s1698_s1 + $0xf0] sm:$0xff]   ;;  %v1299_v9 = vld [vmem:[%s1698_s1 + $0xe8] sm:$0xff]  }
   0x3   :  { %v1292_v2 = vld [vmem:[%s1698_s1 + $0x38] sm:$0xff]   ;;  %1176 = vmatprep.subr.bf16.mxu1 %v1291_v1  ;;  %v1296_v6 = vld [vmem:[%s1698_s1 + $0x30] sm:$0xff]   ;;  %v1300_v10 = vld [vmem:[%s1698_s1 + $0x28] sm:$0xff]  }
   0x4   :  { %v1293_v3 = vld [vmem:[%s1698_s1 + $0xb8] sm:$0xff]   ;;  %1149 = vmatpush3.bf16.msra.mxu0 %v1292_v2  ;;  %v1297_v7 = vld [vmem:[%s1698_s1 + $0xb0] sm:$0xff]   ;;  %v1301_v11 = vld [vmem:[%s1698_s1 + $0xa8] sm:$0xff]  }
   0x5   :  { %1177 = vmatpush3.bf16.msra.mxu1 %v1293_v3  ;;  %1150 = vmatprep.subr.bf16.mxu0 %v1294_v4  ;;  %v1302_v12 = vld [vmem:[%s1698_s1 + $0x60] sm:$0xff]   ;;  %v1306_v16 = vld [vmem:[%s1698_s1 + $0x58] sm:$0xff]   ;;  %v1310_v20 = vld [vmem:[%s1698_s1 + $0x50] sm:$0xff]  }
   0x6   :  { %1178 = vmatprep.subr.bf16.mxu1 %v1295_v5  ;;  %v1303_v13 = vld [vmem:[%s1698_s1 + $0xe0] sm:$0xff]   ;;  %v1307_v17 = vld [vmem:[%s1698_s1 + $0xd8] sm:$0xff]   ;;  %v1311_v21 = vld [vmem:[%s1698_s1 + $0xd0] sm:$0xff]  }
   0x7   :  { %v1304_v14 = vld [vmem:[%s1698_s1 + $0x20] sm:$0xff]   ;;  %v1308_v18 = vld [vmem:[%s1698_s1 + $0x18] sm:$0xff]   ;;  %v1312_v22 = vld [vmem:[%s1698_s1 + $0x10] sm:$0xff]  }
   0x8   :  { %1151 = vmatpush3.bf16.msra.mxu0 %v1296_v6  ;;  %v1305_v15 = vld [vmem:[%s1698_s1 + $0xa0] sm:$0xff]   ;;  %v1309_v19 = vld [vmem:[%s1698_s1 + $0x98] sm:$0xff]   ;;  %v1313_v23 = vld [vmem:[%s1698_s1 + $0x90] sm:$0xff]  }
   0x9   :  { %1179 = vmatpush3.bf16.msra.mxu1 %v1297_v7  ;;  %1152 = vmatprep.subr.bf16.mxu0 %v1298_v8  ;;  %v1314_v24 = vld [vmem:[%s1698_s1 + $0x48] sm:$0xff]   ;;  %v1318_v28 = vld [vmem:[%s1698_s1 + $0x40] sm:$0xff]   ;;  %v1328_v36 = vld [vmem:[%s1698_s1 + $0x178] sm:$0xff]  }
   0xa   :  { %1180 = vmatprep.subr.bf16.mxu1 %v1299_v9  ;;  %v1315_v25 = vld [vmem:[%s1698_s1 + $0xc8] sm:$0xff]   ;;  %v1319_v29 = vld [vmem:[%s1698_s1 + $0xc0] sm:$0xff]   ;;  %v1329_v37 = vld [vmem:[%s1698_s1 + $0x138] sm:$0xff]  }
   0xb   :  { %v1316_v26 = vld [vmem:[%s1698_s1 + $0x8] sm:$0xff]   ;;  %v1320_v30 = vld [vmem:[%s1698_s1] sm:$0xff]   ;;  %v1330_v38 = vld [vmem:[%s1698_s1 + $0x1f8] sm:$0xff]  }
   0xc   :  { %1153 = vmatpush3.bf16.msra.mxu0 %v1300_v10  ;;  %v1317_v27 = vld [vmem:[%s1698_s1 + $0x88] sm:$0xff]   ;;  %v1321_v31 = vld [vmem:[%s1698_s1 + $0x80] sm:$0xff]   ;;  %v1331_v39 = vld [vmem:[%s1698_s1 + $0x1b8] sm:$0xff]  }
   0xd   :  { %1181 = vmatpush3.bf16.msra.mxu1 %v1301_v11  ;;  %1154 = vmatprep.subr.bf16.mxu0 %v1302_v12  ;;  %v1322_v32 = vld [vmem:[%s1699_s0] ss:$36 sps:$4 sm:$0xff]   ;;  %v1325_v34 = vld [vmem:[%s1699_s0 + $0x8] ss:$36 sps:$4 sm:$0xff]   ;;  %v1332_v40 = vld [vmem:[%s1698_s1 + $0x170] sm:$0xff]  }
   0xe   :  { %1182 = vmatprep.subr.bf16.mxu1 %v1303_v13  ;;  %v1324_v33 = vld [vmem:[%s1699_s0 + $0x4] ss:$36 sps:$4 sm:$0xff]   ;;  %v1327_v35 = vld [vmem:[%s1699_s0 + $0xc] ss:$36 sps:$4 sm:$0xff]   ;;  %v1344_v52 = vld [vmem:[%s1698_s1 + $0x158] sm:$0xff]  }
   0xf   :  { %750 = vmatprep.mubr.bf16.mxu0 %v1324_v33  ;;  %799 = vmatprep.mubr.bf16.mxu1 %v1327_v35  ;;  %v1333_v41 = vld [vmem:[%s1698_s1 + $0x130] sm:$0xff]   ;;  %v1336_v44 = vld [vmem:[%s1698_s1 + $0x168] sm:$0xff]   ;;  %v1340_v48 = vld [vmem:[%s1698_s1 + $0x160] sm:$0xff]  }
  0x10   :  { %1155 = vmatpush3.bf16.msra.mxu0 %v1304_v14  ;;  %v1334_v42 = vld [vmem:[%s1698_s1 + $0x1f0] sm:$0xff]   ;;  %v1337_v45 = vld [vmem:[%s1698_s1 + $0x128] sm:$0xff]   ;;  %v1341_v49 = vld [vmem:[%s1698_s1 + $0x120] sm:$0xff]  }
  0x11   :  { %1183 = vmatpush3.bf16.msra.mxu1 %v1305_v15  ;;  %1156 = vmatprep.subr.bf16.mxu0 %v1306_v16  ;;  %v1335_v43 = vld [vmem:[%s1698_s1 + $0x1b0] sm:$0xff]   ;;  %v1338_v46 = vld [vmem:[%s1698_s1 + $0x1e8] sm:$0xff]   ;;  %v1342_v50 = vld [vmem:[%s1698_s1 + $0x1e0] sm:$0xff]  }
  0x12   :  { %1184 = vmatprep.subr.bf16.mxu1 %v1307_v17  ;;  %v1339_v47 = vld [vmem:[%s1698_s1 + $0x1a8] sm:$0xff]   ;;  %v1343_v51 = vld [vmem:[%s1698_s1 + $0x1a0] sm:$0xff]   ;;  %v1345_v53 = vld [vmem:[%s1698_s1 + $0x118] sm:$0xff]  }
  0x13   :  { %v1346_v54 = vld [vmem:[%s1699_s0 + $0x4c] ss:$36 sps:$4 sm:$0xff]   ;;  %v1348_v55 = vld [vmem:[%s1699_s0 + $0x54] ss:$36 sps:$4 sm:$0xff]   ;;  %v1362_v4 = vld [vmem:[%s1698_s1 + $0x140] sm:$0xff]  }
  0x14   :  { %1157 = vmatpush3.bf16.msra.mxu0 %v1308_v18  ;;  %v1350_v56 = vld [vmem:[%s1698_s1 + $0x1d8] sm:$0xff]   ;;  %v1351_v57 = vld [vmem:[%s1699_s0 + $0x48] ss:$36 sps:$4 sm:$0xff]   ;;  %v1352_v58 = vld [vmem:[%s1699_s0 + $0x50] ss:$36 sps:$4 sm:$0xff]  }
  0x15   :  { %1185 = vmatpush3.bf16.msra.mxu1 %v1309_v19  ;;  %1158 = vmatprep.subr.bf16.mxu0 %v1310_v20  ;;  %v1353_v59 = vld [vmem:[%s1698_s1 + $0x198] sm:$0xff]   ;;  %v1354_v60 = vld [vmem:[%s1698_s1 + $0x150] sm:$0xff]   ;;  %v1358_v0 = vld [vmem:[%s1698_s1 + $0x148] sm:$0xff]  }
  0x16   :  { %1186 = vmatprep.subr.bf16.mxu1 %v1311_v21  ;;  %v1355_v61 = vld [vmem:[%s1698_s1 + $0x110] sm:$0xff]   ;;  %v1359_v1 = vld [vmem:[%s1698_s1 + $0x108] sm:$0xff]   ;;  %v1363_v5 = vld [vmem:[%s1698_s1 + $0x100] sm:$0xff]  }
  0x17   :  { %v1356_v62 = vld [vmem:[%s1698_s1 + $0x1d0] sm:$0xff]   ;;  %v1360_v2 = vld [vmem:[%s1698_s1 + $0x1c8] sm:$0xff]   ;;  %v1364_v6 = vld [vmem:[%s1698_s1 + $0x1c0] sm:$0xff]  }
  0x18   :  { %1159 = vmatpush3.bf16.msra.mxu0 %v1312_v22  ;;  %v1357_v63 = vld [vmem:[%s1698_s1 + $0x190] sm:$0xff]   ;;  %v1361_v3 = vld [vmem:[%s1698_s1 + $0x188] sm:$0xff]   ;;  %v1368_v9 = vld [vmem:[%s1698_s1 + $0x180] sm:$0xff]  }
  0x19   :  { %1187 = vmatpush3.bf16.msra.mxu1 %v1313_v23  ;;  %1160 = vmatprep.subr.bf16.mxu0 %v1314_v24  ;;  %v1365_v7 = vld [vmem:[%s1699_s0 + $0x10] ss:$36 sps:$4 sm:$0xff]   ;;  %v1369_v10 = vld [vmem:[%s1698_s1 + $0x238] sm:$0xff]   ;;  %v1377_v16 = vld [vmem:[%s1698_s1 + $0x228] sm:$0xff]  }
  0x1a   :  { %1188 = vmatprep.subr.bf16.mxu1 %v1315_v25  ;;  %v1367_v8 = vld [vmem:[%s1699_s0 + $0x14] ss:$36 sps:$4 sm:$0xff]   ;;  %v1372_v12 = vld [vmem:[%s1699_s0 + $0x1c] ss:$36 sps:$4 sm:$0xff]   ;;  %v1378_v17 = vld [vmem:[%s1699_s0 + $0x64] ss:$36 sps:$4 sm:$0xff]  }
  0x1b   :  { %v1370_v11 = vld [vmem:[%s1699_s0 + $0x18] ss:$36 sps:$4 sm:$0xff]   ;;  %v1373_v13 = vld [vmem:[%s1698_s1 + $0x230] sm:$0xff]   ;;  %v1380_v18 = vld [vmem:[%s1699_s0 + $0x60] ss:$36 sps:$4 sm:$0xff]  }
  0x1c   :  { %1161 = vmatpush3.bf16.msra.mxu0 %v1316_v26  ;;  %v1374_v14 = vld [vmem:[%s1699_s0 + $0x5c] ss:$36 sps:$4 sm:$0xff]   ;;  %v1383_v22 = vld [vmem:[%s1698_s1 + $0x210] sm:$0xff]   ;;  %v1384_v23 = vld [vmem:[%s1698_s1 + $0x208] sm:$0xff]  }
  0x1d   :  { %1189 = vmatpush3.bf16.msra.mxu1 %v1317_v27  ;;  %1162 = vmatprep.subr.bf16.mxu0 %v1318_v28  ;;  %v1376_v15 = vld [vmem:[%s1699_s0 + $0x58] ss:$36 sps:$4 sm:$0xff]   ;;  %v1381_v19 = vld [vmem:[%s1698_s1 + $0x220] sm:$0xff]   ;;  %v1387_v25 = vld [vmem:[%s1699_s0 + $0x68] ss:$36 sps:$4 sm:$0xff]  }
  0x1e   :  { %1190 = vmatprep.subr.bf16.mxu1 %v1319_v29  ;;  %v1382_v20 = vld [vmem:[%s1698_s1 + $0x218] sm:$0xff]   ;;  %v1386_v21 = vld [vmem:[%s1699_s0 + $0x20] ss:$36 sps:$4 sm:$0xff]  }
  0x1f   :  { %v1385_v24 = vld [vmem:[%s1698_s1 + $0x200] sm:$0xff]  }
  0x20   :  { %1163 = vmatpush3.bf16.msra.mxu0 %v1320_v30 }
  0x21   :  { %1191 = vmatpush3.bf16.msra.mxu1 %v1321_v31  ;;  %1204 = vmatprep.subr.bf16.mxu0 %v1328_v36 }
  0x22   :  { %1232 = vmatprep.subr.bf16.mxu1 %v1330_v38 }
  0x23   :  { %751 = vmatmul.mubr.bf16.vlgmr.msra.gmra.mxu0 %v1322_v32 }
  0x24   :  { %800 = vmatmul.mubr.bf16.vlgmr.msra.gmra.mxu1 %v1325_v34  ;;  %1205 = vmatpush3.bf16.msra.mxu0 %v1329_v37 }
  0x25   :  { %1233 = vmatpush3.bf16.msra.mxu1 %v1331_v39  ;;  %1206 = vmatprep.subr.bf16.mxu0 %v1332_v40 }
  0x26   :  { %1234 = vmatprep.subr.bf16.mxu1 %v1334_v42  ;;  %758 = vmatprep.mubr.bf16.mxu0 %v1346_v54 }
  0x27   :  { %807 = vmatprep.mubr.bf16.mxu1 %v1348_v55 }
  0x28   :  { %1207 = vmatpush3.bf16.msra.mxu0 %v1333_v41 }
  0x29   :  { %1235 = vmatpush3.bf16.msra.mxu1 %v1335_v43  ;;  %1208 = vmatprep.subr.bf16.mxu0 %v1336_v44 }
  0x2a   :  { %1236 = vmatprep.subr.bf16.mxu1 %v1338_v46 }
  0x2b   :  { %759 = vmatmul.mubr.bf16.gmra.mxu0 %v1351_v57 }
  0x2c   :  { %1209 = vmatpush3.bf16.msra.mxu0 %v1337_v45  ;;  %808 = vmatmul.mubr.bf16.gmra.mxu1 %v1352_v58 }
  0x2d   :  { %1237 = vmatpush3.bf16.msra.mxu1 %v1339_v47  ;;  %1210 = vmatprep.subr.bf16.mxu0 %v1340_v48 }
  0x2e   :  { %1238 = vmatprep.subr.bf16.mxu1 %v1342_v50  ;;  %848 = vmatprep.mubr.bf16.mxu0 %v1367_v8 }
  0x2f   :  { %897 = vmatprep.mubr.bf16.mxu1 %v1372_v12 }
  0x30   :  { %1211 = vmatpush3.bf16.msra.mxu0 %v1341_v49 }
  0x31   :  { %1239 = vmatpush3.bf16.msra.mxu1 %v1343_v51  ;;  %1212 = vmatprep.subr.bf16.mxu0 %v1344_v52 }
  0x32   :  { %1240 = vmatprep.subr.bf16.mxu1 %v1350_v56 }
  0x34   :  { %1213 = vmatpush3.bf16.msra.mxu0 %v1345_v53 }
  0x35   :  { %1241 = vmatpush3.bf16.msra.mxu1 %v1353_v59  ;;  %1214 = vmatprep.subr.bf16.mxu0 %v1354_v60 }
  0x36   :  { %1242 = vmatprep.subr.bf16.mxu1 %v1356_v62 }
  0x38   :  { %1215 = vmatpush3.bf16.msra.mxu0 %v1355_v61 }
  0x39   :  { %1243 = vmatpush3.bf16.msra.mxu1 %v1357_v63  ;;  %1216 = vmatprep.subr.bf16.mxu0 %v1358_v0 }
  0x3a   :  { %1244 = vmatprep.subr.bf16.mxu1 %v1360_v2 }
  0x3c   :  { %1217 = vmatpush3.bf16.msra.mxu0 %v1359_v1 }
  0x3d   :  { %1245 = vmatpush3.bf16.msra.mxu1 %v1361_v3  ;;  %1218 = vmatprep.subr.bf16.mxu0 %v1362_v4 }
  0x3e   :  { %1246 = vmatprep.subr.bf16.mxu1 %v1364_v6 }
  0x40   :  { %1219 = vmatpush3.bf16.msra.mxu0 %v1363_v5 }
  0x41   :  { %1247 = vmatpush3.bf16.msra.mxu1 %v1368_v9  ;;  %1270 = vmatprep.subr.bf16.mxu0 %v1369_v10 }
  0x43   :  { %849 = vmatmul.mubr.bf16.vlgmr.msra.gmra.mxu0 %v1365_v7 }
  0x44   :  { %1271 = vmatpush3.bf16.msra.mxu0 %v1369_v10  ;;  %898 = vmatmul.mubr.bf16.vlgmr.msra.gmra.mxu1 %v1370_v11 }
  0x45   :  { %1272 = vmatprep.subr.bf16.mxu0 %v1373_v13  ;;  %856 = vmatprep.mubr.bf16.mxu0 %v1374_v14 }
  0x46   :  { %905 = vmatprep.mubr.bf16.mxu1 %v1378_v17 }
  0x48   :  { %1273 = vmatpush3.bf16.msra.mxu0 %v1373_v13 }
  0x49   :  { %1274 = vmatprep.subr.bf16.mxu0 %v1377_v16 }
  0x4b   :  { %857 = vmatmul.mubr.bf16.gmra.mxu0 %v1376_v15 }
  0x4c   :  { %1275 = vmatpush3.bf16.msra.mxu0 %v1377_v16  ;;  %906 = vmatmul.mubr.bf16.gmra.mxu1 %v1380_v18  ;;  %v1119_v18 = vld [vmem:[%s1700_s2] ss:$0 sm:$0xff] }
  0x4d   :  { %1276 = vmatprep.subr.bf16.mxu0 %v1381_v19  ;;  %1286 = vmatprep.mubr.bf16.mxu0 %v1386_v21 }
  0x50   :  { %1277 = vmatpush3.bf16.msra.mxu0 %v1381_v19  ;;  %v1146_v19 = vld [vmem:[%s1701_s3 + $0x8] sm:$0xff]  }
  0x51   :  { %1278 = vmatprep.subr.bf16.mxu0 %v1382_v20 }
  0x54   :  { %1279 = vmatpush3.bf16.msra.mxu0 %v1382_v20 }
  0x55   :  { %1280 = vmatprep.subr.bf16.mxu0 %v1383_v22 }
  0x58   :  { %1281 = vmatpush3.bf16.msra.mxu0 %v1383_v22 }
  0x59   :  { %1282 = vmatprep.subr.bf16.mxu0 %v1384_v23 }
  0x5c   :  { %1283 = vmatpush3.bf16.msra.mxu0 %v1384_v23 }
  0x5d   :  { %1284 = vmatprep.subr.bf16.mxu0 %v1385_v24 }
  0x60   :  { %1285 = vmatpush3.bf16.msra.mxu0 %v1385_v24  ;;  %v1129_v24 = vld [vmem:[%s1701_s3] sm:$0xff]  }
  0x63   :  { %1287 = vmatmul.mubr.bf16.vlgmr.msra.gmra.mxu0 %v1387_v25 }
  0xe3   :  { %v1164_v26 = vpop.f32.mrf.mxu0 }
  0xe4   :  { %v1192_v27 = vpop.f32.mrf.mxu1 }
  0xe5   :  { %v1165_v28 = vpop.f32.mrf.mxu0 }
  0xe6   :  { %v1193_v29 = vpop.f32.mrf.mxu1  ;;  %v1166_v57 = vadd.f32 %v1165_v28, %v1164_v26 }
  0xe7   :  { %v1167_v30 = vpop.f32.mrf.mxu0  ;;  %v1194_v58 = vadd.f32 %v1193_v29, %v1192_v27  ;;  %v1134_v27 = vunpack.c.l.bf16 %v1146_v19 }
  0xe8   :  { %v1195_v31 = vpop.f32.mrf.mxu1 }
  0xe9   :  { %v1168_v32 = vpop.f32.mrf.mxu0  ;;  %v802_v2 = vadd.f32 %v1194_v58, %v1166_v57 }
  0xea   :  { %v1196_v34 = vpop.f32.mrf.mxu1  ;;  %v1169_v3 = vadd.f32 %v1168_v32, %v1167_v30  ;;  %v1130_v30 = vunpack.c.l.bf16 %v1129_v24 }
  0xeb   :  { %v1170_v33 = vpop.f32.mrf.mxu0  ;;  %v1197_v4 = vadd.f32 %v1196_v34, %v1195_v31  ;;  %v1135_v34 = vunpack.c.h.bf16 %v1146_v19 }
  0xec   :  { %v1198_v35 = vpop.f32.mrf.mxu1 }
  0xed   :  { %v1171_v36 = vpop.f32.mrf.mxu0  ;;  %v805_v13 = vadd.f32 %v1197_v4, %v1169_v3 }
  0xee   :  { %v1199_v37 = vpop.f32.mrf.mxu1  ;;  %v1172_v55 = vadd.f32 %v1171_v36, %v1170_v33 }
  0xef   :  { %v1173_v38 = vpop.f32.mrf.mxu0  ;;  %v1200_v56 = vadd.f32 %v1199_v37, %v1198_v35 }
  0xf0   :  { %v1201_v39 = vpop.f32.mrf.mxu1 }
  0xf1   :  { %v1174_v40 = vpop.f32.mrf.mxu0  ;;  %v810_v62 = vadd.f32 %v1200_v56, %v1172_v55 }
  0xf2   :  { %v1202_v42 = vpop.f32.mrf.mxu1  ;;  %v1175_v63 = vadd.f32 %v1174_v40, %v1173_v38  ;;  %v1131_v40 = vunpack.c.h.bf16 %v1129_v24 }
  0xf3   :  { %v1203_v0 = vadd.f32 %v1202_v42, %v1201_v39 }
  0xf5   :  { %v813_v9 = vadd.f32 %v1203_v0, %v1175_v63 }
 0x103   :  { %v1220_v41 = vpop.f32.mrf.mxu0 }
 0x104   :  { %v1248_v44 = vpop.f32.mrf.mxu1 }
 0x105   :  { %v1221_v43 = vpop.f32.mrf.mxu0 }
 0x106   :  { %v1249_v46 = vpop.f32.mrf.mxu1  ;;  %v1222_v1 = vadd.f32 %v1221_v43, %v1220_v41 }
 0x107   :  { %v1223_v45 = vpop.f32.mrf.mxu0  ;;  %v1250_v11 = vadd.f32 %v1249_v46, %v1248_v44 }
 0x108   :  { %v1251_v48 = vpop.f32.mrf.mxu1  ;;  %v851_v10 = vadd.f32 %v1222_v1, %v802_v2 }
 0x109   :  { %v1224_v47 = vpop.f32.mrf.mxu0 }
 0x10a   :  { %v1252_v50 = vpop.f32.mrf.mxu1  ;;  %v1225_v12 = vadd.f32 %v1224_v47, %v1223_v45  ;;  %v900_v23 = vadd.f32 %v1250_v11, %v851_v10 }
 0x10b   :  { %v1226_v49 = vpop.f32.mrf.mxu0  ;;  %v1253_v21 = vadd.f32 %v1252_v50, %v1251_v48 }
 0x10c   :  { %v1254_v52 = vpop.f32.mrf.mxu1  ;;  %v854_v20 = vadd.f32 %v1225_v12, %v805_v13 }
 0x10d   :  { %v1227_v51 = vpop.f32.mrf.mxu0 }
 0x10e   :  { %v1255_v54 = vpop.f32.mrf.mxu1  ;;  %v1228_v59 = vadd.f32 %v1227_v51, %v1226_v49  ;;  %v903_v35 = vadd.f32 %v1253_v21, %v854_v20 }
 0x10f   :  { %v1229_v53 = vpop.f32.mrf.mxu0  ;;  %v1256_v6 = vadd.f32 %v1255_v54, %v1254_v52 }
 0x110   :  { %v1257_v61 = vpop.f32.mrf.mxu1  ;;  %v859_v5 = vadd.f32 %v1228_v59, %v810_v62 }
 0x111   :  { %v1230_v60 = vpop.f32.mrf.mxu0 }
 0x112   :  { %v1231_v7 = vadd.f32 %v1230_v60, %v1229_v53  ;;  %v1258_v8 = vpop.f32.mrf.mxu1  ;;  %v908_v16 = vadd.f32 %v1256_v6, %v859_v5 }
 0x113   :  { %v1259_v15 = vadd.f32 %v1258_v8, %v1257_v61 }
 0x114   :  { %v862_v14 = vadd.f32 %v1231_v7, %v813_v9 }
 0x116   :  { %v911_v29 = vadd.f32 %v1259_v15, %v862_v14 }
 0x123   :  { %v1288_v17 = vpop.f32.mrf.mxu0 }
 0x124   :  { %v957_v22 = vadd.f32 %v1288_v17, %v908_v16 }
 0x125   :  { %v948_v25 = vpop.f32.mrf.mxu0 }
 0x126   :  { %v987_v26 = vadd.f32 %v1119_v18, %v957_v22  ;;  %v949_v28 = vadd.f32 %v948_v25, %v900_v23 }
 0x127   :  { %v1289_v31 = vpop.f32.mrf.mxu0 }
 0x128   :  { %v985_v32 = vadd.f32 %v1119_v18, %v949_v28  ;;  %v960_v33 = vadd.f32 %v1289_v31, %v911_v29  ;;  %v999_v37 = vadd.f32 %v1134_v27, %v987_v26 }
 0x129   :  { %v951_v36 = vpop.f32.mrf.mxu0 }
 0x12a   :  { %v988_v38 = vadd.f32 %v1119_v18, %v960_v33  ;;  %v952_v39 = vadd.f32 %v951_v36, %v903_v35  ;;  %v997_v41 = vadd.f32 %v1130_v30, %v985_v32  ;;  %v1003_v44 = vmax.f32 %v999_v37, 0.0 }
 0x12c   :  { %v1000_v42 = vadd.f32 %v1135_v34, %v988_v38  ;;  %v986_v43 = vadd.f32 %v1119_v18, %v952_v39  ;;  %v1001_v47 = vmax.f32 %v997_v41, 0.0 }
 0x12e   :  { %v1004_v45 = vmax.f32 %v1000_v42, 0.0  ;;  %v998_v46 = vadd.f32 %v1131_v40, %v986_v43 }
 0x130   :  { %v1144_v48 = vpack.c.bf16 %v1004_v45, %v1003_v44  ;;  %v1002_v49 = vmax.f32 %v998_v46, 0.0 }
 0x132   :  { %1147 = vst [vmem:[%s1702_s4 + $0x8] sm:$0xff] %v1144_v48   ;;  %v1139_v50 = vpack.c.bf16 %v1002_v49, %v1001_v47 }
 0x134   :  { %1140 = vst [vmem:[%s1702_s4] sm:$0xff] %v1139_v50  }

// kernel: model_forward.29
= control target key start
LH: loop header
LB: loop body
LE: loop exit
PB: predicated region body
PF: predicated region fallthrough
CT: control target
= control target key end

     0   :  { %v194_v0 = vmov 0.0   ;;  %vm195_vm0 = vmmov 0   ;;  %s249_s1 = inlined_call_operand.vmem [shape: bf16[128,128], index: 1, kind: input, shape index: {}]   ;;  %s250_s0 = inlined_call_operand.vmem [shape: bf16[8,128], index: 0, kind: input, shape index: {}]   ;;  %s251_s2 = inlined_call_operand.vmem [shape: f32[1,128], index: 2, kind: input, shape index: {}]   ;;  %s252_s3 = inlined_call_operand.vmem [shape: bf16[8,128], index: 3, kind: output, shape index: {}]  }
   0x1   :  { %164 = vmatprep.subr.bf16.mxu0 %v194_v0  ;;  %v186_v1 = vld [vmem:[%s249_s1 + $0x38] sm:$0xff]   ;;  %180 = vmatprep.mubr.msk.bf16.mxu0 %vm195_vm0, %v194_v0  ;;  %v187_v2 = vld [vmem:[%s249_s1 + $0x30] sm:$0xff]   ;;  %v188_v3 = vld [vmem:[%s249_s1 + $0x28] sm:$0xff]  }
   0x2   :  { %165 = vmatpush3.bf16.msra.mxu0 %v186_v1  ;;  %v189_v4 = vld [vmem:[%s249_s1 + $0x20] sm:$0xff]   ;;  %v190_v5 = vld [vmem:[%s249_s1 + $0x18] sm:$0xff]   ;;  %v191_v6 = vld [vmem:[%s249_s1 + $0x10] sm:$0xff]  }
   0x3   :  { %166 = vmatprep.subr.bf16.mxu0 %v194_v0  ;;  %v192_v7 = vld [vmem:[%s249_s1 + $0x8] sm:$0xff]   ;;  %v193_v8 = vld [vmem:[%s249_s1] sm:$0xff]  }
   0x4   :  { %v21_v9 = vld [vmem:[%s250_s0] sm:$0xf] }
   0x5   :  { %v154_v10 = vld [vmem:[%s251_s2] ss:$0 sm:$0xff] }
   0x6   :  { %167 = vmatpush3.bf16.msra.mxu0 %v187_v2 }
   0x7   :  { %168 = vmatprep.subr.bf16.mxu0 %v194_v0 }
   0xa   :  { %169 = vmatpush3.bf16.msra.mxu0 %v188_v3 }
   0xb   :  { %170 = vmatprep.subr.bf16.mxu0 %v194_v0 }
   0xe   :  { %171 = vmatpush3.bf16.msra.mxu0 %v189_v4 }
   0xf   :  { %172 = vmatprep.subr.bf16.mxu0 %v194_v0 }
  0x12   :  { %173 = vmatpush3.bf16.msra.mxu0 %v190_v5 }
  0x13   :  { %174 = vmatprep.subr.bf16.mxu0 %v194_v0 }
  0x16   :  { %175 = vmatpush3.bf16.msra.mxu0 %v191_v6 }
  0x17   :  { %176 = vmatprep.subr.bf16.mxu0 %v194_v0 }
  0x1a   :  { %177 = vmatpush3.bf16.msra.mxu0 %v192_v7 }
  0x1b   :  { %178 = vmatprep.subr.bf16.mxu0 %v194_v0 }
  0x1e   :  { %179 = vmatpush3.bf16.msra.mxu0 %v193_v8 }
  0x21   :  { %181 = vmatmul.mubr.bf16.vlgmr.msra.gmra.mxu0 %v21_v9 }
  0xe1   :  { %v120_v11 = vpop.f32.mrf.mxu0 }
  0xe2   :  { %v139_v12 = vadd.f32 %v154_v10, %v120_v11 }
  0xe3   :  { %v182_v13 = vpop.f32.mrf.mxu0 }
  0xe4   :  { %v140_v14 = vpack.c.bf16 %v139_v12, %v139_v12 }
  0xe5   :  { %v123_v15 = vpop.f32.mrf.mxu0 }
  0xe6   :  { %141 = vst [vmem:[%s252_s3] sm:$0xf] %v140_v14 }
  0xe7   :  { %v183_v16 = vpop.f32.mrf.mxu0 }

// kernel: model_forward.28
= control target key start
LH: loop header
LB: loop body
LE: loop exit
PB: predicated region body
PF: predicated region fallthrough
CT: control target
= control target key end

     0   :  { %vm1138_vm0 = vmmov 0   ;;  %s1396_s1 = inlined_call_operand.vmem [shape: bf16[1152,128], index: 1, kind: input, shape index: {}]   ;;  %s1397_s0 = inlined_call_operand.vmem [shape: bf16[8,1152], index: 0, kind: input, shape index: {}]   ;;  %s1398_s2 = inlined_call_operand.vmem [shape: f32[1,128], index: 2, kind: input, shape index: {}]   ;;  %s1399_s3 = inlined_call_operand.vmem [shape: bf16[8,128], index: 3, kind: output, shape index: {}]  }
   0x1   :  { %v1056_v0 = vld [vmem:[%s1396_s1 + $0x78] sm:$0xff]   ;;  %v1060_v4 = vld [vmem:[%s1396_s1 + $0x70] sm:$0xff]   ;;  %v1064_v8 = vld [vmem:[%s1396_s1 + $0x68] sm:$0xff]  }
   0x2   :  { %v1057_v1 = vld [vmem:[%s1396_s1 + $0xf8] sm:$0xff]   ;;  %937 = vmatprep.subr.bf16.mxu0 %v1056_v0  ;;  %v1061_v5 = vld [vmem:[%s1396_s1 + $0xf0] sm:$0xff]   ;;  %v1065_v9 = vld [vmem:[%s1396_s1 + $0xe8] sm:$0xff]  }
   0x3   :  { %v1058_v2 = vld [vmem:[%s1396_s1 + $0x38] sm:$0xff]   ;;  %959 = vmatprep.subr.bf16.mxu1 %v1057_v1  ;;  %v1062_v6 = vld [vmem:[%s1396_s1 + $0x30] sm:$0xff]   ;;  %v1066_v10 = vld [vmem:[%s1396_s1 + $0x28] sm:$0xff]  }
   0x4   :  { %v1059_v3 = vld [vmem:[%s1396_s1 + $0xb8] sm:$0xff]   ;;  %938 = vmatpush3.bf16.msra.mxu0 %v1058_v2  ;;  %v1063_v7 = vld [vmem:[%s1396_s1 + $0xb0] sm:$0xff]   ;;  %v1067_v11 = vld [vmem:[%s1396_s1 + $0xa8] sm:$0xff]  }
   0x5   :  { %960 = vmatpush3.bf16.msra.mxu1 %v1059_v3  ;;  %939 = vmatprep.subr.bf16.mxu0 %v1060_v4  ;;  %v1068_v12 = vld [vmem:[%s1396_s1 + $0x60] sm:$0xff]   ;;  %v1072_v16 = vld [vmem:[%s1396_s1 + $0x58] sm:$0xff]   ;;  %v1076_v20 = vld [vmem:[%s1396_s1 + $0x50] sm:$0xff]  }
   0x6   :  { %961 = vmatprep.subr.bf16.mxu1 %v1061_v5  ;;  %v1069_v13 = vld [vmem:[%s1396_s1 + $0xe0] sm:$0xff]   ;;  %v1073_v17 = vld [vmem:[%s1396_s1 + $0xd8] sm:$0xff]   ;;  %v1077_v21 = vld [vmem:[%s1396_s1 + $0xd0] sm:$0xff]  }
   0x7   :  { %v1070_v14 = vld [vmem:[%s1396_s1 + $0x20] sm:$0xff]   ;;  %v1074_v18 = vld [vmem:[%s1396_s1 + $0x18] sm:$0xff]   ;;  %v1078_v22 = vld [vmem:[%s1396_s1 + $0x10] sm:$0xff]  }
   0x8   :  { %940 = vmatpush3.bf16.msra.mxu0 %v1062_v6  ;;  %v1071_v15 = vld [vmem:[%s1396_s1 + $0xa0] sm:$0xff]   ;;  %v1075_v19 = vld [vmem:[%s1396_s1 + $0x98] sm:$0xff]   ;;  %v1079_v23 = vld [vmem:[%s1396_s1 + $0x90] sm:$0xff]  }
   0x9   :  { %962 = vmatpush3.bf16.msra.mxu1 %v1063_v7  ;;  %941 = vmatprep.subr.bf16.mxu0 %v1064_v8  ;;  %v1080_v24 = vld [vmem:[%s1396_s1 + $0x48] sm:$0xff]   ;;  %v1084_v28 = vld [vmem:[%s1396_s1 + $0x40] sm:$0xff]   ;;  %v1092_v38 = vld [vmem:[%s1396_s1 + $0x178] sm:$0xff]  }
   0xa   :  { %963 = vmatprep.subr.bf16.mxu1 %v1065_v9  ;;  %v1081_v25 = vld [vmem:[%s1396_s1 + $0xc8] sm:$0xff]   ;;  %v1085_v29 = vld [vmem:[%s1396_s1 + $0xc0] sm:$0xff]   ;;  %v1093_v39 = vld [vmem:[%s1396_s1 + $0x138] sm:$0xff]  }
   0xb   :  { %v1082_v26 = vld [vmem:[%s1396_s1 + $0x8] sm:$0xff]   ;;  %v1086_v30 = vld [vmem:[%s1396_s1] sm:$0xff]   ;;  %v1094_v40 = vld [vmem:[%s1396_s1 + $0x1f8] sm:$0xff]  }
   0xc   :  { %942 = vmatpush3.bf16.msra.mxu0 %v1066_v10  ;;  %v1083_v27 = vld [vmem:[%s1396_s1 + $0x88] sm:$0xff]   ;;  %v1087_v31 = vld [vmem:[%s1396_s1 + $0x80] sm:$0xff]   ;;  %v1095_v41 = vld [vmem:[%s1396_s1 + $0x1b8] sm:$0xff]  }
   0xd   :  { %964 = vmatpush3.bf16.msra.mxu1 %v1067_v11  ;;  %943 = vmatprep.subr.bf16.mxu0 %v1068_v12  ;;  %v21_v32 = vld [vmem:[%s1397_s0] sm:$0xff]  ;;  %v22_v33 = vld [vmem:[%s1397_s0 + $0x8] sm:$0xff]  ;;  %v1096_v42 = vld [vmem:[%s1396_s1 + $0x170] sm:$0xff]  }
   0xe   :  { %965 = vmatprep.subr.bf16.mxu1 %v1069_v13  ;;  %v855_v34 = vcombine.low %v21_v32, %v21_v32  ;;  %v856_v35 = vcombine.high %v21_v32, %v21_v32  ;;  %v857_v36 = vcombine.low %v22_v33, %v22_v33  ;;  %v858_v37 = vcombine.high %v22_v33, %v22_v33  ;;  %v1097_v43 = vld [vmem:[%s1396_s1 + $0x130] sm:$0xff]   ;;  %v1100_v46 = vld [vmem:[%s1396_s1 + $0x168] sm:$0xff]   ;;  %v1104_v50 = vld [vmem:[%s1396_s1 + $0x160] sm:$0xff]  }
   0xf   :  { %v1098_v44 = vld [vmem:[%s1396_s1 + $0x1f0] sm:$0xff]   ;;  %v1101_v47 = vld [vmem:[%s1396_s1 + $0x128] sm:$0xff]   ;;  %v1105_v51 = vld [vmem:[%s1396_s1 + $0x120] sm:$0xff]   ;;  %v1137_v13 = vmov 0.0  }
  0x10   :  { %944 = vmatpush3.bf16.msra.mxu0 %v1070_v14  ;;  %666 = vmatprep.mubr.bf16.mxu0 %v856_v35  ;;  %v1099_v45 = vld [vmem:[%s1396_s1 + $0x1b0] sm:$0xff]   ;;  %v1102_v48 = vld [vmem:[%s1396_s1 + $0x1e8] sm:$0xff]   ;;  %v1106_v52 = vld [vmem:[%s1396_s1 + $0x1e0] sm:$0xff]  }
  0x11   :  { %966 = vmatpush3.bf16.msra.mxu1 %v1071_v15  ;;  %945 = vmatprep.subr.bf16.mxu0 %v1072_v16  ;;  %v1103_v49 = vld [vmem:[%s1396_s1 + $0x1a8] sm:$0xff]   ;;  %v1107_v53 = vld [vmem:[%s1396_s1 + $0x1a0] sm:$0xff]   ;;  %v1108_v54 = vld [vmem:[%s1396_s1 + $0x158] sm:$0xff]  }
  0x12   :  { %967 = vmatprep.subr.bf16.mxu1 %v1073_v17  ;;  %706 = vmatprep.mubr.bf16.mxu1 %v858_v37  ;;  %v1109_v55 = vld [vmem:[%s1396_s1 + $0x118] sm:$0xff]   ;;  %v1112_v58 = vld [vmem:[%s1396_s1 + $0x150] sm:$0xff]   ;;  %v1116_v62 = vld [vmem:[%s1396_s1 + $0x148] sm:$0xff]  }
  0x13   :  { %v1110_v56 = vld [vmem:[%s1396_s1 + $0x1d8] sm:$0xff]   ;;  %v1113_v59 = vld [vmem:[%s1396_s1 + $0x110] sm:$0xff]   ;;  %v1117_v63 = vld [vmem:[%s1396_s1 + $0x108] sm:$0xff]  }
  0x14   :  { %946 = vmatpush3.bf16.msra.mxu0 %v1074_v18  ;;  %v1111_v57 = vld [vmem:[%s1396_s1 + $0x198] sm:$0xff]   ;;  %v1114_v60 = vld [vmem:[%s1396_s1 + $0x1d0] sm:$0xff]   ;;  %v1118_v0 = vld [vmem:[%s1396_s1 + $0x1c8] sm:$0xff]  }
  0x15   :  { %968 = vmatpush3.bf16.msra.mxu1 %v1075_v19  ;;  %947 = vmatprep.subr.bf16.mxu0 %v1076_v20  ;;  %v1115_v61 = vld [vmem:[%s1396_s1 + $0x190] sm:$0xff]   ;;  %v1119_v1 = vld [vmem:[%s1396_s1 + $0x188] sm:$0xff]   ;;  %v1120_v2 = vld [vmem:[%s1396_s1 + $0x140] sm:$0xff]  }
  0x16   :  { %969 = vmatprep.subr.bf16.mxu1 %v1077_v21  ;;  %v1121_v3 = vld [vmem:[%s1396_s1 + $0x100] sm:$0xff]   ;;  %v23_v5 = vld [vmem:[%s1397_s0 + $0x10] sm:$0xff]  ;;  %v24_v9 = vld [vmem:[%s1397_s0 + $0x18] sm:$0xff] }
  0x17   :  { %v1122_v4 = vld [vmem:[%s1396_s1 + $0x1c0] sm:$0xff]   ;;  %v860_v6 = vcombine.high %v23_v5, %v23_v5  ;;  %v859_v8 = vcombine.low %v23_v5, %v23_v5  ;;  %v861_v10 = vcombine.low %v24_v9, %v24_v9  ;;  %v862_v11 = vcombine.high %v24_v9, %v24_v9  ;;  %v1128_v12 = vld [vmem:[%s1396_s1 + $0x238] sm:$0xff]   ;;  %v1129_v14 = vld [vmem:[%s1396_s1 + $0x230] sm:$0xff]  }
  0x18   :  { %948 = vmatpush3.bf16.msra.mxu0 %v1078_v22  ;;  %v1125_v7 = vld [vmem:[%s1396_s1 + $0x180] sm:$0xff]   ;;  %v1130_v15 = vld [vmem:[%s1396_s1 + $0x228] sm:$0xff]   ;;  %v1132_v17 = vld [vmem:[%s1396_s1 + $0x218] sm:$0xff]  }
  0x19   :  { %970 = vmatpush3.bf16.msra.mxu1 %v1079_v23  ;;  %949 = vmatprep.subr.bf16.mxu0 %v1080_v24  ;;  %v1131_v16 = vld [vmem:[%s1396_s1 + $0x220] sm:$0xff]   ;;  %v1133_v18 = vld [vmem:[%s1396_s1 + $0x210] sm:$0xff]   ;;  %v1134_v19 = vld [vmem:[%s1396_s1 + $0x208] sm:$0xff]  }
  0x1a   :  { %971 = vmatprep.subr.bf16.mxu1 %v1081_v25  ;;  %v1135_v20 = vld [vmem:[%s1396_s1 + $0x200] sm:$0xff]  }
  0x1b   :  { %v1136_v21 = vld [vmem:[%s1397_s0 + $0x20] ss:$0 sps:$4 sm:$0xff]  }
  0x1c   :  { %950 = vmatpush3.bf16.msra.mxu0 %v1082_v26 }
  0x1d   :  { %972 = vmatpush3.bf16.msra.mxu1 %v1083_v27  ;;  %951 = vmatprep.subr.bf16.mxu0 %v1084_v28 }
  0x1e   :  { %973 = vmatprep.subr.bf16.mxu1 %v1085_v29 }
  0x20   :  { %952 = vmatpush3.bf16.msra.mxu0 %v1086_v30 }
  0x21   :  { %974 = vmatpush3.bf16.msra.mxu1 %v1087_v31  ;;  %981 = vmatprep.subr.bf16.mxu0 %v1092_v38 }
  0x22   :  { %1003 = vmatprep.subr.bf16.mxu1 %v1094_v40 }
  0x23   :  { %667 = vmatmul.mubr.bf16.vlgmr.msra.gmra.mxu0 %v855_v34 }
  0x24   :  { %707 = vmatmul.mubr.bf16.vlgmr.msra.gmra.mxu1 %v857_v36  ;;  %982 = vmatpush3.bf16.msra.mxu0 %v1093_v39 }
  0x25   :  { %1004 = vmatpush3.bf16.msra.mxu1 %v1095_v41  ;;  %983 = vmatprep.subr.bf16.mxu0 %v1096_v42 }
  0x26   :  { %1005 = vmatprep.subr.bf16.mxu1 %v1098_v44  ;;  %746 = vmatprep.mubr.bf16.mxu0 %v860_v6 }
  0x27   :  { %786 = vmatprep.mubr.bf16.mxu1 %v862_v11 }
  0x28   :  { %984 = vmatpush3.bf16.msra.mxu0 %v1097_v43 }
  0x29   :  { %1006 = vmatpush3.bf16.msra.mxu1 %v1099_v45  ;;  %985 = vmatprep.subr.bf16.mxu0 %v1100_v46  ;;  %v936_v46 = vld [vmem:[%s1398_s2] ss:$0 sm:$0xff] }
  0x2a   :  { %1007 = vmatprep.subr.bf16.mxu1 %v1102_v48 }
  0x2c   :  { %986 = vmatpush3.bf16.msra.mxu0 %v1101_v47 }
  0x2d   :  { %1008 = vmatpush3.bf16.msra.mxu1 %v1103_v49  ;;  %987 = vmatprep.subr.bf16.mxu0 %v1104_v50 }
  0x2e   :  { %1009 = vmatprep.subr.bf16.mxu1 %v1106_v52 }
  0x30   :  { %988 = vmatpush3.bf16.msra.mxu0 %v1105_v51 }
  0x31   :  { %1010 = vmatpush3.bf16.msra.mxu1 %v1107_v53  ;;  %989 = vmatprep.subr.bf16.mxu0 %v1108_v54 }
  0x32   :  { %1011 = vmatprep.subr.bf16.mxu1 %v1110_v56 }
  0x34   :  { %990 = vmatpush3.bf16.msra.mxu0 %v1109_v55 }
  0x35   :  { %1012 = vmatpush3.bf16.msra.mxu1 %v1111_v57  ;;  %991 = vmatprep.subr.bf16.mxu0 %v1112_v58 }
  0x36   :  { %1013 = vmatprep.subr.bf16.mxu1 %v1114_v60 }
  0x38   :  { %992 = vmatpush3.bf16.msra.mxu0 %v1113_v59 }
  0x39   :  { %1014 = vmatpush3.bf16.msra.mxu1 %v1115_v61  ;;  %993 = vmatprep.subr.bf16.mxu0 %v1116_v62 }
  0x3a   :  { %1015 = vmatprep.subr.bf16.mxu1 %v1118_v0 }
  0x3c   :  { %994 = vmatpush3.bf16.msra.mxu0 %v1117_v63 }
  0x3d   :  { %1016 = vmatpush3.bf16.msra.mxu1 %v1119_v1  ;;  %995 = vmatprep.subr.bf16.mxu0 %v1120_v2 }
  0x3e   :  { %1017 = vmatprep.subr.bf16.mxu1 %v1122_v4 }
  0x40   :  { %996 = vmatpush3.bf16.msra.mxu0 %v1121_v3 }
  0x41   :  { %1018 = vmatpush3.bf16.msra.mxu1 %v1125_v7  ;;  %1034 = vmatprep.subr.bf16.mxu0 %v1137_v13 }
  0x43   :  { %747 = vmatmul.mubr.bf16.vlgmr.msra.gmra.mxu0 %v859_v8 }
  0x44   :  { %1035 = vmatpush3.bf16.msra.mxu0 %v1128_v12  ;;  %787 = vmatmul.mubr.bf16.vlgmr.msra.gmra.mxu1 %v861_v10 }
  0x45   :  { %1036 = vmatprep.subr.bf16.mxu0 %v1137_v13  ;;  %1050 = vmatprep.mubr.msk.bf16.mxu0 %vm1138_vm0, %v1137_v13 }
  0x48   :  { %1037 = vmatpush3.bf16.msra.mxu0 %v1129_v14 }
  0x49   :  { %1038 = vmatprep.subr.bf16.mxu0 %v1137_v13 }
  0x4c   :  { %1039 = vmatpush3.bf16.msra.mxu0 %v1130_v15 }
  0x4d   :  { %1040 = vmatprep.subr.bf16.mxu0 %v1137_v13 }
  0x50   :  { %1041 = vmatpush3.bf16.msra.mxu0 %v1131_v16 }
  0x51   :  { %1042 = vmatprep.subr.bf16.mxu0 %v1137_v13 }
  0x54   :  { %1043 = vmatpush3.bf16.msra.mxu0 %v1132_v17 }
  0x55   :  { %1044 = vmatprep.subr.bf16.mxu0 %v1137_v13 }
  0x58   :  { %1045 = vmatpush3.bf16.msra.mxu0 %v1133_v18 }
  0x59   :  { %1046 = vmatprep.subr.bf16.mxu0 %v1137_v13 }
  0x5c   :  { %1047 = vmatpush3.bf16.msra.mxu0 %v1134_v19 }
  0x5d   :  { %1048 = vmatprep.subr.bf16.mxu0 %v1137_v13 }
  0x60   :  { %1049 = vmatpush3.bf16.msra.mxu0 %v1135_v20 }
  0x63   :  { %1051 = vmatmul.mubr.bf16.vlgmr.msra.gmra.mxu0 %v1136_v21 }
  0xe3   :  { %v953_v22 = vpop.f32.mrf.mxu0 }
  0xe4   :  { %v975_v23 = vpop.f32.mrf.mxu1 }
  0xe5   :  { %v954_v24 = vpop.f32.mrf.mxu0 }
  0xe6   :  { %v976_v25 = vpop.f32.mrf.mxu1  ;;  %v955_v38 = vadd.f32 %v954_v24, %v953_v22 }
  0xe7   :  { %v956_v26 = vpop.f32.mrf.mxu0  ;;  %v977_v39 = vadd.f32 %v976_v25, %v975_v23 }
  0xe8   :  { %v978_v27 = vpop.f32.mrf.mxu1 }
  0xe9   :  { %v957_v28 = vpop.f32.mrf.mxu0  ;;  %v709_v41 = vadd.f32 %v977_v39, %v955_v38 }
  0xea   :  { %v979_v29 = vpop.f32.mrf.mxu1 }
 0x103   :  { %v997_v30 = vpop.f32.mrf.mxu0 }
 0x104   :  { %v1019_v31 = vpop.f32.mrf.mxu1 }
 0x105   :  { %v998_v32 = vpop.f32.mrf.mxu0 }
 0x106   :  { %v1020_v33 = vpop.f32.mrf.mxu1  ;;  %v999_v40 = vadd.f32 %v998_v32, %v997_v30 }
 0x107   :  { %v1000_v34 = vpop.f32.mrf.mxu0  ;;  %v1021_v43 = vadd.f32 %v1020_v33, %v1019_v31 }
 0x108   :  { %v1022_v35 = vpop.f32.mrf.mxu1  ;;  %v749_v42 = vadd.f32 %v999_v40, %v709_v41 }
 0x109   :  { %v1001_v36 = vpop.f32.mrf.mxu0 }
 0x10a   :  { %v1023_v37 = vpop.f32.mrf.mxu1  ;;  %v789_v44 = vadd.f32 %v1021_v43, %v749_v42 }
 0x123   :  { %v828_v45 = vpop.f32.mrf.mxu0 }
 0x124   :  { %v829_v47 = vadd.f32 %v828_v45, %v789_v44 }
 0x125   :  { %v1052_v48 = vpop.f32.mrf.mxu0 }
 0x126   :  { %v847_v49 = vadd.f32 %v936_v46, %v829_v47 }
 0x127   :  { %v831_v50 = vpop.f32.mrf.mxu0 }
 0x128   :  { %v848_v51 = vmax.f32 %v847_v49, 0.0 }
 0x129   :  { %v1053_v52 = vpop.f32.mrf.mxu0 }
 0x12a   :  { %v849_v53 = vpack.c.bf16 %v848_v51, %v848_v51 }
 0x12c   :  { %850 = vst [vmem:[%s1399_s3] sm:$0xf] %v849_v53 }

// kernel: model_forward.30
= control target key start
LH: loop header
LB: loop body
LE: loop exit
PB: predicated region body
PF: predicated region fallthrough
CT: control target
= control target key end

     0   :  { %vm1144_vm0 = vmmov 0   ;;  %s1410_s1 = inlined_call_operand.vmem [shape: bf16[1152,128], index: 1, kind: input, shape index: {}]   ;;  %s1411_s0 = inlined_call_operand.vmem [shape: bf16[8,1152], index: 0, kind: input, shape index: {}]   ;;  %s1412_s3 = inlined_call_operand.vmem [shape: bf16[8,128], index: 3, kind: input, shape index: {}]   ;;  %s1413_s2 = inlined_call_operand.vmem [shape: f32[1,128], index: 2, kind: input, shape index: {}]   ;;  %s1414_s4 = inlined_call_operand.vmem [shape: bf16[8,128], index: 4, kind: output, shape index: {}]  }
   0x1   :  { %v1062_v0 = vld [vmem:[%s1410_s1 + $0x78] sm:$0xff]   ;;  %v1066_v4 = vld [vmem:[%s1410_s1 + $0x70] sm:$0xff]   ;;  %v1070_v8 = vld [vmem:[%s1410_s1 + $0x68] sm:$0xff]  }
   0x2   :  { %v1063_v1 = vld [vmem:[%s1410_s1 + $0xf8] sm:$0xff]   ;;  %943 = vmatprep.subr.bf16.mxu0 %v1062_v0  ;;  %v1067_v5 = vld [vmem:[%s1410_s1 + $0xf0] sm:$0xff]   ;;  %v1071_v9 = vld [vmem:[%s1410_s1 + $0xe8] sm:$0xff]  }
   0x3   :  { %v1064_v2 = vld [vmem:[%s1410_s1 + $0x38] sm:$0xff]   ;;  %965 = vmatprep.subr.bf16.mxu1 %v1063_v1  ;;  %v1068_v6 = vld [vmem:[%s1410_s1 + $0x30] sm:$0xff]   ;;  %v1072_v10 = vld [vmem:[%s1410_s1 + $0x28] sm:$0xff]  }
   0x4   :  { %v1065_v3 = vld [vmem:[%s1410_s1 + $0xb8] sm:$0xff]   ;;  %944 = vmatpush3.bf16.msra.mxu0 %v1064_v2  ;;  %v1069_v7 = vld [vmem:[%s1410_s1 + $0xb0] sm:$0xff]   ;;  %v1073_v11 = vld [vmem:[%s1410_s1 + $0xa8] sm:$0xff]  }
   0x5   :  { %966 = vmatpush3.bf16.msra.mxu1 %v1065_v3  ;;  %945 = vmatprep.subr.bf16.mxu0 %v1066_v4  ;;  %v1074_v12 = vld [vmem:[%s1410_s1 + $0x60] sm:$0xff]   ;;  %v1078_v16 = vld [vmem:[%s1410_s1 + $0x58] sm:$0xff]   ;;  %v1082_v20 = vld [vmem:[%s1410_s1 + $0x50] sm:$0xff]  }
   0x6   :  { %967 = vmatprep.subr.bf16.mxu1 %v1067_v5  ;;  %v1075_v13 = vld [vmem:[%s1410_s1 + $0xe0] sm:$0xff]   ;;  %v1079_v17 = vld [vmem:[%s1410_s1 + $0xd8] sm:$0xff]   ;;  %v1083_v21 = vld [vmem:[%s1410_s1 + $0xd0] sm:$0xff]  }
   0x7   :  { %v1076_v14 = vld [vmem:[%s1410_s1 + $0x20] sm:$0xff]   ;;  %v1080_v18 = vld [vmem:[%s1410_s1 + $0x18] sm:$0xff]   ;;  %v1084_v22 = vld [vmem:[%s1410_s1 + $0x10] sm:$0xff]  }
   0x8   :  { %946 = vmatpush3.bf16.msra.mxu0 %v1068_v6  ;;  %v1077_v15 = vld [vmem:[%s1410_s1 + $0xa0] sm:$0xff]   ;;  %v1081_v19 = vld [vmem:[%s1410_s1 + $0x98] sm:$0xff]   ;;  %v1085_v23 = vld [vmem:[%s1410_s1 + $0x90] sm:$0xff]  }
   0x9   :  { %968 = vmatpush3.bf16.msra.mxu1 %v1069_v7  ;;  %947 = vmatprep.subr.bf16.mxu0 %v1070_v8  ;;  %v1086_v24 = vld [vmem:[%s1410_s1 + $0x48] sm:$0xff]   ;;  %v1090_v28 = vld [vmem:[%s1410_s1 + $0x40] sm:$0xff]   ;;  %v1098_v38 = vld [vmem:[%s1410_s1 + $0x178] sm:$0xff]  }
   0xa   :  { %969 = vmatprep.subr.bf16.mxu1 %v1071_v9  ;;  %v1087_v25 = vld [vmem:[%s1410_s1 + $0xc8] sm:$0xff]   ;;  %v1091_v29 = vld [vmem:[%s1410_s1 + $0xc0] sm:$0xff]   ;;  %v1099_v39 = vld [vmem:[%s1410_s1 + $0x138] sm:$0xff]  }
   0xb   :  { %v1088_v26 = vld [vmem:[%s1410_s1 + $0x8] sm:$0xff]   ;;  %v1092_v30 = vld [vmem:[%s1410_s1] sm:$0xff]   ;;  %v1100_v40 = vld [vmem:[%s1410_s1 + $0x1f8] sm:$0xff]  }
   0xc   :  { %948 = vmatpush3.bf16.msra.mxu0 %v1072_v10  ;;  %v1089_v27 = vld [vmem:[%s1410_s1 + $0x88] sm:$0xff]   ;;  %v1093_v31 = vld [vmem:[%s1410_s1 + $0x80] sm:$0xff]   ;;  %v1101_v41 = vld [vmem:[%s1410_s1 + $0x1b8] sm:$0xff]  }
   0xd   :  { %970 = vmatpush3.bf16.msra.mxu1 %v1073_v11  ;;  %949 = vmatprep.subr.bf16.mxu0 %v1074_v12  ;;  %v24_v32 = vld [vmem:[%s1411_s0] sm:$0xff]  ;;  %v25_v33 = vld [vmem:[%s1411_s0 + $0x8] sm:$0xff]  ;;  %v1102_v42 = vld [vmem:[%s1410_s1 + $0x170] sm:$0xff]  }
   0xe   :  { %971 = vmatprep.subr.bf16.mxu1 %v1075_v13  ;;  %v861_v34 = vcombine.low %v24_v32, %v24_v32  ;;  %v862_v35 = vcombine.high %v24_v32, %v24_v32  ;;  %v863_v36 = vcombine.low %v25_v33, %v25_v33  ;;  %v864_v37 = vcombine.high %v25_v33, %v25_v33  ;;  %v1103_v43 = vld [vmem:[%s1410_s1 + $0x130] sm:$0xff]   ;;  %v1106_v46 = vld [vmem:[%s1410_s1 + $0x168] sm:$0xff]   ;;  %v1110_v50 = vld [vmem:[%s1410_s1 + $0x160] sm:$0xff]  }
   0xf   :  { %v1104_v44 = vld [vmem:[%s1410_s1 + $0x1f0] sm:$0xff]   ;;  %v1107_v47 = vld [vmem:[%s1410_s1 + $0x128] sm:$0xff]   ;;  %v1111_v51 = vld [vmem:[%s1410_s1 + $0x120] sm:$0xff]   ;;  %v1143_v13 = vmov 0.0  }
  0x10   :  { %950 = vmatpush3.bf16.msra.mxu0 %v1076_v14  ;;  %669 = vmatprep.mubr.bf16.mxu0 %v862_v35  ;;  %v1105_v45 = vld [vmem:[%s1410_s1 + $0x1b0] sm:$0xff]   ;;  %v1108_v48 = vld [vmem:[%s1410_s1 + $0x1e8] sm:$0xff]   ;;  %v1112_v52 = vld [vmem:[%s1410_s1 + $0x1e0] sm:$0xff]  }
  0x11   :  { %972 = vmatpush3.bf16.msra.mxu1 %v1077_v15  ;;  %951 = vmatprep.subr.bf16.mxu0 %v1078_v16  ;;  %v1109_v49 = vld [vmem:[%s1410_s1 + $0x1a8] sm:$0xff]   ;;  %v1113_v53 = vld [vmem:[%s1410_s1 + $0x1a0] sm:$0xff]   ;;  %v1114_v54 = vld [vmem:[%s1410_s1 + $0x158] sm:$0xff]  }
  0x12   :  { %973 = vmatprep.subr.bf16.mxu1 %v1079_v17  ;;  %709 = vmatprep.mubr.bf16.mxu1 %v864_v37  ;;  %v1115_v55 = vld [vmem:[%s1410_s1 + $0x118] sm:$0xff]   ;;  %v1118_v58 = vld [vmem:[%s1410_s1 + $0x150] sm:$0xff]   ;;  %v1122_v62 = vld [vmem:[%s1410_s1 + $0x148] sm:$0xff]  }
  0x13   :  { %v1116_v56 = vld [vmem:[%s1410_s1 + $0x1d8] sm:$0xff]   ;;  %v1119_v59 = vld [vmem:[%s1410_s1 + $0x110] sm:$0xff]   ;;  %v1123_v63 = vld [vmem:[%s1410_s1 + $0x108] sm:$0xff]  }
  0x14   :  { %952 = vmatpush3.bf16.msra.mxu0 %v1080_v18  ;;  %v1117_v57 = vld [vmem:[%s1410_s1 + $0x198] sm:$0xff]   ;;  %v1120_v60 = vld [vmem:[%s1410_s1 + $0x1d0] sm:$0xff]   ;;  %v1124_v0 = vld [vmem:[%s1410_s1 + $0x1c8] sm:$0xff]  }
  0x15   :  { %974 = vmatpush3.bf16.msra.mxu1 %v1081_v19  ;;  %953 = vmatprep.subr.bf16.mxu0 %v1082_v20  ;;  %v1121_v61 = vld [vmem:[%s1410_s1 + $0x190] sm:$0xff]   ;;  %v1125_v1 = vld [vmem:[%s1410_s1 + $0x188] sm:$0xff]   ;;  %v1126_v2 = vld [vmem:[%s1410_s1 + $0x140] sm:$0xff]  }
  0x16   :  { %975 = vmatprep.subr.bf16.mxu1 %v1083_v21  ;;  %v1127_v3 = vld [vmem:[%s1410_s1 + $0x100] sm:$0xff]   ;;  %v26_v5 = vld [vmem:[%s1411_s0 + $0x10] sm:$0xff]  ;;  %v27_v9 = vld [vmem:[%s1411_s0 + $0x18] sm:$0xff] }
  0x17   :  { %v1128_v4 = vld [vmem:[%s1410_s1 + $0x1c0] sm:$0xff]   ;;  %v866_v6 = vcombine.high %v26_v5, %v26_v5  ;;  %v865_v8 = vcombine.low %v26_v5, %v26_v5  ;;  %v867_v10 = vcombine.low %v27_v9, %v27_v9  ;;  %v868_v11 = vcombine.high %v27_v9, %v27_v9  ;;  %v1134_v12 = vld [vmem:[%s1410_s1 + $0x238] sm:$0xff]   ;;  %v1135_v14 = vld [vmem:[%s1410_s1 + $0x230] sm:$0xff]  }
  0x18   :  { %954 = vmatpush3.bf16.msra.mxu0 %v1084_v22  ;;  %v1131_v7 = vld [vmem:[%s1410_s1 + $0x180] sm:$0xff]   ;;  %v1136_v15 = vld [vmem:[%s1410_s1 + $0x228] sm:$0xff]   ;;  %v1138_v17 = vld [vmem:[%s1410_s1 + $0x218] sm:$0xff]  }
  0x19   :  { %976 = vmatpush3.bf16.msra.mxu1 %v1085_v23  ;;  %955 = vmatprep.subr.bf16.mxu0 %v1086_v24  ;;  %v1137_v16 = vld [vmem:[%s1410_s1 + $0x220] sm:$0xff]   ;;  %v1139_v18 = vld [vmem:[%s1410_s1 + $0x210] sm:$0xff]   ;;  %v1140_v19 = vld [vmem:[%s1410_s1 + $0x208] sm:$0xff]  }
  0x1a   :  { %977 = vmatprep.subr.bf16.mxu1 %v1087_v25  ;;  %v1141_v20 = vld [vmem:[%s1410_s1 + $0x200] sm:$0xff]  }
  0x1b   :  { %v1142_v21 = vld [vmem:[%s1411_s0 + $0x20] ss:$0 sps:$4 sm:$0xff]  }
  0x1c   :  { %956 = vmatpush3.bf16.msra.mxu0 %v1088_v26 }
  0x1d   :  { %978 = vmatpush3.bf16.msra.mxu1 %v1089_v27  ;;  %957 = vmatprep.subr.bf16.mxu0 %v1090_v28 }
  0x1e   :  { %979 = vmatprep.subr.bf16.mxu1 %v1091_v29 }
  0x20   :  { %958 = vmatpush3.bf16.msra.mxu0 %v1092_v30 }
  0x21   :  { %980 = vmatpush3.bf16.msra.mxu1 %v1093_v31  ;;  %987 = vmatprep.subr.bf16.mxu0 %v1098_v38 }
  0x22   :  { %1009 = vmatprep.subr.bf16.mxu1 %v1100_v40 }
  0x23   :  { %670 = vmatmul.mubr.bf16.vlgmr.msra.gmra.mxu0 %v861_v34 }
  0x24   :  { %710 = vmatmul.mubr.bf16.vlgmr.msra.gmra.mxu1 %v863_v36  ;;  %988 = vmatpush3.bf16.msra.mxu0 %v1099_v39 }
  0x25   :  { %1010 = vmatpush3.bf16.msra.mxu1 %v1101_v41  ;;  %989 = vmatprep.subr.bf16.mxu0 %v1102_v42 }
  0x26   :  { %1011 = vmatprep.subr.bf16.mxu1 %v1104_v44  ;;  %749 = vmatprep.mubr.bf16.mxu0 %v866_v6  ;;  %v851_v44 = vld [vmem:[%s1412_s3] sm:$0xf] }
  0x27   :  { %789 = vmatprep.mubr.bf16.mxu1 %v868_v11 }
  0x28   :  { %990 = vmatpush3.bf16.msra.mxu0 %v1103_v43 }
  0x29   :  { %1012 = vmatpush3.bf16.msra.mxu1 %v1105_v45  ;;  %991 = vmatprep.subr.bf16.mxu0 %v1106_v46 }
  0x2a   :  { %1013 = vmatprep.subr.bf16.mxu1 %v1108_v48 }
  0x2c   :  { %992 = vmatpush3.bf16.msra.mxu0 %v1107_v47  ;;  %v942_v47 = vld [vmem:[%s1413_s2] ss:$0 sm:$0xff] }
  0x2d   :  { %1014 = vmatpush3.bf16.msra.mxu1 %v1109_v49  ;;  %993 = vmatprep.subr.bf16.mxu0 %v1110_v50  ;;  %v852_v49 = vunpack.c.l.bf16 %v851_v44 }
  0x2e   :  { %1015 = vmatprep.subr.bf16.mxu1 %v1112_v52 }
  0x30   :  { %994 = vmatpush3.bf16.msra.mxu0 %v1111_v51 }
  0x31   :  { %1016 = vmatpush3.bf16.msra.mxu1 %v1113_v53  ;;  %995 = vmatprep.subr.bf16.mxu0 %v1114_v54 }
  0x32   :  { %1017 = vmatprep.subr.bf16.mxu1 %v1116_v56 }
  0x34   :  { %996 = vmatpush3.bf16.msra.mxu0 %v1115_v55 }
  0x35   :  { %1018 = vmatpush3.bf16.msra.mxu1 %v1117_v57  ;;  %997 = vmatprep.subr.bf16.mxu0 %v1118_v58 }
  0x36   :  { %1019 = vmatprep.subr.bf16.mxu1 %v1120_v60 }
  0x38   :  { %998 = vmatpush3.bf16.msra.mxu0 %v1119_v59 }
  0x39   :  { %1020 = vmatpush3.bf16.msra.mxu1 %v1121_v61  ;;  %999 = vmatprep.subr.bf16.mxu0 %v1122_v62 }
  0x3a   :  { %1021 = vmatprep.subr.bf16.mxu1 %v1124_v0 }
  0x3c   :  { %1000 = vmatpush3.bf16.msra.mxu0 %v1123_v63 }
  0x3d   :  { %1022 = vmatpush3.bf16.msra.mxu1 %v1125_v1  ;;  %1001 = vmatprep.subr.bf16.mxu0 %v1126_v2 }
  0x3e   :  { %1023 = vmatprep.subr.bf16.mxu1 %v1128_v4 }
  0x40   :  { %1002 = vmatpush3.bf16.msra.mxu0 %v1127_v3 }
  0x41   :  { %1024 = vmatpush3.bf16.msra.mxu1 %v1131_v7  ;;  %1040 = vmatprep.subr.bf16.mxu0 %v1143_v13 }
  0x43   :  { %750 = vmatmul.mubr.bf16.vlgmr.msra.gmra.mxu0 %v865_v8 }
  0x44   :  { %1041 = vmatpush3.bf16.msra.mxu0 %v1134_v12  ;;  %790 = vmatmul.mubr.bf16.vlgmr.msra.gmra.mxu1 %v867_v10 }
  0x45   :  { %1042 = vmatprep.subr.bf16.mxu0 %v1143_v13  ;;  %1056 = vmatprep.mubr.msk.bf16.mxu0 %vm1144_vm0, %v1143_v13 }
  0x48   :  { %1043 = vmatpush3.bf16.msra.mxu0 %v1135_v14 }
  0x49   :  { %1044 = vmatprep.subr.bf16.mxu0 %v1143_v13 }
  0x4c   :  { %1045 = vmatpush3.bf16.msra.mxu0 %v1136_v15 }
  0x4d   :  { %1046 = vmatprep.subr.bf16.mxu0 %v1143_v13 }
  0x50   :  { %1047 = vmatpush3.bf16.msra.mxu0 %v1137_v16 }
  0x51   :  { %1048 = vmatprep.subr.bf16.mxu0 %v1143_v13 }
  0x54   :  { %1049 = vmatpush3.bf16.msra.mxu0 %v1138_v17 }
  0x55   :  { %1050 = vmatprep.subr.bf16.mxu0 %v1143_v13 }
  0x58   :  { %1051 = vmatpush3.bf16.msra.mxu0 %v1139_v18 }
  0x59   :  { %1052 = vmatprep.subr.bf16.mxu0 %v1143_v13 }
  0x5c   :  { %1053 = vmatpush3.bf16.msra.mxu0 %v1140_v19 }
  0x5d   :  { %1054 = vmatprep.subr.bf16.mxu0 %v1143_v13 }
  0x60   :  { %1055 = vmatpush3.bf16.msra.mxu0 %v1141_v20 }
  0x63   :  { %1057 = vmatmul.mubr.bf16.vlgmr.msra.gmra.mxu0 %v1142_v21 }
  0xe3   :  { %v959_v22 = vpop.f32.mrf.mxu0 }
  0xe4   :  { %v981_v23 = vpop.f32.mrf.mxu1 }
  0xe5   :  { %v960_v24 = vpop.f32.mrf.mxu0 }
  0xe6   :  { %v982_v25 = vpop.f32.mrf.mxu1  ;;  %v961_v38 = vadd.f32 %v960_v24, %v959_v22 }
  0xe7   :  { %v962_v26 = vpop.f32.mrf.mxu0  ;;  %v983_v39 = vadd.f32 %v982_v25, %v981_v23 }
  0xe8   :  { %v984_v27 = vpop.f32.mrf.mxu1 }
  0xe9   :  { %v963_v28 = vpop.f32.mrf.mxu0  ;;  %v712_v41 = vadd.f32 %v983_v39, %v961_v38 }
  0xea   :  { %v985_v29 = vpop.f32.mrf.mxu1 }
 0x103   :  { %v1003_v30 = vpop.f32.mrf.mxu0 }
 0x104   :  { %v1025_v31 = vpop.f32.mrf.mxu1 }
 0x105   :  { %v1004_v32 = vpop.f32.mrf.mxu0 }
 0x106   :  { %v1026_v33 = vpop.f32.mrf.mxu1  ;;  %v1005_v40 = vadd.f32 %v1004_v32, %v1003_v30 }
 0x107   :  { %v1006_v34 = vpop.f32.mrf.mxu0  ;;  %v1027_v43 = vadd.f32 %v1026_v33, %v1025_v31 }
 0x108   :  { %v1028_v35 = vpop.f32.mrf.mxu1  ;;  %v752_v42 = vadd.f32 %v1005_v40, %v712_v41 }
 0x109   :  { %v1007_v36 = vpop.f32.mrf.mxu0 }
 0x10a   :  { %v1029_v37 = vpop.f32.mrf.mxu1  ;;  %v792_v45 = vadd.f32 %v1027_v43, %v752_v42 }
 0x123   :  { %v831_v46 = vpop.f32.mrf.mxu0 }
 0x124   :  { %v832_v48 = vadd.f32 %v831_v46, %v792_v45 }
 0x125   :  { %v1058_v50 = vpop.f32.mrf.mxu0 }
 0x126   :  { %v850_v51 = vadd.f32 %v942_v47, %v832_v48 }
 0x127   :  { %v834_v52 = vpop.f32.mrf.mxu0 }
 0x128   :  { %v853_v53 = vadd.f32 %v852_v49, %v850_v51 }
 0x129   :  { %v1059_v54 = vpop.f32.mrf.mxu0 }
 0x12a   :  { %v854_v55 = vmax.f32 %v853_v53, 0.0 }
 0x12c   :  { %v855_v56 = vpack.c.bf16 %v854_v55, %v854_v55 }
 0x12e   :  { %856 = vst [vmem:[%s1414_s4] sm:$0xf] %v855_v56 }

// kernel: model_forward.34
= control target key start
LH: loop header
LB: loop body
LE: loop exit
PB: predicated region body
PF: predicated region fallthrough
CT: control target
= control target key end

     0   :  { %v240_v1 = vmov 0   ;;  %v172_v18 = vlaneseq  ;;  %s318_s1 = inlined_call_operand.vmem [shape: bf16[128,256], index: 1, kind: input, shape index: {}]   ;;  %s319_s0 = inlined_call_operand.vmem [shape: bf16[8,128], index: 0, kind: input, shape index: {}]   ;;  %s320_s2 = inlined_call_operand.vmem [shape: f32[1,256], index: 2, kind: input, shape index: {}]   ;;  %s321_s3 = inlined_call_operand.vmem [shape: bf16[8,256], index: 3, kind: output, shape index: {}]  }
   0x1   :  { %v216_v0 = vld [vmem:[%s318_s1 + $0x74] ss:$8 sps:$4 sm:$0xff]   ;;  %152 = vmatprep.mubr.bf16.mxu0 %v240_v1  ;;  %v218_v2 = vld [vmem:[%s318_s1 + $0x70] ss:$8 sps:$4 sm:$0xff]   ;;  %v219_v3 = vld [vmem:[%s318_s1 + $0x64] ss:$8 sps:$4 sm:$0xff]  }
   0x2   :  { %120 = vmatprep.subr.bf16.mxu0 %v216_v0  ;;  %v221_v4 = vld [vmem:[%s318_s1 + $0x60] ss:$8 sps:$4 sm:$0xff]   ;;  %v222_v5 = vld [vmem:[%s318_s1 + $0x54] ss:$8 sps:$4 sm:$0xff]   ;;  %v224_v6 = vld [vmem:[%s318_s1 + $0x50] ss:$8 sps:$4 sm:$0xff]  }
   0x3   :  { %121 = vmatpush1.bf16.msra.mxu0 %v218_v2  ;;  %v225_v7 = vld [vmem:[%s318_s1 + $0x44] ss:$8 sps:$4 sm:$0xff]   ;;  %v227_v8 = vld [vmem:[%s318_s1 + $0x40] ss:$8 sps:$4 sm:$0xff]   ;;  %v228_v9 = vld [vmem:[%s318_s1 + $0x34] ss:$8 sps:$4 sm:$0xff]  }
   0x4   :  { %122 = vmatprep.subr.bf16.mxu0 %v219_v3  ;;  %v230_v10 = vld [vmem:[%s318_s1 + $0x30] ss:$8 sps:$4 sm:$0xff]   ;;  %v231_v11 = vld [vmem:[%s318_s1 + $0x24] ss:$8 sps:$4 sm:$0xff]   ;;  %v233_v12 = vld [vmem:[%s318_s1 + $0x20] ss:$8 sps:$4 sm:$0xff]  }
   0x5   :  { %v234_v13 = vld [vmem:[%s318_s1 + $0x14] ss:$8 sps:$4 sm:$0xff]   ;;  %v236_v14 = vld [vmem:[%s318_s1 + $0x10] ss:$8 sps:$4 sm:$0xff]   ;;  %v237_v15 = vld [vmem:[%s318_s1 + $0x4] ss:$8 sps:$4 sm:$0xff]  }
   0x6   :  { %v239_v16 = vld [vmem:[%s318_s1] ss:$8 sps:$4 sm:$0xff]   ;;  %v173_v19 = vshrl.u32 %v172_v18, 7 }
   0x7   :  { %123 = vmatpush1.bf16.msra.mxu0 %v221_v4  ;;  %v23_v17 = vld [vmem:[%s319_s0] sm:$0xf] }
   0x8   :  { %124 = vmatprep.subr.bf16.mxu0 %v222_v5  ;;  %v174_v20 = vsub.s32 0, %v173_v19  ;;  %v178_v21 = vsub.s32 1, %v173_v19  ;;  %v170_v22 = vld [vmem:[%s320_s2] sm:$0x3] }
   0xa   :  { %v175_v23 = vrot.slane %v170_v22, %v174_v20  ;;  %v179_v24 = vrot.slane %v170_v22, %v178_v21 }
   0xb   :  { %125 = vmatpush1.bf16.msra.mxu0 %v224_v6 }
   0xc   :  { %126 = vmatprep.subr.bf16.mxu0 %v225_v7 }
   0xf   :  { %127 = vmatpush1.bf16.msra.mxu0 %v227_v8 }
  0x10   :  { %128 = vmatprep.subr.bf16.mxu0 %v228_v9 }
  0x13   :  { %129 = vmatpush1.bf16.msra.mxu0 %v230_v10 }
  0x14   :  { %130 = vmatprep.subr.bf16.mxu0 %v231_v11 }
  0x17   :  { %131 = vmatpush1.bf16.msra.mxu0 %v233_v12 }
  0x18   :  { %132 = vmatprep.subr.bf16.mxu0 %v234_v13 }
  0x1b   :  { %133 = vmatpush1.bf16.msra.mxu0 %v236_v14 }
  0x1c   :  { %134 = vmatprep.subr.bf16.mxu0 %v237_v15 }
  0x1f   :  { %135 = vmatpush1.bf16.msra.mxu0 %v239_v16 }
  0x22   :  { %153 = vmatmul.mubr.bf16.vlgmr.msra.gmra.mxu0 %v23_v17 }
  0xe2   :  { %v154_v25 = vpop.f32.mrf.mxu0 }
  0xe3   :  { %v182_v27 = vadd.f32 %v175_v23, %v154_v25 }
  0xe4   :  { %v156_v26 = vpop.f32.mrf.mxu0 }
  0xe5   :  { %v183_v28 = vadd.f32 %v179_v24, %v156_v26 }
  0xe6   :  { %v158_v29 = vpop.f32.mrf.mxu0 }
  0xe7   :  { %v214_v30 = vpack.c.bf16 %v183_v28, %v182_v27 }
  0xe8   :  { %v159_v31 = vpop.f32.mrf.mxu0 }
  0xe9   :  { %192 = vst [vmem:[%s321_s3] sm:$0xff] %v214_v30 }

// kernel: model_forward.33
= control target key start
LH: loop header
LB: loop body
LE: loop exit
PB: predicated region body
PF: predicated region fallthrough
CT: control target
= control target key end

     0   :  { %s2034_s1 = inlined_call_operand.vmem [shape: bf16[1152,256], index: 1, kind: input, shape index: {}]   ;;  %s2035_s0 = inlined_call_operand.vmem [shape: bf16[8,1152], index: 0, kind: input, shape index: {}]   ;;  %s2036_s2 = inlined_call_operand.vmem [shape: f32[1,256], index: 2, kind: input, shape index: {}]   ;;  %s2037_s3 = inlined_call_operand.vmem [shape: bf16[8,256], index: 3, kind: output, shape index: {}]  }
   0x1   :  { %v1323_v0 = vld [vmem:[%s2034_s1 + $0x74] ss:$8 sps:$4 sm:$0xff]   ;;  %v1327_v2 = vld [vmem:[%s2034_s1 + $0x70] ss:$8 sps:$4 sm:$0xff]   ;;  %v1329_v4 = vld [vmem:[%s2034_s1 + $0x64] ss:$8 sps:$4 sm:$0xff]  }
   0x2   :  { %v1325_v1 = vld [vmem:[%s2034_s1 + $0x174] ss:$8 sps:$4 sm:$0xff]   ;;  %924 = vmatprep.subr.bf16.mxu0 %v1323_v0  ;;  %v1328_v3 = vld [vmem:[%s2034_s1 + $0x170] ss:$8 sps:$4 sm:$0xff]   ;;  %v1331_v5 = vld [vmem:[%s2034_s1 + $0x164] ss:$8 sps:$4 sm:$0xff]  }
   0x3   :  { %965 = vmatprep.subr.bf16.mxu1 %v1325_v1  ;;  %925 = vmatpush1.bf16.msra.mxu0 %v1327_v2  ;;  %v1333_v6 = vld [vmem:[%s2034_s1 + $0x60] ss:$8 sps:$4 sm:$0xff]   ;;  %v1335_v8 = vld [vmem:[%s2034_s1 + $0x54] ss:$8 sps:$4 sm:$0xff]   ;;  %v1339_v10 = vld [vmem:[%s2034_s1 + $0x50] ss:$8 sps:$4 sm:$0xff]  }
   0x4   :  { %966 = vmatpush1.bf16.msra.mxu1 %v1328_v3  ;;  %926 = vmatprep.subr.bf16.mxu0 %v1329_v4  ;;  %v1334_v7 = vld [vmem:[%s2034_s1 + $0x160] ss:$8 sps:$4 sm:$0xff]   ;;  %v1337_v9 = vld [vmem:[%s2034_s1 + $0x154] ss:$8 sps:$4 sm:$0xff]   ;;  %v1340_v11 = vld [vmem:[%s2034_s1 + $0x150] ss:$8 sps:$4 sm:$0xff]  }
   0x5   :  { %967 = vmatprep.subr.bf16.mxu1 %v1331_v5  ;;  %v1341_v12 = vld [vmem:[%s2034_s1 + $0x44] ss:$8 sps:$4 sm:$0xff]   ;;  %v1345_v14 = vld [vmem:[%s2034_s1 + $0x40] ss:$8 sps:$4 sm:$0xff]   ;;  %v1347_v16 = vld [vmem:[%s2034_s1 + $0x34] ss:$8 sps:$4 sm:$0xff]  }
   0x6   :  { %v1343_v13 = vld [vmem:[%s2034_s1 + $0x144] ss:$8 sps:$4 sm:$0xff]   ;;  %v1346_v15 = vld [vmem:[%s2034_s1 + $0x140] ss:$8 sps:$4 sm:$0xff]   ;;  %v1349_v17 = vld [vmem:[%s2034_s1 + $0x134] ss:$8 sps:$4 sm:$0xff]  }
   0x7   :  { %927 = vmatpush1.bf16.msra.mxu0 %v1333_v6  ;;  %v1351_v18 = vld [vmem:[%s2034_s1 + $0x30] ss:$8 sps:$4 sm:$0xff]   ;;  %v1353_v20 = vld [vmem:[%s2034_s1 + $0x24] ss:$8 sps:$4 sm:$0xff]   ;;  %v1357_v22 = vld [vmem:[%s2034_s1 + $0x20] ss:$8 sps:$4 sm:$0xff]  }
   0x8   :  { %968 = vmatpush1.bf16.msra.mxu1 %v1334_v7  ;;  %928 = vmatprep.subr.bf16.mxu0 %v1335_v8  ;;  %v1352_v19 = vld [vmem:[%s2034_s1 + $0x130] ss:$8 sps:$4 sm:$0xff]   ;;  %v1355_v21 = vld [vmem:[%s2034_s1 + $0x124] ss:$8 sps:$4 sm:$0xff]   ;;  %v1358_v23 = vld [vmem:[%s2034_s1 + $0x120] ss:$8 sps:$4 sm:$0xff]  }
   0x9   :  { %969 = vmatprep.subr.bf16.mxu1 %v1337_v9  ;;  %v1359_v24 = vld [vmem:[%s2034_s1 + $0x14] ss:$8 sps:$4 sm:$0xff]   ;;  %v1363_v26 = vld [vmem:[%s2034_s1 + $0x10] ss:$8 sps:$4 sm:$0xff]   ;;  %v1365_v28 = vld [vmem:[%s2034_s1 + $0x4] ss:$8 sps:$4 sm:$0xff]  }
   0xa   :  { %v1361_v25 = vld [vmem:[%s2034_s1 + $0x114] ss:$8 sps:$4 sm:$0xff]   ;;  %v1364_v27 = vld [vmem:[%s2034_s1 + $0x110] ss:$8 sps:$4 sm:$0xff]   ;;  %v1367_v29 = vld [vmem:[%s2034_s1 + $0x104] ss:$8 sps:$4 sm:$0xff]  }
   0xb   :  { %929 = vmatpush1.bf16.msra.mxu0 %v1339_v10  ;;  %v1369_v30 = vld [vmem:[%s2034_s1] ss:$8 sps:$4 sm:$0xff]   ;;  %v1371_v32 = vld [vmem:[%s2034_s1 + $0xf4] ss:$8 sps:$4 sm:$0xff]   ;;  %v1375_v34 = vld [vmem:[%s2034_s1 + $0xf0] ss:$8 sps:$4 sm:$0xff]  }
   0xc   :  { %970 = vmatpush1.bf16.msra.mxu1 %v1340_v11  ;;  %930 = vmatprep.subr.bf16.mxu0 %v1341_v12  ;;  %v1370_v31 = vld [vmem:[%s2034_s1 + $0x100] ss:$8 sps:$4 sm:$0xff]   ;;  %v1373_v33 = vld [vmem:[%s2034_s1 + $0x1f4] ss:$8 sps:$4 sm:$0xff]   ;;  %v1376_v35 = vld [vmem:[%s2034_s1 + $0x1f0] ss:$8 sps:$4 sm:$0xff]  }
   0xd   :  { %971 = vmatprep.subr.bf16.mxu1 %v1343_v13  ;;  %v1377_v36 = vld [vmem:[%s2034_s1 + $0xe4] ss:$8 sps:$4 sm:$0xff]   ;;  %v1381_v38 = vld [vmem:[%s2034_s1 + $0xe0] ss:$8 sps:$4 sm:$0xff]   ;;  %v1383_v40 = vld [vmem:[%s2034_s1 + $0xd4] ss:$8 sps:$4 sm:$0xff]  }
   0xe   :  { %v1379_v37 = vld [vmem:[%s2034_s1 + $0x1e4] ss:$8 sps:$4 sm:$0xff]   ;;  %v1382_v39 = vld [vmem:[%s2034_s1 + $0x1e0] ss:$8 sps:$4 sm:$0xff]   ;;  %v1385_v41 = vld [vmem:[%s2034_s1 + $0x1d4] ss:$8 sps:$4 sm:$0xff]  }
   0xf   :  { %931 = vmatpush1.bf16.msra.mxu0 %v1345_v14  ;;  %v1387_v42 = vld [vmem:[%s2034_s1 + $0xd0] ss:$8 sps:$4 sm:$0xff]   ;;  %v1389_v44 = vld [vmem:[%s2034_s1 + $0xc4] ss:$8 sps:$4 sm:$0xff]   ;;  %v1393_v49 = vld [vmem:[%s2034_s1 + $0xc0] ss:$8 sps:$4 sm:$0xff]  }
  0x10   :  { %972 = vmatpush1.bf16.msra.mxu1 %v1346_v15  ;;  %932 = vmatprep.subr.bf16.mxu0 %v1347_v16  ;;  %v1388_v43 = vld [vmem:[%s2034_s1 + $0x1d0] ss:$8 sps:$4 sm:$0xff]   ;;  %v1391_v45 = vld [vmem:[%s2034_s1 + $0x1c4] ss:$8 sps:$4 sm:$0xff]   ;;  %v1394_v50 = vld [vmem:[%s2034_s1 + $0x1c0] ss:$8 sps:$4 sm:$0xff]  }
  0x11   :  { %973 = vmatprep.subr.bf16.mxu1 %v1349_v17  ;;  %v23_v46 = vld [vmem:[%s2035_s0] sm:$0xff]  ;;  %v24_v48 = vld [vmem:[%s2035_s0 + $0x8] sm:$0xff]  ;;  %v1395_v52 = vld [vmem:[%s2034_s1 + $0xb4] ss:$8 sps:$4 sm:$0xff]  }
  0x12   :  { %v1168_v47 = vcombine.high %v23_v46, %v23_v46  ;;  %v1170_v51 = vcombine.high %v24_v48, %v24_v48  ;;  %v1397_v53 = vld [vmem:[%s2034_s1 + $0x1b4] ss:$8 sps:$4 sm:$0xff]   ;;  %v1399_v54 = vld [vmem:[%s2034_s1 + $0xb0] ss:$8 sps:$4 sm:$0xff]   ;;  %v1401_v56 = vld [vmem:[%s2034_s1 + $0xa4] ss:$8 sps:$4 sm:$0xff]   ;;  %v1167_v6 = vcombine.low %v23_v46, %v23_v46  ;;  %v1169_v7 = vcombine.low %v24_v48, %v24_v48 }
  0x13   :  { %933 = vmatpush1.bf16.msra.mxu0 %v1351_v18  ;;  %v1400_v55 = vld [vmem:[%s2034_s1 + $0x1b0] ss:$8 sps:$4 sm:$0xff]   ;;  %v1403_v57 = vld [vmem:[%s2034_s1 + $0x1a4] ss:$8 sps:$4 sm:$0xff]   ;;  %v1405_v58 = vld [vmem:[%s2034_s1 + $0xa0] ss:$8 sps:$4 sm:$0xff]  }
  0x14   :  { %974 = vmatpush1.bf16.msra.mxu1 %v1352_v19  ;;  %934 = vmatprep.subr.bf16.mxu0 %v1353_v20  ;;  %v1406_v59 = vld [vmem:[%s2034_s1 + $0x1a0] ss:$8 sps:$4 sm:$0xff]   ;;  %v1407_v60 = vld [vmem:[%s2034_s1 + $0x94] ss:$8 sps:$4 sm:$0xff]   ;;  %v1411_v62 = vld [vmem:[%s2034_s1 + $0x90] ss:$8 sps:$4 sm:$0xff]  }
  0x15   :  { %975 = vmatprep.subr.bf16.mxu1 %v1355_v21  ;;  %956 = vmatprep.mubr.bf16.mxu0 %v1168_v47  ;;  %v1409_v61 = vld [vmem:[%s2034_s1 + $0x194] ss:$8 sps:$4 sm:$0xff]   ;;  %v1412_v63 = vld [vmem:[%s2034_s1 + $0x190] ss:$8 sps:$4 sm:$0xff]   ;;  %v1413_v0 = vld [vmem:[%s2034_s1 + $0x84] ss:$8 sps:$4 sm:$0xff]  }
  0x16   :  { %997 = vmatprep.mubr.bf16.mxu1 %v1170_v51  ;;  %v1415_v1 = vld [vmem:[%s2034_s1 + $0x184] ss:$8 sps:$4 sm:$0xff]   ;;  %v1417_v2 = vld [vmem:[%s2034_s1 + $0x80] ss:$8 sps:$4 sm:$0xff]   ;;  %v1425_v4 = vld [vmem:[%s2034_s1 + $0x274] ss:$8 sps:$4 sm:$0xff]  }
  0x17   :  { %935 = vmatpush1.bf16.msra.mxu0 %v1357_v22  ;;  %v1418_v3 = vld [vmem:[%s2034_s1 + $0x180] ss:$8 sps:$4 sm:$0xff]   ;;  %v1428_v5 = vld [vmem:[%s2034_s1 + $0x374] ss:$8 sps:$4 sm:$0xff]   ;;  %v1423_v8 = vld [vmem:[%s2034_s1 + $0x270] ss:$8 sps:$4 sm:$0xff]  }
  0x18   :  { %976 = vmatpush1.bf16.msra.mxu1 %v1358_v23  ;;  %936 = vmatprep.subr.bf16.mxu0 %v1359_v24  ;;  %v1426_v9 = vld [vmem:[%s2034_s1 + $0x370] ss:$8 sps:$4 sm:$0xff]   ;;  %v1431_v10 = vld [vmem:[%s2034_s1 + $0x264] ss:$8 sps:$4 sm:$0xff]   ;;  %v1429_v12 = vld [vmem:[%s2034_s1 + $0x260] ss:$8 sps:$4 sm:$0xff]  }
  0x19   :  { %977 = vmatprep.subr.bf16.mxu1 %v1361_v25  ;;  %v1434_v11 = vld [vmem:[%s2034_s1 + $0x364] ss:$8 sps:$4 sm:$0xff]   ;;  %v1432_v13 = vld [vmem:[%s2034_s1 + $0x360] ss:$8 sps:$4 sm:$0xff]   ;;  %v1437_v14 = vld [vmem:[%s2034_s1 + $0x254] ss:$8 sps:$4 sm:$0xff]  }
  0x1a   :  { %v1440_v15 = vld [vmem:[%s2034_s1 + $0x354] ss:$8 sps:$4 sm:$0xff]   ;;  %v1435_v16 = vld [vmem:[%s2034_s1 + $0x250] ss:$8 sps:$4 sm:$0xff]   ;;  %v1443_v18 = vld [vmem:[%s2034_s1 + $0x244] ss:$8 sps:$4 sm:$0xff]  }
  0x1b   :  { %937 = vmatpush1.bf16.msra.mxu0 %v1363_v26  ;;  %v1438_v17 = vld [vmem:[%s2034_s1 + $0x350] ss:$8 sps:$4 sm:$0xff]   ;;  %v1446_v19 = vld [vmem:[%s2034_s1 + $0x344] ss:$8 sps:$4 sm:$0xff]   ;;  %v1441_v20 = vld [vmem:[%s2034_s1 + $0x240] ss:$8 sps:$4 sm:$0xff]  }
  0x1c   :  { %978 = vmatpush1.bf16.msra.mxu1 %v1364_v27  ;;  %938 = vmatprep.subr.bf16.mxu0 %v1365_v28  ;;  %v1444_v21 = vld [vmem:[%s2034_s1 + $0x340] ss:$8 sps:$4 sm:$0xff]   ;;  %v1449_v22 = vld [vmem:[%s2034_s1 + $0x234] ss:$8 sps:$4 sm:$0xff]   ;;  %v1447_v24 = vld [vmem:[%s2034_s1 + $0x230] ss:$8 sps:$4 sm:$0xff]  }
  0x1d   :  { %979 = vmatprep.subr.bf16.mxu1 %v1367_v29  ;;  %v1452_v23 = vld [vmem:[%s2034_s1 + $0x334] ss:$8 sps:$4 sm:$0xff]   ;;  %v1450_v25 = vld [vmem:[%s2034_s1 + $0x330] ss:$8 sps:$4 sm:$0xff]   ;;  %v1455_v26 = vld [vmem:[%s2034_s1 + $0x224] ss:$8 sps:$4 sm:$0xff]  }
  0x1e   :  { %v1458_v27 = vld [vmem:[%s2034_s1 + $0x324] ss:$8 sps:$4 sm:$0xff]   ;;  %v1453_v28 = vld [vmem:[%s2034_s1 + $0x220] ss:$8 sps:$4 sm:$0xff]   ;;  %v1488_v51 = vld [vmem:[%s2034_s1 + $0x3d4] ss:$8 sps:$4 sm:$0xff]  }
  0x1f   :  { %939 = vmatpush1.bf16.msra.mxu0 %v1369_v30  ;;  %v1456_v29 = vld [vmem:[%s2034_s1 + $0x320] ss:$8 sps:$4 sm:$0xff]   ;;  %v1461_v30 = vld [vmem:[%s2034_s1 + $0x214] ss:$8 sps:$4 sm:$0xff]   ;;  %v1479_v46 = vld [vmem:[%s2034_s1 + $0x2e4] ss:$8 sps:$4 sm:$0xff]  }
  0x20   :  { %980 = vmatpush1.bf16.msra.mxu1 %v1370_v31  ;;  %940 = vmatprep.subr.bf16.mxu0 %v1371_v32  ;;  %v1464_v31 = vld [vmem:[%s2034_s1 + $0x314] ss:$8 sps:$4 sm:$0xff]   ;;  %v1482_v47 = vld [vmem:[%s2034_s1 + $0x3e4] ss:$8 sps:$4 sm:$0xff]   ;;  %v1477_v48 = vld [vmem:[%s2034_s1 + $0x2e0] ss:$8 sps:$4 sm:$0xff]  }
  0x21   :  { %981 = vmatprep.subr.bf16.mxu1 %v1373_v33  ;;  %v1848_v32 = vld [vmem:[%s2035_s0 + $0x10] sm:$0xff] }
  0x22   :  { %v1459_v33 = vld [vmem:[%s2034_s1 + $0x210] ss:$8 sps:$4 sm:$0xff]  }
  0x23   :  { %941 = vmatpush2.bf16.msra.mxu0 %v1375_v34  ;;  %v1462_v34 = vld [vmem:[%s2034_s1 + $0x310] ss:$8 sps:$4 sm:$0xff]  }
  0x24   :  { %982 = vmatpush2.bf16.msra.mxu1 %v1376_v35  ;;  %942 = vmatprep.subr.bf16.mxu0 %v1377_v36  ;;  %v1172_v35 = vcombine.high %v1848_v32, %v1848_v32  ;;  %v1861_v36 = vld [vmem:[%s2035_s0 + $0x18] sm:$0xff] }
  0x25   :  { %983 = vmatprep.subr.bf16.mxu1 %v1379_v37  ;;  %v1467_v37 = vld [vmem:[%s2034_s1 + $0x204] ss:$8 sps:$4 sm:$0xff]  }
  0x27   :  { %943 = vmatpush2.bf16.msra.mxu0 %v1381_v38  ;;  %v1174_v38 = vcombine.high %v1861_v36, %v1861_v36 }
  0x28   :  { %984 = vmatpush2.bf16.msra.mxu1 %v1382_v39  ;;  %944 = vmatprep.subr.bf16.mxu0 %v1383_v40  ;;  %v1470_v39 = vld [vmem:[%s2034_s1 + $0x304] ss:$8 sps:$4 sm:$0xff]   ;;  %v1465_v40 = vld [vmem:[%s2034_s1 + $0x200] ss:$8 sps:$4 sm:$0xff]  }
  0x29   :  { %985 = vmatprep.subr.bf16.mxu1 %v1385_v41  ;;  %v1468_v41 = vld [vmem:[%s2034_s1 + $0x300] ss:$8 sps:$4 sm:$0xff]  }
  0x2b   :  { %945 = vmatpush2.bf16.msra.mxu0 %v1387_v42  ;;  %v1473_v42 = vld [vmem:[%s2034_s1 + $0x2f4] ss:$8 sps:$4 sm:$0xff]  }
  0x2c   :  { %986 = vmatpush2.bf16.msra.mxu1 %v1388_v43  ;;  %946 = vmatprep.subr.bf16.mxu0 %v1389_v44  ;;  %v1476_v43 = vld [vmem:[%s2034_s1 + $0x3f4] ss:$8 sps:$4 sm:$0xff]   ;;  %v1471_v44 = vld [vmem:[%s2034_s1 + $0x2f0] ss:$8 sps:$4 sm:$0xff]  }
  0x2d   :  { %987 = vmatprep.subr.bf16.mxu1 %v1391_v45  ;;  %v1474_v45 = vld [vmem:[%s2034_s1 + $0x3f0] ss:$8 sps:$4 sm:$0xff]  }
  0x2f   :  { %947 = vmatpush2.bf16.msra.mxu0 %v1393_v49  ;;  %v1480_v49 = vld [vmem:[%s2034_s1 + $0x3e0] ss:$8 sps:$4 sm:$0xff]  }
  0x30   :  { %988 = vmatpush2.bf16.msra.mxu1 %v1394_v50  ;;  %948 = vmatprep.subr.bf16.mxu0 %v1395_v52  ;;  %v1485_v50 = vld [vmem:[%s2034_s1 + $0x2d4] ss:$8 sps:$4 sm:$0xff]   ;;  %v1483_v52 = vld [vmem:[%s2034_s1 + $0x2d0] ss:$8 sps:$4 sm:$0xff]  }
  0x31   :  { %989 = vmatprep.subr.bf16.mxu1 %v1397_v53  ;;  %v1486_v53 = vld [vmem:[%s2034_s1 + $0x3d0] ss:$8 sps:$4 sm:$0xff]  }
  0x33   :  { %949 = vmatpush2.bf16.msra.mxu0 %v1399_v54  ;;  %v1491_v54 = vld [vmem:[%s2034_s1 + $0x2c4] ss:$8 sps:$4 sm:$0xff]  }
  0x34   :  { %990 = vmatpush2.bf16.msra.mxu1 %v1400_v55  ;;  %950 = vmatprep.subr.bf16.mxu0 %v1401_v56  ;;  %v1494_v55 = vld [vmem:[%s2034_s1 + $0x3c4] ss:$8 sps:$4 sm:$0xff]   ;;  %v1489_v56 = vld [vmem:[%s2034_s1 + $0x2c0] ss:$8 sps:$4 sm:$0xff]  }
  0x35   :  { %991 = vmatprep.subr.bf16.mxu1 %v1403_v57  ;;  %v1492_v57 = vld [vmem:[%s2034_s1 + $0x3c0] ss:$8 sps:$4 sm:$0xff]  }
  0x37   :  { %951 = vmatpush2.bf16.msra.mxu0 %v1405_v58  ;;  %v1497_v58 = vld [vmem:[%s2034_s1 + $0x2b4] ss:$8 sps:$4 sm:$0xff]  }
  0x38   :  { %992 = vmatpush2.bf16.msra.mxu1 %v1406_v59  ;;  %952 = vmatprep.subr.bf16.mxu0 %v1407_v60  ;;  %v1500_v59 = vld [vmem:[%s2034_s1 + $0x3b4] ss:$8 sps:$4 sm:$0xff]   ;;  %v1495_v60 = vld [vmem:[%s2034_s1 + $0x2b0] ss:$8 sps:$4 sm:$0xff]  }
  0x39   :  { %993 = vmatprep.subr.bf16.mxu1 %v1409_v61  ;;  %v1498_v61 = vld [vmem:[%s2034_s1 + $0x3b0] ss:$8 sps:$4 sm:$0xff]  }
  0x3b   :  { %953 = vmatpush2.bf16.msra.mxu0 %v1411_v62  ;;  %v1503_v62 = vld [vmem:[%s2034_s1 + $0x2a4] ss:$8 sps:$4 sm:$0xff]  }
  0x3c   :  { %994 = vmatpush2.bf16.msra.mxu1 %v1412_v63  ;;  %954 = vmatprep.subr.bf16.mxu0 %v1413_v0  ;;  %v1506_v63 = vld [vmem:[%s2034_s1 + $0x3a4] ss:$8 sps:$4 sm:$0xff]   ;;  %v1501_v0 = vld [vmem:[%s2034_s1 + $0x2a0] ss:$8 sps:$4 sm:$0xff]  }
  0x3d   :  { %995 = vmatprep.subr.bf16.mxu1 %v1415_v1  ;;  %v1504_v1 = vld [vmem:[%s2034_s1 + $0x3a0] ss:$8 sps:$4 sm:$0xff]  }
  0x3f   :  { %955 = vmatpush2.bf16.msra.mxu0 %v1417_v2  ;;  %v1509_v2 = vld [vmem:[%s2034_s1 + $0x294] ss:$8 sps:$4 sm:$0xff]  }
  0x40   :  { %996 = vmatpush2.bf16.msra.mxu1 %v1418_v3  ;;  %1006 = vmatprep.subr.bf16.mxu0 %v1425_v4  ;;  %v1512_v3 = vld [vmem:[%s2034_s1 + $0x394] ss:$8 sps:$4 sm:$0xff]   ;;  %v1507_v4 = vld [vmem:[%s2034_s1 + $0x290] ss:$8 sps:$4 sm:$0xff]  }
  0x41   :  { %1047 = vmatprep.subr.bf16.mxu1 %v1428_v5  ;;  %v1510_v5 = vld [vmem:[%s2034_s1 + $0x390] ss:$8 sps:$4 sm:$0xff]  }
  0x42   :  { %957 = vmatmul.mubr.bf16.vlgmr.msra.gmra.mxu0 %v1167_v6  ;;  %v1515_v6 = vld [vmem:[%s2034_s1 + $0x284] ss:$8 sps:$4 sm:$0xff]  }
  0x43   :  { %998 = vmatmul.mubr.bf16.vlgmr.msra.gmra.mxu1 %v1169_v7  ;;  %1007 = vmatpush1.bf16.msra.mxu0 %v1423_v8  ;;  %v1518_v7 = vld [vmem:[%s2034_s1 + $0x384] ss:$8 sps:$4 sm:$0xff]   ;;  %v1513_v8 = vld [vmem:[%s2034_s1 + $0x280] ss:$8 sps:$4 sm:$0xff]  }
  0x44   :  { %1048 = vmatpush1.bf16.msra.mxu1 %v1426_v9  ;;  %1008 = vmatprep.subr.bf16.mxu0 %v1431_v10  ;;  %v1516_v9 = vld [vmem:[%s2034_s1 + $0x380] ss:$8 sps:$4 sm:$0xff]   ;;  %v1523_v10 = vld [vmem:[%s2034_s1 + $0x474] ss:$8 sps:$4 sm:$0xff]  }
  0x45   :  { %1049 = vmatprep.subr.bf16.mxu1 %v1434_v11  ;;  %1038 = vmatprep.mubr.bf16.mxu0 %v1172_v35  ;;  %v1171_v11 = vcombine.low %v1848_v32, %v1848_v32 }
  0x46   :  { %1079 = vmatprep.mubr.bf16.mxu1 %v1174_v38 }
  0x47   :  { %1009 = vmatpush1.bf16.msra.mxu0 %v1429_v12  ;;  %v1173_v12 = vcombine.low %v1861_v36, %v1861_v36 }
  0x48   :  { %1050 = vmatpush1.bf16.msra.mxu1 %v1432_v13  ;;  %1010 = vmatprep.subr.bf16.mxu0 %v1437_v14  ;;  %v1521_v13 = vld [vmem:[%s2034_s1 + $0x470] ss:$8 sps:$4 sm:$0xff]   ;;  %v1528_v14 = vld [vmem:[%s2034_s1 + $0x464] ss:$8 sps:$4 sm:$0xff]  }
  0x49   :  { %1051 = vmatprep.subr.bf16.mxu1 %v1440_v15  ;;  %v1526_v15 = vld [vmem:[%s2034_s1 + $0x460] ss:$8 sps:$4 sm:$0xff]  }
  0x4b   :  { %1011 = vmatpush1.bf16.msra.mxu0 %v1435_v16  ;;  %v1548_v16 = vmov 0  }
  0x4c   :  { %1052 = vmatpush1.bf16.msra.mxu1 %v1438_v17  ;;  %1012 = vmatprep.subr.bf16.mxu0 %v1443_v18  ;;  %v1531_v17 = vld [vmem:[%s2034_s1 + $0x454] ss:$8 sps:$4 sm:$0xff]   ;;  %v1529_v18 = vld [vmem:[%s2034_s1 + $0x450] ss:$8 sps:$4 sm:$0xff]  }
  0x4d   :  { %1053 = vmatprep.subr.bf16.mxu1 %v1446_v19  ;;  %v1534_v19 = vld [vmem:[%s2034_s1 + $0x444] ss:$8 sps:$4 sm:$0xff]  }
  0x4f   :  { %1013 = vmatpush1.bf16.msra.mxu0 %v1441_v20  ;;  %v1532_v20 = vld [vmem:[%s2034_s1 + $0x440] ss:$8 sps:$4 sm:$0xff]  }
  0x50   :  { %1054 = vmatpush1.bf16.msra.mxu1 %v1444_v21  ;;  %1014 = vmatprep.subr.bf16.mxu0 %v1449_v22  ;;  %v1537_v21 = vld [vmem:[%s2034_s1 + $0x434] ss:$8 sps:$4 sm:$0xff]   ;;  %v1535_v22 = vld [vmem:[%s2034_s1 + $0x430] ss:$8 sps:$4 sm:$0xff]  }
  0x51   :  { %1055 = vmatprep.subr.bf16.mxu1 %v1452_v23  ;;  %v1540_v23 = vld [vmem:[%s2034_s1 + $0x424] ss:$8 sps:$4 sm:$0xff]  }
  0x53   :  { %1015 = vmatpush1.bf16.msra.mxu0 %v1447_v24  ;;  %v1538_v24 = vld [vmem:[%s2034_s1 + $0x420] ss:$8 sps:$4 sm:$0xff]  }
  0x54   :  { %1056 = vmatpush1.bf16.msra.mxu1 %v1450_v25  ;;  %1016 = vmatprep.subr.bf16.mxu0 %v1455_v26  ;;  %v1543_v25 = vld [vmem:[%s2034_s1 + $0x414] ss:$8 sps:$4 sm:$0xff]   ;;  %v1541_v26 = vld [vmem:[%s2034_s1 + $0x410] ss:$8 sps:$4 sm:$0xff]  }
  0x55   :  { %1057 = vmatprep.subr.bf16.mxu1 %v1458_v27  ;;  %v1546_v27 = vld [vmem:[%s2034_s1 + $0x404] ss:$8 sps:$4 sm:$0xff]  }
  0x57   :  { %1017 = vmatpush1.bf16.msra.mxu0 %v1453_v28  ;;  %v1544_v28 = vld [vmem:[%s2034_s1 + $0x400] ss:$8 sps:$4 sm:$0xff]  }
  0x58   :  { %1058 = vmatpush1.bf16.msra.mxu1 %v1456_v29  ;;  %1018 = vmatprep.subr.bf16.mxu0 %v1461_v30  ;;  %v1547_v29 = vld [vmem:[%s2035_s0 + $0x20] ss:$0 sps:$4 sm:$0xff]  }
  0x59   :  { %1059 = vmatprep.subr.bf16.mxu1 %v1464_v31 }
  0x5b   :  { %1019 = vmatpush1.bf16.msra.mxu0 %v1459_v33 }
  0x5c   :  { %1060 = vmatpush1.bf16.msra.mxu1 %v1462_v34  ;;  %1020 = vmatprep.subr.bf16.mxu0 %v1467_v37 }
  0x5d   :  { %1061 = vmatprep.subr.bf16.mxu1 %v1470_v39 }
  0x5f   :  { %1021 = vmatpush1.bf16.msra.mxu0 %v1465_v40 }
  0x60   :  { %1062 = vmatpush1.bf16.msra.mxu1 %v1468_v41  ;;  %1022 = vmatprep.subr.bf16.mxu0 %v1473_v42 }
  0x61   :  { %1063 = vmatprep.subr.bf16.mxu1 %v1476_v43 }
  0x63   :  { %1023 = vmatpush2.bf16.msra.mxu0 %v1471_v44 }
  0x64   :  { %1064 = vmatpush2.bf16.msra.mxu1 %v1474_v45  ;;  %1024 = vmatprep.subr.bf16.mxu0 %v1479_v46 }
  0x65   :  { %1065 = vmatprep.subr.bf16.mxu1 %v1482_v47 }
  0x67   :  { %1025 = vmatpush2.bf16.msra.mxu0 %v1477_v48  ;;  %v1140_v48 = vlaneseq }
  0x68   :  { %1066 = vmatpush2.bf16.msra.mxu1 %v1480_v49  ;;  %1026 = vmatprep.subr.bf16.mxu0 %v1485_v50 }
  0x69   :  { %1067 = vmatprep.subr.bf16.mxu1 %v1488_v51  ;;  %v1141_v49 = vshrl.u32 %v1140_v48, 7 }
  0x6b   :  { %1027 = vmatpush2.bf16.msra.mxu0 %v1483_v52  ;;  %v1142_v51 = vsub.s32 0, %v1141_v49  ;;  %v1138_v52 = vld [vmem:[%s2036_s2] sm:$0x3] }
  0x6c   :  { %1068 = vmatpush2.bf16.msra.mxu1 %v1486_v53  ;;  %1028 = vmatprep.subr.bf16.mxu0 %v1491_v54  ;;  %v1146_v54 = vsub.s32 1, %v1141_v49 }
  0x6d   :  { %1069 = vmatprep.subr.bf16.mxu1 %v1494_v55 }
  0x6f   :  { %1029 = vmatpush2.bf16.msra.mxu0 %v1489_v56  ;;  %v1143_v56 = vrot.slane %v1138_v52, %v1142_v51 }
  0x70   :  { %1070 = vmatpush2.bf16.msra.mxu1 %v1492_v57  ;;  %1030 = vmatprep.subr.bf16.mxu0 %v1497_v58 }
  0x71   :  { %1071 = vmatprep.subr.bf16.mxu1 %v1500_v59 }
  0x73   :  { %1031 = vmatpush2.bf16.msra.mxu0 %v1495_v60  ;;  %v1147_v60 = vrot.slane %v1138_v52, %v1146_v54 }
  0x74   :  { %1072 = vmatpush2.bf16.msra.mxu1 %v1498_v61  ;;  %1032 = vmatprep.subr.bf16.mxu0 %v1503_v62 }
  0x75   :  { %1073 = vmatprep.subr.bf16.mxu1 %v1506_v63 }
  0x77   :  { %1033 = vmatpush2.bf16.msra.mxu0 %v1501_v0 }
  0x78   :  { %1074 = vmatpush2.bf16.msra.mxu1 %v1504_v1  ;;  %1034 = vmatprep.subr.bf16.mxu0 %v1509_v2 }
  0x79   :  { %1075 = vmatprep.subr.bf16.mxu1 %v1512_v3 }
  0x7b   :  { %1035 = vmatpush2.bf16.msra.mxu0 %v1507_v4 }
  0x7c   :  { %1076 = vmatpush2.bf16.msra.mxu1 %v1510_v5  ;;  %1036 = vmatprep.subr.bf16.mxu0 %v1515_v6 }
  0x7d   :  { %1077 = vmatprep.subr.bf16.mxu1 %v1518_v7 }
  0x7f   :  { %1037 = vmatpush2.bf16.msra.mxu0 %v1513_v8 }
  0x80   :  { %1078 = vmatpush2.bf16.msra.mxu1 %v1516_v9  ;;  %1088 = vmatprep.subr.bf16.mxu0 %v1523_v10 }
  0x82   :  { %1039 = vmatmul.mubr.bf16.vlgmr.msra.gmra.mxu0 %v1171_v11 }
  0x83   :  { %1080 = vmatmul.mubr.bf16.vlgmr.msra.gmra.mxu1 %v1173_v12  ;;  %1089 = vmatpush1.bf16.msra.mxu0 %v1521_v13 }
  0x84   :  { %1120 = vmatprep.mubr.bf16.mxu0 %v1548_v16  ;;  %1090 = vmatprep.subr.bf16.mxu0 %v1528_v14 }
  0x87   :  { %1091 = vmatpush1.bf16.msra.mxu0 %v1526_v15 }
  0x88   :  { %1092 = vmatprep.subr.bf16.mxu0 %v1531_v17 }
  0x8b   :  { %1093 = vmatpush1.bf16.msra.mxu0 %v1529_v18 }
  0x8c   :  { %1094 = vmatprep.subr.bf16.mxu0 %v1534_v19 }
  0x8f   :  { %1095 = vmatpush1.bf16.msra.mxu0 %v1532_v20 }
  0x90   :  { %1096 = vmatprep.subr.bf16.mxu0 %v1537_v21 }
  0x93   :  { %1097 = vmatpush1.bf16.msra.mxu0 %v1535_v22 }
  0x94   :  { %1098 = vmatprep.subr.bf16.mxu0 %v1540_v23 }
  0x97   :  { %1099 = vmatpush1.bf16.msra.mxu0 %v1538_v24 }
  0x98   :  { %1100 = vmatprep.subr.bf16.mxu0 %v1543_v25 }
  0x9b   :  { %1101 = vmatpush1.bf16.msra.mxu0 %v1541_v26 }
  0x9c   :  { %1102 = vmatprep.subr.bf16.mxu0 %v1546_v27 }
  0x9f   :  { %1103 = vmatpush1.bf16.msra.mxu0 %v1544_v28 }
  0xa2   :  { %1121 = vmatmul.mubr.bf16.vlgmr.msra.gmra.mxu0 %v1547_v29 }
 0x102   :  { %v958_v30 = vpop.f32.mrf.mxu0 }
 0x103   :  { %v999_v31 = vpop.f32.mrf.mxu1 }
 0x104   :  { %v1000_v32 = vadd.f32 %v999_v31, %v958_v30  ;;  %v960_v33 = vpop.f32.mrf.mxu0 }
 0x105   :  { %v1001_v34 = vpop.f32.mrf.mxu1 }
 0x106   :  { %v1002_v35 = vadd.f32 %v1001_v34, %v960_v33  ;;  %v962_v36 = vpop.f32.mrf.mxu0 }
 0x107   :  { %v1003_v37 = vpop.f32.mrf.mxu1 }
 0x108   :  { %v963_v38 = vpop.f32.mrf.mxu0 }
 0x109   :  { %v1004_v39 = vpop.f32.mrf.mxu1 }
 0x142   :  { %v1040_v40 = vpop.f32.mrf.mxu0 }
 0x143   :  { %v1081_v41 = vpop.f32.mrf.mxu1  ;;  %v1041_v50 = vadd.f32 %v1040_v40, %v1000_v32 }
 0x144   :  { %v1042_v42 = vpop.f32.mrf.mxu0 }
 0x145   :  { %v1083_v43 = vpop.f32.mrf.mxu1  ;;  %v1043_v53 = vadd.f32 %v1042_v42, %v1002_v35  ;;  %v1082_v55 = vadd.f32 %v1081_v41, %v1041_v50 }
 0x146   :  { %v1044_v44 = vpop.f32.mrf.mxu0 }
 0x147   :  { %v1085_v45 = vpop.f32.mrf.mxu1  ;;  %v1084_v58 = vadd.f32 %v1083_v43, %v1043_v53 }
 0x148   :  { %v1045_v46 = vpop.f32.mrf.mxu0 }
 0x149   :  { %v1086_v47 = vpop.f32.mrf.mxu1 }
 0x162   :  { %v1122_v57 = vpop.f32.mrf.mxu0 }
 0x163   :  { %v1123_v59 = vadd.f32 %v1122_v57, %v1082_v55 }
 0x164   :  { %v1124_v61 = vpop.f32.mrf.mxu0 }
 0x165   :  { %v1150_v62 = vadd.f32 %v1143_v56, %v1123_v59  ;;  %v1125_v63 = vadd.f32 %v1124_v61, %v1084_v58 }
 0x166   :  { %v1126_v0 = vpop.f32.mrf.mxu0 }
 0x167   :  { %v1151_v1 = vadd.f32 %v1147_v60, %v1125_v63  ;;  %v1152_v3 = vmax.f32 %v1150_v62, 0.0 }
 0x168   :  { %v1127_v2 = vpop.f32.mrf.mxu0 }
 0x169   :  { %v1153_v4 = vmax.f32 %v1151_v1, 0.0 }
 0x16b   :  { %v1321_v5 = vpack.c.bf16 %v1153_v4, %v1152_v3 }
 0x16d   :  { %1162 = vst [vmem:[%s2037_s3] sm:$0xff] %v1321_v5 }

// kernel: model_forward.35
= control target key start
LH: loop header
LB: loop body
LE: loop exit
PB: predicated region body
PF: predicated region fallthrough
CT: control target
= control target key end

     0   :  { %s2106_s15 = smov 0   ;;  %s2108_s16 = smov 0   ;;  %s2319_s0 = inlined_call_operand.vmem [shape: bf16[8,2304], index: 0, kind: input, shape index: {}]   ;;  %s2320_s1 = inlined_call_operand.vmem [shape: bf16[2304,256], index: 1, kind: input, shape index: {}]   ;;  %s2321_s2 = inlined_call_operand.vmem [shape: f32[1,256], index: 2, kind: input, shape index: {}]   ;;  %s2322_s3 = inlined_call_operand.vmem [shape: bf16[8,256], index: 3, kind: input, shape index: {}]   ;;  %s2323_s4 = inlined_call_operand.vmem [shape: bf16[8,256], index: 4, kind: output, shape index: {}]  }
   0x1   :  { %s2110_s17 = smov 0  }
   0x2 LB: > { %s26_s18 = sadd.s32 1, %s2073_s16  ;;  %p1638_p0 = scmp.ge.s32.totalorder %s2077_s17, 1  ;;  %s2077_s17 = sphi %s2110_s17, %s14_s17   ;;  %s2073_s16 = sphi %s2108_s16, %s2325_s16   ;;  %s2069_s15 = sphi %s2106_s15, %s2324_s15  }
   0x3   : > { %p27_p1 = scmp.ge.s32.totalorder %s26_s18, 2  ;;  %p236_p2 = scmp.lt.s32.totalorder %s2077_s17, 3 }
   0x5   : > { %s2327_s18 = smov (%p27_p1, %s26_s18), 0  ;;  %p237_p3 = pnand %p1638_p0, %p236_p2 }
   0x6   : > { %s293_s19 = smul.u32 (!%p237_p3), 9, %s2069_s15  ;;  %p1642_p6 = scmp.ne.s32.totalorder (!%p237_p3), %s2069_s15, 0 }
   0x7   : > { %240 = sbr.rel (%p237_p3) target bundleno = 400 (0x190), region = 36 }
   0x8   : > { %s303_s20 = smul.u32 (!%p237_p3), 144, %s2069_s15  ;;  %p296_p4 = scmp.lt.s32.totalorder (!%p237_p3), %s293_s19, 17 }
   0xa   : > { %p305_p5 = scmp.lt.s32.totalorder (!%p237_p3), %s303_s20, 287 }
   0xc   : > { %s2329_s19 = smov (!%p296_p4, %s293_s19), 17  ;;  %s2331_s20 = smov (!%p305_p5, %s303_s20), 287 }
   0xd   : > { %s1639_s21 = sshll.u32 %s2329_s19, 2  ;;  %s1802_s25 = sshll.u32 %s2331_s20, 3 }
   0xe   : > { %s2131_s24 = scalar_lea.vmem %s2319_s0, %s1639_s21  ;;  %s2136_s28 = scalar_lea.vmem %s2320_s1, %s1802_s25 }
   0xf   : > { %344 = sbr.rel (%p1642_p6) target bundleno = 22 (0x16), region = 40 }
  0x14   : > { %v2079_v0 = vmov 0.0  }
  0x15   : > { %345 = vst [vmem:[#allocation2] sm:$0xff] %v2079_v0  ;;  %346 = vst [vmem:[#allocation2 + $0x8] sm:$0xff] %v2079_v0 }
  0x16 PF: > { %v1830_v1 = vld [vmem:[%s2136_s28 + $0x74] ss:$8 sps:$4 sm:$0xff]   ;;  %v1834_v3 = vld [vmem:[%s2136_s28 + $0x70] ss:$8 sps:$4 sm:$0xff]   ;;  %v1836_v5 = vld [vmem:[%s2136_s28 + $0x64] ss:$8 sps:$4 sm:$0xff]  }
  0x17   : > { %v1832_v2 = vld [vmem:[%s2136_s28 + $0x174] ss:$8 sps:$4 sm:$0xff]   ;;  %1250 = vmatprep.subr.bf16.mxu0 %v1830_v1  ;;  %v1835_v4 = vld [vmem:[%s2136_s28 + $0x170] ss:$8 sps:$4 sm:$0xff]   ;;  %v1838_v6 = vld [vmem:[%s2136_s28 + $0x164] ss:$8 sps:$4 sm:$0xff]  }
  0x18   : > { %1291 = vmatprep.subr.bf16.mxu1 %v1832_v2  ;;  %1251 = vmatpush1.bf16.msra.mxu0 %v1834_v3  ;;  %v1840_v7 = vld [vmem:[%s2136_s28 + $0x60] ss:$8 sps:$4 sm:$0xff]   ;;  %v1842_v9 = vld [vmem:[%s2136_s28 + $0x54] ss:$8 sps:$4 sm:$0xff]   ;;  %v1846_v11 = vld [vmem:[%s2136_s28 + $0x50] ss:$8 sps:$4 sm:$0xff]  }
  0x19   : > { %1292 = vmatpush1.bf16.msra.mxu1 %v1835_v4  ;;  %1252 = vmatprep.subr.bf16.mxu0 %v1836_v5  ;;  %v1841_v8 = vld [vmem:[%s2136_s28 + $0x160] ss:$8 sps:$4 sm:$0xff]   ;;  %v1844_v10 = vld [vmem:[%s2136_s28 + $0x154] ss:$8 sps:$4 sm:$0xff]   ;;  %v1847_v12 = vld [vmem:[%s2136_s28 + $0x150] ss:$8 sps:$4 sm:$0xff]  }
  0x1a   : > { %1293 = vmatprep.subr.bf16.mxu1 %v1838_v6  ;;  %v1848_v13 = vld [vmem:[%s2136_s28 + $0x44] ss:$8 sps:$4 sm:$0xff]   ;;  %v1852_v15 = vld [vmem:[%s2136_s28 + $0x40] ss:$8 sps:$4 sm:$0xff]   ;;  %v1854_v17 = vld [vmem:[%s2136_s28 + $0x34] ss:$8 sps:$4 sm:$0xff]  }
  0x1b   : > { %v1850_v14 = vld [vmem:[%s2136_s28 + $0x144] ss:$8 sps:$4 sm:$0xff]   ;;  %v1853_v16 = vld [vmem:[%s2136_s28 + $0x140] ss:$8 sps:$4 sm:$0xff]   ;;  %v1856_v18 = vld [vmem:[%s2136_s28 + $0x134] ss:$8 sps:$4 sm:$0xff]  }
  0x1c   : > { %1253 = vmatpush1.bf16.msra.mxu0 %v1840_v7  ;;  %v1858_v19 = vld [vmem:[%s2136_s28 + $0x30] ss:$8 sps:$4 sm:$0xff]   ;;  %v1860_v21 = vld [vmem:[%s2136_s28 + $0x24] ss:$8 sps:$4 sm:$0xff]   ;;  %v1864_v23 = vld [vmem:[%s2136_s28 + $0x20] ss:$8 sps:$4 sm:$0xff]  }
  0x1d   : > { %1294 = vmatpush1.bf16.msra.mxu1 %v1841_v8  ;;  %1254 = vmatprep.subr.bf16.mxu0 %v1842_v9  ;;  %v1859_v20 = vld [vmem:[%s2136_s28 + $0x130] ss:$8 sps:$4 sm:$0xff]   ;;  %v1862_v22 = vld [vmem:[%s2136_s28 + $0x124] ss:$8 sps:$4 sm:$0xff]   ;;  %v1865_v24 = vld [vmem:[%s2136_s28 + $0x120] ss:$8 sps:$4 sm:$0xff]  }
  0x1e   : > { %1295 = vmatprep.subr.bf16.mxu1 %v1844_v10  ;;  %v1866_v25 = vld [vmem:[%s2136_s28 + $0x14] ss:$8 sps:$4 sm:$0xff]   ;;  %v1870_v27 = vld [vmem:[%s2136_s28 + $0x10] ss:$8 sps:$4 sm:$0xff]   ;;  %v1872_v29 = vld [vmem:[%s2136_s28 + $0x4] ss:$8 sps:$4 sm:$0xff]  }
  0x1f   : > { %v1868_v26 = vld [vmem:[%s2136_s28 + $0x114] ss:$8 sps:$4 sm:$0xff]   ;;  %v1871_v28 = vld [vmem:[%s2136_s28 + $0x110] ss:$8 sps:$4 sm:$0xff]   ;;  %v1874_v30 = vld [vmem:[%s2136_s28 + $0x104] ss:$8 sps:$4 sm:$0xff]  }
  0x20   : > { %1255 = vmatpush1.bf16.msra.mxu0 %v1846_v11  ;;  %v1876_v31 = vld [vmem:[%s2136_s28] ss:$8 sps:$4 sm:$0xff]   ;;  %v1878_v33 = vld [vmem:[%s2136_s28 + $0xf4] ss:$8 sps:$4 sm:$0xff]   ;;  %v1882_v35 = vld [vmem:[%s2136_s28 + $0xf0] ss:$8 sps:$4 sm:$0xff]  }
  0x21   : > { %1296 = vmatpush1.bf16.msra.mxu1 %v1847_v12  ;;  %1256 = vmatprep.subr.bf16.mxu0 %v1848_v13  ;;  %v1877_v32 = vld [vmem:[%s2136_s28 + $0x100] ss:$8 sps:$4 sm:$0xff]   ;;  %v1880_v34 = vld [vmem:[%s2136_s28 + $0x1f4] ss:$8 sps:$4 sm:$0xff]   ;;  %v1883_v36 = vld [vmem:[%s2136_s28 + $0x1f0] ss:$8 sps:$4 sm:$0xff]  }
  0x22   : > { %1297 = vmatprep.subr.bf16.mxu1 %v1850_v14  ;;  %v1884_v37 = vld [vmem:[%s2136_s28 + $0xe4] ss:$8 sps:$4 sm:$0xff]   ;;  %v1888_v39 = vld [vmem:[%s2136_s28 + $0xe0] ss:$8 sps:$4 sm:$0xff]   ;;  %v1890_v41 = vld [vmem:[%s2136_s28 + $0xd4] ss:$8 sps:$4 sm:$0xff]  }
  0x23   : > { %v1886_v38 = vld [vmem:[%s2136_s28 + $0x1e4] ss:$8 sps:$4 sm:$0xff]   ;;  %v1889_v40 = vld [vmem:[%s2136_s28 + $0x1e0] ss:$8 sps:$4 sm:$0xff]   ;;  %v1892_v42 = vld [vmem:[%s2136_s28 + $0x1d4] ss:$8 sps:$4 sm:$0xff]  }
  0x24   : > { %1257 = vmatpush1.bf16.msra.mxu0 %v1852_v15  ;;  %v1894_v43 = vld [vmem:[%s2136_s28 + $0xd0] ss:$8 sps:$4 sm:$0xff]   ;;  %v1896_v45 = vld [vmem:[%s2136_s28 + $0xc4] ss:$8 sps:$4 sm:$0xff]   ;;  %v1900_v50 = vld [vmem:[%s2136_s28 + $0xc0] ss:$8 sps:$4 sm:$0xff]  }
  0x25   : > { %1298 = vmatpush1.bf16.msra.mxu1 %v1853_v16  ;;  %1258 = vmatprep.subr.bf16.mxu0 %v1854_v17  ;;  %v1895_v44 = vld [vmem:[%s2136_s28 + $0x1d0] ss:$8 sps:$4 sm:$0xff]   ;;  %v1898_v46 = vld [vmem:[%s2136_s28 + $0x1c4] ss:$8 sps:$4 sm:$0xff]   ;;  %v1901_v51 = vld [vmem:[%s2136_s28 + $0x1c0] ss:$8 sps:$4 sm:$0xff]  }
  0x26   : > { %1299 = vmatprep.subr.bf16.mxu1 %v1856_v18  ;;  %v349_v47 = vld [vmem:[%s2131_s24] sm:$0xff]  ;;  %v350_v49 = vld [vmem:[%s2131_s24 + $0x8] sm:$0xff]  ;;  %v1902_v53 = vld [vmem:[%s2136_s28 + $0xb4] ss:$8 sps:$4 sm:$0xff]   ;;  %p1796_p7 = scmp.ne.s32.totalorder %s2069_s15, 1 }
  0x27   : > { %v1644_v48 = vcombine.high %v349_v47, %v349_v47  ;;  %v1646_v52 = vcombine.high %v350_v49, %v350_v49  ;;  %v1904_v54 = vld [vmem:[%s2136_s28 + $0x1b4] ss:$8 sps:$4 sm:$0xff]   ;;  %v1906_v55 = vld [vmem:[%s2136_s28 + $0xb0] ss:$8 sps:$4 sm:$0xff]   ;;  %v1908_v57 = vld [vmem:[%s2136_s28 + $0xa4] ss:$8 sps:$4 sm:$0xff]   ;;  %v1643_v7 = vcombine.low %v349_v47, %v349_v47  ;;  %v1645_v8 = vcombine.low %v350_v49, %v350_v49 }
  0x28   : > { %1259 = vmatpush1.bf16.msra.mxu0 %v1858_v19  ;;  %v1907_v56 = vld [vmem:[%s2136_s28 + $0x1b0] ss:$8 sps:$4 sm:$0xff]   ;;  %v1910_v58 = vld [vmem:[%s2136_s28 + $0x1a4] ss:$8 sps:$4 sm:$0xff]   ;;  %v1912_v59 = vld [vmem:[%s2136_s28 + $0xa0] ss:$8 sps:$4 sm:$0xff]  }
  0x29   : > { %1300 = vmatpush1.bf16.msra.mxu1 %v1859_v20  ;;  %1260 = vmatprep.subr.bf16.mxu0 %v1860_v21  ;;  %v1913_v60 = vld [vmem:[%s2136_s28 + $0x1a0] ss:$8 sps:$4 sm:$0xff]   ;;  %v1914_v61 = vld [vmem:[%s2136_s28 + $0x94] ss:$8 sps:$4 sm:$0xff]   ;;  %v1918_v63 = vld [vmem:[%s2136_s28 + $0x90] ss:$8 sps:$4 sm:$0xff]  }
  0x2a   : > { %1301 = vmatprep.subr.bf16.mxu1 %v1862_v22  ;;  %1282 = vmatprep.mubr.bf16.mxu0 %v1644_v48  ;;  %v1916_v62 = vld [vmem:[%s2136_s28 + $0x194] ss:$8 sps:$4 sm:$0xff]   ;;  %v1919_v0 = vld [vmem:[%s2136_s28 + $0x190] ss:$8 sps:$4 sm:$0xff]   ;;  %v1920_v1 = vld [vmem:[%s2136_s28 + $0x84] ss:$8 sps:$4 sm:$0xff]  }
  0x2b   : > { %1323 = vmatprep.mubr.bf16.mxu1 %v1646_v52  ;;  %v1922_v2 = vld [vmem:[%s2136_s28 + $0x184] ss:$8 sps:$4 sm:$0xff]   ;;  %v1924_v3 = vld [vmem:[%s2136_s28 + $0x80] ss:$8 sps:$4 sm:$0xff]   ;;  %v1932_v5 = vld [vmem:[%s2136_s28 + $0x274] ss:$8 sps:$4 sm:$0xff]  }
  0x2c   : > { %1261 = vmatpush1.bf16.msra.mxu0 %v1864_v23  ;;  %v1925_v4 = vld [vmem:[%s2136_s28 + $0x180] ss:$8 sps:$4 sm:$0xff]   ;;  %v1935_v6 = vld [vmem:[%s2136_s28 + $0x374] ss:$8 sps:$4 sm:$0xff]   ;;  %v1930_v9 = vld [vmem:[%s2136_s28 + $0x270] ss:$8 sps:$4 sm:$0xff]  }
  0x2d   : > { %1302 = vmatpush1.bf16.msra.mxu1 %v1865_v24  ;;  %1262 = vmatprep.subr.bf16.mxu0 %v1866_v25  ;;  %v1933_v10 = vld [vmem:[%s2136_s28 + $0x370] ss:$8 sps:$4 sm:$0xff]   ;;  %v1938_v11 = vld [vmem:[%s2136_s28 + $0x264] ss:$8 sps:$4 sm:$0xff]   ;;  %v1936_v13 = vld [vmem:[%s2136_s28 + $0x260] ss:$8 sps:$4 sm:$0xff]  }
  0x2e   : > { %1303 = vmatprep.subr.bf16.mxu1 %v1868_v26  ;;  %v1941_v12 = vld [vmem:[%s2136_s28 + $0x364] ss:$8 sps:$4 sm:$0xff]   ;;  %v1939_v14 = vld [vmem:[%s2136_s28 + $0x360] ss:$8 sps:$4 sm:$0xff]   ;;  %v1944_v15 = vld [vmem:[%s2136_s28 + $0x254] ss:$8 sps:$4 sm:$0xff]  }
  0x2f   : > { %v1947_v16 = vld [vmem:[%s2136_s28 + $0x354] ss:$8 sps:$4 sm:$0xff]   ;;  %v1942_v17 = vld [vmem:[%s2136_s28 + $0x250] ss:$8 sps:$4 sm:$0xff]   ;;  %v1950_v19 = vld [vmem:[%s2136_s28 + $0x244] ss:$8 sps:$4 sm:$0xff]  }
  0x30   : > { %1263 = vmatpush1.bf16.msra.mxu0 %v1870_v27  ;;  %v1945_v18 = vld [vmem:[%s2136_s28 + $0x350] ss:$8 sps:$4 sm:$0xff]   ;;  %v1953_v20 = vld [vmem:[%s2136_s28 + $0x344] ss:$8 sps:$4 sm:$0xff]   ;;  %v1948_v21 = vld [vmem:[%s2136_s28 + $0x240] ss:$8 sps:$4 sm:$0xff]  }
  0x31   : > { %1304 = vmatpush1.bf16.msra.mxu1 %v1871_v28  ;;  %1264 = vmatprep.subr.bf16.mxu0 %v1872_v29  ;;  %v1951_v22 = vld [vmem:[%s2136_s28 + $0x340] ss:$8 sps:$4 sm:$0xff]   ;;  %v1956_v23 = vld [vmem:[%s2136_s28 + $0x234] ss:$8 sps:$4 sm:$0xff]   ;;  %v1954_v25 = vld [vmem:[%s2136_s28 + $0x230] ss:$8 sps:$4 sm:$0xff]  }
  0x32   : > { %1305 = vmatprep.subr.bf16.mxu1 %v1874_v30  ;;  %v1959_v24 = vld [vmem:[%s2136_s28 + $0x334] ss:$8 sps:$4 sm:$0xff]   ;;  %v1957_v26 = vld [vmem:[%s2136_s28 + $0x330] ss:$8 sps:$4 sm:$0xff]   ;;  %v1962_v27 = vld [vmem:[%s2136_s28 + $0x224] ss:$8 sps:$4 sm:$0xff]  }
  0x33   : > { %v1965_v28 = vld [vmem:[%s2136_s28 + $0x324] ss:$8 sps:$4 sm:$0xff]   ;;  %v1960_v29 = vld [vmem:[%s2136_s28 + $0x220] ss:$8 sps:$4 sm:$0xff]   ;;  %v1995_v52 = vld [vmem:[%s2136_s28 + $0x3d4] ss:$8 sps:$4 sm:$0xff]  }
  0x34   : > { %1265 = vmatpush1.bf16.msra.mxu0 %v1876_v31  ;;  %v1963_v30 = vld [vmem:[%s2136_s28 + $0x320] ss:$8 sps:$4 sm:$0xff]   ;;  %v1968_v31 = vld [vmem:[%s2136_s28 + $0x214] ss:$8 sps:$4 sm:$0xff]   ;;  %v1986_v47 = vld [vmem:[%s2136_s28 + $0x2e4] ss:$8 sps:$4 sm:$0xff]  }
  0x35   : > { %1306 = vmatpush1.bf16.msra.mxu1 %v1877_v32  ;;  %1266 = vmatprep.subr.bf16.mxu0 %v1878_v33  ;;  %v1971_v32 = vld [vmem:[%s2136_s28 + $0x314] ss:$8 sps:$4 sm:$0xff]   ;;  %v1989_v48 = vld [vmem:[%s2136_s28 + $0x3e4] ss:$8 sps:$4 sm:$0xff]   ;;  %v1984_v49 = vld [vmem:[%s2136_s28 + $0x2e0] ss:$8 sps:$4 sm:$0xff]  }
  0x36   : > { %1307 = vmatprep.subr.bf16.mxu1 %v1880_v34  ;;  %v2232_v33 = vld [vmem:[%s2131_s24 + $0x10] sm:$0xff] }
  0x37   : > { %v1966_v34 = vld [vmem:[%s2136_s28 + $0x210] ss:$8 sps:$4 sm:$0xff]  }
  0x38   : > { %1267 = vmatpush2.bf16.msra.mxu0 %v1882_v35  ;;  %v1969_v35 = vld [vmem:[%s2136_s28 + $0x310] ss:$8 sps:$4 sm:$0xff]  }
  0x39   : > { %1308 = vmatpush2.bf16.msra.mxu1 %v1883_v36  ;;  %1268 = vmatprep.subr.bf16.mxu0 %v1884_v37  ;;  %v1648_v36 = vcombine.high %v2232_v33, %v2232_v33  ;;  %v2239_v37 = vld [vmem:[%s2131_s24 + $0x18] sm:$0xff] }
  0x3a   : > { %1309 = vmatprep.subr.bf16.mxu1 %v1886_v38  ;;  %v1974_v38 = vld [vmem:[%s2136_s28 + $0x204] ss:$8 sps:$4 sm:$0xff]  }
  0x3c   : > { %1269 = vmatpush2.bf16.msra.mxu0 %v1888_v39  ;;  %v1650_v39 = vcombine.high %v2239_v37, %v2239_v37 }
  0x3d   : > { %1310 = vmatpush2.bf16.msra.mxu1 %v1889_v40  ;;  %1270 = vmatprep.subr.bf16.mxu0 %v1890_v41  ;;  %v1977_v40 = vld [vmem:[%s2136_s28 + $0x304] ss:$8 sps:$4 sm:$0xff]   ;;  %v1972_v41 = vld [vmem:[%s2136_s28 + $0x200] ss:$8 sps:$4 sm:$0xff]  }
  0x3e   : > { %1311 = vmatprep.subr.bf16.mxu1 %v1892_v42  ;;  %v1975_v42 = vld [vmem:[%s2136_s28 + $0x300] ss:$8 sps:$4 sm:$0xff]  }
  0x40   : > { %1271 = vmatpush2.bf16.msra.mxu0 %v1894_v43  ;;  %v1980_v43 = vld [vmem:[%s2136_s28 + $0x2f4] ss:$8 sps:$4 sm:$0xff]  }
  0x41   : > { %1312 = vmatpush2.bf16.msra.mxu1 %v1895_v44  ;;  %1272 = vmatprep.subr.bf16.mxu0 %v1896_v45  ;;  %v1983_v44 = vld [vmem:[%s2136_s28 + $0x3f4] ss:$8 sps:$4 sm:$0xff]   ;;  %v1978_v45 = vld [vmem:[%s2136_s28 + $0x2f0] ss:$8 sps:$4 sm:$0xff]  }
  0x42   : > { %1313 = vmatprep.subr.bf16.mxu1 %v1898_v46  ;;  %v1981_v46 = vld [vmem:[%s2136_s28 + $0x3f0] ss:$8 sps:$4 sm:$0xff]  }
  0x44   : > { %1273 = vmatpush2.bf16.msra.mxu0 %v1900_v50  ;;  %v1987_v50 = vld [vmem:[%s2136_s28 + $0x3e0] ss:$8 sps:$4 sm:$0xff]  }
  0x45   : > { %1314 = vmatpush2.bf16.msra.mxu1 %v1901_v51  ;;  %1274 = vmatprep.subr.bf16.mxu0 %v1902_v53  ;;  %v1992_v51 = vld [vmem:[%s2136_s28 + $0x2d4] ss:$8 sps:$4 sm:$0xff]   ;;  %v1990_v53 = vld [vmem:[%s2136_s28 + $0x2d0] ss:$8 sps:$4 sm:$0xff]  }
  0x46   : > { %1315 = vmatprep.subr.bf16.mxu1 %v1904_v54  ;;  %v1993_v54 = vld [vmem:[%s2136_s28 + $0x3d0] ss:$8 sps:$4 sm:$0xff]  }
  0x48   : > { %1275 = vmatpush2.bf16.msra.mxu0 %v1906_v55  ;;  %v1998_v55 = vld [vmem:[%s2136_s28 + $0x2c4] ss:$8 sps:$4 sm:$0xff]  }
  0x49   : > { %1316 = vmatpush2.bf16.msra.mxu1 %v1907_v56  ;;  %1276 = vmatprep.subr.bf16.mxu0 %v1908_v57  ;;  %v2001_v56 = vld [vmem:[%s2136_s28 + $0x3c4] ss:$8 sps:$4 sm:$0xff]   ;;  %v1996_v57 = vld [vmem:[%s2136_s28 + $0x2c0] ss:$8 sps:$4 sm:$0xff]  }
  0x4a   : > { %1317 = vmatprep.subr.bf16.mxu1 %v1910_v58  ;;  %v1999_v58 = vld [vmem:[%s2136_s28 + $0x3c0] ss:$8 sps:$4 sm:$0xff]  }
  0x4c   : > { %1277 = vmatpush2.bf16.msra.mxu0 %v1912_v59  ;;  %v2004_v59 = vld [vmem:[%s2136_s28 + $0x2b4] ss:$8 sps:$4 sm:$0xff]  }
  0x4d   : > { %1318 = vmatpush2.bf16.msra.mxu1 %v1913_v60  ;;  %1278 = vmatprep.subr.bf16.mxu0 %v1914_v61  ;;  %v2007_v60 = vld [vmem:[%s2136_s28 + $0x3b4] ss:$8 sps:$4 sm:$0xff]   ;;  %v2002_v61 = vld [vmem:[%s2136_s28 + $0x2b0] ss:$8 sps:$4 sm:$0xff]  }
  0x4e   : > { %1319 = vmatprep.subr.bf16.mxu1 %v1916_v62  ;;  %v2005_v62 = vld [vmem:[%s2136_s28 + $0x3b0] ss:$8 sps:$4 sm:$0xff]  }
  0x50   : > { %1279 = vmatpush2.bf16.msra.mxu0 %v1918_v63  ;;  %v2010_v63 = vld [vmem:[%s2136_s28 + $0x2a4] ss:$8 sps:$4 sm:$0xff]  }
  0x51   : > { %1320 = vmatpush2.bf16.msra.mxu1 %v1919_v0  ;;  %1280 = vmatprep.subr.bf16.mxu0 %v1920_v1  ;;  %v2013_v0 = vld [vmem:[%s2136_s28 + $0x3a4] ss:$8 sps:$4 sm:$0xff]   ;;  %v2008_v1 = vld [vmem:[%s2136_s28 + $0x2a0] ss:$8 sps:$4 sm:$0xff]  }
  0x52   : > { %1321 = vmatprep.subr.bf16.mxu1 %v1922_v2  ;;  %v2011_v2 = vld [vmem:[%s2136_s28 + $0x3a0] ss:$8 sps:$4 sm:$0xff]  }
  0x54   : > { %1281 = vmatpush2.bf16.msra.mxu0 %v1924_v3  ;;  %v2016_v3 = vld [vmem:[%s2136_s28 + $0x294] ss:$8 sps:$4 sm:$0xff]  }
  0x55   : > { %1322 = vmatpush2.bf16.msra.mxu1 %v1925_v4  ;;  %1332 = vmatprep.subr.bf16.mxu0 %v1932_v5  ;;  %v2019_v4 = vld [vmem:[%s2136_s28 + $0x394] ss:$8 sps:$4 sm:$0xff]   ;;  %v2014_v5 = vld [vmem:[%s2136_s28 + $0x290] ss:$8 sps:$4 sm:$0xff]  }
  0x56   : > { %1373 = vmatprep.subr.bf16.mxu1 %v1935_v6  ;;  %v2017_v6 = vld [vmem:[%s2136_s28 + $0x390] ss:$8 sps:$4 sm:$0xff]  }
  0x57   : > { %1283 = vmatmul.mubr.bf16.vlgmr.msra.gmra.mxu0 %v1643_v7  ;;  %v2022_v7 = vld [vmem:[%s2136_s28 + $0x284] ss:$8 sps:$4 sm:$0xff]  }
  0x58   : > { %1324 = vmatmul.mubr.bf16.vlgmr.msra.gmra.mxu1 %v1645_v8  ;;  %1333 = vmatpush1.bf16.msra.mxu0 %v1930_v9  ;;  %v2025_v8 = vld [vmem:[%s2136_s28 + $0x384] ss:$8 sps:$4 sm:$0xff]   ;;  %v2020_v9 = vld [vmem:[%s2136_s28 + $0x280] ss:$8 sps:$4 sm:$0xff]  }
  0x59   : > { %1374 = vmatpush1.bf16.msra.mxu1 %v1933_v10  ;;  %1334 = vmatprep.subr.bf16.mxu0 %v1938_v11  ;;  %v2023_v10 = vld [vmem:[%s2136_s28 + $0x380] ss:$8 sps:$4 sm:$0xff]   ;;  %v2030_v11 = vld [vmem:[%s2136_s28 + $0x474] ss:$8 sps:$4 sm:$0xff]  }
  0x5a   : > { %1375 = vmatprep.subr.bf16.mxu1 %v1941_v12  ;;  %1364 = vmatprep.mubr.bf16.mxu0 %v1648_v36  ;;  %v1647_v12 = vcombine.low %v2232_v33, %v2232_v33 }
  0x5b   : > { %1405 = vmatprep.mubr.bf16.mxu1 %v1650_v39 }
  0x5c   : > { %1335 = vmatpush1.bf16.msra.mxu0 %v1936_v13  ;;  %v1649_v13 = vcombine.low %v2239_v37, %v2239_v37 }
  0x5d   : > { %1376 = vmatpush1.bf16.msra.mxu1 %v1939_v14  ;;  %1336 = vmatprep.subr.bf16.mxu0 %v1944_v15  ;;  %v2028_v14 = vld [vmem:[%s2136_s28 + $0x470] ss:$8 sps:$4 sm:$0xff]   ;;  %v2035_v15 = vld [vmem:[%s2136_s28 + $0x464] ss:$8 sps:$4 sm:$0xff]  }
  0x5e   : > { %1377 = vmatprep.subr.bf16.mxu1 %v1947_v16  ;;  %v2033_v16 = vld [vmem:[%s2136_s28 + $0x460] ss:$8 sps:$4 sm:$0xff]  }
  0x60   : > { %1337 = vmatpush1.bf16.msra.mxu0 %v1942_v17  ;;  %v2080_v17 = vmov 0  }
  0x61   : > { %1378 = vmatpush1.bf16.msra.mxu1 %v1945_v18  ;;  %1338 = vmatprep.subr.bf16.mxu0 %v1950_v19  ;;  %v2038_v18 = vld [vmem:[%s2136_s28 + $0x454] ss:$8 sps:$4 sm:$0xff]   ;;  %v2036_v19 = vld [vmem:[%s2136_s28 + $0x450] ss:$8 sps:$4 sm:$0xff]  }
  0x62   : > { %1379 = vmatprep.subr.bf16.mxu1 %v1953_v20  ;;  %v2041_v20 = vld [vmem:[%s2136_s28 + $0x444] ss:$8 sps:$4 sm:$0xff]  }
  0x64   : > { %1339 = vmatpush1.bf16.msra.mxu0 %v1948_v21  ;;  %v2039_v21 = vld [vmem:[%s2136_s28 + $0x440] ss:$8 sps:$4 sm:$0xff]  }
  0x65   : > { %1380 = vmatpush1.bf16.msra.mxu1 %v1951_v22  ;;  %1340 = vmatprep.subr.bf16.mxu0 %v1956_v23  ;;  %v2044_v22 = vld [vmem:[%s2136_s28 + $0x434] ss:$8 sps:$4 sm:$0xff]   ;;  %v2042_v23 = vld [vmem:[%s2136_s28 + $0x430] ss:$8 sps:$4 sm:$0xff]  }
  0x66   : > { %1381 = vmatprep.subr.bf16.mxu1 %v1959_v24  ;;  %v2047_v24 = vld [vmem:[%s2136_s28 + $0x424] ss:$8 sps:$4 sm:$0xff]  }
  0x68   : > { %1341 = vmatpush1.bf16.msra.mxu0 %v1954_v25  ;;  %v2045_v25 = vld [vmem:[%s2136_s28 + $0x420] ss:$8 sps:$4 sm:$0xff]  }
  0x69   : > { %1382 = vmatpush1.bf16.msra.mxu1 %v1957_v26  ;;  %1342 = vmatprep.subr.bf16.mxu0 %v1962_v27  ;;  %v2050_v26 = vld [vmem:[%s2136_s28 + $0x414] ss:$8 sps:$4 sm:$0xff]   ;;  %v2048_v27 = vld [vmem:[%s2136_s28 + $0x410] ss:$8 sps:$4 sm:$0xff]  }
  0x6a   : > { %1383 = vmatprep.subr.bf16.mxu1 %v1965_v28  ;;  %v2053_v28 = vld [vmem:[%s2136_s28 + $0x404] ss:$8 sps:$4 sm:$0xff]  }
  0x6c   : > { %1343 = vmatpush1.bf16.msra.mxu0 %v1960_v29  ;;  %v2051_v29 = vld [vmem:[%s2136_s28 + $0x400] ss:$8 sps:$4 sm:$0xff]  }
  0x6d   : > { %1384 = vmatpush1.bf16.msra.mxu1 %v1963_v30  ;;  %1344 = vmatprep.subr.bf16.mxu0 %v1968_v31  ;;  %v2054_v30 = vld [vmem:[%s2131_s24 + $0x20] ss:$0 sps:$4 sm:$0xff]  }
  0x6e   : > { %1385 = vmatprep.subr.bf16.mxu1 %v1971_v32 }
  0x70   : > { %1345 = vmatpush1.bf16.msra.mxu0 %v1966_v34 }
  0x71   : > { %1386 = vmatpush1.bf16.msra.mxu1 %v1969_v35  ;;  %1346 = vmatprep.subr.bf16.mxu0 %v1974_v38 }
  0x72   : > { %1387 = vmatprep.subr.bf16.mxu1 %v1977_v40 }
  0x74   : > { %1347 = vmatpush1.bf16.msra.mxu0 %v1972_v41 }
  0x75   : > { %1388 = vmatpush1.bf16.msra.mxu1 %v1975_v42  ;;  %1348 = vmatprep.subr.bf16.mxu0 %v1980_v43 }
  0x76   : > { %1389 = vmatprep.subr.bf16.mxu1 %v1983_v44 }
  0x78   : > { %1349 = vmatpush2.bf16.msra.mxu0 %v1978_v45 }
  0x79   : > { %1390 = vmatpush2.bf16.msra.mxu1 %v1981_v46  ;;  %1350 = vmatprep.subr.bf16.mxu0 %v1986_v47 }
  0x7a   : > { %1391 = vmatprep.subr.bf16.mxu1 %v1989_v48 }
  0x7c   : > { %1351 = vmatpush2.bf16.msra.mxu0 %v1984_v49 }
  0x7d   : > { %1392 = vmatpush2.bf16.msra.mxu1 %v1987_v50  ;;  %1352 = vmatprep.subr.bf16.mxu0 %v1992_v51 }
  0x7e   : > { %1393 = vmatprep.subr.bf16.mxu1 %v1995_v52  ;;  %v347_v52 = vld [vmem:[#allocation2] sm:$0xff] }
  0x80   : > { %1353 = vmatpush2.bf16.msra.mxu0 %v1990_v53 }
  0x81   : > { %1394 = vmatpush2.bf16.msra.mxu1 %v1993_v54  ;;  %1354 = vmatprep.subr.bf16.mxu0 %v1998_v55 }
  0x82   : > { %1395 = vmatprep.subr.bf16.mxu1 %v2001_v56  ;;  %v348_v56 = vld [vmem:[#allocation2 + $0x8] sm:$0xff] }
  0x84   : > { %1355 = vmatpush2.bf16.msra.mxu0 %v1996_v57 }
  0x85   : > { %1396 = vmatpush2.bf16.msra.mxu1 %v1999_v58  ;;  %1356 = vmatprep.subr.bf16.mxu0 %v2004_v59 }
  0x86   : > { %1397 = vmatprep.subr.bf16.mxu1 %v2007_v60 }
  0x88   : > { %1357 = vmatpush2.bf16.msra.mxu0 %v2002_v61 }
  0x89   : > { %1398 = vmatpush2.bf16.msra.mxu1 %v2005_v62  ;;  %1358 = vmatprep.subr.bf16.mxu0 %v2010_v63 }
  0x8a   : > { %1399 = vmatprep.subr.bf16.mxu1 %v2013_v0 }
  0x8c   : > { %1359 = vmatpush2.bf16.msra.mxu0 %v2008_v1 }
  0x8d   : > { %1400 = vmatpush2.bf16.msra.mxu1 %v2011_v2  ;;  %1360 = vmatprep.subr.bf16.mxu0 %v2016_v3 }
  0x8e   : > { %1401 = vmatprep.subr.bf16.mxu1 %v2019_v4 }
  0x90   : > { %1361 = vmatpush2.bf16.msra.mxu0 %v2014_v5 }
  0x91   : > { %1402 = vmatpush2.bf16.msra.mxu1 %v2017_v6  ;;  %1362 = vmatprep.subr.bf16.mxu0 %v2022_v7 }
  0x92   : > { %1403 = vmatprep.subr.bf16.mxu1 %v2025_v8 }
  0x94   : > { %1363 = vmatpush2.bf16.msra.mxu0 %v2020_v9 }
  0x95   : > { %1404 = vmatpush2.bf16.msra.mxu1 %v2023_v10  ;;  %1414 = vmatprep.subr.bf16.mxu0 %v2030_v11 }
  0x97   : > { %1365 = vmatmul.mubr.bf16.vlgmr.msra.gmra.mxu0 %v1647_v12 }
  0x98   : > { %1406 = vmatmul.mubr.bf16.vlgmr.msra.gmra.mxu1 %v1649_v13  ;;  %1415 = vmatpush1.bf16.msra.mxu0 %v2028_v14 }
  0x99   : > { %1446 = vmatprep.mubr.bf16.mxu0 %v2080_v17  ;;  %1416 = vmatprep.subr.bf16.mxu0 %v2035_v15 }
  0x9c   : > { %1417 = vmatpush1.bf16.msra.mxu0 %v2033_v16 }
  0x9d   : > { %1418 = vmatprep.subr.bf16.mxu0 %v2038_v18 }
  0xa0   : > { %1419 = vmatpush1.bf16.msra.mxu0 %v2036_v19 }
  0xa1   : > { %1420 = vmatprep.subr.bf16.mxu0 %v2041_v20 }
  0xa4   : > { %1421 = vmatpush1.bf16.msra.mxu0 %v2039_v21 }
  0xa5   : > { %1422 = vmatprep.subr.bf16.mxu0 %v2044_v22 }
  0xa8   : > { %1423 = vmatpush1.bf16.msra.mxu0 %v2042_v23 }
  0xa9   : > { %1424 = vmatprep.subr.bf16.mxu0 %v2047_v24 }
  0xac   : > { %1425 = vmatpush1.bf16.msra.mxu0 %v2045_v25 }
  0xad   : > { %1426 = vmatprep.subr.bf16.mxu0 %v2050_v26 }
  0xb0   : > { %1427 = vmatpush1.bf16.msra.mxu0 %v2048_v27 }
  0xb1   : > { %1428 = vmatprep.subr.bf16.mxu0 %v2053_v28 }
  0xb4   : > { %1429 = vmatpush1.bf16.msra.mxu0 %v2051_v29 }
  0xb7   : > { %1447 = vmatmul.mubr.bf16.vlgmr.msra.gmra.mxu0 %v2054_v30 }
 0x117   : > { %v1284_v31 = vpop.f32.mrf.mxu0 }
 0x118   : > { %v1325_v32 = vpop.f32.mrf.mxu1 }
 0x119   : > { %v1326_v33 = vadd.f32 %v1325_v32, %v1284_v31  ;;  %v1286_v34 = vpop.f32.mrf.mxu0 }
 0x11a   : > { %v1327_v35 = vpop.f32.mrf.mxu1 }
 0x11b   : > { %v1328_v36 = vadd.f32 %v1327_v35, %v1286_v34  ;;  %v1288_v37 = vpop.f32.mrf.mxu0 }
 0x11c   : > { %v1329_v38 = vpop.f32.mrf.mxu1 }
 0x11d   : > { %v1289_v39 = vpop.f32.mrf.mxu0 }
 0x11e   : > { %v1330_v40 = vpop.f32.mrf.mxu1 }
 0x157   : > { %v1366_v41 = vpop.f32.mrf.mxu0 }
 0x158   : > { %v1407_v42 = vpop.f32.mrf.mxu1  ;;  %v1367_v49 = vadd.f32 %v1366_v41, %v1326_v33 }
 0x159   : > { %v1368_v43 = vpop.f32.mrf.mxu0 }
 0x15a   : > { %v1409_v44 = vpop.f32.mrf.mxu1  ;;  %v1369_v50 = vadd.f32 %v1368_v43, %v1328_v36  ;;  %v1408_v51 = vadd.f32 %v1407_v42, %v1367_v49 }
 0x15b   : > { %v1370_v45 = vpop.f32.mrf.mxu0 }
 0x15c   : > { %v1411_v46 = vpop.f32.mrf.mxu1  ;;  %v1410_v54 = vadd.f32 %v1409_v44, %v1369_v50 }
 0x15d   : > { %v1371_v47 = vpop.f32.mrf.mxu0 }
 0x15e   : > { %v1412_v48 = vpop.f32.mrf.mxu1 }
 0x177   : > { %v1448_v53 = vpop.f32.mrf.mxu0 }
 0x178   : > { %v1449_v55 = vadd.f32 %v1448_v53, %v1408_v51 }
 0x179   : > { %v1450_v57 = vpop.f32.mrf.mxu0 }
 0x17a   : > { %v1455_v58 = vadd.f32 %v1449_v55, %v347_v52  ;;  %v1451_v59 = vadd.f32 %v1450_v57, %v1410_v54  ;;  %1462 = sbr.rel (%p1796_p7) target bundleno = 400 (0x190), region = 44 }
 0x17b   : > { %v1452_v60 = vpop.f32.mrf.mxu0 }
 0x17c   : > { %1457 = vst [vmem:[#allocation2] sm:$0xff] %v1455_v58  ;;  %v1456_v61 = vadd.f32 %v1451_v59, %v348_v56 }
 0x17d   : > { %v1453_v62 = vpop.f32.mrf.mxu0 }
 0x17e   : > { %1458 = vst [vmem:[#allocation2 + $0x8] sm:$0xff] %v1456_v61 }
 0x17f   : > { %v1467_v63 = vlaneseq  ;;  %v1465_v1 = vld [vmem:[%s2321_s2] sm:$0x3] }
 0x180   : > { %v1479_v2 = vld [vmem:[%s2322_s3] sm:$0xff] }
 0x181   : > { %v1468_v0 = vshrl.u32 %v1467_v63, 7  ;;  %v1480_v9 = vunpack.c.l.bf16 %v1479_v2  ;;  %v1481_v10 = vunpack.c.h.bf16 %v1479_v2 }
 0x183   : > { %v1469_v3 = vsub.s32 0, %v1468_v0  ;;  %v1473_v4 = vsub.s32 1, %v1468_v0  ;;  %v1463_v5 = vld [vmem:[#allocation2] sm:$0xff] }
 0x185   : > { %v1464_v6 = vld [vmem:[#allocation2 + $0x8] sm:$0xff]  ;;  %v1470_v7 = vrot.slane %v1465_v1, %v1469_v3  ;;  %v1474_v8 = vrot.slane %v1465_v1, %v1473_v4 }
 0x187   : > { %v1477_v11 = vadd.f32 %v1470_v7, %v1463_v5  ;;  %v1478_v12 = vadd.f32 %v1474_v8, %v1464_v6 }
 0x189   : > { %v1482_v13 = vadd.f32 %v1480_v9, %v1477_v11  ;;  %v1483_v14 = vadd.f32 %v1481_v10, %v1478_v12 }
 0x18b   : > { %v1484_v15 = vmax.f32 %v1482_v13, 0.0  ;;  %v1485_v16 = vmax.f32 %v1483_v14, 0.0 }
 0x18d   : > { %v1803_v17 = vpack.c.bf16 %v1485_v16, %v1484_v15 }
 0x18f   : > { %1494 = vst [vmem:[%s2323_s4] sm:$0xff] %v1803_v17 }
 0x190 PF: > { %s14_s17 = sadd.s32 1, %s2077_s17   ;;  %s2324_s15 = smov %s2073_s16 }
 0x191   : > { %p11_p8 = scmp.ge.s32.totalorder %s14_s17, 4   ;;  %s2325_s16 = smov %s2327_s18 }
 0x193   :  { %13 = sbr.rel (!%p11_p8) target bundleno = 2 (0x2), region = 83 }

// kernel: model_forward.36
= control target key start
LH: loop header
LB: loop body
LE: loop exit
PB: predicated region body
PF: predicated region fallthrough
CT: control target
= control target key end

     0   :  { %s2011_s12 = smov 0   ;;  %s2013_s13 = smov 0   ;;  %s2221_s0 = inlined_call_operand.vmem [shape: bf16[8,2304], index: 0, kind: input, shape index: {}]   ;;  %s2222_s1 = inlined_call_operand.vmem [shape: bf16[2304,256], index: 1, kind: input, shape index: {}]   ;;  %s2223_s2 = inlined_call_operand.vmem [shape: f32[1,256], index: 2, kind: input, shape index: {}]   ;;  %s2224_s3 = inlined_call_operand.vmem [shape: bf16[8,256], index: 3, kind: output, shape index: {}]  }
   0x1   :  { %s2015_s14 = smov 0  }
   0x2 LB: > { %s25_s15 = sadd.s32 1, %s1983_s13  ;;  %p1548_p0 = scmp.ge.s32.totalorder %s1987_s14, 1  ;;  %s1987_s14 = sphi %s2015_s14, %s13_s14   ;;  %s1983_s13 = sphi %s2013_s13, %s2226_s13   ;;  %s1979_s12 = sphi %s2011_s12, %s2225_s12  }
   0x3   : > { %p26_p1 = scmp.ge.s32.totalorder %s25_s15, 2  ;;  %p194_p2 = scmp.lt.s32.totalorder %s1987_s14, 3 }
   0x5   : > { %s2228_s15 = smov (%p26_p1, %s25_s15), 0  ;;  %p195_p3 = pnand %p1548_p0, %p194_p2 }
   0x6   : > { %s240_s16 = smul.u32 (!%p195_p3), 9, %s1979_s12  ;;  %p1552_p6 = scmp.ne.s32.totalorder (!%p195_p3), %s1979_s12, 0 }
   0x7   : > { %198 = sbr.rel (%p195_p3) target bundleno = 398 (0x18e), region = 32 }
   0x8   : > { %s250_s17 = smul.u32 (!%p195_p3), 144, %s1979_s12  ;;  %p243_p4 = scmp.lt.s32.totalorder (!%p195_p3), %s240_s16, 17 }
   0xa   : > { %p252_p5 = scmp.lt.s32.totalorder (!%p195_p3), %s250_s17, 287 }
   0xc   : > { %s2230_s16 = smov (!%p243_p4, %s240_s16), 17  ;;  %s2232_s17 = smov (!%p252_p5, %s250_s17), 287 }
   0xd   : > { %s1549_s18 = sshll.u32 %s2230_s16, 2  ;;  %s1712_s22 = sshll.u32 %s2232_s17, 3 }
   0xe   : > { %s2036_s21 = scalar_lea.vmem %s2221_s0, %s1549_s18  ;;  %s2041_s25 = scalar_lea.vmem %s2222_s1, %s1712_s22 }
   0xf   : > { %281 = sbr.rel (%p1552_p6) target bundleno = 22 (0x16), region = 36 }
  0x14   : > { %v1989_v0 = vmov 0.0  }
  0x15   : > { %282 = vst [vmem:[#allocation2] sm:$0xff] %v1989_v0  ;;  %283 = vst [vmem:[#allocation2 + $0x8] sm:$0xff] %v1989_v0 }
  0x16 PF: > { %v1740_v1 = vld [vmem:[%s2041_s25 + $0x74] ss:$8 sps:$4 sm:$0xff]   ;;  %v1744_v3 = vld [vmem:[%s2041_s25 + $0x70] ss:$8 sps:$4 sm:$0xff]   ;;  %v1746_v5 = vld [vmem:[%s2041_s25 + $0x64] ss:$8 sps:$4 sm:$0xff]  }
  0x17   : > { %v1742_v2 = vld [vmem:[%s2041_s25 + $0x174] ss:$8 sps:$4 sm:$0xff]   ;;  %1187 = vmatprep.subr.bf16.mxu0 %v1740_v1  ;;  %v1745_v4 = vld [vmem:[%s2041_s25 + $0x170] ss:$8 sps:$4 sm:$0xff]   ;;  %v1748_v6 = vld [vmem:[%s2041_s25 + $0x164] ss:$8 sps:$4 sm:$0xff]  }
  0x18   : > { %1228 = vmatprep.subr.bf16.mxu1 %v1742_v2  ;;  %1188 = vmatpush1.bf16.msra.mxu0 %v1744_v3  ;;  %v1750_v7 = vld [vmem:[%s2041_s25 + $0x60] ss:$8 sps:$4 sm:$0xff]   ;;  %v1752_v9 = vld [vmem:[%s2041_s25 + $0x54] ss:$8 sps:$4 sm:$0xff]   ;;  %v1756_v11 = vld [vmem:[%s2041_s25 + $0x50] ss:$8 sps:$4 sm:$0xff]  }
  0x19   : > { %1229 = vmatpush1.bf16.msra.mxu1 %v1745_v4  ;;  %1189 = vmatprep.subr.bf16.mxu0 %v1746_v5  ;;  %v1751_v8 = vld [vmem:[%s2041_s25 + $0x160] ss:$8 sps:$4 sm:$0xff]   ;;  %v1754_v10 = vld [vmem:[%s2041_s25 + $0x154] ss:$8 sps:$4 sm:$0xff]   ;;  %v1757_v12 = vld [vmem:[%s2041_s25 + $0x150] ss:$8 sps:$4 sm:$0xff]  }
  0x1a   : > { %1230 = vmatprep.subr.bf16.mxu1 %v1748_v6  ;;  %v1758_v13 = vld [vmem:[%s2041_s25 + $0x44] ss:$8 sps:$4 sm:$0xff]   ;;  %v1762_v15 = vld [vmem:[%s2041_s25 + $0x40] ss:$8 sps:$4 sm:$0xff]   ;;  %v1764_v17 = vld [vmem:[%s2041_s25 + $0x34] ss:$8 sps:$4 sm:$0xff]  }
  0x1b   : > { %v1760_v14 = vld [vmem:[%s2041_s25 + $0x144] ss:$8 sps:$4 sm:$0xff]   ;;  %v1763_v16 = vld [vmem:[%s2041_s25 + $0x140] ss:$8 sps:$4 sm:$0xff]   ;;  %v1766_v18 = vld [vmem:[%s2041_s25 + $0x134] ss:$8 sps:$4 sm:$0xff]  }
  0x1c   : > { %1190 = vmatpush1.bf16.msra.mxu0 %v1750_v7  ;;  %v1768_v19 = vld [vmem:[%s2041_s25 + $0x30] ss:$8 sps:$4 sm:$0xff]   ;;  %v1770_v21 = vld [vmem:[%s2041_s25 + $0x24] ss:$8 sps:$4 sm:$0xff]   ;;  %v1774_v23 = vld [vmem:[%s2041_s25 + $0x20] ss:$8 sps:$4 sm:$0xff]  }
  0x1d   : > { %1231 = vmatpush1.bf16.msra.mxu1 %v1751_v8  ;;  %1191 = vmatprep.subr.bf16.mxu0 %v1752_v9  ;;  %v1769_v20 = vld [vmem:[%s2041_s25 + $0x130] ss:$8 sps:$4 sm:$0xff]   ;;  %v1772_v22 = vld [vmem:[%s2041_s25 + $0x124] ss:$8 sps:$4 sm:$0xff]   ;;  %v1775_v24 = vld [vmem:[%s2041_s25 + $0x120] ss:$8 sps:$4 sm:$0xff]  }
  0x1e   : > { %1232 = vmatprep.subr.bf16.mxu1 %v1754_v10  ;;  %v1776_v25 = vld [vmem:[%s2041_s25 + $0x14] ss:$8 sps:$4 sm:$0xff]   ;;  %v1780_v27 = vld [vmem:[%s2041_s25 + $0x10] ss:$8 sps:$4 sm:$0xff]   ;;  %v1782_v29 = vld [vmem:[%s2041_s25 + $0x4] ss:$8 sps:$4 sm:$0xff]  }
  0x1f   : > { %v1778_v26 = vld [vmem:[%s2041_s25 + $0x114] ss:$8 sps:$4 sm:$0xff]   ;;  %v1781_v28 = vld [vmem:[%s2041_s25 + $0x110] ss:$8 sps:$4 sm:$0xff]   ;;  %v1784_v30 = vld [vmem:[%s2041_s25 + $0x104] ss:$8 sps:$4 sm:$0xff]  }
  0x20   : > { %1192 = vmatpush1.bf16.msra.mxu0 %v1756_v11  ;;  %v1786_v31 = vld [vmem:[%s2041_s25] ss:$8 sps:$4 sm:$0xff]   ;;  %v1788_v33 = vld [vmem:[%s2041_s25 + $0xf4] ss:$8 sps:$4 sm:$0xff]   ;;  %v1792_v35 = vld [vmem:[%s2041_s25 + $0xf0] ss:$8 sps:$4 sm:$0xff]  }
  0x21   : > { %1233 = vmatpush1.bf16.msra.mxu1 %v1757_v12  ;;  %1193 = vmatprep.subr.bf16.mxu0 %v1758_v13  ;;  %v1787_v32 = vld [vmem:[%s2041_s25 + $0x100] ss:$8 sps:$4 sm:$0xff]   ;;  %v1790_v34 = vld [vmem:[%s2041_s25 + $0x1f4] ss:$8 sps:$4 sm:$0xff]   ;;  %v1793_v36 = vld [vmem:[%s2041_s25 + $0x1f0] ss:$8 sps:$4 sm:$0xff]  }
  0x22   : > { %1234 = vmatprep.subr.bf16.mxu1 %v1760_v14  ;;  %v1794_v37 = vld [vmem:[%s2041_s25 + $0xe4] ss:$8 sps:$4 sm:$0xff]   ;;  %v1798_v39 = vld [vmem:[%s2041_s25 + $0xe0] ss:$8 sps:$4 sm:$0xff]   ;;  %v1800_v41 = vld [vmem:[%s2041_s25 + $0xd4] ss:$8 sps:$4 sm:$0xff]  }
  0x23   : > { %v1796_v38 = vld [vmem:[%s2041_s25 + $0x1e4] ss:$8 sps:$4 sm:$0xff]   ;;  %v1799_v40 = vld [vmem:[%s2041_s25 + $0x1e0] ss:$8 sps:$4 sm:$0xff]   ;;  %v1802_v42 = vld [vmem:[%s2041_s25 + $0x1d4] ss:$8 sps:$4 sm:$0xff]  }
  0x24   : > { %1194 = vmatpush1.bf16.msra.mxu0 %v1762_v15  ;;  %v1804_v43 = vld [vmem:[%s2041_s25 + $0xd0] ss:$8 sps:$4 sm:$0xff]   ;;  %v1806_v45 = vld [vmem:[%s2041_s25 + $0xc4] ss:$8 sps:$4 sm:$0xff]   ;;  %v1810_v50 = vld [vmem:[%s2041_s25 + $0xc0] ss:$8 sps:$4 sm:$0xff]  }
  0x25   : > { %1235 = vmatpush1.bf16.msra.mxu1 %v1763_v16  ;;  %1195 = vmatprep.subr.bf16.mxu0 %v1764_v17  ;;  %v1805_v44 = vld [vmem:[%s2041_s25 + $0x1d0] ss:$8 sps:$4 sm:$0xff]   ;;  %v1808_v46 = vld [vmem:[%s2041_s25 + $0x1c4] ss:$8 sps:$4 sm:$0xff]   ;;  %v1811_v51 = vld [vmem:[%s2041_s25 + $0x1c0] ss:$8 sps:$4 sm:$0xff]  }
  0x26   : > { %1236 = vmatprep.subr.bf16.mxu1 %v1766_v18  ;;  %v286_v47 = vld [vmem:[%s2036_s21] sm:$0xff]  ;;  %v287_v49 = vld [vmem:[%s2036_s21 + $0x8] sm:$0xff]  ;;  %v1812_v53 = vld [vmem:[%s2041_s25 + $0xb4] ss:$8 sps:$4 sm:$0xff]   ;;  %p1706_p7 = scmp.ne.s32.totalorder %s1979_s12, 1 }
  0x27   : > { %v1554_v48 = vcombine.high %v286_v47, %v286_v47  ;;  %v1556_v52 = vcombine.high %v287_v49, %v287_v49  ;;  %v1814_v54 = vld [vmem:[%s2041_s25 + $0x1b4] ss:$8 sps:$4 sm:$0xff]   ;;  %v1816_v55 = vld [vmem:[%s2041_s25 + $0xb0] ss:$8 sps:$4 sm:$0xff]   ;;  %v1818_v57 = vld [vmem:[%s2041_s25 + $0xa4] ss:$8 sps:$4 sm:$0xff]   ;;  %v1553_v7 = vcombine.low %v286_v47, %v286_v47  ;;  %v1555_v8 = vcombine.low %v287_v49, %v287_v49 }
  0x28   : > { %1196 = vmatpush1.bf16.msra.mxu0 %v1768_v19  ;;  %v1817_v56 = vld [vmem:[%s2041_s25 + $0x1b0] ss:$8 sps:$4 sm:$0xff]   ;;  %v1820_v58 = vld [vmem:[%s2041_s25 + $0x1a4] ss:$8 sps:$4 sm:$0xff]   ;;  %v1822_v59 = vld [vmem:[%s2041_s25 + $0xa0] ss:$8 sps:$4 sm:$0xff]  }
  0x29   : > { %1237 = vmatpush1.bf16.msra.mxu1 %v1769_v20  ;;  %1197 = vmatprep.subr.bf16.mxu0 %v1770_v21  ;;  %v1823_v60 = vld [vmem:[%s2041_s25 + $0x1a0] ss:$8 sps:$4 sm:$0xff]   ;;  %v1824_v61 = vld [vmem:[%s2041_s25 + $0x94] ss:$8 sps:$4 sm:$0xff]   ;;  %v1828_v63 = vld [vmem:[%s2041_s25 + $0x90] ss:$8 sps:$4 sm:$0xff]  }
  0x2a   : > { %1238 = vmatprep.subr.bf16.mxu1 %v1772_v22  ;;  %1219 = vmatprep.mubr.bf16.mxu0 %v1554_v48  ;;  %v1826_v62 = vld [vmem:[%s2041_s25 + $0x194] ss:$8 sps:$4 sm:$0xff]   ;;  %v1829_v0 = vld [vmem:[%s2041_s25 + $0x190] ss:$8 sps:$4 sm:$0xff]   ;;  %v1830_v1 = vld [vmem:[%s2041_s25 + $0x84] ss:$8 sps:$4 sm:$0xff]  }
  0x2b   : > { %1260 = vmatprep.mubr.bf16.mxu1 %v1556_v52  ;;  %v1832_v2 = vld [vmem:[%s2041_s25 + $0x184] ss:$8 sps:$4 sm:$0xff]   ;;  %v1834_v3 = vld [vmem:[%s2041_s25 + $0x80] ss:$8 sps:$4 sm:$0xff]   ;;  %v1842_v5 = vld [vmem:[%s2041_s25 + $0x274] ss:$8 sps:$4 sm:$0xff]  }
  0x2c   : > { %1198 = vmatpush1.bf16.msra.mxu0 %v1774_v23  ;;  %v1835_v4 = vld [vmem:[%s2041_s25 + $0x180] ss:$8 sps:$4 sm:$0xff]   ;;  %v1845_v6 = vld [vmem:[%s2041_s25 + $0x374] ss:$8 sps:$4 sm:$0xff]   ;;  %v1840_v9 = vld [vmem:[%s2041_s25 + $0x270] ss:$8 sps:$4 sm:$0xff]  }
  0x2d   : > { %1239 = vmatpush1.bf16.msra.mxu1 %v1775_v24  ;;  %1199 = vmatprep.subr.bf16.mxu0 %v1776_v25  ;;  %v1843_v10 = vld [vmem:[%s2041_s25 + $0x370] ss:$8 sps:$4 sm:$0xff]   ;;  %v1848_v11 = vld [vmem:[%s2041_s25 + $0x264] ss:$8 sps:$4 sm:$0xff]   ;;  %v1846_v13 = vld [vmem:[%s2041_s25 + $0x260] ss:$8 sps:$4 sm:$0xff]  }
  0x2e   : > { %1240 = vmatprep.subr.bf16.mxu1 %v1778_v26  ;;  %v1851_v12 = vld [vmem:[%s2041_s25 + $0x364] ss:$8 sps:$4 sm:$0xff]   ;;  %v1849_v14 = vld [vmem:[%s2041_s25 + $0x360] ss:$8 sps:$4 sm:$0xff]   ;;  %v1854_v15 = vld [vmem:[%s2041_s25 + $0x254] ss:$8 sps:$4 sm:$0xff]  }
  0x2f   : > { %v1857_v16 = vld [vmem:[%s2041_s25 + $0x354] ss:$8 sps:$4 sm:$0xff]   ;;  %v1852_v17 = vld [vmem:[%s2041_s25 + $0x250] ss:$8 sps:$4 sm:$0xff]   ;;  %v1860_v19 = vld [vmem:[%s2041_s25 + $0x244] ss:$8 sps:$4 sm:$0xff]  }
  0x30   : > { %1200 = vmatpush1.bf16.msra.mxu0 %v1780_v27  ;;  %v1855_v18 = vld [vmem:[%s2041_s25 + $0x350] ss:$8 sps:$4 sm:$0xff]   ;;  %v1863_v20 = vld [vmem:[%s2041_s25 + $0x344] ss:$8 sps:$4 sm:$0xff]   ;;  %v1858_v21 = vld [vmem:[%s2041_s25 + $0x240] ss:$8 sps:$4 sm:$0xff]  }
  0x31   : > { %1241 = vmatpush1.bf16.msra.mxu1 %v1781_v28  ;;  %1201 = vmatprep.subr.bf16.mxu0 %v1782_v29  ;;  %v1861_v22 = vld [vmem:[%s2041_s25 + $0x340] ss:$8 sps:$4 sm:$0xff]   ;;  %v1866_v23 = vld [vmem:[%s2041_s25 + $0x234] ss:$8 sps:$4 sm:$0xff]   ;;  %v1864_v25 = vld [vmem:[%s2041_s25 + $0x230] ss:$8 sps:$4 sm:$0xff]  }
  0x32   : > { %1242 = vmatprep.subr.bf16.mxu1 %v1784_v30  ;;  %v1869_v24 = vld [vmem:[%s2041_s25 + $0x334] ss:$8 sps:$4 sm:$0xff]   ;;  %v1867_v26 = vld [vmem:[%s2041_s25 + $0x330] ss:$8 sps:$4 sm:$0xff]   ;;  %v1872_v27 = vld [vmem:[%s2041_s25 + $0x224] ss:$8 sps:$4 sm:$0xff]  }
  0x33   : > { %v1875_v28 = vld [vmem:[%s2041_s25 + $0x324] ss:$8 sps:$4 sm:$0xff]   ;;  %v1870_v29 = vld [vmem:[%s2041_s25 + $0x220] ss:$8 sps:$4 sm:$0xff]   ;;  %v1905_v52 = vld [vmem:[%s2041_s25 + $0x3d4] ss:$8 sps:$4 sm:$0xff]  }
  0x34   : > { %1202 = vmatpush1.bf16.msra.mxu0 %v1786_v31  ;;  %v1873_v30 = vld [vmem:[%s2041_s25 + $0x320] ss:$8 sps:$4 sm:$0xff]   ;;  %v1878_v31 = vld [vmem:[%s2041_s25 + $0x214] ss:$8 sps:$4 sm:$0xff]   ;;  %v1896_v47 = vld [vmem:[%s2041_s25 + $0x2e4] ss:$8 sps:$4 sm:$0xff]  }
  0x35   : > { %1243 = vmatpush1.bf16.msra.mxu1 %v1787_v32  ;;  %1203 = vmatprep.subr.bf16.mxu0 %v1788_v33  ;;  %v1881_v32 = vld [vmem:[%s2041_s25 + $0x314] ss:$8 sps:$4 sm:$0xff]   ;;  %v1899_v48 = vld [vmem:[%s2041_s25 + $0x3e4] ss:$8 sps:$4 sm:$0xff]   ;;  %v1894_v49 = vld [vmem:[%s2041_s25 + $0x2e0] ss:$8 sps:$4 sm:$0xff]  }
  0x36   : > { %1244 = vmatprep.subr.bf16.mxu1 %v1790_v34  ;;  %v2137_v33 = vld [vmem:[%s2036_s21 + $0x10] sm:$0xff] }
  0x37   : > { %v1876_v34 = vld [vmem:[%s2041_s25 + $0x210] ss:$8 sps:$4 sm:$0xff]  }
  0x38   : > { %1204 = vmatpush2.bf16.msra.mxu0 %v1792_v35  ;;  %v1879_v35 = vld [vmem:[%s2041_s25 + $0x310] ss:$8 sps:$4 sm:$0xff]  }
  0x39   : > { %1245 = vmatpush2.bf16.msra.mxu1 %v1793_v36  ;;  %1205 = vmatprep.subr.bf16.mxu0 %v1794_v37  ;;  %v1558_v36 = vcombine.high %v2137_v33, %v2137_v33  ;;  %v2144_v37 = vld [vmem:[%s2036_s21 + $0x18] sm:$0xff] }
  0x3a   : > { %1246 = vmatprep.subr.bf16.mxu1 %v1796_v38  ;;  %v1884_v38 = vld [vmem:[%s2041_s25 + $0x204] ss:$8 sps:$4 sm:$0xff]  }
  0x3c   : > { %1206 = vmatpush2.bf16.msra.mxu0 %v1798_v39  ;;  %v1560_v39 = vcombine.high %v2144_v37, %v2144_v37 }
  0x3d   : > { %1247 = vmatpush2.bf16.msra.mxu1 %v1799_v40  ;;  %1207 = vmatprep.subr.bf16.mxu0 %v1800_v41  ;;  %v1887_v40 = vld [vmem:[%s2041_s25 + $0x304] ss:$8 sps:$4 sm:$0xff]   ;;  %v1882_v41 = vld [vmem:[%s2041_s25 + $0x200] ss:$8 sps:$4 sm:$0xff]  }
  0x3e   : > { %1248 = vmatprep.subr.bf16.mxu1 %v1802_v42  ;;  %v1885_v42 = vld [vmem:[%s2041_s25 + $0x300] ss:$8 sps:$4 sm:$0xff]  }
  0x40   : > { %1208 = vmatpush2.bf16.msra.mxu0 %v1804_v43  ;;  %v1890_v43 = vld [vmem:[%s2041_s25 + $0x2f4] ss:$8 sps:$4 sm:$0xff]  }
  0x41   : > { %1249 = vmatpush2.bf16.msra.mxu1 %v1805_v44  ;;  %1209 = vmatprep.subr.bf16.mxu0 %v1806_v45  ;;  %v1893_v44 = vld [vmem:[%s2041_s25 + $0x3f4] ss:$8 sps:$4 sm:$0xff]   ;;  %v1888_v45 = vld [vmem:[%s2041_s25 + $0x2f0] ss:$8 sps:$4 sm:$0xff]  }
  0x42   : > { %1250 = vmatprep.subr.bf16.mxu1 %v1808_v46  ;;  %v1891_v46 = vld [vmem:[%s2041_s25 + $0x3f0] ss:$8 sps:$4 sm:$0xff]  }
  0x44   : > { %1210 = vmatpush2.bf16.msra.mxu0 %v1810_v50  ;;  %v1897_v50 = vld [vmem:[%s2041_s25 + $0x3e0] ss:$8 sps:$4 sm:$0xff]  }
  0x45   : > { %1251 = vmatpush2.bf16.msra.mxu1 %v1811_v51  ;;  %1211 = vmatprep.subr.bf16.mxu0 %v1812_v53  ;;  %v1902_v51 = vld [vmem:[%s2041_s25 + $0x2d4] ss:$8 sps:$4 sm:$0xff]   ;;  %v1900_v53 = vld [vmem:[%s2041_s25 + $0x2d0] ss:$8 sps:$4 sm:$0xff]  }
  0x46   : > { %1252 = vmatprep.subr.bf16.mxu1 %v1814_v54  ;;  %v1903_v54 = vld [vmem:[%s2041_s25 + $0x3d0] ss:$8 sps:$4 sm:$0xff]  }
  0x48   : > { %1212 = vmatpush2.bf16.msra.mxu0 %v1816_v55  ;;  %v1908_v55 = vld [vmem:[%s2041_s25 + $0x2c4] ss:$8 sps:$4 sm:$0xff]  }
  0x49   : > { %1253 = vmatpush2.bf16.msra.mxu1 %v1817_v56  ;;  %1213 = vmatprep.subr.bf16.mxu0 %v1818_v57  ;;  %v1911_v56 = vld [vmem:[%s2041_s25 + $0x3c4] ss:$8 sps:$4 sm:$0xff]   ;;  %v1906_v57 = vld [vmem:[%s2041_s25 + $0x2c0] ss:$8 sps:$4 sm:$0xff]  }
  0x4a   : > { %1254 = vmatprep.subr.bf16.mxu1 %v1820_v58  ;;  %v1909_v58 = vld [vmem:[%s2041_s25 + $0x3c0] ss:$8 sps:$4 sm:$0xff]  }
  0x4c   : > { %1214 = vmatpush2.bf16.msra.mxu0 %v1822_v59  ;;  %v1914_v59 = vld [vmem:[%s2041_s25 + $0x2b4] ss:$8 sps:$4 sm:$0xff]  }
  0x4d   : > { %1255 = vmatpush2.bf16.msra.mxu1 %v1823_v60  ;;  %1215 = vmatprep.subr.bf16.mxu0 %v1824_v61  ;;  %v1917_v60 = vld [vmem:[%s2041_s25 + $0x3b4] ss:$8 sps:$4 sm:$0xff]   ;;  %v1912_v61 = vld [vmem:[%s2041_s25 + $0x2b0] ss:$8 sps:$4 sm:$0xff]  }
  0x4e   : > { %1256 = vmatprep.subr.bf16.mxu1 %v1826_v62  ;;  %v1915_v62 = vld [vmem:[%s2041_s25 + $0x3b0] ss:$8 sps:$4 sm:$0xff]  }
  0x50   : > { %1216 = vmatpush2.bf16.msra.mxu0 %v1828_v63  ;;  %v1920_v63 = vld [vmem:[%s2041_s25 + $0x2a4] ss:$8 sps:$4 sm:$0xff]  }
  0x51   : > { %1257 = vmatpush2.bf16.msra.mxu1 %v1829_v0  ;;  %1217 = vmatprep.subr.bf16.mxu0 %v1830_v1  ;;  %v1923_v0 = vld [vmem:[%s2041_s25 + $0x3a4] ss:$8 sps:$4 sm:$0xff]   ;;  %v1918_v1 = vld [vmem:[%s2041_s25 + $0x2a0] ss:$8 sps:$4 sm:$0xff]  }
  0x52   : > { %1258 = vmatprep.subr.bf16.mxu1 %v1832_v2  ;;  %v1921_v2 = vld [vmem:[%s2041_s25 + $0x3a0] ss:$8 sps:$4 sm:$0xff]  }
  0x54   : > { %1218 = vmatpush2.bf16.msra.mxu0 %v1834_v3  ;;  %v1926_v3 = vld [vmem:[%s2041_s25 + $0x294] ss:$8 sps:$4 sm:$0xff]  }
  0x55   : > { %1259 = vmatpush2.bf16.msra.mxu1 %v1835_v4  ;;  %1269 = vmatprep.subr.bf16.mxu0 %v1842_v5  ;;  %v1929_v4 = vld [vmem:[%s2041_s25 + $0x394] ss:$8 sps:$4 sm:$0xff]   ;;  %v1924_v5 = vld [vmem:[%s2041_s25 + $0x290] ss:$8 sps:$4 sm:$0xff]  }
  0x56   : > { %1310 = vmatprep.subr.bf16.mxu1 %v1845_v6  ;;  %v1927_v6 = vld [vmem:[%s2041_s25 + $0x390] ss:$8 sps:$4 sm:$0xff]  }
  0x57   : > { %1220 = vmatmul.mubr.bf16.vlgmr.msra.gmra.mxu0 %v1553_v7  ;;  %v1932_v7 = vld [vmem:[%s2041_s25 + $0x284] ss:$8 sps:$4 sm:$0xff]  }
  0x58   : > { %1261 = vmatmul.mubr.bf16.vlgmr.msra.gmra.mxu1 %v1555_v8  ;;  %1270 = vmatpush1.bf16.msra.mxu0 %v1840_v9  ;;  %v1935_v8 = vld [vmem:[%s2041_s25 + $0x384] ss:$8 sps:$4 sm:$0xff]   ;;  %v1930_v9 = vld [vmem:[%s2041_s25 + $0x280] ss:$8 sps:$4 sm:$0xff]  }
  0x59   : > { %1311 = vmatpush1.bf16.msra.mxu1 %v1843_v10  ;;  %1271 = vmatprep.subr.bf16.mxu0 %v1848_v11  ;;  %v1933_v10 = vld [vmem:[%s2041_s25 + $0x380] ss:$8 sps:$4 sm:$0xff]   ;;  %v1940_v11 = vld [vmem:[%s2041_s25 + $0x474] ss:$8 sps:$4 sm:$0xff]  }
  0x5a   : > { %1312 = vmatprep.subr.bf16.mxu1 %v1851_v12  ;;  %1301 = vmatprep.mubr.bf16.mxu0 %v1558_v36  ;;  %v1557_v12 = vcombine.low %v2137_v33, %v2137_v33 }
  0x5b   : > { %1342 = vmatprep.mubr.bf16.mxu1 %v1560_v39 }
  0x5c   : > { %1272 = vmatpush1.bf16.msra.mxu0 %v1846_v13  ;;  %v1559_v13 = vcombine.low %v2144_v37, %v2144_v37 }
  0x5d   : > { %1313 = vmatpush1.bf16.msra.mxu1 %v1849_v14  ;;  %1273 = vmatprep.subr.bf16.mxu0 %v1854_v15  ;;  %v1938_v14 = vld [vmem:[%s2041_s25 + $0x470] ss:$8 sps:$4 sm:$0xff]   ;;  %v1945_v15 = vld [vmem:[%s2041_s25 + $0x464] ss:$8 sps:$4 sm:$0xff]  }
  0x5e   : > { %1314 = vmatprep.subr.bf16.mxu1 %v1857_v16  ;;  %v1943_v16 = vld [vmem:[%s2041_s25 + $0x460] ss:$8 sps:$4 sm:$0xff]  }
  0x60   : > { %1274 = vmatpush1.bf16.msra.mxu0 %v1852_v17  ;;  %v1990_v17 = vmov 0  }
  0x61   : > { %1315 = vmatpush1.bf16.msra.mxu1 %v1855_v18  ;;  %1275 = vmatprep.subr.bf16.mxu0 %v1860_v19  ;;  %v1948_v18 = vld [vmem:[%s2041_s25 + $0x454] ss:$8 sps:$4 sm:$0xff]   ;;  %v1946_v19 = vld [vmem:[%s2041_s25 + $0x450] ss:$8 sps:$4 sm:$0xff]  }
  0x62   : > { %1316 = vmatprep.subr.bf16.mxu1 %v1863_v20  ;;  %v1951_v20 = vld [vmem:[%s2041_s25 + $0x444] ss:$8 sps:$4 sm:$0xff]  }
  0x64   : > { %1276 = vmatpush1.bf16.msra.mxu0 %v1858_v21  ;;  %v1949_v21 = vld [vmem:[%s2041_s25 + $0x440] ss:$8 sps:$4 sm:$0xff]  }
  0x65   : > { %1317 = vmatpush1.bf16.msra.mxu1 %v1861_v22  ;;  %1277 = vmatprep.subr.bf16.mxu0 %v1866_v23  ;;  %v1954_v22 = vld [vmem:[%s2041_s25 + $0x434] ss:$8 sps:$4 sm:$0xff]   ;;  %v1952_v23 = vld [vmem:[%s2041_s25 + $0x430] ss:$8 sps:$4 sm:$0xff]  }
  0x66   : > { %1318 = vmatprep.subr.bf16.mxu1 %v1869_v24  ;;  %v1957_v24 = vld [vmem:[%s2041_s25 + $0x424] ss:$8 sps:$4 sm:$0xff]  }
  0x68   : > { %1278 = vmatpush1.bf16.msra.mxu0 %v1864_v25  ;;  %v1955_v25 = vld [vmem:[%s2041_s25 + $0x420] ss:$8 sps:$4 sm:$0xff]  }
  0x69   : > { %1319 = vmatpush1.bf16.msra.mxu1 %v1867_v26  ;;  %1279 = vmatprep.subr.bf16.mxu0 %v1872_v27  ;;  %v1960_v26 = vld [vmem:[%s2041_s25 + $0x414] ss:$8 sps:$4 sm:$0xff]   ;;  %v1958_v27 = vld [vmem:[%s2041_s25 + $0x410] ss:$8 sps:$4 sm:$0xff]  }
  0x6a   : > { %1320 = vmatprep.subr.bf16.mxu1 %v1875_v28  ;;  %v1963_v28 = vld [vmem:[%s2041_s25 + $0x404] ss:$8 sps:$4 sm:$0xff]  }
  0x6c   : > { %1280 = vmatpush1.bf16.msra.mxu0 %v1870_v29  ;;  %v1961_v29 = vld [vmem:[%s2041_s25 + $0x400] ss:$8 sps:$4 sm:$0xff]  }
  0x6d   : > { %1321 = vmatpush1.bf16.msra.mxu1 %v1873_v30  ;;  %1281 = vmatprep.subr.bf16.mxu0 %v1878_v31  ;;  %v1964_v30 = vld [vmem:[%s2036_s21 + $0x20] ss:$0 sps:$4 sm:$0xff]  }
  0x6e   : > { %1322 = vmatprep.subr.bf16.mxu1 %v1881_v32 }
  0x70   : > { %1282 = vmatpush1.bf16.msra.mxu0 %v1876_v34 }
  0x71   : > { %1323 = vmatpush1.bf16.msra.mxu1 %v1879_v35  ;;  %1283 = vmatprep.subr.bf16.mxu0 %v1884_v38 }
  0x72   : > { %1324 = vmatprep.subr.bf16.mxu1 %v1887_v40 }
  0x74   : > { %1284 = vmatpush1.bf16.msra.mxu0 %v1882_v41 }
  0x75   : > { %1325 = vmatpush1.bf16.msra.mxu1 %v1885_v42  ;;  %1285 = vmatprep.subr.bf16.mxu0 %v1890_v43 }
  0x76   : > { %1326 = vmatprep.subr.bf16.mxu1 %v1893_v44 }
  0x78   : > { %1286 = vmatpush2.bf16.msra.mxu0 %v1888_v45 }
  0x79   : > { %1327 = vmatpush2.bf16.msra.mxu1 %v1891_v46  ;;  %1287 = vmatprep.subr.bf16.mxu0 %v1896_v47 }
  0x7a   : > { %1328 = vmatprep.subr.bf16.mxu1 %v1899_v48 }
  0x7c   : > { %1288 = vmatpush2.bf16.msra.mxu0 %v1894_v49 }
  0x7d   : > { %1329 = vmatpush2.bf16.msra.mxu1 %v1897_v50  ;;  %1289 = vmatprep.subr.bf16.mxu0 %v1902_v51 }
  0x7e   : > { %1330 = vmatprep.subr.bf16.mxu1 %v1905_v52  ;;  %v284_v52 = vld [vmem:[#allocation2] sm:$0xff] }
  0x80   : > { %1290 = vmatpush2.bf16.msra.mxu0 %v1900_v53 }
  0x81   : > { %1331 = vmatpush2.bf16.msra.mxu1 %v1903_v54  ;;  %1291 = vmatprep.subr.bf16.mxu0 %v1908_v55 }
  0x82   : > { %1332 = vmatprep.subr.bf16.mxu1 %v1911_v56  ;;  %v285_v56 = vld [vmem:[#allocation2 + $0x8] sm:$0xff] }
  0x84   : > { %1292 = vmatpush2.bf16.msra.mxu0 %v1906_v57 }
  0x85   : > { %1333 = vmatpush2.bf16.msra.mxu1 %v1909_v58  ;;  %1293 = vmatprep.subr.bf16.mxu0 %v1914_v59 }
  0x86   : > { %1334 = vmatprep.subr.bf16.mxu1 %v1917_v60 }
  0x88   : > { %1294 = vmatpush2.bf16.msra.mxu0 %v1912_v61 }
  0x89   : > { %1335 = vmatpush2.bf16.msra.mxu1 %v1915_v62  ;;  %1295 = vmatprep.subr.bf16.mxu0 %v1920_v63 }
  0x8a   : > { %1336 = vmatprep.subr.bf16.mxu1 %v1923_v0 }
  0x8c   : > { %1296 = vmatpush2.bf16.msra.mxu0 %v1918_v1 }
  0x8d   : > { %1337 = vmatpush2.bf16.msra.mxu1 %v1921_v2  ;;  %1297 = vmatprep.subr.bf16.mxu0 %v1926_v3 }
  0x8e   : > { %1338 = vmatprep.subr.bf16.mxu1 %v1929_v4 }
  0x90   : > { %1298 = vmatpush2.bf16.msra.mxu0 %v1924_v5 }
  0x91   : > { %1339 = vmatpush2.bf16.msra.mxu1 %v1927_v6  ;;  %1299 = vmatprep.subr.bf16.mxu0 %v1932_v7 }
  0x92   : > { %1340 = vmatprep.subr.bf16.mxu1 %v1935_v8 }
  0x94   : > { %1300 = vmatpush2.bf16.msra.mxu0 %v1930_v9 }
  0x95   : > { %1341 = vmatpush2.bf16.msra.mxu1 %v1933_v10  ;;  %1351 = vmatprep.subr.bf16.mxu0 %v1940_v11 }
  0x97   : > { %1302 = vmatmul.mubr.bf16.vlgmr.msra.gmra.mxu0 %v1557_v12 }
  0x98   : > { %1343 = vmatmul.mubr.bf16.vlgmr.msra.gmra.mxu1 %v1559_v13  ;;  %1352 = vmatpush1.bf16.msra.mxu0 %v1938_v14 }
  0x99   : > { %1383 = vmatprep.mubr.bf16.mxu0 %v1990_v17  ;;  %1353 = vmatprep.subr.bf16.mxu0 %v1945_v15 }
  0x9c   : > { %1354 = vmatpush1.bf16.msra.mxu0 %v1943_v16 }
  0x9d   : > { %1355 = vmatprep.subr.bf16.mxu0 %v1948_v18 }
  0xa0   : > { %1356 = vmatpush1.bf16.msra.mxu0 %v1946_v19 }
  0xa1   : > { %1357 = vmatprep.subr.bf16.mxu0 %v1951_v20 }
  0xa4   : > { %1358 = vmatpush1.bf16.msra.mxu0 %v1949_v21 }
  0xa5   : > { %1359 = vmatprep.subr.bf16.mxu0 %v1954_v22 }
  0xa8   : > { %1360 = vmatpush1.bf16.msra.mxu0 %v1952_v23 }
  0xa9   : > { %1361 = vmatprep.subr.bf16.mxu0 %v1957_v24 }
  0xac   : > { %1362 = vmatpush1.bf16.msra.mxu0 %v1955_v25 }
  0xad   : > { %1363 = vmatprep.subr.bf16.mxu0 %v1960_v26 }
  0xb0   : > { %1364 = vmatpush1.bf16.msra.mxu0 %v1958_v27 }
  0xb1   : > { %1365 = vmatprep.subr.bf16.mxu0 %v1963_v28 }
  0xb4   : > { %1366 = vmatpush1.bf16.msra.mxu0 %v1961_v29 }
  0xb7   : > { %1384 = vmatmul.mubr.bf16.vlgmr.msra.gmra.mxu0 %v1964_v30 }
 0x117   : > { %v1221_v31 = vpop.f32.mrf.mxu0 }
 0x118   : > { %v1262_v32 = vpop.f32.mrf.mxu1 }
 0x119   : > { %v1263_v33 = vadd.f32 %v1262_v32, %v1221_v31  ;;  %v1223_v34 = vpop.f32.mrf.mxu0 }
 0x11a   : > { %v1264_v35 = vpop.f32.mrf.mxu1 }
 0x11b   : > { %v1265_v36 = vadd.f32 %v1264_v35, %v1223_v34  ;;  %v1225_v37 = vpop.f32.mrf.mxu0 }
 0x11c   : > { %v1266_v38 = vpop.f32.mrf.mxu1 }
 0x11d   : > { %v1226_v39 = vpop.f32.mrf.mxu0 }
 0x11e   : > { %v1267_v40 = vpop.f32.mrf.mxu1 }
 0x157   : > { %v1303_v41 = vpop.f32.mrf.mxu0 }
 0x158   : > { %v1344_v42 = vpop.f32.mrf.mxu1  ;;  %v1304_v49 = vadd.f32 %v1303_v41, %v1263_v33 }
 0x159   : > { %v1305_v43 = vpop.f32.mrf.mxu0 }
 0x15a   : > { %v1346_v44 = vpop.f32.mrf.mxu1  ;;  %v1306_v50 = vadd.f32 %v1305_v43, %v1265_v36  ;;  %v1345_v51 = vadd.f32 %v1344_v42, %v1304_v49 }
 0x15b   : > { %v1307_v45 = vpop.f32.mrf.mxu0 }
 0x15c   : > { %v1348_v46 = vpop.f32.mrf.mxu1  ;;  %v1347_v54 = vadd.f32 %v1346_v44, %v1306_v50 }
 0x15d   : > { %v1308_v47 = vpop.f32.mrf.mxu0 }
 0x15e   : > { %v1349_v48 = vpop.f32.mrf.mxu1 }
 0x177   : > { %v1385_v53 = vpop.f32.mrf.mxu0 }
 0x178   : > { %v1386_v55 = vadd.f32 %v1385_v53, %v1345_v51 }
 0x179   : > { %v1387_v57 = vpop.f32.mrf.mxu0 }
 0x17a   : > { %v1392_v58 = vadd.f32 %v1386_v55, %v284_v52  ;;  %v1388_v59 = vadd.f32 %v1387_v57, %v1347_v54  ;;  %1399 = sbr.rel (%p1706_p7) target bundleno = 398 (0x18e), region = 40 }
 0x17b   : > { %v1389_v60 = vpop.f32.mrf.mxu0 }
 0x17c   : > { %1394 = vst [vmem:[#allocation2] sm:$0xff] %v1392_v58  ;;  %v1393_v61 = vadd.f32 %v1388_v59, %v285_v56 }
 0x17d   : > { %v1390_v62 = vpop.f32.mrf.mxu0 }
 0x17e   : > { %1395 = vst [vmem:[#allocation2 + $0x8] sm:$0xff] %v1393_v61 }
 0x17f   : > { %v1404_v63 = vlaneseq  ;;  %v1402_v1 = vld [vmem:[%s2223_s2] sm:$0x3] }
 0x181   : > { %v1405_v0 = vshrl.u32 %v1404_v63, 7 }
 0x183   : > { %v1406_v2 = vsub.s32 0, %v1405_v0  ;;  %v1410_v3 = vsub.s32 1, %v1405_v0  ;;  %v1400_v4 = vld [vmem:[#allocation2] sm:$0xff] }
 0x185   : > { %v1401_v5 = vld [vmem:[#allocation2 + $0x8] sm:$0xff]  ;;  %v1407_v6 = vrot.slane %v1402_v1, %v1406_v2  ;;  %v1411_v7 = vrot.slane %v1402_v1, %v1410_v3 }
 0x187   : > { %v1414_v8 = vadd.f32 %v1407_v6, %v1400_v4  ;;  %v1415_v9 = vadd.f32 %v1411_v7, %v1401_v5 }
 0x189   : > { %v1416_v10 = vmax.f32 %v1414_v8, 0.0  ;;  %v1417_v11 = vmax.f32 %v1415_v9, 0.0 }
 0x18b   : > { %v1713_v12 = vpack.c.bf16 %v1417_v11, %v1416_v10 }
 0x18d   : > { %1426 = vst [vmem:[%s2224_s3] sm:$0xff] %v1713_v12 }
 0x18e PF: > { %s13_s14 = sadd.s32 1, %s1987_s14   ;;  %s2225_s12 = smov %s1983_s13 }
 0x18f   : > { %p10_p8 = scmp.ge.s32.totalorder %s13_s14, 4   ;;  %s2226_s13 = smov %s2228_s15 }
 0x191   :  { %12 = sbr.rel (!%p10_p8) target bundleno = 2 (0x2), region = 76 }

// kernel: model_forward.39
= control target key start
LH: loop header
LB: loop body
LE: loop exit
PB: predicated region body
PF: predicated region fallthrough
CT: control target
= control target key end

     0   :  { %s955_s1 = inlined_call_operand.vmem [shape: bf16[256,512], index: 1, kind: input, shape index: {}]   ;;  %s956_s0 = inlined_call_operand.vmem [shape: bf16[8,256], index: 0, kind: input, shape index: {}]   ;;  %s957_s2 = inlined_call_operand.vmem [shape: f32[1,512], index: 2, kind: input, shape index: {}]   ;;  %s958_s3 = inlined_call_operand.vmem [shape: bf16[8,512], index: 3, kind: output, shape index: {}]  }
   0x1   :  { %v633_v0 = vld [vmem:[%s955_s1 + $0xe4] ss:$16 sps:$4 sm:$0xff]   ;;  %v635_v1 = vld [vmem:[%s955_s1 + $0xec] ss:$16 sps:$4 sm:$0xff]   ;;  %v637_v2 = vld [vmem:[%s955_s1 + $0xe0] ss:$16 sps:$4 sm:$0xff]  }
   0x2   :  { %418 = vmatprep.subr.bf16.mxu0 %v633_v0  ;;  %v638_v3 = vld [vmem:[%s955_s1 + $0xe8] ss:$16 sps:$4 sm:$0xff]   ;;  %459 = vmatprep.subr.bf16.mxu1 %v635_v1  ;;  %v639_v4 = vld [vmem:[%s955_s1 + $0xc4] ss:$16 sps:$4 sm:$0xff]   ;;  %v641_v5 = vld [vmem:[%s955_s1 + $0xcc] ss:$16 sps:$4 sm:$0xff]  }
   0x3   :  { %419 = vmatpush1.bf16.msra.mxu0 %v637_v2  ;;  %460 = vmatpush1.bf16.msra.mxu1 %v638_v3  ;;  %v643_v6 = vld [vmem:[%s955_s1 + $0xc0] ss:$16 sps:$4 sm:$0xff]   ;;  %v644_v7 = vld [vmem:[%s955_s1 + $0xc8] ss:$16 sps:$4 sm:$0xff]   ;;  %v645_v8 = vld [vmem:[%s955_s1 + $0xa4] ss:$16 sps:$4 sm:$0xff]   ;;  %v517_v3 = vlaneseq }
   0x4   :  { %420 = vmatprep.subr.bf16.mxu0 %v639_v4  ;;  %461 = vmatprep.subr.bf16.mxu1 %v641_v5  ;;  %v647_v9 = vld [vmem:[%s955_s1 + $0xac] ss:$16 sps:$4 sm:$0xff]   ;;  %v649_v10 = vld [vmem:[%s955_s1 + $0xa0] ss:$16 sps:$4 sm:$0xff]   ;;  %v650_v11 = vld [vmem:[%s955_s1 + $0xa8] ss:$16 sps:$4 sm:$0xff]  }
   0x5   :  { %v651_v12 = vld [vmem:[%s955_s1 + $0x84] ss:$16 sps:$4 sm:$0xff]   ;;  %v653_v13 = vld [vmem:[%s955_s1 + $0x8c] ss:$16 sps:$4 sm:$0xff]   ;;  %v655_v14 = vld [vmem:[%s955_s1 + $0x80] ss:$16 sps:$4 sm:$0xff]  }
   0x6   :  { %v656_v15 = vld [vmem:[%s955_s1 + $0x88] ss:$16 sps:$4 sm:$0xff]   ;;  %v657_v16 = vld [vmem:[%s955_s1 + $0x64] ss:$16 sps:$4 sm:$0xff]   ;;  %v659_v17 = vld [vmem:[%s955_s1 + $0x6c] ss:$16 sps:$4 sm:$0xff]  }
   0x7   :  { %421 = vmatpush1.bf16.msra.mxu0 %v643_v6  ;;  %462 = vmatpush1.bf16.msra.mxu1 %v644_v7  ;;  %v661_v18 = vld [vmem:[%s955_s1 + $0x60] ss:$16 sps:$4 sm:$0xff]   ;;  %v662_v19 = vld [vmem:[%s955_s1 + $0x68] ss:$16 sps:$4 sm:$0xff]   ;;  %v663_v20 = vld [vmem:[%s955_s1 + $0x44] ss:$16 sps:$4 sm:$0xff]  }
   0x8   :  { %422 = vmatprep.subr.bf16.mxu0 %v645_v8  ;;  %463 = vmatprep.subr.bf16.mxu1 %v647_v9  ;;  %v665_v21 = vld [vmem:[%s955_s1 + $0x4c] ss:$16 sps:$4 sm:$0xff]   ;;  %v667_v22 = vld [vmem:[%s955_s1 + $0x40] ss:$16 sps:$4 sm:$0xff]   ;;  %v668_v23 = vld [vmem:[%s955_s1 + $0x48] ss:$16 sps:$4 sm:$0xff]  }
   0x9   :  { %v669_v24 = vld [vmem:[%s955_s1 + $0x24] ss:$16 sps:$4 sm:$0xff]   ;;  %v671_v25 = vld [vmem:[%s955_s1 + $0x2c] ss:$16 sps:$4 sm:$0xff]   ;;  %v673_v26 = vld [vmem:[%s955_s1 + $0x20] ss:$16 sps:$4 sm:$0xff]  }
   0xa   :  { %v674_v27 = vld [vmem:[%s955_s1 + $0x28] ss:$16 sps:$4 sm:$0xff]   ;;  %v675_v28 = vld [vmem:[%s955_s1 + $0x4] ss:$16 sps:$4 sm:$0xff]   ;;  %v677_v29 = vld [vmem:[%s955_s1 + $0xc] ss:$16 sps:$4 sm:$0xff]  }
   0xb   :  { %423 = vmatpush1.bf16.msra.mxu0 %v649_v10  ;;  %464 = vmatpush1.bf16.msra.mxu1 %v650_v11  ;;  %v679_v30 = vld [vmem:[%s955_s1] ss:$16 sps:$4 sm:$0xff]   ;;  %v680_v31 = vld [vmem:[%s955_s1 + $0x8] ss:$16 sps:$4 sm:$0xff]   ;;  %v681_v32 = vld [vmem:[%s955_s1 + $0x1e4] ss:$16 sps:$4 sm:$0xff]  }
   0xc   :  { %424 = vmatprep.subr.bf16.mxu0 %v651_v12  ;;  %465 = vmatprep.subr.bf16.mxu1 %v653_v13  ;;  %v683_v33 = vld [vmem:[%s955_s1 + $0x1ec] ss:$16 sps:$4 sm:$0xff]   ;;  %v685_v34 = vld [vmem:[%s955_s1 + $0x1e0] ss:$16 sps:$4 sm:$0xff]   ;;  %v686_v35 = vld [vmem:[%s955_s1 + $0x1e8] ss:$16 sps:$4 sm:$0xff]  }
   0xd   :  { %v687_v36 = vld [vmem:[%s955_s1 + $0x1c4] ss:$16 sps:$4 sm:$0xff]   ;;  %v689_v37 = vld [vmem:[%s955_s1 + $0x1cc] ss:$16 sps:$4 sm:$0xff]   ;;  %v691_v38 = vld [vmem:[%s955_s1 + $0x1c0] ss:$16 sps:$4 sm:$0xff]  }
   0xe   :  { %v692_v39 = vld [vmem:[%s955_s1 + $0x1c8] ss:$16 sps:$4 sm:$0xff]   ;;  %v693_v40 = vld [vmem:[%s955_s1 + $0x1a4] ss:$16 sps:$4 sm:$0xff]   ;;  %v695_v41 = vld [vmem:[%s955_s1 + $0x1ac] ss:$16 sps:$4 sm:$0xff]  }
   0xf   :  { %425 = vmatpush1.bf16.msra.mxu0 %v655_v14  ;;  %466 = vmatpush1.bf16.msra.mxu1 %v656_v15  ;;  %v697_v42 = vld [vmem:[%s955_s1 + $0x1a0] ss:$16 sps:$4 sm:$0xff]   ;;  %v698_v43 = vld [vmem:[%s955_s1 + $0x1a8] ss:$16 sps:$4 sm:$0xff]   ;;  %v699_v44 = vld [vmem:[%s955_s1 + $0x184] ss:$16 sps:$4 sm:$0xff]  }
  0x10   :  { %426 = vmatprep.subr.bf16.mxu0 %v657_v16  ;;  %467 = vmatprep.subr.bf16.mxu1 %v659_v17  ;;  %v701_v45 = vld [vmem:[%s955_s1 + $0x18c] ss:$16 sps:$4 sm:$0xff]   ;;  %v26_v46 = vld [vmem:[%s956_s0] sm:$0xff]  ;;  %v704_v49 = vld [vmem:[%s955_s1 + $0x188] ss:$16 sps:$4 sm:$0xff]   ;;  %v518_v4 = vshrl.u32 %v517_v3, 7 }
  0x11   :  { %v564_v47 = vcombine.high %v26_v46, %v26_v46  ;;  %v703_v48 = vld [vmem:[%s955_s1 + $0x180] ss:$16 sps:$4 sm:$0xff]   ;;  %v705_v50 = vld [vmem:[%s955_s1 + $0x164] ss:$16 sps:$4 sm:$0xff]   ;;  %v707_v51 = vld [vmem:[%s955_s1 + $0x16c] ss:$16 sps:$4 sm:$0xff]   ;;  %v563_v2 = vcombine.low %v26_v46, %v26_v46 }
  0x12   :  { %v709_v52 = vld [vmem:[%s955_s1 + $0x160] ss:$16 sps:$4 sm:$0xff]   ;;  %v710_v53 = vld [vmem:[%s955_s1 + $0x168] ss:$16 sps:$4 sm:$0xff]   ;;  %v711_v54 = vld [vmem:[%s955_s1 + $0x144] ss:$16 sps:$4 sm:$0xff]  }
  0x13   :  { %427 = vmatpush1.bf16.msra.mxu0 %v661_v18  ;;  %468 = vmatpush1.bf16.msra.mxu1 %v662_v19  ;;  %v713_v55 = vld [vmem:[%s955_s1 + $0x14c] ss:$16 sps:$4 sm:$0xff]   ;;  %v715_v56 = vld [vmem:[%s955_s1 + $0x140] ss:$16 sps:$4 sm:$0xff]   ;;  %v716_v57 = vld [vmem:[%s955_s1 + $0x148] ss:$16 sps:$4 sm:$0xff]  }
  0x14   :  { %428 = vmatprep.subr.bf16.mxu0 %v663_v20  ;;  %469 = vmatprep.subr.bf16.mxu1 %v665_v21  ;;  %v717_v58 = vld [vmem:[%s955_s1 + $0x124] ss:$16 sps:$4 sm:$0xff]   ;;  %v719_v59 = vld [vmem:[%s955_s1 + $0x12c] ss:$16 sps:$4 sm:$0xff]   ;;  %v721_v60 = vld [vmem:[%s955_s1 + $0x120] ss:$16 sps:$4 sm:$0xff]  }
  0x15   :  { %450 = vmatprep.mubr.bf16.mxu0 %v564_v47  ;;  %491 = vmatprep.mubr.bf16.mxu1 %v564_v47  ;;  %v722_v61 = vld [vmem:[%s955_s1 + $0x128] ss:$16 sps:$4 sm:$0xff]   ;;  %v723_v62 = vld [vmem:[%s955_s1 + $0x104] ss:$16 sps:$4 sm:$0xff]   ;;  %v725_v63 = vld [vmem:[%s955_s1 + $0x10c] ss:$16 sps:$4 sm:$0xff]  }
  0x16   :  { %v727_v0 = vld [vmem:[%s955_s1 + $0x100] ss:$16 sps:$4 sm:$0xff]   ;;  %v728_v1 = vld [vmem:[%s955_s1 + $0x108] ss:$16 sps:$4 sm:$0xff]   ;;  %v519_v5 = vsub.s32 0, %v518_v4  ;;  %v527_v6 = vsub.s32 2, %v518_v4 }
  0x17   :  { %429 = vmatpush1.bf16.msra.mxu0 %v667_v22  ;;  %470 = vmatpush1.bf16.msra.mxu1 %v668_v23  ;;  %v523_v7 = vsub.s32 1, %v518_v4  ;;  %v531_v8 = vsub.s32 3, %v518_v4  ;;  %v515_v9 = vld [vmem:[%s957_s2] sm:$0xf] }
  0x18   :  { %430 = vmatprep.subr.bf16.mxu0 %v669_v24  ;;  %471 = vmatprep.subr.bf16.mxu1 %v671_v25  ;;  %v520_v10 = vrot.slane %v515_v9, %v519_v5  ;;  %v528_v11 = vrot.slane %v515_v9, %v527_v6 }
  0x19   :  { %v524_v12 = vrot.slane %v515_v9, %v523_v7  ;;  %v532_v13 = vrot.slane %v515_v9, %v531_v8 }
  0x1b   :  { %431 = vmatpush1.bf16.msra.mxu0 %v673_v26  ;;  %472 = vmatpush1.bf16.msra.mxu1 %v674_v27 }
  0x1c   :  { %432 = vmatprep.subr.bf16.mxu0 %v675_v28  ;;  %473 = vmatprep.subr.bf16.mxu1 %v677_v29 }
  0x1f   :  { %433 = vmatpush1.bf16.msra.mxu0 %v679_v30  ;;  %474 = vmatpush1.bf16.msra.mxu1 %v680_v31 }
  0x20   :  { %434 = vmatprep.subr.bf16.mxu0 %v681_v32  ;;  %475 = vmatprep.subr.bf16.mxu1 %v683_v33 }
  0x23   :  { %435 = vmatpush2.bf16.msra.mxu0 %v685_v34  ;;  %476 = vmatpush2.bf16.msra.mxu1 %v686_v35 }
  0x24   :  { %436 = vmatprep.subr.bf16.mxu0 %v687_v36  ;;  %477 = vmatprep.subr.bf16.mxu1 %v689_v37 }
  0x27   :  { %437 = vmatpush2.bf16.msra.mxu0 %v691_v38  ;;  %478 = vmatpush2.bf16.msra.mxu1 %v692_v39 }
  0x28   :  { %438 = vmatprep.subr.bf16.mxu0 %v693_v40  ;;  %479 = vmatprep.subr.bf16.mxu1 %v695_v41 }
  0x2b   :  { %439 = vmatpush2.bf16.msra.mxu0 %v697_v42  ;;  %480 = vmatpush2.bf16.msra.mxu1 %v698_v43 }
  0x2c   :  { %440 = vmatprep.subr.bf16.mxu0 %v699_v44  ;;  %481 = vmatprep.subr.bf16.mxu1 %v701_v45 }
  0x2f   :  { %441 = vmatpush2.bf16.msra.mxu0 %v703_v48  ;;  %482 = vmatpush2.bf16.msra.mxu1 %v704_v49 }
  0x30   :  { %442 = vmatprep.subr.bf16.mxu0 %v705_v50  ;;  %483 = vmatprep.subr.bf16.mxu1 %v707_v51 }
  0x33   :  { %443 = vmatpush2.bf16.msra.mxu0 %v709_v52  ;;  %484 = vmatpush2.bf16.msra.mxu1 %v710_v53 }
  0x34   :  { %444 = vmatprep.subr.bf16.mxu0 %v711_v54  ;;  %485 = vmatprep.subr.bf16.mxu1 %v713_v55 }
  0x37   :  { %445 = vmatpush2.bf16.msra.mxu0 %v715_v56  ;;  %486 = vmatpush2.bf16.msra.mxu1 %v716_v57 }
  0x38   :  { %446 = vmatprep.subr.bf16.mxu0 %v717_v58  ;;  %487 = vmatprep.subr.bf16.mxu1 %v719_v59 }
  0x3b   :  { %447 = vmatpush2.bf16.msra.mxu0 %v721_v60  ;;  %488 = vmatpush2.bf16.msra.mxu1 %v722_v61 }
  0x3c   :  { %448 = vmatprep.subr.bf16.mxu0 %v723_v62  ;;  %489 = vmatprep.subr.bf16.mxu1 %v725_v63 }
  0x3f   :  { %449 = vmatpush2.bf16.msra.mxu0 %v727_v0  ;;  %490 = vmatpush2.bf16.msra.mxu1 %v728_v1 }
  0x42   :  { %451 = vmatmul.mubr.bf16.vlgmr.msra.gmra.mxu0 %v563_v2  ;;  %492 = vmatmul.mubr.bf16.vlgmr.msra.gmra.mxu1 %v563_v2 }
 0x102   :  { %v452_v14 = vpop.f32.mrf.mxu0  ;;  %v493_v15 = vpop.f32.mrf.mxu1 }
 0x103   :  { %v537_v18 = vadd.f32 %v520_v10, %v452_v14  ;;  %v539_v19 = vadd.f32 %v528_v11, %v493_v15 }
 0x104   :  { %v454_v16 = vpop.f32.mrf.mxu0  ;;  %v495_v17 = vpop.f32.mrf.mxu1 }
 0x105   :  { %v538_v20 = vadd.f32 %v524_v12, %v454_v16  ;;  %v540_v21 = vadd.f32 %v532_v13, %v495_v17 }
 0x106   :  { %v456_v22 = vpop.f32.mrf.mxu0  ;;  %v497_v23 = vpop.f32.mrf.mxu1 }
 0x107   :  { %v631_v24 = vpack.c.bf16 %v538_v20, %v537_v18  ;;  %v632_v25 = vpack.c.bf16 %v540_v21, %v539_v19 }
 0x108   :  { %v457_v26 = vpop.f32.mrf.mxu0  ;;  %v498_v27 = vpop.f32.mrf.mxu1 }
 0x109   :  { %557 = vst [vmem:[%s958_s3] sm:$0xff] %v631_v24  ;;  %558 = vst [vmem:[%s958_s3 + $0x8] sm:$0xff] %v632_v25 }

// kernel: model_forward.38
= control target key start
LH: loop header
LB: loop body
LE: loop exit
PB: predicated region body
PF: predicated region fallthrough
CT: control target
= control target key end

     0   :  { %s3475_s12 = smov 0   ;;  %s3477_s13 = smov 0   ;;  %s3876_s0 = inlined_call_operand.vmem [shape: bf16[8,2304], index: 0, kind: input, shape index: {}]   ;;  %s3877_s1 = inlined_call_operand.vmem [shape: bf16[2304,512], index: 1, kind: input, shape index: {}]   ;;  %s3878_s2 = inlined_call_operand.vmem [shape: f32[1,512], index: 2, kind: input, shape index: {}]   ;;  %s3879_s3 = inlined_call_operand.vmem [shape: bf16[8,512], index: 3, kind: output, shape index: {}]  }
   0x1   :  { %s3479_s14 = smov 0  }
   0x2 LB: > { %s25_s15 = sadd.s32 1, %s3447_s13  ;;  %p2650_p0 = scmp.ge.s32.totalorder %s3451_s14, 1  ;;  %s3451_s14 = sphi %s3479_s14, %s13_s14   ;;  %s3447_s13 = sphi %s3477_s13, %s3881_s13   ;;  %s3443_s12 = sphi %s3475_s12, %s3880_s12  }
   0x3   : > { %p26_p1 = scmp.ge.s32.totalorder %s25_s15, 2  ;;  %p194_p2 = scmp.lt.s32.totalorder %s3451_s14, 3 }
   0x5   : > { %s3883_s15 = smov (%p26_p1, %s25_s15), 0  ;;  %p195_p3 = pnand %p2650_p0, %p194_p2 }
   0x6   : > { %s240_s16 = smul.u32 (!%p195_p3), 9, %s3443_s12  ;;  %p2654_p6 = scmp.ne.s32.totalorder (!%p195_p3), %s3443_s12, 0 }
   0x7   : > { %198 = sbr.rel (%p195_p3) target bundleno = 529 (0x211), region = 32 }
   0x8   : > { %s250_s17 = smul.u32 (!%p195_p3), 144, %s3443_s12  ;;  %p243_p4 = scmp.lt.s32.totalorder (!%p195_p3), %s240_s16, 17 }
   0xa   : > { %p252_p5 = scmp.lt.s32.totalorder (!%p195_p3), %s250_s17, 287 }
   0xc   : > { %s3885_s16 = smov (!%p243_p4, %s240_s16), 17  ;;  %s3887_s17 = smov (!%p252_p5, %s250_s17), 287 }
   0xd   : > { %s2651_s18 = sshll.u32 %s3885_s16, 2  ;;  %s2959_s22 = sshll.u32 %s3887_s17, 4 }
   0xe   : > { %s3500_s21 = scalar_lea.vmem %s3876_s0, %s2651_s18  ;;  %s3505_s25 = scalar_lea.vmem %s3877_s1, %s2959_s22 }
   0xf   : > { %281 = sbr.rel (%p2654_p6) target bundleno = 23 (0x17), region = 36 }
  0x14   : > { %v3453_v0 = vmov 0.0  }
  0x15   : > { %282 = vst [vmem:[#allocation2 + $0x10] sm:$0xff] %v3453_v0  ;;  %283 = vst [vmem:[#allocation2] sm:$0xff] %v3453_v0 }
  0x16   : > { %284 = vst [vmem:[#allocation2 + $0x18] sm:$0xff] %v3453_v0  ;;  %285 = vst [vmem:[#allocation2 + $0x8] sm:$0xff] %v3453_v0 }
  0x17 PF: > { %v2988_v1 = vld [vmem:[%s3505_s25 + $0xe4] ss:$16 sps:$4 sm:$0xff]   ;;  %v2992_v3 = vld [vmem:[%s3505_s25 + $0xe0] ss:$16 sps:$4 sm:$0xff]   ;;  %v291_v49 = vld [vmem:[%s3500_s21 + $0x8] sm:$0xff]  ;;  %p2952_p7 = scmp.ne.s32.totalorder %s3443_s12, 1 }
  0x18   : > { %v2990_v2 = vld [vmem:[%s3505_s25 + $0x2e4] ss:$16 sps:$4 sm:$0xff]   ;;  %2055 = vmatprep.subr.bf16.mxu0 %v2988_v1  ;;  %v2993_v4 = vld [vmem:[%s3505_s25 + $0x2e0] ss:$16 sps:$4 sm:$0xff]   ;;  %v3560_v52 = vcombine.high %v291_v49, %v291_v49 }
  0x19   : > { %2096 = vmatprep.subr.bf16.mxu1 %v2990_v2  ;;  %v2994_v5 = vld [vmem:[%s3505_s25 + $0xc4] ss:$16 sps:$4 sm:$0xff]   ;;  %2056 = vmatpush1.bf16.msra.mxu0 %v2992_v3  ;;  %v2998_v7 = vld [vmem:[%s3505_s25 + $0xc0] ss:$16 sps:$4 sm:$0xff]  }
  0x1a   : > { %2097 = vmatpush1.bf16.msra.mxu1 %v2993_v4  ;;  %v2996_v6 = vld [vmem:[%s3505_s25 + $0x2c4] ss:$16 sps:$4 sm:$0xff]   ;;  %2057 = vmatprep.subr.bf16.mxu0 %v2994_v5  ;;  %v2999_v8 = vld [vmem:[%s3505_s25 + $0x2c0] ss:$16 sps:$4 sm:$0xff]  }
  0x1b   : > { %2098 = vmatprep.subr.bf16.mxu1 %v2996_v6  ;;  %v3000_v9 = vld [vmem:[%s3505_s25 + $0xa4] ss:$16 sps:$4 sm:$0xff]   ;;  %v3004_v11 = vld [vmem:[%s3505_s25 + $0xa0] ss:$16 sps:$4 sm:$0xff]   ;;  %2128 = vmatprep.mubr.bf16.mxu1 %v3560_v52 }
  0x1c   : > { %v3002_v10 = vld [vmem:[%s3505_s25 + $0x2a4] ss:$16 sps:$4 sm:$0xff]   ;;  %v3005_v12 = vld [vmem:[%s3505_s25 + $0x2a0] ss:$16 sps:$4 sm:$0xff]  }
  0x1d   : > { %2058 = vmatpush1.bf16.msra.mxu0 %v2998_v7  ;;  %v3006_v13 = vld [vmem:[%s3505_s25 + $0x84] ss:$16 sps:$4 sm:$0xff]   ;;  %v3010_v15 = vld [vmem:[%s3505_s25 + $0x80] ss:$16 sps:$4 sm:$0xff]  }
  0x1e   : > { %2099 = vmatpush1.bf16.msra.mxu1 %v2999_v8  ;;  %2059 = vmatprep.subr.bf16.mxu0 %v3000_v9  ;;  %v3008_v14 = vld [vmem:[%s3505_s25 + $0x284] ss:$16 sps:$4 sm:$0xff]   ;;  %v3011_v16 = vld [vmem:[%s3505_s25 + $0x280] ss:$16 sps:$4 sm:$0xff]   ;;  %v3584_v8 = vcombine.low %v291_v49, %v291_v49 }
  0x1f   : > { %2100 = vmatprep.subr.bf16.mxu1 %v3002_v10  ;;  %v3012_v17 = vld [vmem:[%s3505_s25 + $0x64] ss:$16 sps:$4 sm:$0xff]   ;;  %v3016_v19 = vld [vmem:[%s3505_s25 + $0x60] ss:$16 sps:$4 sm:$0xff]  }
  0x20   : > { %v3014_v18 = vld [vmem:[%s3505_s25 + $0x264] ss:$16 sps:$4 sm:$0xff]   ;;  %v3017_v20 = vld [vmem:[%s3505_s25 + $0x260] ss:$16 sps:$4 sm:$0xff]  }
  0x21   : > { %2060 = vmatpush1.bf16.msra.mxu0 %v3004_v11  ;;  %v3018_v21 = vld [vmem:[%s3505_s25 + $0x44] ss:$16 sps:$4 sm:$0xff]   ;;  %v3022_v23 = vld [vmem:[%s3505_s25 + $0x40] ss:$16 sps:$4 sm:$0xff]  }
  0x22   : > { %2101 = vmatpush1.bf16.msra.mxu1 %v3005_v12  ;;  %2061 = vmatprep.subr.bf16.mxu0 %v3006_v13  ;;  %v3020_v22 = vld [vmem:[%s3505_s25 + $0x244] ss:$16 sps:$4 sm:$0xff]   ;;  %v3023_v24 = vld [vmem:[%s3505_s25 + $0x240] ss:$16 sps:$4 sm:$0xff]  }
  0x23   : > { %2102 = vmatprep.subr.bf16.mxu1 %v3008_v14  ;;  %v3024_v25 = vld [vmem:[%s3505_s25 + $0x24] ss:$16 sps:$4 sm:$0xff]   ;;  %v3028_v27 = vld [vmem:[%s3505_s25 + $0x20] ss:$16 sps:$4 sm:$0xff]  }
  0x24   : > { %v3026_v26 = vld [vmem:[%s3505_s25 + $0x224] ss:$16 sps:$4 sm:$0xff]   ;;  %v3029_v28 = vld [vmem:[%s3505_s25 + $0x220] ss:$16 sps:$4 sm:$0xff]  }
  0x25   : > { %2062 = vmatpush1.bf16.msra.mxu0 %v3010_v15  ;;  %v3030_v29 = vld [vmem:[%s3505_s25 + $0x4] ss:$16 sps:$4 sm:$0xff]   ;;  %v3034_v31 = vld [vmem:[%s3505_s25] ss:$16 sps:$4 sm:$0xff]  }
  0x26   : > { %2103 = vmatpush1.bf16.msra.mxu1 %v3011_v16  ;;  %2063 = vmatprep.subr.bf16.mxu0 %v3012_v17  ;;  %v3032_v30 = vld [vmem:[%s3505_s25 + $0x204] ss:$16 sps:$4 sm:$0xff]   ;;  %v3035_v32 = vld [vmem:[%s3505_s25 + $0x200] ss:$16 sps:$4 sm:$0xff]  }
  0x27   : > { %2104 = vmatprep.subr.bf16.mxu1 %v3014_v18  ;;  %v3036_v33 = vld [vmem:[%s3505_s25 + $0x1e4] ss:$16 sps:$4 sm:$0xff]   ;;  %v3040_v35 = vld [vmem:[%s3505_s25 + $0x1e0] ss:$16 sps:$4 sm:$0xff]  }
  0x28   : > { %v3038_v34 = vld [vmem:[%s3505_s25 + $0x3e4] ss:$16 sps:$4 sm:$0xff]   ;;  %v3041_v36 = vld [vmem:[%s3505_s25 + $0x3e0] ss:$16 sps:$4 sm:$0xff]  }
  0x29   : > { %2064 = vmatpush1.bf16.msra.mxu0 %v3016_v19  ;;  %v3042_v37 = vld [vmem:[%s3505_s25 + $0x1c4] ss:$16 sps:$4 sm:$0xff]   ;;  %v3046_v39 = vld [vmem:[%s3505_s25 + $0x1c0] ss:$16 sps:$4 sm:$0xff]  }
  0x2a   : > { %2105 = vmatpush1.bf16.msra.mxu1 %v3017_v20  ;;  %2065 = vmatprep.subr.bf16.mxu0 %v3018_v21  ;;  %v3044_v38 = vld [vmem:[%s3505_s25 + $0x3c4] ss:$16 sps:$4 sm:$0xff]   ;;  %v3047_v40 = vld [vmem:[%s3505_s25 + $0x3c0] ss:$16 sps:$4 sm:$0xff]  }
  0x2b   : > { %2106 = vmatprep.subr.bf16.mxu1 %v3020_v22  ;;  %v3048_v41 = vld [vmem:[%s3505_s25 + $0x1a4] ss:$16 sps:$4 sm:$0xff]   ;;  %v3052_v43 = vld [vmem:[%s3505_s25 + $0x1a0] ss:$16 sps:$4 sm:$0xff]  }
  0x2c   : > { %v3050_v42 = vld [vmem:[%s3505_s25 + $0x3a4] ss:$16 sps:$4 sm:$0xff]   ;;  %v3053_v44 = vld [vmem:[%s3505_s25 + $0x3a0] ss:$16 sps:$4 sm:$0xff]  }
  0x2d   : > { %2066 = vmatpush1.bf16.msra.mxu0 %v3022_v23  ;;  %v3054_v45 = vld [vmem:[%s3505_s25 + $0x184] ss:$16 sps:$4 sm:$0xff]   ;;  %v3058_v50 = vld [vmem:[%s3505_s25 + $0x180] ss:$16 sps:$4 sm:$0xff]  }
  0x2e   : > { %2107 = vmatpush1.bf16.msra.mxu1 %v3023_v24  ;;  %2067 = vmatprep.subr.bf16.mxu0 %v3024_v25  ;;  %v3056_v46 = vld [vmem:[%s3505_s25 + $0x384] ss:$16 sps:$4 sm:$0xff]   ;;  %v3059_v51 = vld [vmem:[%s3505_s25 + $0x380] ss:$16 sps:$4 sm:$0xff]  }
  0x2f   : > { %2108 = vmatprep.subr.bf16.mxu1 %v3026_v26  ;;  %v290_v47 = vld [vmem:[%s3500_s21] sm:$0xff] }
  0x30   : > { %v3555_v48 = vcombine.high %v290_v47, %v290_v47  ;;  %v3060_v53 = vld [vmem:[%s3505_s25 + $0x164] ss:$16 sps:$4 sm:$0xff]   ;;  %v3064_v55 = vld [vmem:[%s3505_s25 + $0x160] ss:$16 sps:$4 sm:$0xff]   ;;  %v3582_v7 = vcombine.low %v290_v47, %v290_v47 }
  0x31   : > { %2068 = vmatpush1.bf16.msra.mxu0 %v3028_v27  ;;  %v3062_v54 = vld [vmem:[%s3505_s25 + $0x364] ss:$16 sps:$4 sm:$0xff]   ;;  %v3065_v56 = vld [vmem:[%s3505_s25 + $0x360] ss:$16 sps:$4 sm:$0xff]  }
  0x32   : > { %2109 = vmatpush1.bf16.msra.mxu1 %v3029_v28  ;;  %2069 = vmatprep.subr.bf16.mxu0 %v3030_v29  ;;  %v3066_v57 = vld [vmem:[%s3505_s25 + $0x144] ss:$16 sps:$4 sm:$0xff]   ;;  %v3070_v59 = vld [vmem:[%s3505_s25 + $0x140] ss:$16 sps:$4 sm:$0xff]  }
  0x33   : > { %2110 = vmatprep.subr.bf16.mxu1 %v3032_v30  ;;  %2087 = vmatprep.mubr.bf16.mxu0 %v3555_v48  ;;  %v3068_v58 = vld [vmem:[%s3505_s25 + $0x344] ss:$16 sps:$4 sm:$0xff]   ;;  %v3071_v60 = vld [vmem:[%s3505_s25 + $0x340] ss:$16 sps:$4 sm:$0xff]  }
  0x34   : > { %v3072_v61 = vld [vmem:[%s3505_s25 + $0x124] ss:$16 sps:$4 sm:$0xff]   ;;  %v3076_v63 = vld [vmem:[%s3505_s25 + $0x120] ss:$16 sps:$4 sm:$0xff]  }
  0x35   : > { %2070 = vmatpush1.bf16.msra.mxu0 %v3034_v31  ;;  %v3074_v62 = vld [vmem:[%s3505_s25 + $0x324] ss:$16 sps:$4 sm:$0xff]   ;;  %v3077_v0 = vld [vmem:[%s3505_s25 + $0x320] ss:$16 sps:$4 sm:$0xff]  }
  0x36   : > { %2111 = vmatpush1.bf16.msra.mxu1 %v3035_v32  ;;  %2071 = vmatprep.subr.bf16.mxu0 %v3036_v33  ;;  %v3078_v1 = vld [vmem:[%s3505_s25 + $0x104] ss:$16 sps:$4 sm:$0xff]   ;;  %v3082_v3 = vld [vmem:[%s3505_s25 + $0x100] ss:$16 sps:$4 sm:$0xff]  }
  0x37   : > { %2112 = vmatprep.subr.bf16.mxu1 %v3038_v34  ;;  %v3080_v2 = vld [vmem:[%s3505_s25 + $0x304] ss:$16 sps:$4 sm:$0xff]   ;;  %v3083_v4 = vld [vmem:[%s3505_s25 + $0x300] ss:$16 sps:$4 sm:$0xff]   ;;  %v3616_v34 = vld [vmem:[%s3500_s21 + $0x18] sm:$0xff] }
  0x38   : > { %v3090_v5 = vld [vmem:[%s3505_s25 + $0x4e4] ss:$16 sps:$4 sm:$0xff]   ;;  %v3088_v9 = vld [vmem:[%s3505_s25 + $0x4e0] ss:$16 sps:$4 sm:$0xff]  }
  0x39   : > { %2072 = vmatpush2.bf16.msra.mxu0 %v3040_v35  ;;  %v3093_v6 = vld [vmem:[%s3505_s25 + $0x6e4] ss:$16 sps:$4 sm:$0xff]   ;;  %v3091_v10 = vld [vmem:[%s3505_s25 + $0x6e0] ss:$16 sps:$4 sm:$0xff]  }
  0x3a   : > { %2113 = vmatpush2.bf16.msra.mxu1 %v3041_v36  ;;  %2073 = vmatprep.subr.bf16.mxu0 %v3042_v37  ;;  %v3096_v11 = vld [vmem:[%s3505_s25 + $0x4c4] ss:$16 sps:$4 sm:$0xff]   ;;  %v3094_v13 = vld [vmem:[%s3505_s25 + $0x4c0] ss:$16 sps:$4 sm:$0xff]  }
  0x3b   : > { %2114 = vmatprep.subr.bf16.mxu1 %v3044_v38  ;;  %v3099_v12 = vld [vmem:[%s3505_s25 + $0x6c4] ss:$16 sps:$4 sm:$0xff]   ;;  %v3097_v14 = vld [vmem:[%s3505_s25 + $0x6c0] ss:$16 sps:$4 sm:$0xff]   ;;  %v3626_v38 = vcombine.high %v3616_v34, %v3616_v34 }
  0x3c   : > { %v3102_v15 = vld [vmem:[%s3505_s25 + $0x4a4] ss:$16 sps:$4 sm:$0xff]   ;;  %v3100_v17 = vld [vmem:[%s3505_s25 + $0x4a0] ss:$16 sps:$4 sm:$0xff]  }
  0x3d   : > { %2074 = vmatpush2.bf16.msra.mxu0 %v3046_v39  ;;  %v3105_v16 = vld [vmem:[%s3505_s25 + $0x6a4] ss:$16 sps:$4 sm:$0xff]   ;;  %v3103_v18 = vld [vmem:[%s3505_s25 + $0x6a0] ss:$16 sps:$4 sm:$0xff]  }
  0x3e   : > { %2115 = vmatpush2.bf16.msra.mxu1 %v3047_v40  ;;  %2075 = vmatprep.subr.bf16.mxu0 %v3048_v41  ;;  %v3108_v19 = vld [vmem:[%s3505_s25 + $0x484] ss:$16 sps:$4 sm:$0xff]   ;;  %v3106_v21 = vld [vmem:[%s3505_s25 + $0x480] ss:$16 sps:$4 sm:$0xff]  }
  0x3f   : > { %2116 = vmatprep.subr.bf16.mxu1 %v3050_v42  ;;  %v3111_v20 = vld [vmem:[%s3505_s25 + $0x684] ss:$16 sps:$4 sm:$0xff]   ;;  %v3109_v22 = vld [vmem:[%s3505_s25 + $0x680] ss:$16 sps:$4 sm:$0xff]  }
  0x40   : > { %v3114_v23 = vld [vmem:[%s3505_s25 + $0x464] ss:$16 sps:$4 sm:$0xff]   ;;  %v3112_v25 = vld [vmem:[%s3505_s25 + $0x460] ss:$16 sps:$4 sm:$0xff]  }
  0x41   : > { %2076 = vmatpush2.bf16.msra.mxu0 %v3052_v43  ;;  %v3117_v24 = vld [vmem:[%s3505_s25 + $0x664] ss:$16 sps:$4 sm:$0xff]   ;;  %v3115_v26 = vld [vmem:[%s3505_s25 + $0x660] ss:$16 sps:$4 sm:$0xff]  }
  0x42   : > { %2117 = vmatpush2.bf16.msra.mxu1 %v3053_v44  ;;  %2077 = vmatprep.subr.bf16.mxu0 %v3054_v45  ;;  %v3120_v27 = vld [vmem:[%s3505_s25 + $0x444] ss:$16 sps:$4 sm:$0xff]   ;;  %v3118_v29 = vld [vmem:[%s3505_s25 + $0x440] ss:$16 sps:$4 sm:$0xff]  }
  0x43   : > { %2118 = vmatprep.subr.bf16.mxu1 %v3056_v46  ;;  %v3123_v28 = vld [vmem:[%s3505_s25 + $0x644] ss:$16 sps:$4 sm:$0xff]   ;;  %v3121_v30 = vld [vmem:[%s3505_s25 + $0x640] ss:$16 sps:$4 sm:$0xff]  }
  0x44   : > { %v3126_v31 = vld [vmem:[%s3505_s25 + $0x424] ss:$16 sps:$4 sm:$0xff]   ;;  %v3124_v35 = vld [vmem:[%s3505_s25 + $0x420] ss:$16 sps:$4 sm:$0xff]  }
  0x45   : > { %2078 = vmatpush2.bf16.msra.mxu0 %v3058_v50  ;;  %v3129_v32 = vld [vmem:[%s3505_s25 + $0x624] ss:$16 sps:$4 sm:$0xff]   ;;  %v3127_v36 = vld [vmem:[%s3505_s25 + $0x620] ss:$16 sps:$4 sm:$0xff]  }
  0x46   : > { %2119 = vmatpush2.bf16.msra.mxu1 %v3059_v51  ;;  %2079 = vmatprep.subr.bf16.mxu0 %v3060_v53  ;;  %v3613_v33 = vld [vmem:[%s3500_s21 + $0x10] sm:$0xff] }
  0x47   : > { %2120 = vmatprep.subr.bf16.mxu1 %v3062_v54  ;;  %v3622_v37 = vcombine.high %v3613_v33, %v3613_v33  ;;  %v3132_v39 = vld [vmem:[%s3505_s25 + $0x404] ss:$16 sps:$4 sm:$0xff]   ;;  %v3130_v41 = vld [vmem:[%s3505_s25 + $0x400] ss:$16 sps:$4 sm:$0xff]  }
  0x48   : > { %v3135_v40 = vld [vmem:[%s3505_s25 + $0x604] ss:$16 sps:$4 sm:$0xff]   ;;  %v3133_v42 = vld [vmem:[%s3505_s25 + $0x600] ss:$16 sps:$4 sm:$0xff]  }
  0x49   : > { %2080 = vmatpush2.bf16.msra.mxu0 %v3064_v55  ;;  %v3138_v43 = vld [vmem:[%s3505_s25 + $0x5e4] ss:$16 sps:$4 sm:$0xff]   ;;  %v3136_v45 = vld [vmem:[%s3505_s25 + $0x5e0] ss:$16 sps:$4 sm:$0xff]  }
  0x4a   : > { %2121 = vmatpush2.bf16.msra.mxu1 %v3065_v56  ;;  %2081 = vmatprep.subr.bf16.mxu0 %v3066_v57  ;;  %v3141_v44 = vld [vmem:[%s3505_s25 + $0x7e4] ss:$16 sps:$4 sm:$0xff]   ;;  %v3139_v46 = vld [vmem:[%s3505_s25 + $0x7e0] ss:$16 sps:$4 sm:$0xff]  }
  0x4b   : > { %2122 = vmatprep.subr.bf16.mxu1 %v3068_v58  ;;  %v3144_v47 = vld [vmem:[%s3505_s25 + $0x5c4] ss:$16 sps:$4 sm:$0xff]   ;;  %v3142_v50 = vld [vmem:[%s3505_s25 + $0x5c0] ss:$16 sps:$4 sm:$0xff]  }
  0x4c   : > { %v3147_v49 = vld [vmem:[%s3505_s25 + $0x7c4] ss:$16 sps:$4 sm:$0xff]   ;;  %v3145_v51 = vld [vmem:[%s3505_s25 + $0x7c0] ss:$16 sps:$4 sm:$0xff]  }
  0x4d   : > { %2082 = vmatpush2.bf16.msra.mxu0 %v3070_v59  ;;  %v3150_v53 = vld [vmem:[%s3505_s25 + $0x5a4] ss:$16 sps:$4 sm:$0xff]   ;;  %v3148_v55 = vld [vmem:[%s3505_s25 + $0x5a0] ss:$16 sps:$4 sm:$0xff]  }
  0x4e   : > { %2123 = vmatpush2.bf16.msra.mxu1 %v3071_v60  ;;  %2083 = vmatprep.subr.bf16.mxu0 %v3072_v61  ;;  %v3153_v54 = vld [vmem:[%s3505_s25 + $0x7a4] ss:$16 sps:$4 sm:$0xff]   ;;  %v3151_v56 = vld [vmem:[%s3505_s25 + $0x7a0] ss:$16 sps:$4 sm:$0xff]  }
  0x4f   : > { %2124 = vmatprep.subr.bf16.mxu1 %v3074_v62  ;;  %v3156_v57 = vld [vmem:[%s3505_s25 + $0x584] ss:$16 sps:$4 sm:$0xff]   ;;  %v3154_v59 = vld [vmem:[%s3505_s25 + $0x580] ss:$16 sps:$4 sm:$0xff]  }
  0x50   : > { %v3159_v58 = vld [vmem:[%s3505_s25 + $0x784] ss:$16 sps:$4 sm:$0xff]   ;;  %v3157_v60 = vld [vmem:[%s3505_s25 + $0x780] ss:$16 sps:$4 sm:$0xff]  }
  0x51   : > { %2084 = vmatpush2.bf16.msra.mxu0 %v3076_v63  ;;  %v3162_v61 = vld [vmem:[%s3505_s25 + $0x564] ss:$16 sps:$4 sm:$0xff]   ;;  %v3160_v63 = vld [vmem:[%s3505_s25 + $0x560] ss:$16 sps:$4 sm:$0xff]  }
  0x52   : > { %2125 = vmatpush2.bf16.msra.mxu1 %v3077_v0  ;;  %2085 = vmatprep.subr.bf16.mxu0 %v3078_v1  ;;  %v3165_v62 = vld [vmem:[%s3505_s25 + $0x764] ss:$16 sps:$4 sm:$0xff]   ;;  %v3163_v0 = vld [vmem:[%s3505_s25 + $0x760] ss:$16 sps:$4 sm:$0xff]  }
  0x53   : > { %2126 = vmatprep.subr.bf16.mxu1 %v3080_v2  ;;  %v3168_v1 = vld [vmem:[%s3505_s25 + $0x544] ss:$16 sps:$4 sm:$0xff]  }
  0x54   : > { %v3171_v2 = vld [vmem:[%s3505_s25 + $0x744] ss:$16 sps:$4 sm:$0xff]  }
  0x55   : > { %2086 = vmatpush2.bf16.msra.mxu0 %v3082_v3  ;;  %v3166_v3 = vld [vmem:[%s3505_s25 + $0x540] ss:$16 sps:$4 sm:$0xff]  }
  0x56   : > { %2127 = vmatpush2.bf16.msra.mxu1 %v3083_v4  ;;  %2137 = vmatprep.subr.bf16.mxu0 %v3090_v5  ;;  %v3169_v4 = vld [vmem:[%s3505_s25 + $0x740] ss:$16 sps:$4 sm:$0xff]   ;;  %v3174_v5 = vld [vmem:[%s3505_s25 + $0x524] ss:$16 sps:$4 sm:$0xff]  }
  0x57   : > { %2178 = vmatprep.subr.bf16.mxu1 %v3093_v6  ;;  %v3177_v6 = vld [vmem:[%s3505_s25 + $0x724] ss:$16 sps:$4 sm:$0xff]  }
  0x58   : > { %2088 = vmatmul.mubr.bf16.vlgmr.msra.gmra.mxu0 %v3582_v7 }
  0x59   : > { %2129 = vmatmul.mubr.bf16.vlgmr.msra.gmra.mxu1 %v3584_v8  ;;  %2138 = vmatpush1.bf16.msra.mxu0 %v3088_v9  ;;  %v3172_v9 = vld [vmem:[%s3505_s25 + $0x520] ss:$16 sps:$4 sm:$0xff]  }
  0x5a   : > { %2179 = vmatpush1.bf16.msra.mxu1 %v3091_v10  ;;  %2139 = vmatprep.subr.bf16.mxu0 %v3096_v11  ;;  %v3175_v10 = vld [vmem:[%s3505_s25 + $0x720] ss:$16 sps:$4 sm:$0xff]   ;;  %v3180_v11 = vld [vmem:[%s3505_s25 + $0x504] ss:$16 sps:$4 sm:$0xff]  }
  0x5b   : > { %2180 = vmatprep.subr.bf16.mxu1 %v3099_v12  ;;  %2169 = vmatprep.mubr.bf16.mxu0 %v3622_v37  ;;  %v3183_v12 = vld [vmem:[%s3505_s25 + $0x704] ss:$16 sps:$4 sm:$0xff]  }
  0x5c   : > { %2210 = vmatprep.mubr.bf16.mxu1 %v3626_v38 }
  0x5d   : > { %2140 = vmatpush1.bf16.msra.mxu0 %v3094_v13  ;;  %v3178_v13 = vld [vmem:[%s3505_s25 + $0x500] ss:$16 sps:$4 sm:$0xff]  }
  0x5e   : > { %2181 = vmatpush1.bf16.msra.mxu1 %v3097_v14  ;;  %2141 = vmatprep.subr.bf16.mxu0 %v3102_v15  ;;  %v3181_v14 = vld [vmem:[%s3505_s25 + $0x700] ss:$16 sps:$4 sm:$0xff]   ;;  %v3190_v15 = vld [vmem:[%s3505_s25 + $0x8e4] ss:$16 sps:$4 sm:$0xff]  }
  0x5f   : > { %2182 = vmatprep.subr.bf16.mxu1 %v3105_v16  ;;  %v3193_v16 = vld [vmem:[%s3505_s25 + $0xec] ss:$16 sps:$4 sm:$0xff]  }
  0x61   : > { %2142 = vmatpush1.bf16.msra.mxu0 %v3100_v17  ;;  %v3670_v17 = vcombine.low %v3613_v33, %v3613_v33  ;;  %v3209_v33 = vld [vmem:[%s3505_s25 + $0x88] ss:$16 sps:$4 sm:$0xff]  }
  0x62   : > { %2183 = vmatpush1.bf16.msra.mxu1 %v3103_v18  ;;  %2143 = vmatprep.subr.bf16.mxu0 %v3108_v19  ;;  %v3674_v18 = vcombine.low %v3616_v34, %v3616_v34  ;;  %v3188_v19 = vld [vmem:[%s3505_s25 + $0x8e0] ss:$16 sps:$4 sm:$0xff]   ;;  %v3217_v34 = vld [vmem:[%s3505_s25 + $0x6c] ss:$16 sps:$4 sm:$0xff]  }
  0x63   : > { %2184 = vmatprep.subr.bf16.mxu1 %v3111_v20  ;;  %v3191_v20 = vld [vmem:[%s3505_s25 + $0xe8] ss:$16 sps:$4 sm:$0xff]  }
  0x65   : > { %2144 = vmatpush1.bf16.msra.mxu0 %v3106_v21  ;;  %v3196_v21 = vld [vmem:[%s3505_s25 + $0x8c4] ss:$16 sps:$4 sm:$0xff]  }
  0x66   : > { %2185 = vmatpush1.bf16.msra.mxu1 %v3109_v22  ;;  %2145 = vmatprep.subr.bf16.mxu0 %v3114_v23  ;;  %v3199_v22 = vld [vmem:[%s3505_s25 + $0xcc] ss:$16 sps:$4 sm:$0xff]   ;;  %v3194_v23 = vld [vmem:[%s3505_s25 + $0x8c0] ss:$16 sps:$4 sm:$0xff]  }
  0x67   : > { %2186 = vmatprep.subr.bf16.mxu1 %v3117_v24  ;;  %v3197_v24 = vld [vmem:[%s3505_s25 + $0xc8] ss:$16 sps:$4 sm:$0xff]  }
  0x69   : > { %2146 = vmatpush1.bf16.msra.mxu0 %v3112_v25  ;;  %v3202_v25 = vld [vmem:[%s3505_s25 + $0x8a4] ss:$16 sps:$4 sm:$0xff]  }
  0x6a   : > { %2187 = vmatpush1.bf16.msra.mxu1 %v3115_v26  ;;  %2147 = vmatprep.subr.bf16.mxu0 %v3120_v27  ;;  %v3205_v26 = vld [vmem:[%s3505_s25 + $0xac] ss:$16 sps:$4 sm:$0xff]   ;;  %v3454_v27 = vmov 0  }
  0x6b   : > { %2188 = vmatprep.subr.bf16.mxu1 %v3123_v28  ;;  %v3200_v28 = vld [vmem:[%s3505_s25 + $0x8a0] ss:$16 sps:$4 sm:$0xff]  }
  0x6d   : > { %2148 = vmatpush1.bf16.msra.mxu0 %v3118_v29  ;;  %v3203_v29 = vld [vmem:[%s3505_s25 + $0xa8] ss:$16 sps:$4 sm:$0xff]  }
  0x6e   : > { %2189 = vmatpush1.bf16.msra.mxu1 %v3121_v30  ;;  %2149 = vmatprep.subr.bf16.mxu0 %v3126_v31  ;;  %v3208_v30 = vld [vmem:[%s3505_s25 + $0x884] ss:$16 sps:$4 sm:$0xff]   ;;  %v3211_v31 = vld [vmem:[%s3505_s25 + $0x8c] ss:$16 sps:$4 sm:$0xff]  }
  0x6f   : > { %2190 = vmatprep.subr.bf16.mxu1 %v3129_v32  ;;  %v3206_v32 = vld [vmem:[%s3505_s25 + $0x880] ss:$16 sps:$4 sm:$0xff]  }
  0x71   : > { %2150 = vmatpush1.bf16.msra.mxu0 %v3124_v35  ;;  %v3212_v35 = vld [vmem:[%s3505_s25 + $0x860] ss:$16 sps:$4 sm:$0xff]  }
  0x72   : > { %2191 = vmatpush1.bf16.msra.mxu1 %v3127_v36  ;;  %2151 = vmatprep.subr.bf16.mxu0 %v3132_v39  ;;  %v3215_v36 = vld [vmem:[%s3505_s25 + $0x68] ss:$16 sps:$4 sm:$0xff]   ;;  %v3220_v39 = vld [vmem:[%s3505_s25 + $0x844] ss:$16 sps:$4 sm:$0xff]  }
  0x73   : > { %2192 = vmatprep.subr.bf16.mxu1 %v3135_v40  ;;  %v3223_v40 = vld [vmem:[%s3505_s25 + $0x4c] ss:$16 sps:$4 sm:$0xff]  }
  0x75   : > { %2152 = vmatpush1.bf16.msra.mxu0 %v3130_v41  ;;  %v3218_v41 = vld [vmem:[%s3505_s25 + $0x840] ss:$16 sps:$4 sm:$0xff]  }
  0x76   : > { %2193 = vmatpush1.bf16.msra.mxu1 %v3133_v42  ;;  %2153 = vmatprep.subr.bf16.mxu0 %v3138_v43  ;;  %v3221_v42 = vld [vmem:[%s3505_s25 + $0x48] ss:$16 sps:$4 sm:$0xff]   ;;  %v3226_v43 = vld [vmem:[%s3505_s25 + $0x824] ss:$16 sps:$4 sm:$0xff]  }
  0x77   : > { %2194 = vmatprep.subr.bf16.mxu1 %v3141_v44  ;;  %v3229_v44 = vld [vmem:[%s3505_s25 + $0x2c] ss:$16 sps:$4 sm:$0xff]  }
  0x79   : > { %2154 = vmatpush2.bf16.msra.mxu0 %v3136_v45  ;;  %v3224_v45 = vld [vmem:[%s3505_s25 + $0x820] ss:$16 sps:$4 sm:$0xff]  }
  0x7a   : > { %2195 = vmatpush2.bf16.msra.mxu1 %v3139_v46  ;;  %2155 = vmatprep.subr.bf16.mxu0 %v3144_v47  ;;  %v3227_v46 = vld [vmem:[%s3505_s25 + $0x28] ss:$16 sps:$4 sm:$0xff]   ;;  %v3232_v47 = vld [vmem:[%s3505_s25 + $0x804] ss:$16 sps:$4 sm:$0xff]  }
  0x7b   : > { %2196 = vmatprep.subr.bf16.mxu1 %v3147_v49  ;;  %v3235_v49 = vld [vmem:[%s3505_s25 + $0xc] ss:$16 sps:$4 sm:$0xff]  }
  0x7d   : > { %2156 = vmatpush2.bf16.msra.mxu0 %v3142_v50  ;;  %v3230_v50 = vld [vmem:[%s3505_s25 + $0x800] ss:$16 sps:$4 sm:$0xff]  }
  0x7e   : > { %2197 = vmatpush2.bf16.msra.mxu1 %v3145_v51  ;;  %2157 = vmatprep.subr.bf16.mxu0 %v3150_v53  ;;  %v3233_v51 = vld [vmem:[%s3505_s25 + $0x8] ss:$16 sps:$4 sm:$0xff]   ;;  %v3239_v53 = vld [vmem:[%s3505_s25 + $0x1ec] ss:$16 sps:$4 sm:$0xff]  }
  0x7f   : > { %2198 = vmatprep.subr.bf16.mxu1 %v3153_v54  ;;  %v3242_v54 = vld [vmem:[%s3505_s25 + $0x2ec] ss:$16 sps:$4 sm:$0xff]  }
  0x81   : > { %2158 = vmatpush2.bf16.msra.mxu0 %v3148_v55  ;;  %v3713_v55 = vld [vmem:[%s3500_s21 + $0x20] ss:$0 sps:$4 sm:$0xff]  }
  0x82   : > { %2199 = vmatpush2.bf16.msra.mxu1 %v3151_v56  ;;  %2159 = vmatprep.subr.bf16.mxu0 %v3156_v57  ;;  %v3237_v56 = vld [vmem:[%s3505_s25 + $0x1e8] ss:$16 sps:$4 sm:$0xff]  }
  0x83   : > { %2200 = vmatprep.subr.bf16.mxu1 %v3159_v58  ;;  %v3240_v57 = vld [vmem:[%s3505_s25 + $0x2e8] ss:$16 sps:$4 sm:$0xff]   ;;  %v3245_v58 = vld [vmem:[%s3505_s25 + $0x1cc] ss:$16 sps:$4 sm:$0xff]  }
  0x85   : > { %2160 = vmatpush2.bf16.msra.mxu0 %v3154_v59  ;;  %v3248_v59 = vld [vmem:[%s3505_s25 + $0x2cc] ss:$16 sps:$4 sm:$0xff]  }
  0x86   : > { %2201 = vmatpush2.bf16.msra.mxu1 %v3157_v60  ;;  %2161 = vmatprep.subr.bf16.mxu0 %v3162_v61  ;;  %v3243_v60 = vld [vmem:[%s3505_s25 + $0x1c8] ss:$16 sps:$4 sm:$0xff]  }
  0x87   : > { %2202 = vmatprep.subr.bf16.mxu1 %v3165_v62  ;;  %v3246_v61 = vld [vmem:[%s3505_s25 + $0x2c8] ss:$16 sps:$4 sm:$0xff]   ;;  %v3251_v62 = vld [vmem:[%s3505_s25 + $0x1ac] ss:$16 sps:$4 sm:$0xff]  }
  0x89   : > { %2162 = vmatpush2.bf16.msra.mxu0 %v3160_v63  ;;  %v3254_v63 = vld [vmem:[%s3505_s25 + $0x2ac] ss:$16 sps:$4 sm:$0xff]  }
  0x8a   : > { %2203 = vmatpush2.bf16.msra.mxu1 %v3163_v0  ;;  %2163 = vmatprep.subr.bf16.mxu0 %v3168_v1  ;;  %v3249_v0 = vld [vmem:[%s3505_s25 + $0x1a8] ss:$16 sps:$4 sm:$0xff]  }
  0x8b   : > { %2204 = vmatprep.subr.bf16.mxu1 %v3171_v2  ;;  %v3252_v1 = vld [vmem:[%s3505_s25 + $0x2a8] ss:$16 sps:$4 sm:$0xff]   ;;  %v3257_v2 = vld [vmem:[%s3505_s25 + $0x18c] ss:$16 sps:$4 sm:$0xff]  }
  0x8d   : > { %2164 = vmatpush2.bf16.msra.mxu0 %v3166_v3  ;;  %v3260_v3 = vld [vmem:[%s3505_s25 + $0x28c] ss:$16 sps:$4 sm:$0xff]  }
  0x8e   : > { %2205 = vmatpush2.bf16.msra.mxu1 %v3169_v4  ;;  %2165 = vmatprep.subr.bf16.mxu0 %v3174_v5  ;;  %v3255_v4 = vld [vmem:[%s3505_s25 + $0x188] ss:$16 sps:$4 sm:$0xff]  }
  0x8f   : > { %2206 = vmatprep.subr.bf16.mxu1 %v3177_v6  ;;  %v3258_v5 = vld [vmem:[%s3505_s25 + $0x288] ss:$16 sps:$4 sm:$0xff]   ;;  %v3266_v6 = vld [vmem:[%s3505_s25 + $0x26c] ss:$16 sps:$4 sm:$0xff]  }
  0x91   : > { %2166 = vmatpush2.bf16.msra.mxu0 %v3172_v9  ;;  %v3261_v9 = vld [vmem:[%s3505_s25 + $0x168] ss:$16 sps:$4 sm:$0xff]  }
  0x92   : > { %2207 = vmatpush2.bf16.msra.mxu1 %v3175_v10  ;;  %2167 = vmatprep.subr.bf16.mxu0 %v3180_v11  ;;  %v3264_v10 = vld [vmem:[%s3505_s25 + $0x268] ss:$16 sps:$4 sm:$0xff]   ;;  %v3269_v11 = vld [vmem:[%s3505_s25 + $0x14c] ss:$16 sps:$4 sm:$0xff]  }
  0x93   : > { %2208 = vmatprep.subr.bf16.mxu1 %v3183_v12  ;;  %v3272_v12 = vld [vmem:[%s3505_s25 + $0x24c] ss:$16 sps:$4 sm:$0xff]  }
  0x95   : > { %2168 = vmatpush2.bf16.msra.mxu0 %v3178_v13  ;;  %v3267_v13 = vld [vmem:[%s3505_s25 + $0x148] ss:$16 sps:$4 sm:$0xff]  }
  0x96   : > { %2209 = vmatpush2.bf16.msra.mxu1 %v3181_v14  ;;  %2219 = vmatprep.subr.bf16.mxu0 %v3190_v15  ;;  %v3270_v14 = vld [vmem:[%s3505_s25 + $0x248] ss:$16 sps:$4 sm:$0xff]   ;;  %v3275_v15 = vld [vmem:[%s3505_s25 + $0x12c] ss:$16 sps:$4 sm:$0xff]  }
  0x97   : > { %2260 = vmatprep.subr.bf16.mxu1 %v3193_v16  ;;  %v3278_v16 = vld [vmem:[%s3505_s25 + $0x22c] ss:$16 sps:$4 sm:$0xff]  }
  0x98   : > { %2170 = vmatmul.mubr.bf16.vlgmr.msra.gmra.mxu0 %v3670_v17 }
  0x99   : > { %2211 = vmatmul.mubr.bf16.vlgmr.msra.gmra.mxu1 %v3674_v18  ;;  %2220 = vmatpush1.bf16.msra.mxu0 %v3188_v19  ;;  %v3273_v19 = vld [vmem:[%s3505_s25 + $0x128] ss:$16 sps:$4 sm:$0xff]  }
  0x9a   : > { %2261 = vmatpush1.bf16.msra.mxu1 %v3191_v20  ;;  %2221 = vmatprep.subr.bf16.mxu0 %v3196_v21  ;;  %v3276_v20 = vld [vmem:[%s3505_s25 + $0x228] ss:$16 sps:$4 sm:$0xff]   ;;  %v3281_v21 = vld [vmem:[%s3505_s25 + $0x10c] ss:$16 sps:$4 sm:$0xff]  }
  0x9b   : > { %2262 = vmatprep.subr.bf16.mxu1 %v3199_v22  ;;  %2251 = vmatprep.mubr.bf16.mxu0 %v3454_v27  ;;  %v3284_v22 = vld [vmem:[%s3505_s25 + $0x20c] ss:$16 sps:$4 sm:$0xff]  }
  0x9c   : > { %2292 = vmatprep.mubr.bf16.mxu1 %v3555_v48  ;;  %v3214_v48 = vld [vmem:[%s3505_s25 + $0x864] ss:$16 sps:$4 sm:$0xff]  }
  0x9d   : > { %2222 = vmatpush1.bf16.msra.mxu0 %v3194_v23  ;;  %v3279_v23 = vld [vmem:[%s3505_s25 + $0x108] ss:$16 sps:$4 sm:$0xff]  }
  0x9e   : > { %2263 = vmatpush1.bf16.msra.mxu1 %v3197_v24  ;;  %2223 = vmatprep.subr.bf16.mxu0 %v3202_v25  ;;  %v3282_v24 = vld [vmem:[%s3505_s25 + $0x208] ss:$16 sps:$4 sm:$0xff]   ;;  %v3287_v25 = vld [vmem:[%s3505_s25 + $0x3ec] ss:$16 sps:$4 sm:$0xff]  }
  0x9f   : > { %2264 = vmatprep.subr.bf16.mxu1 %v3205_v26  ;;  %v3290_v26 = vld [vmem:[%s3505_s25 + $0x4ec] ss:$16 sps:$4 sm:$0xff]  }
  0xa1   : > { %2224 = vmatpush1.bf16.msra.mxu0 %v3200_v28  ;;  %v3285_v28 = vld [vmem:[%s3505_s25 + $0x3e8] ss:$16 sps:$4 sm:$0xff]  }
  0xa2   : > { %2265 = vmatpush1.bf16.msra.mxu1 %v3203_v29  ;;  %2225 = vmatprep.subr.bf16.mxu0 %v3208_v30  ;;  %v3288_v29 = vld [vmem:[%s3505_s25 + $0x4e8] ss:$16 sps:$4 sm:$0xff]   ;;  %v3293_v30 = vld [vmem:[%s3505_s25 + $0x3cc] ss:$16 sps:$4 sm:$0xff]  }
  0xa3   : > { %2266 = vmatprep.subr.bf16.mxu1 %v3211_v31  ;;  %v3296_v31 = vld [vmem:[%s3505_s25 + $0x4cc] ss:$16 sps:$4 sm:$0xff]  }
  0xa5   : > { %2226 = vmatpush1.bf16.msra.mxu0 %v3206_v32  ;;  %v3291_v32 = vld [vmem:[%s3505_s25 + $0x3c8] ss:$16 sps:$4 sm:$0xff]  }
  0xa6   : > { %2267 = vmatpush1.bf16.msra.mxu1 %v3209_v33  ;;  %2227 = vmatprep.subr.bf16.mxu0 %v3214_v48  ;;  %v3294_v33 = vld [vmem:[%s3505_s25 + $0x4c8] ss:$16 sps:$4 sm:$0xff]   ;;  %v3299_v48 = vld [vmem:[%s3505_s25 + $0x3ac] ss:$16 sps:$4 sm:$0xff]  }
  0xa7   : > { %2268 = vmatprep.subr.bf16.mxu1 %v3217_v34  ;;  %v3302_v34 = vld [vmem:[%s3505_s25 + $0x4ac] ss:$16 sps:$4 sm:$0xff]  }
  0xa9   : > { %2228 = vmatpush1.bf16.msra.mxu0 %v3212_v35  ;;  %v3297_v35 = vld [vmem:[%s3505_s25 + $0x3a8] ss:$16 sps:$4 sm:$0xff]  }
  0xaa   : > { %2269 = vmatpush1.bf16.msra.mxu1 %v3215_v36  ;;  %2229 = vmatprep.subr.bf16.mxu0 %v3220_v39  ;;  %v3305_v36 = vld [vmem:[%s3505_s25 + $0x38c] ss:$16 sps:$4 sm:$0xff]  }
  0xab   : > { %2270 = vmatprep.subr.bf16.mxu1 %v3223_v40  ;;  %v3308_v39 = vld [vmem:[%s3505_s25 + $0x48c] ss:$16 sps:$4 sm:$0xff]   ;;  %v3303_v40 = vld [vmem:[%s3505_s25 + $0x388] ss:$16 sps:$4 sm:$0xff]  }
  0xad   : > { %2230 = vmatpush1.bf16.msra.mxu0 %v3218_v41  ;;  %v3306_v41 = vld [vmem:[%s3505_s25 + $0x488] ss:$16 sps:$4 sm:$0xff]  }
  0xae   : > { %2271 = vmatpush1.bf16.msra.mxu1 %v3221_v42  ;;  %2231 = vmatprep.subr.bf16.mxu0 %v3226_v43  ;;  %v3314_v42 = vld [vmem:[%s3505_s25 + $0x46c] ss:$16 sps:$4 sm:$0xff]   ;;  %v3309_v43 = vld [vmem:[%s3505_s25 + $0x368] ss:$16 sps:$4 sm:$0xff]  }
  0xaf   : > { %2272 = vmatprep.subr.bf16.mxu1 %v3229_v44  ;;  %v3312_v44 = vld [vmem:[%s3505_s25 + $0x468] ss:$16 sps:$4 sm:$0xff]  }
  0xb1   : > { %2232 = vmatpush1.bf16.msra.mxu0 %v3224_v45  ;;  %v3317_v45 = vld [vmem:[%s3505_s25 + $0x34c] ss:$16 sps:$4 sm:$0xff]  }
  0xb2   : > { %2273 = vmatpush1.bf16.msra.mxu1 %v3227_v46  ;;  %2233 = vmatprep.subr.bf16.mxu0 %v3232_v47  ;;  %v3320_v46 = vld [vmem:[%s3505_s25 + $0x44c] ss:$16 sps:$4 sm:$0xff]   ;;  %v3315_v47 = vld [vmem:[%s3505_s25 + $0x348] ss:$16 sps:$4 sm:$0xff]  }
  0xb3   : > { %2274 = vmatprep.subr.bf16.mxu1 %v3235_v49  ;;  %v3318_v49 = vld [vmem:[%s3505_s25 + $0x448] ss:$16 sps:$4 sm:$0xff]  }
  0xb5   : > { %2234 = vmatpush1.bf16.msra.mxu0 %v3230_v50  ;;  %v3323_v50 = vld [vmem:[%s3505_s25 + $0x32c] ss:$16 sps:$4 sm:$0xff]  }
  0xb6   : > { %2275 = vmatpush1.bf16.msra.mxu1 %v3233_v51  ;;  %2301 = vmatprep.subr.bf16.mxu0 %v3242_v54  ;;  %v3326_v51 = vld [vmem:[%s3505_s25 + $0x42c] ss:$16 sps:$4 sm:$0xff]   ;;  %v3324_v54 = vld [vmem:[%s3505_s25 + $0x428] ss:$16 sps:$4 sm:$0xff]  }
  0xb7   : > { %2276 = vmatprep.subr.bf16.mxu1 %v3239_v53  ;;  %v3321_v53 = vld [vmem:[%s3505_s25 + $0x328] ss:$16 sps:$4 sm:$0xff]  }
  0xb8   : > { %2252 = vmatmul.mubr.bf16.vlgmr.msra.gmra.mxu0 %v3713_v55 }
  0xb9   : > { %2302 = vmatpush1.bf16.msra.mxu0 %v3240_v57  ;;  %2333 = vmatprep.mubr.bf16.mxu0 %v3560_v52  ;;  %v3263_v52 = vld [vmem:[%s3505_s25 + $0x16c] ss:$16 sps:$4 sm:$0xff]  }
  0xba   : > { %2277 = vmatpush2.bf16.msra.mxu1 %v3237_v56  ;;  %2303 = vmatprep.subr.bf16.mxu0 %v3248_v59  ;;  %v3329_v56 = vld [vmem:[%s3505_s25 + $0x30c] ss:$16 sps:$4 sm:$0xff]   ;;  %v3330_v59 = vld [vmem:[%s3505_s25 + $0x408] ss:$16 sps:$4 sm:$0xff]  }
  0xbb   : > { %2278 = vmatprep.subr.bf16.mxu1 %v3245_v58  ;;  %v3332_v57 = vld [vmem:[%s3505_s25 + $0x40c] ss:$16 sps:$4 sm:$0xff]   ;;  %v3327_v58 = vld [vmem:[%s3505_s25 + $0x308] ss:$16 sps:$4 sm:$0xff]  }
  0xbd   : > { %2304 = vmatpush1.bf16.msra.mxu0 %v3246_v61  ;;  %v3338_v61 = vld [vmem:[%s3505_s25 + $0x6ec] ss:$16 sps:$4 sm:$0xff]  }
  0xbe   : > { %2279 = vmatpush2.bf16.msra.mxu1 %v3243_v60  ;;  %2305 = vmatprep.subr.bf16.mxu0 %v3254_v63  ;;  %v3335_v60 = vld [vmem:[%s3505_s25 + $0x5ec] ss:$16 sps:$4 sm:$0xff]   ;;  %v3336_v63 = vld [vmem:[%s3505_s25 + $0x6e8] ss:$16 sps:$4 sm:$0xff]  }
  0xbf   : > { %2280 = vmatprep.subr.bf16.mxu1 %v3251_v62  ;;  %v3333_v62 = vld [vmem:[%s3505_s25 + $0x5e8] ss:$16 sps:$4 sm:$0xff]  }
  0xc1   : > { %2306 = vmatpush1.bf16.msra.mxu0 %v3252_v1  ;;  %v3344_v1 = vld [vmem:[%s3505_s25 + $0x6cc] ss:$16 sps:$4 sm:$0xff]  }
  0xc2   : > { %2281 = vmatpush2.bf16.msra.mxu1 %v3249_v0  ;;  %2307 = vmatprep.subr.bf16.mxu0 %v3260_v3  ;;  %v3341_v0 = vld [vmem:[%s3505_s25 + $0x5cc] ss:$16 sps:$4 sm:$0xff]   ;;  %v3342_v3 = vld [vmem:[%s3505_s25 + $0x6c8] ss:$16 sps:$4 sm:$0xff]  }
  0xc3   : > { %2282 = vmatprep.subr.bf16.mxu1 %v3257_v2  ;;  %v3339_v2 = vld [vmem:[%s3505_s25 + $0x5c8] ss:$16 sps:$4 sm:$0xff]  }
  0xc5   : > { %2308 = vmatpush1.bf16.msra.mxu0 %v3258_v5  ;;  %v3350_v5 = vld [vmem:[%s3505_s25 + $0x6ac] ss:$16 sps:$4 sm:$0xff]  }
  0xc6   : > { %2283 = vmatpush2.bf16.msra.mxu1 %v3255_v4  ;;  %2309 = vmatprep.subr.bf16.mxu0 %v3266_v6  ;;  %v3347_v4 = vld [vmem:[%s3505_s25 + $0x5ac] ss:$16 sps:$4 sm:$0xff]  }
  0xc7   : > { %2284 = vmatprep.subr.bf16.mxu1 %v3263_v52  ;;  %v3345_v52 = vld [vmem:[%s3505_s25 + $0x5a8] ss:$16 sps:$4 sm:$0xff]   ;;  %v3353_v6 = vld [vmem:[%s3505_s25 + $0x58c] ss:$16 sps:$4 sm:$0xff]  }
  0xc9   : > { %2310 = vmatpush1.bf16.msra.mxu0 %v3264_v10  ;;  %v3351_v10 = vld [vmem:[%s3505_s25 + $0x588] ss:$16 sps:$4 sm:$0xff]  }
  0xca   : > { %2285 = vmatpush2.bf16.msra.mxu1 %v3261_v9  ;;  %2311 = vmatprep.subr.bf16.mxu0 %v3272_v12  ;;  %v3356_v9 = vld [vmem:[%s3505_s25 + $0x68c] ss:$16 sps:$4 sm:$0xff]  }
  0xcb   : > { %2286 = vmatprep.subr.bf16.mxu1 %v3269_v11  ;;  %v3354_v11 = vld [vmem:[%s3505_s25 + $0x688] ss:$16 sps:$4 sm:$0xff]   ;;  %v3362_v12 = vld [vmem:[%s3505_s25 + $0x66c] ss:$16 sps:$4 sm:$0xff]  }
  0xcd   : > { %2312 = vmatpush1.bf16.msra.mxu0 %v3270_v14  ;;  %v3360_v14 = vld [vmem:[%s3505_s25 + $0x668] ss:$16 sps:$4 sm:$0xff]  }
  0xce   : > { %2287 = vmatpush2.bf16.msra.mxu1 %v3267_v13  ;;  %2313 = vmatprep.subr.bf16.mxu0 %v3278_v16  ;;  %v3357_v13 = vld [vmem:[%s3505_s25 + $0x568] ss:$16 sps:$4 sm:$0xff]   ;;  %v3368_v16 = vld [vmem:[%s3505_s25 + $0x64c] ss:$16 sps:$4 sm:$0xff]  }
  0xcf   : > { %2288 = vmatprep.subr.bf16.mxu1 %v3275_v15  ;;  %v3365_v15 = vld [vmem:[%s3505_s25 + $0x54c] ss:$16 sps:$4 sm:$0xff]  }
  0xd1   : > { %2314 = vmatpush1.bf16.msra.mxu0 %v3276_v20  ;;  %v3366_v20 = vld [vmem:[%s3505_s25 + $0x648] ss:$16 sps:$4 sm:$0xff]  }
  0xd2   : > { %2289 = vmatpush2.bf16.msra.mxu1 %v3273_v19  ;;  %2315 = vmatprep.subr.bf16.mxu0 %v3284_v22  ;;  %v3363_v19 = vld [vmem:[%s3505_s25 + $0x548] ss:$16 sps:$4 sm:$0xff]   ;;  %v3374_v22 = vld [vmem:[%s3505_s25 + $0x62c] ss:$16 sps:$4 sm:$0xff]  }
  0xd3   : > { %2290 = vmatprep.subr.bf16.mxu1 %v3281_v21  ;;  %v3371_v21 = vld [vmem:[%s3505_s25 + $0x52c] ss:$16 sps:$4 sm:$0xff]  }
  0xd5   : > { %2316 = vmatpush1.bf16.msra.mxu0 %v3282_v24  ;;  %v3372_v24 = vld [vmem:[%s3505_s25 + $0x628] ss:$16 sps:$4 sm:$0xff]  }
  0xd6   : > { %2291 = vmatpush2.bf16.msra.mxu1 %v3279_v23  ;;  %2317 = vmatprep.subr.bf16.mxu0 %v3287_v25  ;;  %v3369_v23 = vld [vmem:[%s3505_s25 + $0x528] ss:$16 sps:$4 sm:$0xff]   ;;  %v3377_v25 = vld [vmem:[%s3505_s25 + $0x50c] ss:$16 sps:$4 sm:$0xff]  }
  0xd7   : > { %2342 = vmatprep.subr.bf16.mxu1 %v3290_v26  ;;  %v3380_v26 = vld [vmem:[%s3505_s25 + $0x60c] ss:$16 sps:$4 sm:$0xff]  }
  0xd9   : > { %2293 = vmatmul.mubr.bf16.vlgmr.msra.gmra.mxu1 %v3582_v7  ;;  %2318 = vmatpush2.bf16.msra.mxu0 %v3285_v28  ;;  %v3300_v7 = vld [vmem:[%s3505_s25 + $0x4a8] ss:$16 sps:$4 sm:$0xff]  }
  0xda   : > { %2343 = vmatpush1.bf16.msra.mxu1 %v3288_v29  ;;  %2319 = vmatprep.subr.bf16.mxu0 %v3293_v30  ;;  %v3375_v28 = vld [vmem:[%s3505_s25 + $0x508] ss:$16 sps:$4 sm:$0xff]   ;;  %v3383_v30 = vld [vmem:[%s3505_s25 + $0x7ec] ss:$16 sps:$4 sm:$0xff]  }
  0xdb   : > { %2344 = vmatprep.subr.bf16.mxu1 %v3296_v31  ;;  %2374 = vmatprep.mubr.bf16.mxu1 %v3622_v37  ;;  %v3311_v37 = vld [vmem:[%s3505_s25 + $0x36c] ss:$16 sps:$4 sm:$0xff]   ;;  %v3378_v29 = vld [vmem:[%s3505_s25 + $0x608] ss:$16 sps:$4 sm:$0xff]  }
  0xdc   : > { %v3386_v31 = vld [vmem:[%s3505_s25 + $0x8ec] ss:$16 sps:$4 sm:$0xff]  }
  0xdd   : > { %2320 = vmatpush2.bf16.msra.mxu0 %v3291_v32  ;;  %v3381_v32 = vld [vmem:[%s3505_s25 + $0x7e8] ss:$16 sps:$4 sm:$0xff]  }
  0xde   : > { %2345 = vmatpush1.bf16.msra.mxu1 %v3294_v33  ;;  %2321 = vmatprep.subr.bf16.mxu0 %v3299_v48  ;;  %v3384_v33 = vld [vmem:[%s3505_s25 + $0x8e8] ss:$16 sps:$4 sm:$0xff]   ;;  %v3389_v48 = vld [vmem:[%s3505_s25 + $0x7cc] ss:$16 sps:$4 sm:$0xff]  }
  0xdf   : > { %2346 = vmatprep.subr.bf16.mxu1 %v3302_v34  ;;  %v3392_v34 = vld [vmem:[%s3505_s25 + $0x8cc] ss:$16 sps:$4 sm:$0xff]  }
  0xe1   : > { %2322 = vmatpush2.bf16.msra.mxu0 %v3297_v35 }
  0xe2   : > { %2347 = vmatpush1.bf16.msra.mxu1 %v3300_v7  ;;  %2323 = vmatprep.subr.bf16.mxu0 %v3305_v36 }
  0xe3   : > { %2348 = vmatprep.subr.bf16.mxu1 %v3308_v39  ;;  %v3387_v39 = vld [vmem:[%s3505_s25 + $0x7c8] ss:$16 sps:$4 sm:$0xff]  }
  0xe5   : > { %2324 = vmatpush2.bf16.msra.mxu0 %v3303_v40  ;;  %v3390_v40 = vld [vmem:[%s3505_s25 + $0x8c8] ss:$16 sps:$4 sm:$0xff]  }
  0xe6   : > { %2349 = vmatpush1.bf16.msra.mxu1 %v3306_v41  ;;  %2325 = vmatprep.subr.bf16.mxu0 %v3311_v37 }
  0xe7   : > { %2350 = vmatprep.subr.bf16.mxu1 %v3314_v42  ;;  %v3395_v42 = vld [vmem:[%s3505_s25 + $0x7ac] ss:$16 sps:$4 sm:$0xff]  }
  0xe9   : > { %2326 = vmatpush2.bf16.msra.mxu0 %v3309_v43  ;;  %v3398_v43 = vld [vmem:[%s3505_s25 + $0x8ac] ss:$16 sps:$4 sm:$0xff]  }
  0xea   : > { %2351 = vmatpush1.bf16.msra.mxu1 %v3312_v44  ;;  %2327 = vmatprep.subr.bf16.mxu0 %v3317_v45 }
  0xeb   : > { %2352 = vmatprep.subr.bf16.mxu1 %v3320_v46  ;;  %v3393_v46 = vld [vmem:[%s3505_s25 + $0x7a8] ss:$16 sps:$4 sm:$0xff]  }
  0xed   : > { %2328 = vmatpush2.bf16.msra.mxu0 %v3315_v47  ;;  %v3396_v47 = vld [vmem:[%s3505_s25 + $0x8a8] ss:$16 sps:$4 sm:$0xff]  }
  0xee   : > { %2353 = vmatpush1.bf16.msra.mxu1 %v3318_v49  ;;  %2329 = vmatprep.subr.bf16.mxu0 %v3323_v50 }
  0xef   : > { %2354 = vmatprep.subr.bf16.mxu1 %v3326_v51  ;;  %v3401_v51 = vld [vmem:[%s3505_s25 + $0x78c] ss:$16 sps:$4 sm:$0xff]  }
  0xf1   : > { %2330 = vmatpush2.bf16.msra.mxu0 %v3321_v53  ;;  %v3404_v53 = vld [vmem:[%s3505_s25 + $0x88c] ss:$16 sps:$4 sm:$0xff]  }
  0xf2   : > { %2355 = vmatpush1.bf16.msra.mxu1 %v3324_v54  ;;  %2331 = vmatprep.subr.bf16.mxu0 %v3329_v56  ;;  %v3402_v54 = vld [vmem:[%s3505_s25 + $0x888] ss:$16 sps:$4 sm:$0xff]   ;;  %v3407_v56 = vld [vmem:[%s3505_s25 + $0x76c] ss:$16 sps:$4 sm:$0xff]  }
  0xf3   : > { %2356 = vmatprep.subr.bf16.mxu1 %v3332_v57  ;;  %v3410_v57 = vld [vmem:[%s3505_s25 + $0x86c] ss:$16 sps:$4 sm:$0xff]  }
  0xf5   : > { %2332 = vmatpush2.bf16.msra.mxu0 %v3327_v58  ;;  %v3405_v58 = vld [vmem:[%s3505_s25 + $0x768] ss:$16 sps:$4 sm:$0xff]  }
  0xf6   : > { %2357 = vmatpush1.bf16.msra.mxu1 %v3330_v59  ;;  %2383 = vmatprep.subr.bf16.mxu0 %v3338_v61  ;;  %v3408_v59 = vld [vmem:[%s3505_s25 + $0x868] ss:$16 sps:$4 sm:$0xff]   ;;  %v3416_v61 = vld [vmem:[%s3505_s25 + $0x84c] ss:$16 sps:$4 sm:$0xff]  }
  0xf7   : > { %2358 = vmatprep.subr.bf16.mxu1 %v3335_v60  ;;  %v3413_v60 = vld [vmem:[%s3505_s25 + $0x74c] ss:$16 sps:$4 sm:$0xff]  }
  0xf8   : > { %2334 = vmatmul.mubr.bf16.vlgmr.msra.gmra.mxu0 %v3584_v8  ;;  %v3348_v8 = vld [vmem:[%s3505_s25 + $0x6a8] ss:$16 sps:$4 sm:$0xff]  }
  0xf9   : > { %2384 = vmatpush1.bf16.msra.mxu0 %v3336_v63  ;;  %2415 = vmatprep.mubr.bf16.mxu0 %v3626_v38  ;;  %v3359_v38 = vld [vmem:[%s3505_s25 + $0x56c] ss:$16 sps:$4 sm:$0xff]   ;;  %v3414_v63 = vld [vmem:[%s3505_s25 + $0x848] ss:$16 sps:$4 sm:$0xff]  }
  0xfa   : > { %2359 = vmatpush2.bf16.msra.mxu1 %v3333_v62  ;;  %2385 = vmatprep.subr.bf16.mxu0 %v3344_v1  ;;  %v3411_v62 = vld [vmem:[%s3505_s25 + $0x748] ss:$16 sps:$4 sm:$0xff]   ;;  %v3422_v1 = vld [vmem:[%s3505_s25 + $0x82c] ss:$16 sps:$4 sm:$0xff]  }
  0xfb   : > { %2360 = vmatprep.subr.bf16.mxu1 %v3341_v0  ;;  %v3419_v0 = vld [vmem:[%s3505_s25 + $0x72c] ss:$16 sps:$4 sm:$0xff]  }
  0xfd   : > { %2386 = vmatpush1.bf16.msra.mxu0 %v3342_v3  ;;  %v3420_v3 = vld [vmem:[%s3505_s25 + $0x828] ss:$16 sps:$4 sm:$0xff]  }
  0xfe   : > { %2361 = vmatpush2.bf16.msra.mxu1 %v3339_v2  ;;  %2387 = vmatprep.subr.bf16.mxu0 %v3350_v5  ;;  %v3417_v2 = vld [vmem:[%s3505_s25 + $0x728] ss:$16 sps:$4 sm:$0xff]   ;;  %v3428_v5 = vld [vmem:[%s3505_s25 + $0x80c] ss:$16 sps:$4 sm:$0xff]  }
  0xff   : > { %2362 = vmatprep.subr.bf16.mxu1 %v3347_v4  ;;  %v3425_v4 = vld [vmem:[%s3505_s25 + $0x70c] ss:$16 sps:$4 sm:$0xff]  }
 0x101   : > { %2388 = vmatpush1.bf16.msra.mxu0 %v3348_v8  ;;  %v3426_v8 = vld [vmem:[%s3505_s25 + $0x808] ss:$16 sps:$4 sm:$0xff]  }
 0x102   : > { %2363 = vmatpush2.bf16.msra.mxu1 %v3345_v52  ;;  %2389 = vmatprep.subr.bf16.mxu0 %v3356_v9  ;;  %v3423_v52 = vld [vmem:[%s3505_s25 + $0x708] ss:$16 sps:$4 sm:$0xff]  }
 0x103   : > { %2364 = vmatprep.subr.bf16.mxu1 %v3353_v6 }
 0x105   : > { %2390 = vmatpush1.bf16.msra.mxu0 %v3354_v11 }
 0x106   : > { %2365 = vmatpush2.bf16.msra.mxu1 %v3351_v10  ;;  %2391 = vmatprep.subr.bf16.mxu0 %v3362_v12 }
 0x107   : > { %2366 = vmatprep.subr.bf16.mxu1 %v3359_v38 }
 0x109   : > { %2392 = vmatpush1.bf16.msra.mxu0 %v3360_v14 }
 0x10a   : > { %2367 = vmatpush2.bf16.msra.mxu1 %v3357_v13  ;;  %2393 = vmatprep.subr.bf16.mxu0 %v3368_v16 }
 0x10b   : > { %2368 = vmatprep.subr.bf16.mxu1 %v3365_v15 }
 0x10d   : > { %2394 = vmatpush1.bf16.msra.mxu0 %v3366_v20  ;;  %v286_v20 = vld [vmem:[#allocation2 + $0x10] sm:$0xff] }
 0x10e   : > { %2369 = vmatpush2.bf16.msra.mxu1 %v3363_v19  ;;  %2395 = vmatprep.subr.bf16.mxu0 %v3374_v22 }
 0x10f   : > { %2370 = vmatprep.subr.bf16.mxu1 %v3371_v21 }
 0x111   : > { %2396 = vmatpush1.bf16.msra.mxu0 %v3372_v24 }
 0x112   : > { %2371 = vmatpush2.bf16.msra.mxu1 %v3369_v23  ;;  %2397 = vmatprep.subr.bf16.mxu0 %v3380_v26 }
 0x113   : > { %2372 = vmatprep.subr.bf16.mxu1 %v3377_v25 }
 0x115   : > { %2398 = vmatpush1.bf16.msra.mxu0 %v3378_v29 }
 0x116   : > { %2373 = vmatpush2.bf16.msra.mxu1 %v3375_v28  ;;  %2399 = vmatprep.subr.bf16.mxu0 %v3383_v30 }
 0x117   : > { %2424 = vmatprep.subr.bf16.mxu1 %v3386_v31 }
 0x118   : > { %v2089_v35 = vpop.f32.mrf.mxu0 }
 0x119   : > { %v2130_v7 = vpop.f32.mrf.mxu1  ;;  %2375 = vmatmul.mubr.bf16.vlgmr.msra.gmra.mxu1 %v3670_v17  ;;  %2400 = vmatpush2.bf16.msra.mxu0 %v3381_v32 }
 0x11a   : > { %v3822_v36 = vadd.f32 %v2130_v7, %v2089_v35  ;;  %2425 = vmatpush1.bf16.msra.mxu1 %v3384_v33  ;;  %v2091_v41 = vpop.f32.mrf.mxu0  ;;  %2401 = vmatprep.subr.bf16.mxu0 %v3389_v48 }
 0x11b   : > { %v2132_v37 = vpop.f32.mrf.mxu1  ;;  %2426 = vmatprep.subr.bf16.mxu1 %v3392_v34  ;;  %2456 = vmatprep.mubr.bf16.mxu1 %v3454_v27  ;;  %v3399_v27 = vld [vmem:[%s3505_s25 + $0x788] ss:$16 sps:$4 sm:$0xff]  }
 0x11c   : > { %v3828_v44 = vadd.f32 %v2132_v37, %v2091_v41  ;;  %v2093_v17 = vpop.f32.mrf.mxu0 }
 0x11d   : > { %v2134_v45 = vpop.f32.mrf.mxu1  ;;  %2402 = vmatpush2.bf16.msra.mxu0 %v3387_v39 }
 0x11e   : > { %2427 = vmatpush1.bf16.msra.mxu1 %v3390_v40  ;;  %v2094_v49 = vpop.f32.mrf.mxu0  ;;  %2403 = vmatprep.subr.bf16.mxu0 %v3395_v42 }
 0x11f   : > { %v2135_v50 = vpop.f32.mrf.mxu1  ;;  %2428 = vmatprep.subr.bf16.mxu1 %v3398_v43 }
 0x121   : > { %2404 = vmatpush2.bf16.msra.mxu0 %v3393_v46 }
 0x122   : > { %2429 = vmatpush1.bf16.msra.mxu1 %v3396_v47  ;;  %2405 = vmatprep.subr.bf16.mxu0 %v3401_v51  ;;  %v288_v47 = vld [vmem:[#allocation2 + $0x18] sm:$0xff] }
 0x123   : > { %2430 = vmatprep.subr.bf16.mxu1 %v3404_v53 }
 0x125   : > { %2406 = vmatpush2.bf16.msra.mxu0 %v3399_v27  ;;  %v289_v27 = vld [vmem:[#allocation2 + $0x8] sm:$0xff] }
 0x126   : > { %2431 = vmatpush1.bf16.msra.mxu1 %v3402_v54  ;;  %2407 = vmatprep.subr.bf16.mxu0 %v3407_v56 }
 0x127   : > { %2432 = vmatprep.subr.bf16.mxu1 %v3410_v57 }
 0x129   : > { %2408 = vmatpush2.bf16.msra.mxu0 %v3405_v58 }
 0x12a   : > { %2433 = vmatpush1.bf16.msra.mxu1 %v3408_v59  ;;  %2409 = vmatprep.subr.bf16.mxu0 %v3413_v60 }
 0x12b   : > { %2434 = vmatprep.subr.bf16.mxu1 %v3416_v61 }
 0x12d   : > { %2410 = vmatpush2.bf16.msra.mxu0 %v3411_v62 }
 0x12e   : > { %2435 = vmatpush1.bf16.msra.mxu1 %v3414_v63  ;;  %2411 = vmatprep.subr.bf16.mxu0 %v3419_v0 }
 0x12f   : > { %2436 = vmatprep.subr.bf16.mxu1 %v3422_v1 }
 0x131   : > { %2412 = vmatpush2.bf16.msra.mxu0 %v3417_v2 }
 0x132   : > { %2437 = vmatpush1.bf16.msra.mxu1 %v3420_v3  ;;  %2413 = vmatprep.subr.bf16.mxu0 %v3425_v4 }
 0x133   : > { %2438 = vmatprep.subr.bf16.mxu1 %v3428_v5 }
 0x135   : > { %2414 = vmatpush2.bf16.msra.mxu0 %v3423_v52 }
 0x136   : > { %2439 = vmatpush1.bf16.msra.mxu1 %v3426_v8 }
 0x138   : > { %2416 = vmatmul.mubr.bf16.vlgmr.msra.gmra.mxu0 %v3674_v18  ;;  %v287_v18 = vld [vmem:[#allocation2] sm:$0xff] }
 0x139   : > { %2457 = vmatmul.mubr.bf16.vlgmr.msra.gmra.mxu1 %v3713_v55 }
 0x158   : > { %v2171_v6 = vpop.f32.mrf.mxu0 }
 0x159   : > { %v2212_v9 = vpop.f32.mrf.mxu1  ;;  %v2172_v15 = vadd.f32 %v2171_v6, %v3822_v36 }
 0x15a   : > { %v2173_v10 = vpop.f32.mrf.mxu0 }
 0x15b   : > { %v2214_v11 = vpop.f32.mrf.mxu1  ;;  %v2174_v16 = vadd.f32 %v2173_v10, %v3828_v44  ;;  %v2213_v19 = vadd.f32 %v2212_v9, %v2172_v15 }
 0x15c   : > { %v2175_v38 = vpop.f32.mrf.mxu0 }
 0x15d   : > { %v2216_v12 = vpop.f32.mrf.mxu1  ;;  %v2215_v22 = vadd.f32 %v2214_v11, %v2174_v16 }
 0x15e   : > { %v2176_v13 = vpop.f32.mrf.mxu0 }
 0x15f   : > { %v2217_v14 = vpop.f32.mrf.mxu1 }
 0x178   : > { %v2253_v21 = vpop.f32.mrf.mxu0 }
 0x179   : > { %v2254_v23 = vadd.f32 %v2253_v21, %v2213_v19 }
 0x17a   : > { %v2255_v24 = vpop.f32.mrf.mxu0 }
 0x17b   : > { %v2465_v55 = vadd.f32 %v2254_v23, %v286_v20  ;;  %v2256_v25 = vadd.f32 %v2255_v24, %v2215_v22 }
 0x17c   : > { %v2257_v26 = vpop.f32.mrf.mxu0 }
 0x17d   : > { %2469 = vst [vmem:[#allocation2 + $0x10] sm:$0xff] %v2465_v55  ;;  %v2466_v28 = vadd.f32 %v2256_v25, %v287_v18 }
 0x17e   : > { %v2258_v29 = vpop.f32.mrf.mxu0 }
 0x17f   : > { %2470 = vst [vmem:[#allocation2] sm:$0xff] %v2466_v28 }
 0x199   : > { %v2294_v30 = vpop.f32.mrf.mxu1 }
 0x19b   : > { %v2296_v31 = vpop.f32.mrf.mxu1 }
 0x19d   : > { %v2298_v32 = vpop.f32.mrf.mxu1 }
 0x19f   : > { %v2299_v33 = vpop.f32.mrf.mxu1 }
 0x1b8   : > { %v2335_v48 = vpop.f32.mrf.mxu0 }
 0x1b9   : > { %v2336_v37 = vadd.f32 %v2335_v48, %v2294_v30 }
 0x1ba   : > { %v2337_v34 = vpop.f32.mrf.mxu0 }
 0x1bb   : > { %v2338_v42 = vadd.f32 %v2337_v34, %v2296_v31 }
 0x1bc   : > { %v2339_v35 = vpop.f32.mrf.mxu0 }
 0x1be   : > { %v2340_v7 = vpop.f32.mrf.mxu0 }
 0x1d9   : > { %v2376_v36 = vpop.f32.mrf.mxu1 }
 0x1da   : > { %v2377_v43 = vadd.f32 %v2376_v36, %v2336_v37 }
 0x1db   : > { %v2378_v39 = vpop.f32.mrf.mxu1 }
 0x1dc   : > { %v2379_v45 = vadd.f32 %v2378_v39, %v2338_v42 }
 0x1dd   : > { %v2380_v40 = vpop.f32.mrf.mxu1 }
 0x1df   : > { %v2381_v41 = vpop.f32.mrf.mxu1 }
 0x1f8   : > { %v2417_v44 = vpop.f32.mrf.mxu0 }
 0x1f9   : > { %v2458_v17 = vpop.f32.mrf.mxu1  ;;  %v2418_v46 = vadd.f32 %v2417_v44, %v2377_v43 }
 0x1fa   : > { %v2419_v49 = vpop.f32.mrf.mxu0 }
 0x1fb   : > { %v2460_v50 = vpop.f32.mrf.mxu1  ;;  %v2459_v51 = vadd.f32 %v2458_v17, %v2418_v46  ;;  %v2420_v53 = vadd.f32 %v2419_v49, %v2379_v45 }
 0x1fc   : > { %v2421_v54 = vpop.f32.mrf.mxu0 }
 0x1fd   : > { %v2462_v56 = vpop.f32.mrf.mxu1  ;;  %v2467_v57 = vadd.f32 %v2459_v51, %v288_v47  ;;  %v2461_v58 = vadd.f32 %v2460_v50, %v2420_v53  ;;  %2476 = sbr.rel (%p2952_p7) target bundleno = 529 (0x211), region = 40 }
 0x1fe   : > { %v2422_v59 = vpop.f32.mrf.mxu0 }
 0x1ff   : > { %v2463_v60 = vpop.f32.mrf.mxu1  ;;  %2471 = vst [vmem:[#allocation2 + $0x18] sm:$0xff] %v2467_v57  ;;  %v2468_v61 = vadd.f32 %v2461_v58, %v289_v27 }
 0x201   : > { %2472 = vst [vmem:[#allocation2 + $0x8] sm:$0xff] %v2468_v61 }
 0x202   : > { %v2483_v62 = vlaneseq  ;;  %v2481_v0 = vld [vmem:[%s3878_s2] sm:$0xf]  ;;  %v2477_v1 = vld [vmem:[#allocation2 + $0x10] sm:$0xff] }
 0x203   : > { %v2478_v52 = vld [vmem:[#allocation2] sm:$0xff] }
 0x204   : > { %v2484_v63 = vshrl.u32 %v2483_v62, 7 }
 0x206   : > { %v2485_v2 = vsub.s32 0, %v2484_v63  ;;  %v2489_v3 = vsub.s32 1, %v2484_v63  ;;  %v2493_v4 = vsub.s32 2, %v2484_v63  ;;  %v2497_v5 = vsub.s32 3, %v2484_v63  ;;  %v2479_v8 = vld [vmem:[#allocation2 + $0x18] sm:$0xff] }
 0x208   : > { %v2480_v6 = vld [vmem:[#allocation2 + $0x8] sm:$0xff]  ;;  %v2486_v9 = vrot.slane %v2481_v0, %v2485_v2  ;;  %v2490_v10 = vrot.slane %v2481_v0, %v2489_v3  ;;  %v2494_v11 = vrot.slane %v2481_v0, %v2493_v4  ;;  %v2498_v38 = vrot.slane %v2481_v0, %v2497_v5 }
 0x20a   : > { %v2503_v12 = vadd.f32 %v2486_v9, %v2477_v1  ;;  %v2504_v13 = vadd.f32 %v2490_v10, %v2478_v52  ;;  %v2505_v14 = vadd.f32 %v2494_v11, %v2479_v8  ;;  %v2506_v15 = vadd.f32 %v2498_v38, %v2480_v6 }
 0x20c   : > { %v2507_v16 = vmax.f32 %v2503_v12, 0.0  ;;  %v2508_v19 = vmax.f32 %v2504_v13, 0.0  ;;  %v2509_v20 = vmax.f32 %v2505_v14, 0.0  ;;  %v2510_v21 = vmax.f32 %v2506_v15, 0.0 }
 0x20e   : > { %v2960_v22 = vpack.c.bf16 %v2508_v19, %v2507_v16  ;;  %v2961_v23 = vpack.c.bf16 %v2510_v21, %v2509_v20 }
 0x210   : > { %2527 = vst [vmem:[%s3879_s3] sm:$0xff] %v2960_v22  ;;  %2528 = vst [vmem:[%s3879_s3 + $0x8] sm:$0xff] %v2961_v23 }
 0x211 PF: > { %s13_s14 = sadd.s32 1, %s3451_s14   ;;  %s3880_s12 = smov %s3447_s13 }
 0x212   : > { %p10_p8 = scmp.ge.s32.totalorder %s13_s14, 4   ;;  %s3881_s13 = smov %s3883_s15 }
 0x214   :  { %12 = sbr.rel (!%p10_p8) target bundleno = 2 (0x2), region = 76 }

// kernel: model_forward.43
= control target key start
LH: loop header
LB: loop body
LE: loop exit
PB: predicated region body
PF: predicated region fallthrough
CT: control target
= control target key end

     0   :  { %vm55_vm0 = vcmask 64512   ;;  %v822_v0 = vmov 0.0   ;;  %vm823_vm1 = vmmov 0   ;;  %vm141_vm2 = vcmask 261120   ;;  %s1214_s2 = inlined_call_operand.vmem [shape: f32[8,32], index: 2, kind: input, shape index: {}]   ;;  %s1215_s1 = inlined_call_operand.vmem [shape: f32[2,8], index: 1, kind: input, shape index: {}]   ;;  %s1216_s4 = inlined_call_operand.vmem [shape: f32[32,32], index: 4, kind: input, shape index: {}]   ;;  %s1217_s6 = inlined_call_operand.vmem [shape: f32[512,128], index: 6, kind: input, shape index: {}]   ;;  %s1218_s3 = inlined_call_operand.vmem [shape: f32[1,32], index: 3, kind: input, shape index: {}]   ;;  %s1219_s7 = inlined_call_operand.vmem [shape: f32[32,128], index: 7, kind: input, shape index: {}]   ;;  %s1220_s0 = inlined_call_operand.vmem [shape: bf16[2,1,512], index: 0, kind: input, shape index: {}]   ;;  %s1221_s5 = inlined_call_operand.vmem [shape: f32[1,32], index: 5, kind: input, shape index: {}]   ;;  %s1222_s9 = inlined_call_operand.vmem [shape: f32[128,1], index: 9, kind: input, shape index: {}]   ;;  %s1223_s10 = inlined_call_operand.<no memory space> [shape: f32[1,1], index: 10, kind: input, shape index: {}]   ;;  %s1224_s8 = inlined_call_operand.vmem [shape: f32[1,128], index: 8, kind: input, shape index: {}]   ;;  %s1225_s11 = inlined_call_operand.vmem [shape: f32[2,1], index: 11, kind: output, shape index: {}]  }
   0x1   :  { %758 = vmatprep.subr.mxu0 %v822_v0  ;;  %v47_v1 = vld [vmem:[%s1214_s2] sm:$0xff]  ;;  %760 = vmatprep.mubr.msk.f32.mxu0 %vm823_vm1, %v822_v0  ;;  %v133_v3 = vld [vmem:[%s1216_s4 + $0x18] sm:$0xff]  ;;  %v132_v4 = vld [vmem:[%s1216_s4 + $0x10] sm:$0xff]  ;;  %v359_v45 = vlaneseq  ;;  %vm391_vm3 = vcmask 1041409   ;;  %vm642_vm4 = vcmask 1024  }
   0x2   :  { %v46_v2 = vld [vmem:[%s1215_s1] sm:$0x3]  ;;  %759 = vmatpush3.msra.mxu0 %v47_v1  ;;  %v131_v5 = vld [vmem:[%s1216_s4 + $0x8] sm:$0xff]  ;;  %v247_v7 = vld [vmem:[%s1217_s6 + $0xf8] sm:$0xff] }
   0x3   :  { %761 = vmatmul.mubr.msk.f32.vlgmr.msra.gmra.mxu0 %vm55_vm0, %v46_v2  ;;  %763 = vmatprep.subr.mxu0 %v822_v0  ;;  %v130_v6 = vld [vmem:[%s1216_s4] sm:$0xff]  ;;  %v231_v8 = vld [vmem:[%s1217_s6 + $0x78] sm:$0xff]  ;;  %v246_v9 = vld [vmem:[%s1217_s6 + $0xf0] sm:$0xff]  ;;  %v360_v46 = vshrl.u32 %v359_v45, 7 }
   0x4   :  { %764 = vmatpush3.msra.mxu0 %v133_v3  ;;  %771 = vmatprep.mubr.msk.f32.mxu0 %vm823_vm1, %v822_v0  ;;  %v230_v10 = vld [vmem:[%s1217_s6 + $0x70] sm:$0xff]  ;;  %v245_v11 = vld [vmem:[%s1217_s6 + $0xe8] sm:$0xff]  ;;  %v244_v13 = vld [vmem:[%s1217_s6 + $0xe0] sm:$0xff] }
   0x5   :  { %765 = vmatprep.subr.mxu0 %v822_v0  ;;  %671 = vmatprep.subr.mxu1 %v247_v7  ;;  %v229_v12 = vld [vmem:[%s1217_s6 + $0x68] sm:$0xff]  ;;  %v228_v14 = vld [vmem:[%s1217_s6 + $0x60] sm:$0xff]  ;;  %v243_v15 = vld [vmem:[%s1217_s6 + $0xd8] sm:$0xff]  ;;  %v365_v50 = vsub.s32 2, %v360_v46  ;;  %v361_v51 = vsub.s32 0, %v360_v46  ;;  %v373_v62 = vsub.s32 6, %v360_v46 }
   0x6   :  { %766 = vmatpush3.msra.mxu0 %v132_v4  ;;  %672 = vmatpush3.msra.mxu1 %v231_v8  ;;  %v227_v16 = vld [vmem:[%s1217_s6 + $0x58] sm:$0xff]  ;;  %v242_v17 = vld [vmem:[%s1217_s6 + $0xd0] sm:$0xff]  ;;  %v241_v19 = vld [vmem:[%s1217_s6 + $0xc8] sm:$0xff]  ;;  %v369_v63 = vsub.s32 4, %v360_v46 }
   0x7   :  { %767 = vmatprep.subr.mxu0 %v822_v0  ;;  %673 = vmatprep.subr.mxu1 %v246_v9  ;;  %v226_v18 = vld [vmem:[%s1217_s6 + $0x50] sm:$0xff]  ;;  %v225_v20 = vld [vmem:[%s1217_s6 + $0x48] sm:$0xff]  ;;  %v240_v21 = vld [vmem:[%s1217_s6 + $0xc0] sm:$0xff] }
   0x8   :  { %768 = vmatpush3.msra.mxu0 %v131_v5  ;;  %674 = vmatpush3.msra.mxu1 %v230_v10  ;;  %v224_v22 = vld [vmem:[%s1217_s6 + $0x40] sm:$0xff]  ;;  %v239_v23 = vld [vmem:[%s1217_s6 + $0xb8] sm:$0xff]  ;;  %v238_v25 = vld [vmem:[%s1217_s6 + $0xb0] sm:$0xff] }
   0x9   :  { %769 = vmatprep.subr.mxu0 %v822_v0  ;;  %675 = vmatprep.subr.mxu1 %v245_v11  ;;  %v223_v24 = vld [vmem:[%s1217_s6 + $0x38] sm:$0xff]  ;;  %v222_v26 = vld [vmem:[%s1217_s6 + $0x30] sm:$0xff]  ;;  %v237_v27 = vld [vmem:[%s1217_s6 + $0xa8] sm:$0xff] }
   0xa   :  { %770 = vmatpush3.msra.mxu0 %v130_v6  ;;  %676 = vmatpush3.msra.mxu1 %v229_v12  ;;  %v221_v28 = vld [vmem:[%s1217_s6 + $0x28] sm:$0xff]  ;;  %v236_v29 = vld [vmem:[%s1217_s6 + $0xa0] sm:$0xff]  ;;  %v235_v31 = vld [vmem:[%s1217_s6 + $0x98] sm:$0xff] }
   0xb   :  { %774 = vmatprep.subr.mxu0 %v822_v0  ;;  %677 = vmatprep.subr.mxu1 %v244_v13  ;;  %v220_v30 = vld [vmem:[%s1217_s6 + $0x20] sm:$0xff]  ;;  %v219_v32 = vld [vmem:[%s1217_s6 + $0x18] sm:$0xff]  ;;  %v234_v33 = vld [vmem:[%s1217_s6 + $0x90] sm:$0xff] }
   0xc   :  { %678 = vmatpush3.msra.mxu1 %v228_v14  ;;  %v218_v34 = vld [vmem:[%s1217_s6 + $0x10] sm:$0xff]  ;;  %v233_v35 = vld [vmem:[%s1217_s6 + $0x88] sm:$0xff]  ;;  %v232_v37 = vld [vmem:[%s1217_s6 + $0x80] sm:$0xff] }
   0xd   :  { %679 = vmatprep.subr.mxu1 %v243_v15  ;;  %v217_v36 = vld [vmem:[%s1217_s6 + $0x8] sm:$0xff]  ;;  %v648_v38 = vld [vmem:[%s1218_s3] ss:$0 sm:$0xff]  ;;  %v283_v43 = vld [vmem:[%s1219_s7 + $0x18] sm:$0xff] }
   0xe   :  { %680 = vmatpush3.msra.mxu1 %v227_v16  ;;  %v282_v44 = vld [vmem:[%s1219_s7 + $0x10] sm:$0xff]  ;;  %v656_v47 = vld [vmem:[%s1220_s0] sm:$0xff]   ;;  %v281_v58 = vld [vmem:[%s1219_s7 + $0x8] sm:$0xff] }
   0xf   :  { %681 = vmatprep.subr.mxu1 %v242_v17  ;;  %v657_v48 = vunpack.c.l.bf16 %v656_v47  ;;  %v658_v49 = vunpack.c.h.bf16 %v656_v47  ;;  %v216_v56 = vld [vmem:[%s1217_s6] sm:$0xff]  ;;  %v279_v61 = vld [vmem:[%s1217_s6 + $0x1f8] sm:$0xff]  ;;  %v278_v13 = vld [vmem:[%s1217_s6 + $0x1f0] sm:$0xff] }
  0x10   :  { %682 = vmatpush3.msra.mxu1 %v226_v18  ;;  %v280_v60 = vld [vmem:[%s1219_s7] sm:$0xff]  ;;  %v263_v12 = vld [vmem:[%s1217_s6 + $0x178] sm:$0xff]  ;;  %v262_v14 = vld [vmem:[%s1217_s6 + $0x170] sm:$0xff] }
  0x11   :  { %683 = vmatprep.subr.mxu1 %v241_v19  ;;  %v366_v52 = vrot.slane %v657_v48, %v365_v50  ;;  %v382_v53 = vrot.slane %v658_v49, %v365_v50  ;;  %v362_v54 = vrot.slane %v657_v48, %v361_v51  ;;  %v378_v55 = vrot.slane %v658_v49, %v361_v51  ;;  %v650_v7 = vld [vmem:[%s1221_s5] ss:$0 sm:$0xff]  ;;  %v277_v15 = vld [vmem:[%s1217_s6 + $0x1e8] sm:$0xff]  ;;  %v275_v19 = vld [vmem:[%s1217_s6 + $0x1d8] sm:$0xff] }
  0x12   :  { %684 = vmatpush3.msra.mxu1 %v225_v20  ;;  %v374_v1 = vrot.slane %v657_v48, %v373_v62  ;;  %v390_v2 = vrot.slane %v658_v49, %v373_v62  ;;  %v370_v3 = vrot.slane %v657_v48, %v369_v63  ;;  %v386_v4 = vrot.slane %v658_v49, %v369_v63  ;;  %v261_v16 = vld [vmem:[%s1217_s6 + $0x168] sm:$0xff]  ;;  %v276_v17 = vld [vmem:[%s1217_s6 + $0x1e0] sm:$0xff]  ;;  %v259_v20 = vld [vmem:[%s1217_s6 + $0x158] sm:$0xff] }
  0x13   :  { %685 = vmatprep.subr.mxu1 %v240_v21  ;;  %v393_v57 = vsel %vm391_vm3, %v382_v53, %v366_v52  ;;  %v392_v59 = vsel %vm391_vm3, %v378_v55, %v362_v54  ;;  %v260_v18 = vld [vmem:[%s1217_s6 + $0x160] sm:$0xff]  ;;  %v274_v21 = vld [vmem:[%s1217_s6 + $0x1d0] sm:$0xff]  ;;  %v562_v45 = vld [vmem:[%s1222_s9 + $0x68] sm:$0xff] }
  0x14   :  { %686 = vmatpush3.msra.mxu1 %v224_v22  ;;  %464 = vmatprep.mubr.f32.mxu1 %v393_v57  ;;  %v395_v5 = vsel %vm391_vm3, %v390_v2, %v374_v1  ;;  %v1042_v6 = vsel %vm391_vm3, %v386_v4, %v370_v3  ;;  %v258_v22 = vld [vmem:[%s1217_s6 + $0x150] sm:$0xff]  ;;  %v561_v46 = vld [vmem:[%s1222_s9 + $0x60] sm:$0xff]  ;;  %v560_v47 = vld [vmem:[%s1222_s9 + $0x58] sm:$0xff] }
  0x15   :  { %687 = vmatprep.subr.mxu1 %v239_v23  ;;  %v273_v23 = vld [vmem:[%s1217_s6 + $0x1c8] sm:$0xff]  ;;  %v559_v48 = vld [vmem:[%s1222_s9 + $0x50] sm:$0xff]  ;;  %v557_v50 = vld [vmem:[%s1222_s9 + $0x40] sm:$0xff] }
  0x16   :  { %688 = vmatpush3.msra.mxu1 %v223_v24  ;;  %v257_v24 = vld [vmem:[%s1217_s6 + $0x148] sm:$0xff]  ;;  %v556_v51 = vld [vmem:[%s1222_s9 + $0x38] sm:$0xff]  ;;  %v555_v52 = vld [vmem:[%s1222_s9 + $0x30] sm:$0xff] }
  0x17   :  { %689 = vmatprep.subr.mxu1 %v238_v25  ;;  %v272_v25 = vld [vmem:[%s1217_s6 + $0x1c0] sm:$0xff]  ;;  %v558_v49 = vld [vmem:[%s1222_s9 + $0x48] sm:$0xff]  ;;  %v552_v55 = vld [vmem:[%s1222_s9 + $0x18] sm:$0xff] }
  0x18   :  { %690 = vmatpush3.msra.mxu1 %v222_v26  ;;  %v256_v26 = vld [vmem:[%s1217_s6 + $0x140] sm:$0xff]  ;;  %v554_v53 = vld [vmem:[%s1222_s9 + $0x28] sm:$0xff] }
  0x19   :  { %691 = vmatprep.subr.mxu1 %v237_v27  ;;  %v271_v27 = vld [vmem:[%s1217_s6 + $0x1b8] sm:$0xff]  ;;  %v553_v54 = vld [vmem:[%s1222_s9 + $0x20] sm:$0xff]  ;;  %v550_v57 = vld [vmem:[%s1222_s9 + $0x8] sm:$0xff] }
  0x1a   :  { %692 = vmatpush3.msra.mxu1 %v221_v28  ;;  %v255_v28 = vld [vmem:[%s1217_s6 + $0x138] sm:$0xff] }
  0x1b   :  { %693 = vmatprep.subr.mxu1 %v236_v29  ;;  %v270_v29 = vld [vmem:[%s1217_s6 + $0x1b0] sm:$0xff] }
  0x1c   :  { %694 = vmatpush3.msra.mxu1 %v220_v30  ;;  %v254_v30 = vld [vmem:[%s1217_s6 + $0x130] sm:$0xff] }
  0x1d   :  { %695 = vmatprep.subr.mxu1 %v235_v31  ;;  %v269_v31 = vld [vmem:[%s1217_s6 + $0x1a8] sm:$0xff] }
  0x1e   :  { %696 = vmatpush3.msra.mxu1 %v219_v32  ;;  %v253_v32 = vld [vmem:[%s1217_s6 + $0x128] sm:$0xff] }
  0x1f   :  { %697 = vmatprep.subr.mxu1 %v234_v33  ;;  %v268_v33 = vld [vmem:[%s1217_s6 + $0x1a0] sm:$0xff] }
  0x20   :  { %698 = vmatpush3.msra.mxu1 %v218_v34  ;;  %v252_v34 = vld [vmem:[%s1217_s6 + $0x120] sm:$0xff] }
  0x21   :  { %699 = vmatprep.subr.mxu1 %v233_v35  ;;  %v267_v35 = vld [vmem:[%s1217_s6 + $0x198] sm:$0xff] }
  0x22   :  { %700 = vmatpush3.msra.mxu1 %v217_v36  ;;  %v251_v36 = vld [vmem:[%s1217_s6 + $0x118] sm:$0xff] }
  0x23   :  { %701 = vmatprep.subr.mxu1 %v232_v37  ;;  %v266_v37 = vld [vmem:[%s1217_s6 + $0x190] sm:$0xff] }
  0x24   :  { %702 = vmatpush3.msra.mxu1 %v216_v56  ;;  %v551_v56 = vld [vmem:[%s1222_s9 + $0x10] sm:$0xff] }
  0x25   :  { %465 = vmatmul.mubr.f32.vlgmr.msra.gmra.mxu1 %v392_v59  ;;  %785 = vmatprep.subr.mxu1 %v822_v0  ;;  %v16_v59 = vstv %s1223_s10 }
  0x26   :  { %817 = vmatprep.mubr.msk.f32.mxu1 %vm823_vm1, %v822_v0  ;;  %17 = vst [vmem:[#allocation2] sm:$0x1] %v16_v59 }
  0xc3   :  { %v125_v39 = vpop.f32.mrf.mxu0 }
  0xc4   :  { %v126_v40 = vadd.f32 %v648_v38, %v125_v39  ;;  %v250_v38 = vld [vmem:[%s1217_s6 + $0x110] sm:$0xff]  ;;  %v265_v39 = vld [vmem:[%s1217_s6 + $0x188] sm:$0xff] }
  0xc5   :  { %v762_v41 = vpop.f32.mrf.mxu0 }
  0xc6   :  { %v129_v42 = vmax.f32 %v126_v40, 0.0  ;;  %v249_v40 = vld [vmem:[%s1217_s6 + $0x108] sm:$0xff]  ;;  %v264_v41 = vld [vmem:[%s1217_s6 + $0x180] sm:$0xff] }
  0xc8   :  { %772 = vmatmul.mubr.msk.f32.vlgmr.msra.gmra.mxu0 %vm141_vm2, %v129_v42  ;;  %v248_v42 = vld [vmem:[%s1217_s6 + $0x100] sm:$0xff] }
  0xc9   :  { %775 = vmatpush3.msra.mxu0 %v283_v43  ;;  %782 = vmatprep.mubr.msk.f32.mxu0 %vm823_vm1, %v822_v0  ;;  %v564_v43 = vld [vmem:[%s1222_s9 + $0x78] sm:$0xff] }
  0xca   :  { %776 = vmatprep.subr.mxu0 %v822_v0  ;;  %786 = vmatpush3.msra.mxu1 %v564_v43 }
  0xcb   :  { %777 = vmatpush3.msra.mxu0 %v282_v44  ;;  %v563_v44 = vld [vmem:[%s1222_s9 + $0x70] sm:$0xff]  ;;  %787 = vmatprep.subr.mxu1 %v822_v0 }
  0xcc   :  { %778 = vmatprep.subr.mxu0 %v822_v0  ;;  %788 = vmatpush3.msra.mxu1 %v563_v44 }
  0xcd   :  { %779 = vmatpush3.msra.mxu0 %v281_v58  ;;  %789 = vmatprep.subr.mxu1 %v822_v0  ;;  %v549_v58 = vld [vmem:[%s1222_s9] sm:$0xff] }
  0xce   :  { %780 = vmatprep.subr.mxu0 %v822_v0  ;;  %790 = vmatpush3.msra.mxu1 %v562_v45 }
  0xcf   :  { %781 = vmatpush3.msra.mxu0 %v280_v60  ;;  %791 = vmatprep.subr.mxu1 %v822_v0 }
  0xd0   :  { %706 = vmatprep.subr.mxu0 %v279_v61  ;;  %792 = vmatpush3.msra.mxu1 %v561_v46 }
  0xd1   :  { %793 = vmatprep.subr.mxu1 %v822_v0 }
  0xd2   :  { %794 = vmatpush3.msra.mxu1 %v560_v47 }
  0xd3   :  { %795 = vmatprep.subr.mxu1 %v822_v0 }
  0xd4   :  { %796 = vmatpush3.msra.mxu1 %v559_v48 }
  0xd5   :  { %797 = vmatprep.subr.mxu1 %v822_v0 }
  0xd6   :  { %798 = vmatpush3.msra.mxu1 %v558_v49 }
  0xd7   :  { %799 = vmatprep.subr.mxu1 %v822_v0 }
  0xd8   :  { %800 = vmatpush3.msra.mxu1 %v557_v50 }
  0xd9   :  { %801 = vmatprep.subr.mxu1 %v822_v0 }
  0xda   :  { %802 = vmatpush3.msra.mxu1 %v556_v51 }
  0xdb   :  { %803 = vmatprep.subr.mxu1 %v822_v0 }
  0xdc   :  { %804 = vmatpush3.msra.mxu1 %v555_v52 }
  0xdd   :  { %805 = vmatprep.subr.mxu1 %v822_v0 }
  0xde   :  { %806 = vmatpush3.msra.mxu1 %v554_v53 }
  0xdf   :  { %807 = vmatprep.subr.mxu1 %v822_v0 }
  0xe0   :  { %808 = vmatpush3.msra.mxu1 %v553_v54 }
  0xe1   :  { %809 = vmatprep.subr.mxu1 %v822_v0 }
  0xe2   :  { %810 = vmatpush3.msra.mxu1 %v552_v55 }
  0xe3   :  { %811 = vmatprep.subr.mxu1 %v822_v0 }
  0xe4   :  { %812 = vmatpush3.msra.mxu1 %v551_v56 }
  0xe5   :  { %813 = vmatprep.subr.mxu1 %v822_v0  ;;  %v703_v62 = vpop.f32.mrf.mxu1 }
  0xe6   :  { %814 = vmatpush3.msra.mxu1 %v550_v57 }
  0xe7   :  { %815 = vmatprep.subr.mxu1 %v822_v0  ;;  %v704_v63 = vpop.f32.mrf.mxu1  ;;  %v653_v0 = vld [vmem:[%s1224_s8] ss:$0 sm:$0xff] }
  0xe8   :  { %816 = vmatpush3.msra.mxu1 %v549_v58  ;;  %v705_v1 = vadd.f32 %v704_v63, %v703_v62 }
 0x188   :  { %v211_v8 = vpop.f32.mrf.mxu0 }
 0x189   :  { %v212_v9 = vadd.f32 %v650_v7, %v211_v8 }
 0x18a   :  { %v773_v10 = vpop.f32.mrf.mxu0 }
 0x18b   :  { %v215_v11 = vmax.f32 %v212_v9, 0.0  ;;  %v654_v9 = vld [vmem:[#allocation2] ss:$0 sm:$0xff] }
 0x18d   :  { %783 = vmatmul.mubr.msk.f32.vlgmr.msra.gmra.mxu0 %vm141_vm2, %v215_v11 }
 0x18e   :  { %707 = vmatpush3.msra.mxu0 %v263_v12  ;;  %534 = vmatprep.mubr.f32.mxu0 %v395_v5 }
 0x18f   :  { %708 = vmatprep.subr.mxu0 %v278_v13 }
 0x190   :  { %709 = vmatpush3.msra.mxu0 %v262_v14 }
 0x191   :  { %710 = vmatprep.subr.mxu0 %v277_v15 }
 0x192   :  { %711 = vmatpush3.msra.mxu0 %v261_v16 }
 0x193   :  { %712 = vmatprep.subr.mxu0 %v276_v17 }
 0x194   :  { %713 = vmatpush3.msra.mxu0 %v260_v18 }
 0x195   :  { %714 = vmatprep.subr.mxu0 %v275_v19 }
 0x196   :  { %715 = vmatpush3.msra.mxu0 %v259_v20 }
 0x197   :  { %716 = vmatprep.subr.mxu0 %v274_v21 }
 0x198   :  { %717 = vmatpush3.msra.mxu0 %v258_v22 }
 0x199   :  { %718 = vmatprep.subr.mxu0 %v273_v23 }
 0x19a   :  { %719 = vmatpush3.msra.mxu0 %v257_v24 }
 0x19b   :  { %720 = vmatprep.subr.mxu0 %v272_v25 }
 0x19c   :  { %721 = vmatpush3.msra.mxu0 %v256_v26 }
 0x19d   :  { %722 = vmatprep.subr.mxu0 %v271_v27 }
 0x19e   :  { %723 = vmatpush3.msra.mxu0 %v255_v28 }
 0x19f   :  { %724 = vmatprep.subr.mxu0 %v270_v29 }
 0x1a0   :  { %725 = vmatpush3.msra.mxu0 %v254_v30 }
 0x1a1   :  { %726 = vmatprep.subr.mxu0 %v269_v31 }
 0x1a2   :  { %727 = vmatpush3.msra.mxu0 %v253_v32 }
 0x1a3   :  { %728 = vmatprep.subr.mxu0 %v268_v33 }
 0x1a4   :  { %729 = vmatpush3.msra.mxu0 %v252_v34 }
 0x1a5   :  { %730 = vmatprep.subr.mxu0 %v267_v35 }
 0x1a6   :  { %731 = vmatpush3.msra.mxu0 %v251_v36 }
 0x1a7   :  { %732 = vmatprep.subr.mxu0 %v266_v37 }
 0x1a8   :  { %733 = vmatpush3.msra.mxu0 %v250_v38 }
 0x1a9   :  { %734 = vmatprep.subr.mxu0 %v265_v39 }
 0x1aa   :  { %735 = vmatpush3.msra.mxu0 %v249_v40 }
 0x1ab   :  { %736 = vmatprep.subr.mxu0 %v264_v41 }
 0x1ac   :  { %737 = vmatpush3.msra.mxu0 %v248_v42 }
 0x1ad   :  { %535 = vmatmul.mubr.f32.vlgmr.msra.gmra.mxu0 %v1042_v6 }
 0x24d   :  { %v353_v60 = vpop.f32.mrf.mxu0 }
 0x24e   :  { %v467_v4 = vadd.f32 %v705_v1, %v353_v60 }
 0x24f   :  { %v784_v61 = vpop.f32.mrf.mxu0 }
 0x26d   :  { %v738_v2 = vpop.f32.mrf.mxu0 }
 0x26f   :  { %v739_v3 = vpop.f32.mrf.mxu0 }
 0x270   :  { %v740_v5 = vadd.f32 %v739_v3, %v738_v2 }
 0x272   :  { %v537_v6 = vadd.f32 %v740_v5, %v467_v4 }
 0x274   :  { %v547_v7 = vadd.f32 %v653_v0, %v537_v6 }
 0x276   :  { %v548_v8 = vmax.f32 %v547_v7, 0.0 }
 0x278   :  { %818 = vmatmul.mubr.f32.vlgmr.msra.gmra.mxu1 %v548_v8 }
 0x338   :  { %v638_v10 = vpop.f32.mrf.mxu1 }
 0x339   :  { %v639_v11 = vadd.f32 %v654_v9, %v638_v10 }
 0x33a   :  { %v819_v12 = vpop.f32.mrf.mxu1 }
 0x33b   :  { %643 = vst.msk [vmem:[%s1225_s11] sm:$0x3] %vm642_vm4, %v639_v11 }

// kernel: model_forward.40
= control target key start
LH: loop header
LB: loop body
LE: loop exit
PB: predicated region body
PF: predicated region fallthrough
CT: control target
= control target key end

     0   :  { %s4487_s15 = smov 0   ;;  %s4489_s16 = smov 0   ;;  %s5025_s0 = inlined_call_operand.vmem [shape: bf16[8,4608], index: 0, kind: input, shape index: {}]   ;;  %s5026_s1 = inlined_call_operand.vmem [shape: bf16[4608,512], index: 1, kind: input, shape index: {}]   ;;  %s5027_s2 = inlined_call_operand.vmem [shape: f32[1,512], index: 2, kind: input, shape index: {}]   ;;  %s5028_s3 = inlined_call_operand.vmem [shape: bf16[8,512], index: 3, kind: input, shape index: {}]   ;;  %s5029_s4 = inlined_call_operand.vmem [shape: bf16[8,512], index: 4, kind: output, shape index: {}]  }
   0x1   :  { %s4491_s17 = smov 0  }
   0x2 LB: > { %s26_s18 = sadd.s32 1, %s4455_s16  ;;  %p3413_p0 = scmp.ge.s32.totalorder %s4459_s17, 1  ;;  %s4459_s17 = sphi %s4491_s17, %s14_s17   ;;  %s4455_s16 = sphi %s4489_s16, %s5031_s16   ;;  %s4451_s15 = sphi %s4487_s15, %s5030_s15  }
   0x3   : > { %p27_p1 = scmp.ge.s32.totalorder %s26_s18, 3  ;;  %p236_p2 = scmp.lt.s32.totalorder %s4459_s17, 4 }
   0x5   : > { %s5033_s18 = smov (%p27_p1, %s26_s18), 0  ;;  %p237_p3 = pnand %p3413_p0, %p236_p2 }
   0x6   : > { %s293_s19 = smul.u32 (!%p237_p3), 12, %s4451_s15  ;;  %p3417_p6 = scmp.ne.s32.totalorder (!%p237_p3), %s4451_s15, 0 }
   0x7   : > { %240 = sbr.rel (%p237_p3) target bundleno = 627 (0x273), region = 36 }
   0x8   : > { %s303_s20 = smul.u32 (!%p237_p3), 192, %s4451_s15  ;;  %p296_p4 = scmp.lt.s32.totalorder (!%p237_p3), %s293_s19, 35 }
   0xa   : > { %p305_p5 = scmp.lt.s32.totalorder (!%p237_p3), %s303_s20, 575 }
   0xc   : > { %s5035_s19 = smov (!%p296_p4, %s293_s19), 35  ;;  %s5037_s20 = smov (!%p305_p5, %s303_s20), 575 }
   0xd   : > { %s3414_s21 = sshll.u32 %s5035_s19, 2  ;;  %s3821_s25 = sshll.u32 %s5037_s20, 4 }
   0xe   : > { %s4512_s24 = scalar_lea.vmem %s5025_s0, %s3414_s21  ;;  %s4517_s28 = scalar_lea.vmem %s5026_s1, %s3821_s25 }
   0xf   : > { %343 = sbr.rel (%p3417_p6) target bundleno = 23 (0x17), region = 40 }
  0x14   : > { %v4461_v0 = vmov 0.0  }
  0x15   : > { %344 = vst [vmem:[#allocation2 + $0x10] sm:$0xff] %v4461_v0  ;;  %345 = vst [vmem:[#allocation2] sm:$0xff] %v4461_v0 }
  0x16   : > { %346 = vst [vmem:[#allocation2 + $0x18] sm:$0xff] %v4461_v0  ;;  %347 = vst [vmem:[#allocation2 + $0x8] sm:$0xff] %v4461_v0 }
  0x17 PF: > { %v3849_v1 = vld [vmem:[%s4517_s28 + $0xe4] ss:$16 sps:$4 sm:$0xff]   ;;  %v3853_v3 = vld [vmem:[%s4517_s28 + $0xe0] ss:$16 sps:$4 sm:$0xff]   ;;  %v353_v49 = vld [vmem:[%s4512_s24 + $0x8] sm:$0xff]  ;;  %p3814_p7 = scmp.ne.s32.totalorder %s4451_s15, 2 }
  0x18   : > { %v3851_v2 = vld [vmem:[%s4517_s28 + $0x2e4] ss:$16 sps:$4 sm:$0xff]   ;;  %2704 = vmatprep.subr.bf16.mxu0 %v3849_v1  ;;  %v3854_v4 = vld [vmem:[%s4517_s28 + $0x2e0] ss:$16 sps:$4 sm:$0xff]   ;;  %v4572_v52 = vcombine.high %v353_v49, %v353_v49 }
  0x19   : > { %2745 = vmatprep.subr.bf16.mxu1 %v3851_v2  ;;  %v3855_v5 = vld [vmem:[%s4517_s28 + $0xc4] ss:$16 sps:$4 sm:$0xff]   ;;  %2705 = vmatpush1.bf16.msra.mxu0 %v3853_v3  ;;  %v3859_v7 = vld [vmem:[%s4517_s28 + $0xc0] ss:$16 sps:$4 sm:$0xff]  }
  0x1a   : > { %2746 = vmatpush1.bf16.msra.mxu1 %v3854_v4  ;;  %v3857_v6 = vld [vmem:[%s4517_s28 + $0x2c4] ss:$16 sps:$4 sm:$0xff]   ;;  %2706 = vmatprep.subr.bf16.mxu0 %v3855_v5  ;;  %v3860_v8 = vld [vmem:[%s4517_s28 + $0x2c0] ss:$16 sps:$4 sm:$0xff]  }
  0x1b   : > { %2747 = vmatprep.subr.bf16.mxu1 %v3857_v6  ;;  %v3861_v9 = vld [vmem:[%s4517_s28 + $0xa4] ss:$16 sps:$4 sm:$0xff]   ;;  %v3865_v11 = vld [vmem:[%s4517_s28 + $0xa0] ss:$16 sps:$4 sm:$0xff]   ;;  %2777 = vmatprep.mubr.bf16.mxu1 %v4572_v52 }
  0x1c   : > { %v3863_v10 = vld [vmem:[%s4517_s28 + $0x2a4] ss:$16 sps:$4 sm:$0xff]   ;;  %v3866_v12 = vld [vmem:[%s4517_s28 + $0x2a0] ss:$16 sps:$4 sm:$0xff]  }
  0x1d   : > { %2707 = vmatpush1.bf16.msra.mxu0 %v3859_v7  ;;  %v3867_v13 = vld [vmem:[%s4517_s28 + $0x84] ss:$16 sps:$4 sm:$0xff]   ;;  %v3871_v15 = vld [vmem:[%s4517_s28 + $0x80] ss:$16 sps:$4 sm:$0xff]  }
  0x1e   : > { %2748 = vmatpush1.bf16.msra.mxu1 %v3860_v8  ;;  %2708 = vmatprep.subr.bf16.mxu0 %v3861_v9  ;;  %v3869_v14 = vld [vmem:[%s4517_s28 + $0x284] ss:$16 sps:$4 sm:$0xff]   ;;  %v3872_v16 = vld [vmem:[%s4517_s28 + $0x280] ss:$16 sps:$4 sm:$0xff]   ;;  %v4596_v8 = vcombine.low %v353_v49, %v353_v49 }
  0x1f   : > { %2749 = vmatprep.subr.bf16.mxu1 %v3863_v10  ;;  %v3873_v17 = vld [vmem:[%s4517_s28 + $0x64] ss:$16 sps:$4 sm:$0xff]   ;;  %v3877_v19 = vld [vmem:[%s4517_s28 + $0x60] ss:$16 sps:$4 sm:$0xff]  }
  0x20   : > { %v3875_v18 = vld [vmem:[%s4517_s28 + $0x264] ss:$16 sps:$4 sm:$0xff]   ;;  %v3878_v20 = vld [vmem:[%s4517_s28 + $0x260] ss:$16 sps:$4 sm:$0xff]  }
  0x21   : > { %2709 = vmatpush1.bf16.msra.mxu0 %v3865_v11  ;;  %v3879_v21 = vld [vmem:[%s4517_s28 + $0x44] ss:$16 sps:$4 sm:$0xff]   ;;  %v3883_v23 = vld [vmem:[%s4517_s28 + $0x40] ss:$16 sps:$4 sm:$0xff]  }
  0x22   : > { %2750 = vmatpush1.bf16.msra.mxu1 %v3866_v12  ;;  %2710 = vmatprep.subr.bf16.mxu0 %v3867_v13  ;;  %v3881_v22 = vld [vmem:[%s4517_s28 + $0x244] ss:$16 sps:$4 sm:$0xff]   ;;  %v3884_v24 = vld [vmem:[%s4517_s28 + $0x240] ss:$16 sps:$4 sm:$0xff]  }
  0x23   : > { %2751 = vmatprep.subr.bf16.mxu1 %v3869_v14  ;;  %v3885_v25 = vld [vmem:[%s4517_s28 + $0x24] ss:$16 sps:$4 sm:$0xff]   ;;  %v3889_v27 = vld [vmem:[%s4517_s28 + $0x20] ss:$16 sps:$4 sm:$0xff]  }
  0x24   : > { %v3887_v26 = vld [vmem:[%s4517_s28 + $0x224] ss:$16 sps:$4 sm:$0xff]   ;;  %v3890_v28 = vld [vmem:[%s4517_s28 + $0x220] ss:$16 sps:$4 sm:$0xff]  }
  0x25   : > { %2711 = vmatpush1.bf16.msra.mxu0 %v3871_v15  ;;  %v3891_v29 = vld [vmem:[%s4517_s28 + $0x4] ss:$16 sps:$4 sm:$0xff]   ;;  %v3895_v31 = vld [vmem:[%s4517_s28] ss:$16 sps:$4 sm:$0xff]  }
  0x26   : > { %2752 = vmatpush1.bf16.msra.mxu1 %v3872_v16  ;;  %2712 = vmatprep.subr.bf16.mxu0 %v3873_v17  ;;  %v3893_v30 = vld [vmem:[%s4517_s28 + $0x204] ss:$16 sps:$4 sm:$0xff]   ;;  %v3896_v32 = vld [vmem:[%s4517_s28 + $0x200] ss:$16 sps:$4 sm:$0xff]  }
  0x27   : > { %2753 = vmatprep.subr.bf16.mxu1 %v3875_v18  ;;  %v3897_v33 = vld [vmem:[%s4517_s28 + $0x1e4] ss:$16 sps:$4 sm:$0xff]   ;;  %v3901_v35 = vld [vmem:[%s4517_s28 + $0x1e0] ss:$16 sps:$4 sm:$0xff]  }
  0x28   : > { %v3899_v34 = vld [vmem:[%s4517_s28 + $0x3e4] ss:$16 sps:$4 sm:$0xff]   ;;  %v3902_v36 = vld [vmem:[%s4517_s28 + $0x3e0] ss:$16 sps:$4 sm:$0xff]  }
  0x29   : > { %2713 = vmatpush1.bf16.msra.mxu0 %v3877_v19  ;;  %v3903_v37 = vld [vmem:[%s4517_s28 + $0x1c4] ss:$16 sps:$4 sm:$0xff]   ;;  %v3907_v39 = vld [vmem:[%s4517_s28 + $0x1c0] ss:$16 sps:$4 sm:$0xff]  }
  0x2a   : > { %2754 = vmatpush1.bf16.msra.mxu1 %v3878_v20  ;;  %2714 = vmatprep.subr.bf16.mxu0 %v3879_v21  ;;  %v3905_v38 = vld [vmem:[%s4517_s28 + $0x3c4] ss:$16 sps:$4 sm:$0xff]   ;;  %v3908_v40 = vld [vmem:[%s4517_s28 + $0x3c0] ss:$16 sps:$4 sm:$0xff]  }
  0x2b   : > { %2755 = vmatprep.subr.bf16.mxu1 %v3881_v22  ;;  %v3909_v41 = vld [vmem:[%s4517_s28 + $0x1a4] ss:$16 sps:$4 sm:$0xff]   ;;  %v3913_v43 = vld [vmem:[%s4517_s28 + $0x1a0] ss:$16 sps:$4 sm:$0xff]  }
  0x2c   : > { %v3911_v42 = vld [vmem:[%s4517_s28 + $0x3a4] ss:$16 sps:$4 sm:$0xff]   ;;  %v3914_v44 = vld [vmem:[%s4517_s28 + $0x3a0] ss:$16 sps:$4 sm:$0xff]  }
  0x2d   : > { %2715 = vmatpush1.bf16.msra.mxu0 %v3883_v23  ;;  %v3915_v45 = vld [vmem:[%s4517_s28 + $0x184] ss:$16 sps:$4 sm:$0xff]   ;;  %v3919_v50 = vld [vmem:[%s4517_s28 + $0x180] ss:$16 sps:$4 sm:$0xff]  }
  0x2e   : > { %2756 = vmatpush1.bf16.msra.mxu1 %v3884_v24  ;;  %2716 = vmatprep.subr.bf16.mxu0 %v3885_v25  ;;  %v3917_v46 = vld [vmem:[%s4517_s28 + $0x384] ss:$16 sps:$4 sm:$0xff]   ;;  %v3920_v51 = vld [vmem:[%s4517_s28 + $0x380] ss:$16 sps:$4 sm:$0xff]  }
  0x2f   : > { %2757 = vmatprep.subr.bf16.mxu1 %v3887_v26  ;;  %v352_v47 = vld [vmem:[%s4512_s24] sm:$0xff] }
  0x30   : > { %v4567_v48 = vcombine.high %v352_v47, %v352_v47  ;;  %v3921_v53 = vld [vmem:[%s4517_s28 + $0x164] ss:$16 sps:$4 sm:$0xff]   ;;  %v3925_v55 = vld [vmem:[%s4517_s28 + $0x160] ss:$16 sps:$4 sm:$0xff]   ;;  %v4594_v7 = vcombine.low %v352_v47, %v352_v47 }
  0x31   : > { %2717 = vmatpush1.bf16.msra.mxu0 %v3889_v27  ;;  %v3923_v54 = vld [vmem:[%s4517_s28 + $0x364] ss:$16 sps:$4 sm:$0xff]   ;;  %v3926_v56 = vld [vmem:[%s4517_s28 + $0x360] ss:$16 sps:$4 sm:$0xff]  }
  0x32   : > { %2758 = vmatpush1.bf16.msra.mxu1 %v3890_v28  ;;  %2718 = vmatprep.subr.bf16.mxu0 %v3891_v29  ;;  %v3927_v57 = vld [vmem:[%s4517_s28 + $0x144] ss:$16 sps:$4 sm:$0xff]   ;;  %v3931_v59 = vld [vmem:[%s4517_s28 + $0x140] ss:$16 sps:$4 sm:$0xff]  }
  0x33   : > { %2759 = vmatprep.subr.bf16.mxu1 %v3893_v30  ;;  %2736 = vmatprep.mubr.bf16.mxu0 %v4567_v48  ;;  %v3929_v58 = vld [vmem:[%s4517_s28 + $0x344] ss:$16 sps:$4 sm:$0xff]   ;;  %v3932_v60 = vld [vmem:[%s4517_s28 + $0x340] ss:$16 sps:$4 sm:$0xff]  }
  0x34   : > { %v3933_v61 = vld [vmem:[%s4517_s28 + $0x124] ss:$16 sps:$4 sm:$0xff]   ;;  %v3937_v63 = vld [vmem:[%s4517_s28 + $0x120] ss:$16 sps:$4 sm:$0xff]  }
  0x35   : > { %2719 = vmatpush1.bf16.msra.mxu0 %v3895_v31  ;;  %v3935_v62 = vld [vmem:[%s4517_s28 + $0x324] ss:$16 sps:$4 sm:$0xff]   ;;  %v3938_v0 = vld [vmem:[%s4517_s28 + $0x320] ss:$16 sps:$4 sm:$0xff]  }
  0x36   : > { %2760 = vmatpush1.bf16.msra.mxu1 %v3896_v32  ;;  %2720 = vmatprep.subr.bf16.mxu0 %v3897_v33  ;;  %v3939_v1 = vld [vmem:[%s4517_s28 + $0x104] ss:$16 sps:$4 sm:$0xff]   ;;  %v3943_v3 = vld [vmem:[%s4517_s28 + $0x100] ss:$16 sps:$4 sm:$0xff]  }
  0x37   : > { %2761 = vmatprep.subr.bf16.mxu1 %v3899_v34  ;;  %v3941_v2 = vld [vmem:[%s4517_s28 + $0x304] ss:$16 sps:$4 sm:$0xff]   ;;  %v3944_v4 = vld [vmem:[%s4517_s28 + $0x300] ss:$16 sps:$4 sm:$0xff]   ;;  %v4628_v34 = vld [vmem:[%s4512_s24 + $0x18] sm:$0xff] }
  0x38   : > { %v3951_v5 = vld [vmem:[%s4517_s28 + $0x4e4] ss:$16 sps:$4 sm:$0xff]   ;;  %v3949_v9 = vld [vmem:[%s4517_s28 + $0x4e0] ss:$16 sps:$4 sm:$0xff]  }
  0x39   : > { %2721 = vmatpush2.bf16.msra.mxu0 %v3901_v35  ;;  %v3954_v6 = vld [vmem:[%s4517_s28 + $0x6e4] ss:$16 sps:$4 sm:$0xff]   ;;  %v3952_v10 = vld [vmem:[%s4517_s28 + $0x6e0] ss:$16 sps:$4 sm:$0xff]  }
  0x3a   : > { %2762 = vmatpush2.bf16.msra.mxu1 %v3902_v36  ;;  %2722 = vmatprep.subr.bf16.mxu0 %v3903_v37  ;;  %v3957_v11 = vld [vmem:[%s4517_s28 + $0x4c4] ss:$16 sps:$4 sm:$0xff]   ;;  %v3955_v13 = vld [vmem:[%s4517_s28 + $0x4c0] ss:$16 sps:$4 sm:$0xff]  }
  0x3b   : > { %2763 = vmatprep.subr.bf16.mxu1 %v3905_v38  ;;  %v3960_v12 = vld [vmem:[%s4517_s28 + $0x6c4] ss:$16 sps:$4 sm:$0xff]   ;;  %v3958_v14 = vld [vmem:[%s4517_s28 + $0x6c0] ss:$16 sps:$4 sm:$0xff]   ;;  %v4638_v38 = vcombine.high %v4628_v34, %v4628_v34 }
  0x3c   : > { %v3963_v15 = vld [vmem:[%s4517_s28 + $0x4a4] ss:$16 sps:$4 sm:$0xff]   ;;  %v3961_v17 = vld [vmem:[%s4517_s28 + $0x4a0] ss:$16 sps:$4 sm:$0xff]  }
  0x3d   : > { %2723 = vmatpush2.bf16.msra.mxu0 %v3907_v39  ;;  %v3966_v16 = vld [vmem:[%s4517_s28 + $0x6a4] ss:$16 sps:$4 sm:$0xff]   ;;  %v3964_v18 = vld [vmem:[%s4517_s28 + $0x6a0] ss:$16 sps:$4 sm:$0xff]  }
  0x3e   : > { %2764 = vmatpush2.bf16.msra.mxu1 %v3908_v40  ;;  %2724 = vmatprep.subr.bf16.mxu0 %v3909_v41  ;;  %v3969_v19 = vld [vmem:[%s4517_s28 + $0x484] ss:$16 sps:$4 sm:$0xff]   ;;  %v3967_v21 = vld [vmem:[%s4517_s28 + $0x480] ss:$16 sps:$4 sm:$0xff]  }
  0x3f   : > { %2765 = vmatprep.subr.bf16.mxu1 %v3911_v42  ;;  %v3972_v20 = vld [vmem:[%s4517_s28 + $0x684] ss:$16 sps:$4 sm:$0xff]   ;;  %v3970_v22 = vld [vmem:[%s4517_s28 + $0x680] ss:$16 sps:$4 sm:$0xff]  }
  0x40   : > { %v3975_v23 = vld [vmem:[%s4517_s28 + $0x464] ss:$16 sps:$4 sm:$0xff]   ;;  %v3973_v25 = vld [vmem:[%s4517_s28 + $0x460] ss:$16 sps:$4 sm:$0xff]  }
  0x41   : > { %2725 = vmatpush2.bf16.msra.mxu0 %v3913_v43  ;;  %v3978_v24 = vld [vmem:[%s4517_s28 + $0x664] ss:$16 sps:$4 sm:$0xff]   ;;  %v3976_v26 = vld [vmem:[%s4517_s28 + $0x660] ss:$16 sps:$4 sm:$0xff]  }
  0x42   : > { %2766 = vmatpush2.bf16.msra.mxu1 %v3914_v44  ;;  %2726 = vmatprep.subr.bf16.mxu0 %v3915_v45  ;;  %v3981_v27 = vld [vmem:[%s4517_s28 + $0x444] ss:$16 sps:$4 sm:$0xff]   ;;  %v3979_v29 = vld [vmem:[%s4517_s28 + $0x440] ss:$16 sps:$4 sm:$0xff]  }
  0x43   : > { %2767 = vmatprep.subr.bf16.mxu1 %v3917_v46  ;;  %v3984_v28 = vld [vmem:[%s4517_s28 + $0x644] ss:$16 sps:$4 sm:$0xff]   ;;  %v3982_v30 = vld [vmem:[%s4517_s28 + $0x640] ss:$16 sps:$4 sm:$0xff]  }
  0x44   : > { %v3987_v31 = vld [vmem:[%s4517_s28 + $0x424] ss:$16 sps:$4 sm:$0xff]   ;;  %v3985_v35 = vld [vmem:[%s4517_s28 + $0x420] ss:$16 sps:$4 sm:$0xff]  }
  0x45   : > { %2727 = vmatpush2.bf16.msra.mxu0 %v3919_v50  ;;  %v3990_v32 = vld [vmem:[%s4517_s28 + $0x624] ss:$16 sps:$4 sm:$0xff]   ;;  %v3988_v36 = vld [vmem:[%s4517_s28 + $0x620] ss:$16 sps:$4 sm:$0xff]  }
  0x46   : > { %2768 = vmatpush2.bf16.msra.mxu1 %v3920_v51  ;;  %2728 = vmatprep.subr.bf16.mxu0 %v3921_v53  ;;  %v4625_v33 = vld [vmem:[%s4512_s24 + $0x10] sm:$0xff] }
  0x47   : > { %2769 = vmatprep.subr.bf16.mxu1 %v3923_v54  ;;  %v4634_v37 = vcombine.high %v4625_v33, %v4625_v33  ;;  %v3993_v39 = vld [vmem:[%s4517_s28 + $0x404] ss:$16 sps:$4 sm:$0xff]   ;;  %v3991_v41 = vld [vmem:[%s4517_s28 + $0x400] ss:$16 sps:$4 sm:$0xff]  }
  0x48   : > { %v3996_v40 = vld [vmem:[%s4517_s28 + $0x604] ss:$16 sps:$4 sm:$0xff]   ;;  %v3994_v42 = vld [vmem:[%s4517_s28 + $0x600] ss:$16 sps:$4 sm:$0xff]  }
  0x49   : > { %2729 = vmatpush2.bf16.msra.mxu0 %v3925_v55  ;;  %v3999_v43 = vld [vmem:[%s4517_s28 + $0x5e4] ss:$16 sps:$4 sm:$0xff]   ;;  %v3997_v45 = vld [vmem:[%s4517_s28 + $0x5e0] ss:$16 sps:$4 sm:$0xff]  }
  0x4a   : > { %2770 = vmatpush2.bf16.msra.mxu1 %v3926_v56  ;;  %2730 = vmatprep.subr.bf16.mxu0 %v3927_v57  ;;  %v4002_v44 = vld [vmem:[%s4517_s28 + $0x7e4] ss:$16 sps:$4 sm:$0xff]   ;;  %v4000_v46 = vld [vmem:[%s4517_s28 + $0x7e0] ss:$16 sps:$4 sm:$0xff]  }
  0x4b   : > { %2771 = vmatprep.subr.bf16.mxu1 %v3929_v58  ;;  %v4005_v47 = vld [vmem:[%s4517_s28 + $0x5c4] ss:$16 sps:$4 sm:$0xff]   ;;  %v4003_v50 = vld [vmem:[%s4517_s28 + $0x5c0] ss:$16 sps:$4 sm:$0xff]  }
  0x4c   : > { %v4008_v49 = vld [vmem:[%s4517_s28 + $0x7c4] ss:$16 sps:$4 sm:$0xff]   ;;  %v4006_v51 = vld [vmem:[%s4517_s28 + $0x7c0] ss:$16 sps:$4 sm:$0xff]  }
  0x4d   : > { %2731 = vmatpush2.bf16.msra.mxu0 %v3931_v59  ;;  %v4011_v53 = vld [vmem:[%s4517_s28 + $0x5a4] ss:$16 sps:$4 sm:$0xff]   ;;  %v4009_v55 = vld [vmem:[%s4517_s28 + $0x5a0] ss:$16 sps:$4 sm:$0xff]  }
  0x4e   : > { %2772 = vmatpush2.bf16.msra.mxu1 %v3932_v60  ;;  %2732 = vmatprep.subr.bf16.mxu0 %v3933_v61  ;;  %v4014_v54 = vld [vmem:[%s4517_s28 + $0x7a4] ss:$16 sps:$4 sm:$0xff]   ;;  %v4012_v56 = vld [vmem:[%s4517_s28 + $0x7a0] ss:$16 sps:$4 sm:$0xff]  }
  0x4f   : > { %2773 = vmatprep.subr.bf16.mxu1 %v3935_v62  ;;  %v4017_v57 = vld [vmem:[%s4517_s28 + $0x584] ss:$16 sps:$4 sm:$0xff]   ;;  %v4015_v59 = vld [vmem:[%s4517_s28 + $0x580] ss:$16 sps:$4 sm:$0xff]  }
  0x50   : > { %v4020_v58 = vld [vmem:[%s4517_s28 + $0x784] ss:$16 sps:$4 sm:$0xff]   ;;  %v4018_v60 = vld [vmem:[%s4517_s28 + $0x780] ss:$16 sps:$4 sm:$0xff]  }
  0x51   : > { %2733 = vmatpush2.bf16.msra.mxu0 %v3937_v63  ;;  %v4023_v61 = vld [vmem:[%s4517_s28 + $0x564] ss:$16 sps:$4 sm:$0xff]   ;;  %v4021_v63 = vld [vmem:[%s4517_s28 + $0x560] ss:$16 sps:$4 sm:$0xff]  }
  0x52   : > { %2774 = vmatpush2.bf16.msra.mxu1 %v3938_v0  ;;  %2734 = vmatprep.subr.bf16.mxu0 %v3939_v1  ;;  %v4026_v62 = vld [vmem:[%s4517_s28 + $0x764] ss:$16 sps:$4 sm:$0xff]   ;;  %v4024_v0 = vld [vmem:[%s4517_s28 + $0x760] ss:$16 sps:$4 sm:$0xff]  }
  0x53   : > { %2775 = vmatprep.subr.bf16.mxu1 %v3941_v2  ;;  %v4029_v1 = vld [vmem:[%s4517_s28 + $0x544] ss:$16 sps:$4 sm:$0xff]  }
  0x54   : > { %v4032_v2 = vld [vmem:[%s4517_s28 + $0x744] ss:$16 sps:$4 sm:$0xff]  }
  0x55   : > { %2735 = vmatpush2.bf16.msra.mxu0 %v3943_v3  ;;  %v4027_v3 = vld [vmem:[%s4517_s28 + $0x540] ss:$16 sps:$4 sm:$0xff]  }
  0x56   : > { %2776 = vmatpush2.bf16.msra.mxu1 %v3944_v4  ;;  %2786 = vmatprep.subr.bf16.mxu0 %v3951_v5  ;;  %v4030_v4 = vld [vmem:[%s4517_s28 + $0x740] ss:$16 sps:$4 sm:$0xff]   ;;  %v4035_v5 = vld [vmem:[%s4517_s28 + $0x524] ss:$16 sps:$4 sm:$0xff]  }
  0x57   : > { %2827 = vmatprep.subr.bf16.mxu1 %v3954_v6  ;;  %v4038_v6 = vld [vmem:[%s4517_s28 + $0x724] ss:$16 sps:$4 sm:$0xff]  }
  0x58   : > { %2737 = vmatmul.mubr.bf16.vlgmr.msra.gmra.mxu0 %v4594_v7 }
  0x59   : > { %2778 = vmatmul.mubr.bf16.vlgmr.msra.gmra.mxu1 %v4596_v8  ;;  %2787 = vmatpush1.bf16.msra.mxu0 %v3949_v9  ;;  %v4033_v9 = vld [vmem:[%s4517_s28 + $0x520] ss:$16 sps:$4 sm:$0xff]  }
  0x5a   : > { %2828 = vmatpush1.bf16.msra.mxu1 %v3952_v10  ;;  %2788 = vmatprep.subr.bf16.mxu0 %v3957_v11  ;;  %v4036_v10 = vld [vmem:[%s4517_s28 + $0x720] ss:$16 sps:$4 sm:$0xff]   ;;  %v4041_v11 = vld [vmem:[%s4517_s28 + $0x504] ss:$16 sps:$4 sm:$0xff]  }
  0x5b   : > { %2829 = vmatprep.subr.bf16.mxu1 %v3960_v12  ;;  %2818 = vmatprep.mubr.bf16.mxu0 %v4634_v37  ;;  %v4044_v12 = vld [vmem:[%s4517_s28 + $0x704] ss:$16 sps:$4 sm:$0xff]  }
  0x5c   : > { %2859 = vmatprep.mubr.bf16.mxu1 %v4638_v38 }
  0x5d   : > { %2789 = vmatpush1.bf16.msra.mxu0 %v3955_v13  ;;  %v4039_v13 = vld [vmem:[%s4517_s28 + $0x500] ss:$16 sps:$4 sm:$0xff]  }
  0x5e   : > { %2830 = vmatpush1.bf16.msra.mxu1 %v3958_v14  ;;  %2790 = vmatprep.subr.bf16.mxu0 %v3963_v15  ;;  %v4042_v14 = vld [vmem:[%s4517_s28 + $0x700] ss:$16 sps:$4 sm:$0xff]   ;;  %v4051_v15 = vld [vmem:[%s4517_s28 + $0x8e4] ss:$16 sps:$4 sm:$0xff]  }
  0x5f   : > { %2831 = vmatprep.subr.bf16.mxu1 %v3966_v16  ;;  %v4054_v16 = vld [vmem:[%s4517_s28 + $0xae4] ss:$16 sps:$4 sm:$0xff]  }
  0x61   : > { %2791 = vmatpush1.bf16.msra.mxu0 %v3961_v17  ;;  %v4682_v17 = vcombine.low %v4625_v33, %v4625_v33  ;;  %v4069_v33 = vld [vmem:[%s4517_s28 + $0x884] ss:$16 sps:$4 sm:$0xff]  }
  0x62   : > { %2832 = vmatpush1.bf16.msra.mxu1 %v3964_v18  ;;  %2792 = vmatprep.subr.bf16.mxu0 %v3969_v19  ;;  %v4686_v18 = vcombine.low %v4628_v34, %v4628_v34  ;;  %v4049_v19 = vld [vmem:[%s4517_s28 + $0x8e0] ss:$16 sps:$4 sm:$0xff]   ;;  %v4072_v34 = vld [vmem:[%s4517_s28 + $0xa84] ss:$16 sps:$4 sm:$0xff]  }
  0x63   : > { %2833 = vmatprep.subr.bf16.mxu1 %v3972_v20  ;;  %v4052_v20 = vld [vmem:[%s4517_s28 + $0xae0] ss:$16 sps:$4 sm:$0xff]  }
  0x65   : > { %2793 = vmatpush1.bf16.msra.mxu0 %v3967_v21  ;;  %v4057_v21 = vld [vmem:[%s4517_s28 + $0x8c4] ss:$16 sps:$4 sm:$0xff]  }
  0x66   : > { %2834 = vmatpush1.bf16.msra.mxu1 %v3970_v22  ;;  %2794 = vmatprep.subr.bf16.mxu0 %v3975_v23  ;;  %v4060_v22 = vld [vmem:[%s4517_s28 + $0xac4] ss:$16 sps:$4 sm:$0xff]  }
  0x67   : > { %2835 = vmatprep.subr.bf16.mxu1 %v3978_v24  ;;  %v4693_v23 = vld [vmem:[%s4512_s24 + $0x20] sm:$0xff]  ;;  %v4696_v24 = vld [vmem:[%s4512_s24 + $0x28] sm:$0xff] }
  0x69   : > { %2795 = vmatpush1.bf16.msra.mxu0 %v3973_v25  ;;  %v4700_v25 = vcombine.high %v4693_v23, %v4693_v23 }
  0x6a   : > { %2836 = vmatpush1.bf16.msra.mxu1 %v3976_v26  ;;  %2796 = vmatprep.subr.bf16.mxu0 %v3981_v27  ;;  %v4704_v26 = vcombine.high %v4696_v24, %v4696_v24  ;;  %v4055_v27 = vld [vmem:[%s4517_s28 + $0x8c0] ss:$16 sps:$4 sm:$0xff]  }
  0x6b   : > { %2837 = vmatprep.subr.bf16.mxu1 %v3984_v28  ;;  %v4058_v28 = vld [vmem:[%s4517_s28 + $0xac0] ss:$16 sps:$4 sm:$0xff]  }
  0x6d   : > { %2797 = vmatpush1.bf16.msra.mxu0 %v3979_v29  ;;  %v4063_v29 = vld [vmem:[%s4517_s28 + $0x8a4] ss:$16 sps:$4 sm:$0xff]  }
  0x6e   : > { %2838 = vmatpush1.bf16.msra.mxu1 %v3982_v30  ;;  %2798 = vmatprep.subr.bf16.mxu0 %v3987_v31  ;;  %v4066_v30 = vld [vmem:[%s4517_s28 + $0xaa4] ss:$16 sps:$4 sm:$0xff]   ;;  %v4061_v31 = vld [vmem:[%s4517_s28 + $0x8a0] ss:$16 sps:$4 sm:$0xff]  }
  0x6f   : > { %2839 = vmatprep.subr.bf16.mxu1 %v3990_v32  ;;  %v4064_v32 = vld [vmem:[%s4517_s28 + $0xaa0] ss:$16 sps:$4 sm:$0xff]  }
  0x71   : > { %2799 = vmatpush1.bf16.msra.mxu0 %v3985_v35  ;;  %v4067_v35 = vld [vmem:[%s4517_s28 + $0x880] ss:$16 sps:$4 sm:$0xff]  }
  0x72   : > { %2840 = vmatpush1.bf16.msra.mxu1 %v3988_v36  ;;  %2800 = vmatprep.subr.bf16.mxu0 %v3993_v39  ;;  %v4070_v36 = vld [vmem:[%s4517_s28 + $0xa80] ss:$16 sps:$4 sm:$0xff]   ;;  %v4075_v39 = vld [vmem:[%s4517_s28 + $0x864] ss:$16 sps:$4 sm:$0xff]  }
  0x73   : > { %2841 = vmatprep.subr.bf16.mxu1 %v3996_v40  ;;  %v4078_v40 = vld [vmem:[%s4517_s28 + $0xa64] ss:$16 sps:$4 sm:$0xff]  }
  0x75   : > { %2801 = vmatpush1.bf16.msra.mxu0 %v3991_v41  ;;  %v4073_v41 = vld [vmem:[%s4517_s28 + $0x860] ss:$16 sps:$4 sm:$0xff]  }
  0x76   : > { %2842 = vmatpush1.bf16.msra.mxu1 %v3994_v42  ;;  %2802 = vmatprep.subr.bf16.mxu0 %v3999_v43  ;;  %v4076_v42 = vld [vmem:[%s4517_s28 + $0xa60] ss:$16 sps:$4 sm:$0xff]   ;;  %v4081_v43 = vld [vmem:[%s4517_s28 + $0x844] ss:$16 sps:$4 sm:$0xff]  }
  0x77   : > { %2843 = vmatprep.subr.bf16.mxu1 %v4002_v44  ;;  %v4084_v44 = vld [vmem:[%s4517_s28 + $0xa44] ss:$16 sps:$4 sm:$0xff]  }
  0x79   : > { %2803 = vmatpush2.bf16.msra.mxu0 %v3997_v45  ;;  %v4079_v45 = vld [vmem:[%s4517_s28 + $0x840] ss:$16 sps:$4 sm:$0xff]  }
  0x7a   : > { %2844 = vmatpush2.bf16.msra.mxu1 %v4000_v46  ;;  %2804 = vmatprep.subr.bf16.mxu0 %v4005_v47  ;;  %v4082_v46 = vld [vmem:[%s4517_s28 + $0xa40] ss:$16 sps:$4 sm:$0xff]   ;;  %v4087_v47 = vld [vmem:[%s4517_s28 + $0x824] ss:$16 sps:$4 sm:$0xff]  }
  0x7b   : > { %2845 = vmatprep.subr.bf16.mxu1 %v4008_v49  ;;  %v4090_v49 = vld [vmem:[%s4517_s28 + $0xa24] ss:$16 sps:$4 sm:$0xff]  }
  0x7d   : > { %2805 = vmatpush2.bf16.msra.mxu0 %v4003_v50  ;;  %v4085_v50 = vld [vmem:[%s4517_s28 + $0x820] ss:$16 sps:$4 sm:$0xff]  }
  0x7e   : > { %2846 = vmatpush2.bf16.msra.mxu1 %v4006_v51  ;;  %2806 = vmatprep.subr.bf16.mxu0 %v4011_v53  ;;  %v4088_v51 = vld [vmem:[%s4517_s28 + $0xa20] ss:$16 sps:$4 sm:$0xff]   ;;  %v4093_v53 = vld [vmem:[%s4517_s28 + $0x804] ss:$16 sps:$4 sm:$0xff]  }
  0x7f   : > { %2847 = vmatprep.subr.bf16.mxu1 %v4014_v54  ;;  %v4096_v54 = vld [vmem:[%s4517_s28 + $0xa04] ss:$16 sps:$4 sm:$0xff]  }
  0x81   : > { %2807 = vmatpush2.bf16.msra.mxu0 %v4009_v55  ;;  %v4091_v55 = vld [vmem:[%s4517_s28 + $0x800] ss:$16 sps:$4 sm:$0xff]  }
  0x82   : > { %2848 = vmatpush2.bf16.msra.mxu1 %v4012_v56  ;;  %2808 = vmatprep.subr.bf16.mxu0 %v4017_v57  ;;  %v4094_v56 = vld [vmem:[%s4517_s28 + $0xa00] ss:$16 sps:$4 sm:$0xff]   ;;  %v4099_v57 = vld [vmem:[%s4517_s28 + $0x9e4] ss:$16 sps:$4 sm:$0xff]  }
  0x83   : > { %2849 = vmatprep.subr.bf16.mxu1 %v4020_v58  ;;  %v4102_v58 = vld [vmem:[%s4517_s28 + $0xbe4] ss:$16 sps:$4 sm:$0xff]  }
  0x85   : > { %2809 = vmatpush2.bf16.msra.mxu0 %v4015_v59  ;;  %v4097_v59 = vld [vmem:[%s4517_s28 + $0x9e0] ss:$16 sps:$4 sm:$0xff]  }
  0x86   : > { %2850 = vmatpush2.bf16.msra.mxu1 %v4018_v60  ;;  %2810 = vmatprep.subr.bf16.mxu0 %v4023_v61  ;;  %v4100_v60 = vld [vmem:[%s4517_s28 + $0xbe0] ss:$16 sps:$4 sm:$0xff]   ;;  %v4105_v61 = vld [vmem:[%s4517_s28 + $0x9c4] ss:$16 sps:$4 sm:$0xff]  }
  0x87   : > { %2851 = vmatprep.subr.bf16.mxu1 %v4026_v62  ;;  %v4108_v62 = vld [vmem:[%s4517_s28 + $0xbc4] ss:$16 sps:$4 sm:$0xff]  }
  0x89   : > { %2811 = vmatpush2.bf16.msra.mxu0 %v4021_v63  ;;  %v4103_v63 = vld [vmem:[%s4517_s28 + $0x9c0] ss:$16 sps:$4 sm:$0xff]  }
  0x8a   : > { %2852 = vmatpush2.bf16.msra.mxu1 %v4024_v0  ;;  %2812 = vmatprep.subr.bf16.mxu0 %v4029_v1  ;;  %v4106_v0 = vld [vmem:[%s4517_s28 + $0xbc0] ss:$16 sps:$4 sm:$0xff]   ;;  %v4111_v1 = vld [vmem:[%s4517_s28 + $0x9a4] ss:$16 sps:$4 sm:$0xff]  }
  0x8b   : > { %2853 = vmatprep.subr.bf16.mxu1 %v4032_v2  ;;  %v4114_v2 = vld [vmem:[%s4517_s28 + $0xba4] ss:$16 sps:$4 sm:$0xff]  }
  0x8d   : > { %2813 = vmatpush2.bf16.msra.mxu0 %v4027_v3  ;;  %v4109_v3 = vld [vmem:[%s4517_s28 + $0x9a0] ss:$16 sps:$4 sm:$0xff]  }
  0x8e   : > { %2854 = vmatpush2.bf16.msra.mxu1 %v4030_v4  ;;  %2814 = vmatprep.subr.bf16.mxu0 %v4035_v5  ;;  %v4112_v4 = vld [vmem:[%s4517_s28 + $0xba0] ss:$16 sps:$4 sm:$0xff]   ;;  %v4117_v5 = vld [vmem:[%s4517_s28 + $0x984] ss:$16 sps:$4 sm:$0xff]  }
  0x8f   : > { %2855 = vmatprep.subr.bf16.mxu1 %v4038_v6  ;;  %v4120_v6 = vld [vmem:[%s4517_s28 + $0xb84] ss:$16 sps:$4 sm:$0xff]  }
  0x91   : > { %2815 = vmatpush2.bf16.msra.mxu0 %v4033_v9  ;;  %v4115_v9 = vld [vmem:[%s4517_s28 + $0x980] ss:$16 sps:$4 sm:$0xff]  }
  0x92   : > { %2856 = vmatpush2.bf16.msra.mxu1 %v4036_v10  ;;  %2816 = vmatprep.subr.bf16.mxu0 %v4041_v11  ;;  %v4118_v10 = vld [vmem:[%s4517_s28 + $0xb80] ss:$16 sps:$4 sm:$0xff]   ;;  %v4123_v11 = vld [vmem:[%s4517_s28 + $0x964] ss:$16 sps:$4 sm:$0xff]  }
  0x93   : > { %2857 = vmatprep.subr.bf16.mxu1 %v4044_v12  ;;  %v4126_v12 = vld [vmem:[%s4517_s28 + $0xb64] ss:$16 sps:$4 sm:$0xff]  }
  0x95   : > { %2817 = vmatpush2.bf16.msra.mxu0 %v4039_v13  ;;  %v4121_v13 = vld [vmem:[%s4517_s28 + $0x960] ss:$16 sps:$4 sm:$0xff]  }
  0x96   : > { %2858 = vmatpush2.bf16.msra.mxu1 %v4042_v14  ;;  %2868 = vmatprep.subr.bf16.mxu0 %v4051_v15  ;;  %v4124_v14 = vld [vmem:[%s4517_s28 + $0xb60] ss:$16 sps:$4 sm:$0xff]   ;;  %v4129_v15 = vld [vmem:[%s4517_s28 + $0x944] ss:$16 sps:$4 sm:$0xff]  }
  0x97   : > { %2909 = vmatprep.subr.bf16.mxu1 %v4054_v16  ;;  %v4132_v16 = vld [vmem:[%s4517_s28 + $0xb44] ss:$16 sps:$4 sm:$0xff]  }
  0x98   : > { %2819 = vmatmul.mubr.bf16.vlgmr.msra.gmra.mxu0 %v4682_v17 }
  0x99   : > { %2860 = vmatmul.mubr.bf16.vlgmr.msra.gmra.mxu1 %v4686_v18  ;;  %2869 = vmatpush1.bf16.msra.mxu0 %v4049_v19  ;;  %v4127_v19 = vld [vmem:[%s4517_s28 + $0x940] ss:$16 sps:$4 sm:$0xff]  }
  0x9a   : > { %2910 = vmatpush1.bf16.msra.mxu1 %v4052_v20  ;;  %2870 = vmatprep.subr.bf16.mxu0 %v4057_v21  ;;  %v4130_v20 = vld [vmem:[%s4517_s28 + $0xb40] ss:$16 sps:$4 sm:$0xff]   ;;  %v4135_v21 = vld [vmem:[%s4517_s28 + $0x924] ss:$16 sps:$4 sm:$0xff]  }
  0x9b   : > { %2911 = vmatprep.subr.bf16.mxu1 %v4060_v22  ;;  %2900 = vmatprep.mubr.bf16.mxu0 %v4700_v25  ;;  %v4138_v22 = vld [vmem:[%s4517_s28 + $0xb24] ss:$16 sps:$4 sm:$0xff]  }
  0x9c   : > { %2941 = vmatprep.mubr.bf16.mxu1 %v4704_v26 }
  0x9d   : > { %2871 = vmatpush1.bf16.msra.mxu0 %v4055_v27  ;;  %v4133_v27 = vld [vmem:[%s4517_s28 + $0x920] ss:$16 sps:$4 sm:$0xff]  }
  0x9e   : > { %2912 = vmatpush1.bf16.msra.mxu1 %v4058_v28  ;;  %2872 = vmatprep.subr.bf16.mxu0 %v4063_v29  ;;  %v4136_v28 = vld [vmem:[%s4517_s28 + $0xb20] ss:$16 sps:$4 sm:$0xff]   ;;  %v4141_v29 = vld [vmem:[%s4517_s28 + $0x904] ss:$16 sps:$4 sm:$0xff]  }
  0x9f   : > { %2913 = vmatprep.subr.bf16.mxu1 %v4066_v30  ;;  %v4144_v30 = vld [vmem:[%s4517_s28 + $0xb04] ss:$16 sps:$4 sm:$0xff]  }
  0xa1   : > { %2873 = vmatpush1.bf16.msra.mxu0 %v4061_v31  ;;  %v4139_v31 = vld [vmem:[%s4517_s28 + $0x900] ss:$16 sps:$4 sm:$0xff]  }
  0xa2   : > { %2914 = vmatpush1.bf16.msra.mxu1 %v4064_v32  ;;  %2874 = vmatprep.subr.bf16.mxu0 %v4069_v33  ;;  %v4142_v32 = vld [vmem:[%s4517_s28 + $0xb00] ss:$16 sps:$4 sm:$0xff]   ;;  %v4151_v33 = vld [vmem:[%s4517_s28 + $0xec] ss:$16 sps:$4 sm:$0xff]  }
  0xa3   : > { %2915 = vmatprep.subr.bf16.mxu1 %v4072_v34  ;;  %v4154_v34 = vld [vmem:[%s4517_s28 + $0x2ec] ss:$16 sps:$4 sm:$0xff]  }
  0xa5   : > { %2875 = vmatpush1.bf16.msra.mxu0 %v4067_v35  ;;  %v4772_v35 = vcombine.low %v4693_v23, %v4693_v23  ;;  %v4155_v23 = vld [vmem:[%s4517_s28 + $0xc8] ss:$16 sps:$4 sm:$0xff]  }
  0xa6   : > { %2916 = vmatpush1.bf16.msra.mxu1 %v4070_v36  ;;  %2876 = vmatprep.subr.bf16.mxu0 %v4075_v39  ;;  %v4776_v36 = vcombine.low %v4696_v24, %v4696_v24  ;;  %v4149_v39 = vld [vmem:[%s4517_s28 + $0xe8] ss:$16 sps:$4 sm:$0xff]  }
  0xa7   : > { %2917 = vmatprep.subr.bf16.mxu1 %v4078_v40  ;;  %v4152_v40 = vld [vmem:[%s4517_s28 + $0x2e8] ss:$16 sps:$4 sm:$0xff]  }
  0xa8   : > { %v4158_v24 = vld [vmem:[%s4517_s28 + $0x2c8] ss:$16 sps:$4 sm:$0xff]  }
  0xa9   : > { %2877 = vmatpush1.bf16.msra.mxu0 %v4073_v41  ;;  %v4157_v41 = vld [vmem:[%s4517_s28 + $0xcc] ss:$16 sps:$4 sm:$0xff]  }
  0xaa   : > { %2918 = vmatpush1.bf16.msra.mxu1 %v4076_v42  ;;  %2878 = vmatprep.subr.bf16.mxu0 %v4081_v43  ;;  %v4160_v42 = vld [vmem:[%s4517_s28 + $0x2cc] ss:$16 sps:$4 sm:$0xff]  }
  0xab   : > { %2919 = vmatprep.subr.bf16.mxu1 %v4084_v44  ;;  %v4163_v43 = vld [vmem:[%s4517_s28 + $0xac] ss:$16 sps:$4 sm:$0xff]  }
  0xac   : > { %v4166_v44 = vld [vmem:[%s4517_s28 + $0x2ac] ss:$16 sps:$4 sm:$0xff]  }
  0xad   : > { %2879 = vmatpush1.bf16.msra.mxu0 %v4079_v45  ;;  %v4161_v45 = vld [vmem:[%s4517_s28 + $0xa8] ss:$16 sps:$4 sm:$0xff]  }
  0xae   : > { %2920 = vmatpush1.bf16.msra.mxu1 %v4082_v46  ;;  %2880 = vmatprep.subr.bf16.mxu0 %v4087_v47  ;;  %v4164_v46 = vld [vmem:[%s4517_s28 + $0x2a8] ss:$16 sps:$4 sm:$0xff]   ;;  %v4169_v47 = vld [vmem:[%s4517_s28 + $0x8c] ss:$16 sps:$4 sm:$0xff]  }
  0xaf   : > { %2921 = vmatprep.subr.bf16.mxu1 %v4090_v49  ;;  %v4172_v49 = vld [vmem:[%s4517_s28 + $0x28c] ss:$16 sps:$4 sm:$0xff]  }
  0xb1   : > { %2881 = vmatpush1.bf16.msra.mxu0 %v4085_v50  ;;  %v4167_v50 = vld [vmem:[%s4517_s28 + $0x88] ss:$16 sps:$4 sm:$0xff]  }
  0xb2   : > { %2922 = vmatpush1.bf16.msra.mxu1 %v4088_v51  ;;  %2882 = vmatprep.subr.bf16.mxu0 %v4093_v53  ;;  %v4178_v51 = vld [vmem:[%s4517_s28 + $0x26c] ss:$16 sps:$4 sm:$0xff]   ;;  %v4173_v53 = vld [vmem:[%s4517_s28 + $0x68] ss:$16 sps:$4 sm:$0xff]  }
  0xb3   : > { %2923 = vmatprep.subr.bf16.mxu1 %v4096_v54  ;;  %v4176_v54 = vld [vmem:[%s4517_s28 + $0x268] ss:$16 sps:$4 sm:$0xff]  }
  0xb5   : > { %2883 = vmatpush1.bf16.msra.mxu0 %v4091_v55  ;;  %v4181_v55 = vld [vmem:[%s4517_s28 + $0x4c] ss:$16 sps:$4 sm:$0xff]  }
  0xb6   : > { %2924 = vmatpush1.bf16.msra.mxu1 %v4094_v56  ;;  %2884 = vmatprep.subr.bf16.mxu0 %v4099_v57  ;;  %v4184_v56 = vld [vmem:[%s4517_s28 + $0x24c] ss:$16 sps:$4 sm:$0xff]   ;;  %v4179_v57 = vld [vmem:[%s4517_s28 + $0x48] ss:$16 sps:$4 sm:$0xff]  }
  0xb7   : > { %2925 = vmatprep.subr.bf16.mxu1 %v4102_v58  ;;  %v4182_v58 = vld [vmem:[%s4517_s28 + $0x248] ss:$16 sps:$4 sm:$0xff]  }
  0xb9   : > { %2885 = vmatpush2.bf16.msra.mxu0 %v4097_v59  ;;  %v4187_v59 = vld [vmem:[%s4517_s28 + $0x2c] ss:$16 sps:$4 sm:$0xff]  }
  0xba   : > { %2926 = vmatpush2.bf16.msra.mxu1 %v4100_v60  ;;  %2886 = vmatprep.subr.bf16.mxu0 %v4105_v61  ;;  %v4190_v60 = vld [vmem:[%s4517_s28 + $0x22c] ss:$16 sps:$4 sm:$0xff]   ;;  %v4185_v61 = vld [vmem:[%s4517_s28 + $0x28] ss:$16 sps:$4 sm:$0xff]  }
  0xbb   : > { %2927 = vmatprep.subr.bf16.mxu1 %v4108_v62  ;;  %v4188_v62 = vld [vmem:[%s4517_s28 + $0x228] ss:$16 sps:$4 sm:$0xff]  }
  0xbd   : > { %2887 = vmatpush2.bf16.msra.mxu0 %v4103_v63  ;;  %v4193_v63 = vld [vmem:[%s4517_s28 + $0xc] ss:$16 sps:$4 sm:$0xff]  }
  0xbe   : > { %2928 = vmatpush2.bf16.msra.mxu1 %v4106_v0  ;;  %2888 = vmatprep.subr.bf16.mxu0 %v4111_v1  ;;  %v4196_v0 = vld [vmem:[%s4517_s28 + $0x20c] ss:$16 sps:$4 sm:$0xff]   ;;  %v4191_v1 = vld [vmem:[%s4517_s28 + $0x8] ss:$16 sps:$4 sm:$0xff]  }
  0xbf   : > { %2929 = vmatprep.subr.bf16.mxu1 %v4114_v2  ;;  %v4194_v2 = vld [vmem:[%s4517_s28 + $0x208] ss:$16 sps:$4 sm:$0xff]  }
  0xc1   : > { %2889 = vmatpush2.bf16.msra.mxu0 %v4109_v3  ;;  %v4199_v3 = vld [vmem:[%s4517_s28 + $0x1ec] ss:$16 sps:$4 sm:$0xff]  }
  0xc2   : > { %2930 = vmatpush2.bf16.msra.mxu1 %v4112_v4  ;;  %2890 = vmatprep.subr.bf16.mxu0 %v4117_v5  ;;  %v4202_v4 = vld [vmem:[%s4517_s28 + $0x3ec] ss:$16 sps:$4 sm:$0xff]   ;;  %v4197_v5 = vld [vmem:[%s4517_s28 + $0x1e8] ss:$16 sps:$4 sm:$0xff]  }
  0xc3   : > { %2931 = vmatprep.subr.bf16.mxu1 %v4120_v6  ;;  %v4200_v6 = vld [vmem:[%s4517_s28 + $0x3e8] ss:$16 sps:$4 sm:$0xff]  }
  0xc5   : > { %2891 = vmatpush2.bf16.msra.mxu0 %v4115_v9  ;;  %v4205_v9 = vld [vmem:[%s4517_s28 + $0x1cc] ss:$16 sps:$4 sm:$0xff]  }
  0xc6   : > { %2932 = vmatpush2.bf16.msra.mxu1 %v4118_v10  ;;  %2892 = vmatprep.subr.bf16.mxu0 %v4123_v11  ;;  %v4208_v10 = vld [vmem:[%s4517_s28 + $0x3cc] ss:$16 sps:$4 sm:$0xff]   ;;  %v4203_v11 = vld [vmem:[%s4517_s28 + $0x1c8] ss:$16 sps:$4 sm:$0xff]  }
  0xc7   : > { %2933 = vmatprep.subr.bf16.mxu1 %v4126_v12  ;;  %v4206_v12 = vld [vmem:[%s4517_s28 + $0x3c8] ss:$16 sps:$4 sm:$0xff]  }
  0xc9   : > { %2893 = vmatpush2.bf16.msra.mxu0 %v4121_v13  ;;  %v4211_v13 = vld [vmem:[%s4517_s28 + $0x1ac] ss:$16 sps:$4 sm:$0xff]  }
  0xca   : > { %2934 = vmatpush2.bf16.msra.mxu1 %v4124_v14  ;;  %2894 = vmatprep.subr.bf16.mxu0 %v4129_v15  ;;  %v4214_v14 = vld [vmem:[%s4517_s28 + $0x3ac] ss:$16 sps:$4 sm:$0xff]   ;;  %v4209_v15 = vld [vmem:[%s4517_s28 + $0x1a8] ss:$16 sps:$4 sm:$0xff]  }
  0xcb   : > { %2935 = vmatprep.subr.bf16.mxu1 %v4132_v16  ;;  %v4212_v16 = vld [vmem:[%s4517_s28 + $0x3a8] ss:$16 sps:$4 sm:$0xff]  }
  0xcd   : > { %2895 = vmatpush2.bf16.msra.mxu0 %v4127_v19  ;;  %v4217_v19 = vld [vmem:[%s4517_s28 + $0x18c] ss:$16 sps:$4 sm:$0xff]  }
  0xce   : > { %2936 = vmatpush2.bf16.msra.mxu1 %v4130_v20  ;;  %2896 = vmatprep.subr.bf16.mxu0 %v4135_v21  ;;  %v4220_v20 = vld [vmem:[%s4517_s28 + $0x38c] ss:$16 sps:$4 sm:$0xff]   ;;  %v4215_v21 = vld [vmem:[%s4517_s28 + $0x188] ss:$16 sps:$4 sm:$0xff]  }
  0xcf   : > { %2937 = vmatprep.subr.bf16.mxu1 %v4138_v22  ;;  %v4218_v22 = vld [vmem:[%s4517_s28 + $0x388] ss:$16 sps:$4 sm:$0xff]  }
  0xd1   : > { %2897 = vmatpush2.bf16.msra.mxu0 %v4133_v27  ;;  %v4223_v27 = vld [vmem:[%s4517_s28 + $0x16c] ss:$16 sps:$4 sm:$0xff]  }
  0xd2   : > { %2938 = vmatpush2.bf16.msra.mxu1 %v4136_v28  ;;  %2898 = vmatprep.subr.bf16.mxu0 %v4141_v29  ;;  %v4226_v28 = vld [vmem:[%s4517_s28 + $0x36c] ss:$16 sps:$4 sm:$0xff]   ;;  %v4221_v29 = vld [vmem:[%s4517_s28 + $0x168] ss:$16 sps:$4 sm:$0xff]  }
  0xd3   : > { %2939 = vmatprep.subr.bf16.mxu1 %v4144_v30  ;;  %v4224_v30 = vld [vmem:[%s4517_s28 + $0x368] ss:$16 sps:$4 sm:$0xff]  }
  0xd5   : > { %2899 = vmatpush2.bf16.msra.mxu0 %v4139_v31  ;;  %v4229_v31 = vld [vmem:[%s4517_s28 + $0x14c] ss:$16 sps:$4 sm:$0xff]  }
  0xd6   : > { %2940 = vmatpush2.bf16.msra.mxu1 %v4142_v32  ;;  %2950 = vmatprep.subr.bf16.mxu0 %v4151_v33  ;;  %v4232_v32 = vld [vmem:[%s4517_s28 + $0x34c] ss:$16 sps:$4 sm:$0xff]   ;;  %v4227_v33 = vld [vmem:[%s4517_s28 + $0x148] ss:$16 sps:$4 sm:$0xff]  }
  0xd7   : > { %2991 = vmatprep.subr.bf16.mxu1 %v4154_v34  ;;  %v4230_v34 = vld [vmem:[%s4517_s28 + $0x348] ss:$16 sps:$4 sm:$0xff]  }
  0xd8   : > { %2901 = vmatmul.mubr.bf16.vlgmr.msra.gmra.mxu0 %v4772_v35 }
  0xd9   : > { %2942 = vmatmul.mubr.bf16.vlgmr.msra.gmra.mxu1 %v4776_v36  ;;  %2951 = vmatpush1.bf16.msra.mxu0 %v4149_v39  ;;  %v4235_v39 = vld [vmem:[%s4517_s28 + $0x12c] ss:$16 sps:$4 sm:$0xff]  }
  0xda   : > { %2992 = vmatpush1.bf16.msra.mxu1 %v4152_v40  ;;  %2952 = vmatprep.subr.bf16.mxu0 %v4157_v41  ;;  %v4238_v40 = vld [vmem:[%s4517_s28 + $0x32c] ss:$16 sps:$4 sm:$0xff]   ;;  %v4233_v41 = vld [vmem:[%s4517_s28 + $0x128] ss:$16 sps:$4 sm:$0xff]  }
  0xdb   : > { %2993 = vmatprep.subr.bf16.mxu1 %v4160_v42  ;;  %2982 = vmatprep.mubr.bf16.mxu0 %v4567_v48  ;;  %v4170_v48 = vld [vmem:[%s4517_s28 + $0x288] ss:$16 sps:$4 sm:$0xff]  }
  0xdc   : > { %3023 = vmatprep.mubr.bf16.mxu1 %v4572_v52  ;;  %v4175_v52 = vld [vmem:[%s4517_s28 + $0x6c] ss:$16 sps:$4 sm:$0xff]   ;;  %v4236_v42 = vld [vmem:[%s4517_s28 + $0x328] ss:$16 sps:$4 sm:$0xff]  }
  0xdd   : > { %2953 = vmatpush1.bf16.msra.mxu0 %v4155_v23  ;;  %v4241_v23 = vld [vmem:[%s4517_s28 + $0x10c] ss:$16 sps:$4 sm:$0xff]  }
  0xde   : > { %2994 = vmatpush1.bf16.msra.mxu1 %v4158_v24  ;;  %2954 = vmatprep.subr.bf16.mxu0 %v4163_v43  ;;  %v4244_v24 = vld [vmem:[%s4517_s28 + $0x30c] ss:$16 sps:$4 sm:$0xff]   ;;  %v4239_v43 = vld [vmem:[%s4517_s28 + $0x108] ss:$16 sps:$4 sm:$0xff]  }
  0xdf   : > { %2995 = vmatprep.subr.bf16.mxu1 %v4166_v44  ;;  %v4242_v44 = vld [vmem:[%s4517_s28 + $0x308] ss:$16 sps:$4 sm:$0xff]  }
  0xe1   : > { %2955 = vmatpush1.bf16.msra.mxu0 %v4161_v45  ;;  %v4247_v45 = vld [vmem:[%s4517_s28 + $0x4ec] ss:$16 sps:$4 sm:$0xff]  }
  0xe2   : > { %2996 = vmatpush1.bf16.msra.mxu1 %v4164_v46  ;;  %2956 = vmatprep.subr.bf16.mxu0 %v4169_v47  ;;  %v4250_v46 = vld [vmem:[%s4517_s28 + $0x6ec] ss:$16 sps:$4 sm:$0xff]   ;;  %v4245_v47 = vld [vmem:[%s4517_s28 + $0x4e8] ss:$16 sps:$4 sm:$0xff]  }
  0xe3   : > { %2997 = vmatprep.subr.bf16.mxu1 %v4172_v49  ;;  %v4248_v49 = vld [vmem:[%s4517_s28 + $0x6e8] ss:$16 sps:$4 sm:$0xff]  }
  0xe5   : > { %2957 = vmatpush1.bf16.msra.mxu0 %v4167_v50  ;;  %v4253_v50 = vld [vmem:[%s4517_s28 + $0x4cc] ss:$16 sps:$4 sm:$0xff]  }
  0xe6   : > { %2998 = vmatpush1.bf16.msra.mxu1 %v4170_v48  ;;  %2958 = vmatprep.subr.bf16.mxu0 %v4175_v52  ;;  %v4256_v48 = vld [vmem:[%s4517_s28 + $0x6cc] ss:$16 sps:$4 sm:$0xff]  }
  0xe7   : > { %2999 = vmatprep.subr.bf16.mxu1 %v4178_v51 }
  0xe9   : > { %2959 = vmatpush1.bf16.msra.mxu0 %v4173_v53 }
  0xea   : > { %3000 = vmatpush1.bf16.msra.mxu1 %v4176_v54  ;;  %2960 = vmatprep.subr.bf16.mxu0 %v4181_v55  ;;  %v4251_v54 = vld [vmem:[%s4517_s28 + $0x4c8] ss:$16 sps:$4 sm:$0xff]  }
  0xeb   : > { %3001 = vmatprep.subr.bf16.mxu1 %v4184_v56  ;;  %v4254_v55 = vld [vmem:[%s4517_s28 + $0x6c8] ss:$16 sps:$4 sm:$0xff]  }
  0xed   : > { %2961 = vmatpush1.bf16.msra.mxu0 %v4179_v57 }
  0xee   : > { %3002 = vmatpush1.bf16.msra.mxu1 %v4182_v58  ;;  %2962 = vmatprep.subr.bf16.mxu0 %v4187_v59  ;;  %v4259_v58 = vld [vmem:[%s4517_s28 + $0x4ac] ss:$16 sps:$4 sm:$0xff]  }
  0xef   : > { %3003 = vmatprep.subr.bf16.mxu1 %v4190_v60  ;;  %v4262_v59 = vld [vmem:[%s4517_s28 + $0x6ac] ss:$16 sps:$4 sm:$0xff]  }
  0xf1   : > { %2963 = vmatpush1.bf16.msra.mxu0 %v4185_v61  ;;  %v4257_v61 = vld [vmem:[%s4517_s28 + $0x4a8] ss:$16 sps:$4 sm:$0xff]  }
  0xf2   : > { %3004 = vmatpush1.bf16.msra.mxu1 %v4188_v62  ;;  %2964 = vmatprep.subr.bf16.mxu0 %v4193_v63  ;;  %v4260_v62 = vld [vmem:[%s4517_s28 + $0x6a8] ss:$16 sps:$4 sm:$0xff]  }
  0xf3   : > { %3005 = vmatprep.subr.bf16.mxu1 %v4196_v0 }
  0xf5   : > { %2965 = vmatpush1.bf16.msra.mxu0 %v4191_v1  ;;  %v4265_v1 = vld [vmem:[%s4517_s28 + $0x48c] ss:$16 sps:$4 sm:$0xff]  }
  0xf6   : > { %3006 = vmatpush1.bf16.msra.mxu1 %v4194_v2  ;;  %2966 = vmatprep.subr.bf16.mxu0 %v4199_v3  ;;  %v4266_v2 = vld [vmem:[%s4517_s28 + $0x688] ss:$16 sps:$4 sm:$0xff]   ;;  %v4271_v3 = vld [vmem:[%s4517_s28 + $0x46c] ss:$16 sps:$4 sm:$0xff]  }
  0xf7   : > { %3007 = vmatprep.subr.bf16.mxu1 %v4202_v4  ;;  %v4274_v4 = vld [vmem:[%s4517_s28 + $0x66c] ss:$16 sps:$4 sm:$0xff]  }
  0xf9   : > { %2967 = vmatpush2.bf16.msra.mxu0 %v4197_v5  ;;  %v4269_v5 = vld [vmem:[%s4517_s28 + $0x468] ss:$16 sps:$4 sm:$0xff]  }
  0xfa   : > { %3008 = vmatpush2.bf16.msra.mxu1 %v4200_v6  ;;  %2968 = vmatprep.subr.bf16.mxu0 %v4205_v9  ;;  %v4272_v6 = vld [vmem:[%s4517_s28 + $0x668] ss:$16 sps:$4 sm:$0xff]   ;;  %v4277_v9 = vld [vmem:[%s4517_s28 + $0x44c] ss:$16 sps:$4 sm:$0xff]  }
  0xfb   : > { %3009 = vmatprep.subr.bf16.mxu1 %v4208_v10  ;;  %v4280_v10 = vld [vmem:[%s4517_s28 + $0x64c] ss:$16 sps:$4 sm:$0xff]  }
  0xfd   : > { %2969 = vmatpush2.bf16.msra.mxu0 %v4203_v11  ;;  %v4275_v11 = vld [vmem:[%s4517_s28 + $0x448] ss:$16 sps:$4 sm:$0xff]  }
  0xfe   : > { %3010 = vmatpush2.bf16.msra.mxu1 %v4206_v12  ;;  %2970 = vmatprep.subr.bf16.mxu0 %v4211_v13  ;;  %v4278_v12 = vld [vmem:[%s4517_s28 + $0x648] ss:$16 sps:$4 sm:$0xff]   ;;  %v4283_v13 = vld [vmem:[%s4517_s28 + $0x42c] ss:$16 sps:$4 sm:$0xff]  }
  0xff   : > { %3011 = vmatprep.subr.bf16.mxu1 %v4214_v14  ;;  %v4286_v14 = vld [vmem:[%s4517_s28 + $0x62c] ss:$16 sps:$4 sm:$0xff]  }
 0x101   : > { %2971 = vmatpush2.bf16.msra.mxu0 %v4209_v15  ;;  %v4281_v15 = vld [vmem:[%s4517_s28 + $0x428] ss:$16 sps:$4 sm:$0xff]  }
 0x102   : > { %3012 = vmatpush2.bf16.msra.mxu1 %v4212_v16  ;;  %2972 = vmatprep.subr.bf16.mxu0 %v4217_v19  ;;  %v4284_v16 = vld [vmem:[%s4517_s28 + $0x628] ss:$16 sps:$4 sm:$0xff]   ;;  %v4289_v19 = vld [vmem:[%s4517_s28 + $0x40c] ss:$16 sps:$4 sm:$0xff]  }
 0x103   : > { %3013 = vmatprep.subr.bf16.mxu1 %v4220_v20  ;;  %v4292_v20 = vld [vmem:[%s4517_s28 + $0x60c] ss:$16 sps:$4 sm:$0xff]  }
 0x105   : > { %2973 = vmatpush2.bf16.msra.mxu0 %v4215_v21  ;;  %v4287_v21 = vld [vmem:[%s4517_s28 + $0x408] ss:$16 sps:$4 sm:$0xff]  }
 0x106   : > { %3014 = vmatpush2.bf16.msra.mxu1 %v4218_v22  ;;  %2974 = vmatprep.subr.bf16.mxu0 %v4223_v27  ;;  %v4290_v22 = vld [vmem:[%s4517_s28 + $0x608] ss:$16 sps:$4 sm:$0xff]   ;;  %v4295_v27 = vld [vmem:[%s4517_s28 + $0x5ec] ss:$16 sps:$4 sm:$0xff]  }
 0x107   : > { %3015 = vmatprep.subr.bf16.mxu1 %v4226_v28  ;;  %v4298_v28 = vld [vmem:[%s4517_s28 + $0x7ec] ss:$16 sps:$4 sm:$0xff]  }
 0x109   : > { %2975 = vmatpush2.bf16.msra.mxu0 %v4221_v29  ;;  %v4293_v29 = vld [vmem:[%s4517_s28 + $0x5e8] ss:$16 sps:$4 sm:$0xff]  }
 0x10a   : > { %3016 = vmatpush2.bf16.msra.mxu1 %v4224_v30  ;;  %2976 = vmatprep.subr.bf16.mxu0 %v4229_v31  ;;  %v4296_v30 = vld [vmem:[%s4517_s28 + $0x7e8] ss:$16 sps:$4 sm:$0xff]   ;;  %v4301_v31 = vld [vmem:[%s4517_s28 + $0x5cc] ss:$16 sps:$4 sm:$0xff]  }
 0x10b   : > { %3017 = vmatprep.subr.bf16.mxu1 %v4232_v32  ;;  %v4304_v32 = vld [vmem:[%s4517_s28 + $0x7cc] ss:$16 sps:$4 sm:$0xff]  }
 0x10d   : > { %2977 = vmatpush2.bf16.msra.mxu0 %v4227_v33  ;;  %v4299_v33 = vld [vmem:[%s4517_s28 + $0x5c8] ss:$16 sps:$4 sm:$0xff]  }
 0x10e   : > { %3018 = vmatpush2.bf16.msra.mxu1 %v4230_v34  ;;  %2978 = vmatprep.subr.bf16.mxu0 %v4235_v39  ;;  %v4302_v34 = vld [vmem:[%s4517_s28 + $0x7c8] ss:$16 sps:$4 sm:$0xff]   ;;  %v4307_v39 = vld [vmem:[%s4517_s28 + $0x5ac] ss:$16 sps:$4 sm:$0xff]  }
 0x10f   : > { %3019 = vmatprep.subr.bf16.mxu1 %v4238_v40  ;;  %v4310_v40 = vld [vmem:[%s4517_s28 + $0x7ac] ss:$16 sps:$4 sm:$0xff]  }
 0x111   : > { %2979 = vmatpush2.bf16.msra.mxu0 %v4233_v41  ;;  %v4305_v41 = vld [vmem:[%s4517_s28 + $0x5a8] ss:$16 sps:$4 sm:$0xff]  }
 0x112   : > { %3020 = vmatpush2.bf16.msra.mxu1 %v4236_v42  ;;  %2980 = vmatprep.subr.bf16.mxu0 %v4241_v23  ;;  %v4308_v42 = vld [vmem:[%s4517_s28 + $0x7a8] ss:$16 sps:$4 sm:$0xff]   ;;  %v4313_v23 = vld [vmem:[%s4517_s28 + $0x58c] ss:$16 sps:$4 sm:$0xff]  }
 0x113   : > { %3021 = vmatprep.subr.bf16.mxu1 %v4244_v24  ;;  %v4316_v24 = vld [vmem:[%s4517_s28 + $0x78c] ss:$16 sps:$4 sm:$0xff]  }
 0x115   : > { %2981 = vmatpush2.bf16.msra.mxu0 %v4239_v43  ;;  %v4311_v43 = vld [vmem:[%s4517_s28 + $0x588] ss:$16 sps:$4 sm:$0xff]  }
 0x116   : > { %3022 = vmatpush2.bf16.msra.mxu1 %v4242_v44  ;;  %3032 = vmatprep.subr.bf16.mxu0 %v4247_v45  ;;  %v4314_v44 = vld [vmem:[%s4517_s28 + $0x788] ss:$16 sps:$4 sm:$0xff]   ;;  %v4319_v45 = vld [vmem:[%s4517_s28 + $0x56c] ss:$16 sps:$4 sm:$0xff]  }
 0x117   : > { %3073 = vmatprep.subr.bf16.mxu1 %v4250_v46  ;;  %v4322_v46 = vld [vmem:[%s4517_s28 + $0x76c] ss:$16 sps:$4 sm:$0xff]  }
 0x118   : > { %v2738_v52 = vpop.f32.mrf.mxu0  ;;  %2983 = vmatmul.mubr.bf16.vlgmr.msra.gmra.mxu0 %v4594_v7 }
 0x119   : > { %v2779_v51 = vpop.f32.mrf.mxu1  ;;  %3024 = vmatmul.mubr.bf16.vlgmr.msra.gmra.mxu1 %v4596_v8  ;;  %3033 = vmatpush1.bf16.msra.mxu0 %v4245_v47  ;;  %v4317_v47 = vld [vmem:[%s4517_s28 + $0x568] ss:$16 sps:$4 sm:$0xff]  }
 0x11a   : > { %v4852_v53 = vadd.f32 %v2779_v51, %v2738_v52  ;;  %3074 = vmatpush1.bf16.msra.mxu1 %v4248_v49  ;;  %v2740_v56 = vpop.f32.mrf.mxu0  ;;  %3034 = vmatprep.subr.bf16.mxu0 %v4253_v50  ;;  %v4320_v49 = vld [vmem:[%s4517_s28 + $0x768] ss:$16 sps:$4 sm:$0xff]   ;;  %v4325_v50 = vld [vmem:[%s4517_s28 + $0x54c] ss:$16 sps:$4 sm:$0xff]  }
 0x11b   : > { %v2781_v57 = vpop.f32.mrf.mxu1  ;;  %3075 = vmatprep.subr.bf16.mxu1 %v4256_v48  ;;  %3064 = vmatprep.mubr.bf16.mxu0 %v4634_v37  ;;  %v4268_v37 = vld [vmem:[%s4517_s28 + $0x68c] ss:$16 sps:$4 sm:$0xff]   ;;  %v4323_v52 = vld [vmem:[%s4517_s28 + $0x548] ss:$16 sps:$4 sm:$0xff]  }
 0x11c   : > { %v4858_v60 = vadd.f32 %v2781_v57, %v2740_v56  ;;  %3105 = vmatprep.mubr.bf16.mxu1 %v4638_v38  ;;  %v2742_v7 = vpop.f32.mrf.mxu0  ;;  %v4263_v38 = vld [vmem:[%s4517_s28 + $0x488] ss:$16 sps:$4 sm:$0xff]   ;;  %v4328_v48 = vld [vmem:[%s4517_s28 + $0x74c] ss:$16 sps:$4 sm:$0xff]  }
 0x11d   : > { %v2783_v8 = vpop.f32.mrf.mxu1  ;;  %3035 = vmatpush1.bf16.msra.mxu0 %v4251_v54  ;;  %v4326_v51 = vld [vmem:[%s4517_s28 + $0x748] ss:$16 sps:$4 sm:$0xff]   ;;  %v4331_v54 = vld [vmem:[%s4517_s28 + $0x52c] ss:$16 sps:$4 sm:$0xff]  }
 0x11e   : > { %3076 = vmatpush1.bf16.msra.mxu1 %v4254_v55  ;;  %v2743_v63 = vpop.f32.mrf.mxu0  ;;  %3036 = vmatprep.subr.bf16.mxu0 %v4259_v58  ;;  %v4334_v55 = vld [vmem:[%s4517_s28 + $0x72c] ss:$16 sps:$4 sm:$0xff]   ;;  %v4329_v56 = vld [vmem:[%s4517_s28 + $0x528] ss:$16 sps:$4 sm:$0xff]  }
 0x11f   : > { %v2784_v0 = vpop.f32.mrf.mxu1  ;;  %3077 = vmatprep.subr.bf16.mxu1 %v4262_v59  ;;  %v4332_v57 = vld [vmem:[%s4517_s28 + $0x728] ss:$16 sps:$4 sm:$0xff]   ;;  %v4337_v58 = vld [vmem:[%s4517_s28 + $0x50c] ss:$16 sps:$4 sm:$0xff]  }
 0x120   : > { %v4340_v59 = vld [vmem:[%s4517_s28 + $0x70c] ss:$16 sps:$4 sm:$0xff]   ;;  %v4335_v7 = vld [vmem:[%s4517_s28 + $0x508] ss:$16 sps:$4 sm:$0xff]  }
 0x121   : > { %3037 = vmatpush1.bf16.msra.mxu0 %v4257_v61  ;;  %v4338_v8 = vld [vmem:[%s4517_s28 + $0x708] ss:$16 sps:$4 sm:$0xff]   ;;  %v4343_v61 = vld [vmem:[%s4517_s28 + $0x8ec] ss:$16 sps:$4 sm:$0xff]  }
 0x122   : > { %3078 = vmatpush1.bf16.msra.mxu1 %v4260_v62  ;;  %3038 = vmatprep.subr.bf16.mxu0 %v4265_v1  ;;  %v4346_v62 = vld [vmem:[%s4517_s28 + $0xaec] ss:$16 sps:$4 sm:$0xff]   ;;  %v4341_v63 = vld [vmem:[%s4517_s28 + $0x8e8] ss:$16 sps:$4 sm:$0xff]  }
 0x123   : > { %3079 = vmatprep.subr.bf16.mxu1 %v4268_v37  ;;  %v4344_v0 = vld [vmem:[%s4517_s28 + $0xae8] ss:$16 sps:$4 sm:$0xff]   ;;  %v4349_v1 = vld [vmem:[%s4517_s28 + $0x8cc] ss:$16 sps:$4 sm:$0xff]  }
 0x124   : > { %v4352_v37 = vld [vmem:[%s4517_s28 + $0xacc] ss:$16 sps:$4 sm:$0xff]  }
 0x125   : > { %3039 = vmatpush1.bf16.msra.mxu0 %v4263_v38 }
 0x126   : > { %3080 = vmatpush1.bf16.msra.mxu1 %v4266_v2  ;;  %3040 = vmatprep.subr.bf16.mxu0 %v4271_v3  ;;  %v4347_v3 = vld [vmem:[%s4517_s28 + $0x8c8] ss:$16 sps:$4 sm:$0xff]  }
 0x127   : > { %3081 = vmatprep.subr.bf16.mxu1 %v4274_v4  ;;  %v4350_v4 = vld [vmem:[%s4517_s28 + $0xac8] ss:$16 sps:$4 sm:$0xff]  }
 0x129   : > { %3041 = vmatpush1.bf16.msra.mxu0 %v4269_v5 }
 0x12a   : > { %3082 = vmatpush1.bf16.msra.mxu1 %v4272_v6  ;;  %3042 = vmatprep.subr.bf16.mxu0 %v4277_v9  ;;  %v4355_v9 = vld [vmem:[%s4517_s28 + $0x8ac] ss:$16 sps:$4 sm:$0xff]  }
 0x12b   : > { %3083 = vmatprep.subr.bf16.mxu1 %v4280_v10  ;;  %v4358_v10 = vld [vmem:[%s4517_s28 + $0xaac] ss:$16 sps:$4 sm:$0xff]  }
 0x12d   : > { %3043 = vmatpush1.bf16.msra.mxu0 %v4275_v11  ;;  %v4353_v11 = vld [vmem:[%s4517_s28 + $0x8a8] ss:$16 sps:$4 sm:$0xff]  }
 0x12e   : > { %3084 = vmatpush1.bf16.msra.mxu1 %v4278_v12  ;;  %3044 = vmatprep.subr.bf16.mxu0 %v4283_v13  ;;  %v4356_v12 = vld [vmem:[%s4517_s28 + $0xaa8] ss:$16 sps:$4 sm:$0xff]  }
 0x12f   : > { %3085 = vmatprep.subr.bf16.mxu1 %v4286_v14 }
 0x131   : > { %3045 = vmatpush1.bf16.msra.mxu0 %v4281_v15  ;;  %v4361_v15 = vld [vmem:[%s4517_s28 + $0x88c] ss:$16 sps:$4 sm:$0xff]  }
 0x132   : > { %3086 = vmatpush1.bf16.msra.mxu1 %v4284_v16  ;;  %3046 = vmatprep.subr.bf16.mxu0 %v4289_v19  ;;  %v4362_v16 = vld [vmem:[%s4517_s28 + $0xa88] ss:$16 sps:$4 sm:$0xff]   ;;  %v4367_v19 = vld [vmem:[%s4517_s28 + $0x86c] ss:$16 sps:$4 sm:$0xff]  }
 0x133   : > { %3087 = vmatprep.subr.bf16.mxu1 %v4292_v20  ;;  %v4370_v20 = vld [vmem:[%s4517_s28 + $0xa6c] ss:$16 sps:$4 sm:$0xff]  }
 0x135   : > { %3047 = vmatpush1.bf16.msra.mxu0 %v4287_v21  ;;  %v4365_v21 = vld [vmem:[%s4517_s28 + $0x868] ss:$16 sps:$4 sm:$0xff]  }
 0x136   : > { %3088 = vmatpush1.bf16.msra.mxu1 %v4290_v22  ;;  %3048 = vmatprep.subr.bf16.mxu0 %v4295_v27  ;;  %v4368_v22 = vld [vmem:[%s4517_s28 + $0xa68] ss:$16 sps:$4 sm:$0xff]   ;;  %v4373_v27 = vld [vmem:[%s4517_s28 + $0x84c] ss:$16 sps:$4 sm:$0xff]  }
 0x137   : > { %3089 = vmatprep.subr.bf16.mxu1 %v4298_v28  ;;  %v4376_v28 = vld [vmem:[%s4517_s28 + $0xa4c] ss:$16 sps:$4 sm:$0xff]  }
 0x139   : > { %3049 = vmatpush2.bf16.msra.mxu0 %v4293_v29  ;;  %v4371_v29 = vld [vmem:[%s4517_s28 + $0x848] ss:$16 sps:$4 sm:$0xff]  }
 0x13a   : > { %3090 = vmatpush2.bf16.msra.mxu1 %v4296_v30  ;;  %3050 = vmatprep.subr.bf16.mxu0 %v4301_v31  ;;  %v4374_v30 = vld [vmem:[%s4517_s28 + $0xa48] ss:$16 sps:$4 sm:$0xff]   ;;  %v4379_v31 = vld [vmem:[%s4517_s28 + $0x82c] ss:$16 sps:$4 sm:$0xff]  }
 0x13b   : > { %3091 = vmatprep.subr.bf16.mxu1 %v4304_v32  ;;  %v4382_v32 = vld [vmem:[%s4517_s28 + $0xa2c] ss:$16 sps:$4 sm:$0xff]  }
 0x13d   : > { %3051 = vmatpush2.bf16.msra.mxu0 %v4299_v33  ;;  %v4377_v33 = vld [vmem:[%s4517_s28 + $0x828] ss:$16 sps:$4 sm:$0xff]  }
 0x13e   : > { %3092 = vmatpush2.bf16.msra.mxu1 %v4302_v34  ;;  %3052 = vmatprep.subr.bf16.mxu0 %v4307_v39  ;;  %v4380_v34 = vld [vmem:[%s4517_s28 + $0xa28] ss:$16 sps:$4 sm:$0xff]   ;;  %v4385_v39 = vld [vmem:[%s4517_s28 + $0x80c] ss:$16 sps:$4 sm:$0xff]  }
 0x13f   : > { %3093 = vmatprep.subr.bf16.mxu1 %v4310_v40  ;;  %v4388_v40 = vld [vmem:[%s4517_s28 + $0xa0c] ss:$16 sps:$4 sm:$0xff]  }
 0x141   : > { %3053 = vmatpush2.bf16.msra.mxu0 %v4305_v41  ;;  %v4383_v41 = vld [vmem:[%s4517_s28 + $0x808] ss:$16 sps:$4 sm:$0xff]  }
 0x142   : > { %3094 = vmatpush2.bf16.msra.mxu1 %v4308_v42  ;;  %3054 = vmatprep.subr.bf16.mxu0 %v4313_v23  ;;  %v4386_v42 = vld [vmem:[%s4517_s28 + $0xa08] ss:$16 sps:$4 sm:$0xff]   ;;  %v4391_v23 = vld [vmem:[%s4517_s28 + $0x9ec] ss:$16 sps:$4 sm:$0xff]  }
 0x143   : > { %3095 = vmatprep.subr.bf16.mxu1 %v4316_v24  ;;  %v4394_v24 = vld [vmem:[%s4517_s28 + $0xbec] ss:$16 sps:$4 sm:$0xff]  }
 0x145   : > { %3055 = vmatpush2.bf16.msra.mxu0 %v4311_v43  ;;  %v4389_v43 = vld [vmem:[%s4517_s28 + $0x9e8] ss:$16 sps:$4 sm:$0xff]  }
 0x146   : > { %3096 = vmatpush2.bf16.msra.mxu1 %v4314_v44  ;;  %3056 = vmatprep.subr.bf16.mxu0 %v4319_v45  ;;  %v4392_v44 = vld [vmem:[%s4517_s28 + $0xbe8] ss:$16 sps:$4 sm:$0xff]   ;;  %v4397_v45 = vld [vmem:[%s4517_s28 + $0x9cc] ss:$16 sps:$4 sm:$0xff]  }
 0x147   : > { %3097 = vmatprep.subr.bf16.mxu1 %v4322_v46  ;;  %v4400_v46 = vld [vmem:[%s4517_s28 + $0xbcc] ss:$16 sps:$4 sm:$0xff]  }
 0x149   : > { %3057 = vmatpush2.bf16.msra.mxu0 %v4317_v47  ;;  %v4395_v47 = vld [vmem:[%s4517_s28 + $0x9c8] ss:$16 sps:$4 sm:$0xff]  }
 0x14a   : > { %3098 = vmatpush2.bf16.msra.mxu1 %v4320_v49  ;;  %3058 = vmatprep.subr.bf16.mxu0 %v4325_v50  ;;  %v4398_v49 = vld [vmem:[%s4517_s28 + $0xbc8] ss:$16 sps:$4 sm:$0xff]   ;;  %v4403_v50 = vld [vmem:[%s4517_s28 + $0x9ac] ss:$16 sps:$4 sm:$0xff]  }
 0x14b   : > { %3099 = vmatprep.subr.bf16.mxu1 %v4328_v48  ;;  %v4406_v48 = vld [vmem:[%s4517_s28 + $0xbac] ss:$16 sps:$4 sm:$0xff]  }
 0x14d   : > { %3059 = vmatpush2.bf16.msra.mxu0 %v4323_v52  ;;  %v4401_v52 = vld [vmem:[%s4517_s28 + $0x9a8] ss:$16 sps:$4 sm:$0xff]  }
 0x14e   : > { %3100 = vmatpush2.bf16.msra.mxu1 %v4326_v51  ;;  %3060 = vmatprep.subr.bf16.mxu0 %v4331_v54  ;;  %v4404_v51 = vld [vmem:[%s4517_s28 + $0xba8] ss:$16 sps:$4 sm:$0xff]   ;;  %v4409_v54 = vld [vmem:[%s4517_s28 + $0x98c] ss:$16 sps:$4 sm:$0xff]  }
 0x14f   : > { %3101 = vmatprep.subr.bf16.mxu1 %v4334_v55  ;;  %v4412_v55 = vld [vmem:[%s4517_s28 + $0xb8c] ss:$16 sps:$4 sm:$0xff]  }
 0x151   : > { %3061 = vmatpush2.bf16.msra.mxu0 %v4329_v56  ;;  %v4407_v56 = vld [vmem:[%s4517_s28 + $0x988] ss:$16 sps:$4 sm:$0xff]  }
 0x152   : > { %3102 = vmatpush2.bf16.msra.mxu1 %v4332_v57  ;;  %3062 = vmatprep.subr.bf16.mxu0 %v4337_v58  ;;  %v4410_v57 = vld [vmem:[%s4517_s28 + $0xb88] ss:$16 sps:$4 sm:$0xff]   ;;  %v4415_v58 = vld [vmem:[%s4517_s28 + $0x96c] ss:$16 sps:$4 sm:$0xff]  }
 0x153   : > { %3103 = vmatprep.subr.bf16.mxu1 %v4340_v59  ;;  %v4418_v59 = vld [vmem:[%s4517_s28 + $0xb6c] ss:$16 sps:$4 sm:$0xff]  }
 0x155   : > { %3063 = vmatpush2.bf16.msra.mxu0 %v4335_v7  ;;  %v4413_v7 = vld [vmem:[%s4517_s28 + $0x968] ss:$16 sps:$4 sm:$0xff]  }
 0x156   : > { %3104 = vmatpush2.bf16.msra.mxu1 %v4338_v8  ;;  %3114 = vmatprep.subr.bf16.mxu0 %v4343_v61  ;;  %v4416_v8 = vld [vmem:[%s4517_s28 + $0xb68] ss:$16 sps:$4 sm:$0xff]   ;;  %v4421_v61 = vld [vmem:[%s4517_s28 + $0x94c] ss:$16 sps:$4 sm:$0xff]  }
 0x157   : > { %3155 = vmatprep.subr.bf16.mxu1 %v4346_v62  ;;  %v4424_v62 = vld [vmem:[%s4517_s28 + $0xb4c] ss:$16 sps:$4 sm:$0xff]  }
 0x158   : > { %v4922_v38 = vpop.f32.mrf.mxu0  ;;  %3065 = vmatmul.mubr.bf16.vlgmr.msra.gmra.mxu0 %v4682_v17 }
 0x159   : > { %v4924_v2 = vpop.f32.mrf.mxu1  ;;  %3106 = vmatmul.mubr.bf16.vlgmr.msra.gmra.mxu1 %v4686_v18  ;;  %3115 = vmatpush1.bf16.msra.mxu0 %v4341_v63  ;;  %v4419_v63 = vld [vmem:[%s4517_s28 + $0x948] ss:$16 sps:$4 sm:$0xff]  }
 0x15a   : > { %3156 = vmatpush1.bf16.msra.mxu1 %v4344_v0  ;;  %v4930_v5 = vpop.f32.mrf.mxu0  ;;  %3116 = vmatprep.subr.bf16.mxu0 %v4349_v1  ;;  %v4422_v0 = vld [vmem:[%s4517_s28 + $0xb48] ss:$16 sps:$4 sm:$0xff]   ;;  %v4427_v1 = vld [vmem:[%s4517_s28 + $0x92c] ss:$16 sps:$4 sm:$0xff]  }
 0x15b   : > { %v4932_v6 = vpop.f32.mrf.mxu1  ;;  %3157 = vmatprep.subr.bf16.mxu1 %v4352_v37  ;;  %3146 = vmatprep.mubr.bf16.mxu0 %v4700_v25  ;;  %v4364_v25 = vld [vmem:[%s4517_s28 + $0xa8c] ss:$16 sps:$4 sm:$0xff]  }
 0x15c   : > { %3187 = vmatprep.mubr.bf16.mxu1 %v4704_v26  ;;  %v2824_v17 = vpop.f32.mrf.mxu0  ;;  %v4359_v26 = vld [vmem:[%s4517_s28 + $0x888] ss:$16 sps:$4 sm:$0xff]   ;;  %v4430_v37 = vld [vmem:[%s4517_s28 + $0xb2c] ss:$16 sps:$4 sm:$0xff]  }
 0x15d   : > { %v2865_v18 = vpop.f32.mrf.mxu1  ;;  %3117 = vmatpush1.bf16.msra.mxu0 %v4347_v3  ;;  %v4425_v3 = vld [vmem:[%s4517_s28 + $0x928] ss:$16 sps:$4 sm:$0xff]  }
 0x15e   : > { %3158 = vmatpush1.bf16.msra.mxu1 %v4350_v4  ;;  %v2825_v13 = vpop.f32.mrf.mxu0  ;;  %3118 = vmatprep.subr.bf16.mxu0 %v4355_v9  ;;  %v4428_v4 = vld [vmem:[%s4517_s28 + $0xb28] ss:$16 sps:$4 sm:$0xff]   ;;  %v4433_v9 = vld [vmem:[%s4517_s28 + $0x90c] ss:$16 sps:$4 sm:$0xff]  }
 0x15f   : > { %v2866_v14 = vpop.f32.mrf.mxu1  ;;  %3159 = vmatprep.subr.bf16.mxu1 %v4358_v10  ;;  %v4436_v10 = vld [vmem:[%s4517_s28 + $0xb0c] ss:$16 sps:$4 sm:$0xff]   ;;  %v4431_v17 = vld [vmem:[%s4517_s28 + $0x908] ss:$16 sps:$4 sm:$0xff]  }
 0x160   : > { %v4434_v18 = vld [vmem:[%s4517_s28 + $0xb08] ss:$16 sps:$4 sm:$0xff]  }
 0x161   : > { %3119 = vmatpush1.bf16.msra.mxu0 %v4353_v11  ;;  %v2821_v11 = vadd.f32 %v4922_v38, %v4852_v53 }
 0x162   : > { %3160 = vmatpush1.bf16.msra.mxu1 %v4356_v12  ;;  %3120 = vmatprep.subr.bf16.mxu0 %v4361_v15  ;;  %v2823_v12 = vadd.f32 %v4930_v5, %v4858_v60 }
 0x163   : > { %3161 = vmatprep.subr.bf16.mxu1 %v4364_v25  ;;  %v2862_v13 = vadd.f32 %v4924_v2, %v2821_v11 }
 0x164   : > { %v2864_v25 = vadd.f32 %v4932_v6, %v2823_v12 }
 0x165   : > { %3121 = vmatpush1.bf16.msra.mxu0 %v4359_v26 }
 0x166   : > { %3162 = vmatpush1.bf16.msra.mxu1 %v4362_v16  ;;  %3122 = vmatprep.subr.bf16.mxu0 %v4367_v19  ;;  %v348_v16 = vld [vmem:[#allocation2 + $0x10] sm:$0xff] }
 0x167   : > { %3163 = vmatprep.subr.bf16.mxu1 %v4370_v20 }
 0x169   : > { %3123 = vmatpush1.bf16.msra.mxu0 %v4365_v21  ;;  %v349_v21 = vld [vmem:[#allocation2] sm:$0xff] }
 0x16a   : > { %3164 = vmatpush1.bf16.msra.mxu1 %v4368_v22  ;;  %3124 = vmatprep.subr.bf16.mxu0 %v4373_v27 }
 0x16b   : > { %3165 = vmatprep.subr.bf16.mxu1 %v4376_v28 }
 0x16d   : > { %3125 = vmatpush1.bf16.msra.mxu0 %v4371_v29 }
 0x16e   : > { %3166 = vmatpush1.bf16.msra.mxu1 %v4374_v30  ;;  %3126 = vmatprep.subr.bf16.mxu0 %v4379_v31 }
 0x16f   : > { %3167 = vmatprep.subr.bf16.mxu1 %v4382_v32 }
 0x171   : > { %3127 = vmatpush1.bf16.msra.mxu0 %v4377_v33 }
 0x172   : > { %3168 = vmatpush1.bf16.msra.mxu1 %v4380_v34  ;;  %3128 = vmatprep.subr.bf16.mxu0 %v4385_v39 }
 0x173   : > { %3169 = vmatprep.subr.bf16.mxu1 %v4388_v40 }
 0x175   : > { %3129 = vmatpush1.bf16.msra.mxu0 %v4383_v41 }
 0x176   : > { %3170 = vmatpush1.bf16.msra.mxu1 %v4386_v42  ;;  %3130 = vmatprep.subr.bf16.mxu0 %v4391_v23 }
 0x177   : > { %3171 = vmatprep.subr.bf16.mxu1 %v4394_v24 }
 0x179   : > { %3131 = vmatpush2.bf16.msra.mxu0 %v4389_v43 }
 0x17a   : > { %3172 = vmatpush2.bf16.msra.mxu1 %v4392_v44  ;;  %3132 = vmatprep.subr.bf16.mxu0 %v4397_v45 }
 0x17b   : > { %3173 = vmatprep.subr.bf16.mxu1 %v4400_v46 }
 0x17d   : > { %3133 = vmatpush2.bf16.msra.mxu0 %v4395_v47 }
 0x17e   : > { %3174 = vmatpush2.bf16.msra.mxu1 %v4398_v49  ;;  %3134 = vmatprep.subr.bf16.mxu0 %v4403_v50 }
 0x17f   : > { %3175 = vmatprep.subr.bf16.mxu1 %v4406_v48 }
 0x181   : > { %3135 = vmatpush2.bf16.msra.mxu0 %v4401_v52 }
 0x182   : > { %3176 = vmatpush2.bf16.msra.mxu1 %v4404_v51  ;;  %3136 = vmatprep.subr.bf16.mxu0 %v4409_v54 }
 0x183   : > { %3177 = vmatprep.subr.bf16.mxu1 %v4412_v55  ;;  %v350_v55 = vld [vmem:[#allocation2 + $0x18] sm:$0xff] }
 0x185   : > { %3137 = vmatpush2.bf16.msra.mxu0 %v4407_v56 }
 0x186   : > { %3178 = vmatpush2.bf16.msra.mxu1 %v4410_v57  ;;  %3138 = vmatprep.subr.bf16.mxu0 %v4415_v58 }
 0x187   : > { %3179 = vmatprep.subr.bf16.mxu1 %v4418_v59 }
 0x189   : > { %3139 = vmatpush2.bf16.msra.mxu0 %v4413_v7  ;;  %v351_v7 = vld [vmem:[#allocation2 + $0x8] sm:$0xff] }
 0x18a   : > { %3180 = vmatpush2.bf16.msra.mxu1 %v4416_v8  ;;  %3140 = vmatprep.subr.bf16.mxu0 %v4421_v61 }
 0x18b   : > { %3181 = vmatprep.subr.bf16.mxu1 %v4424_v62 }
 0x18d   : > { %3141 = vmatpush2.bf16.msra.mxu0 %v4419_v63 }
 0x18e   : > { %3182 = vmatpush2.bf16.msra.mxu1 %v4422_v0  ;;  %3142 = vmatprep.subr.bf16.mxu0 %v4427_v1 }
 0x18f   : > { %3183 = vmatprep.subr.bf16.mxu1 %v4430_v37 }
 0x191   : > { %3143 = vmatpush2.bf16.msra.mxu0 %v4425_v3 }
 0x192   : > { %3184 = vmatpush2.bf16.msra.mxu1 %v4428_v4  ;;  %3144 = vmatprep.subr.bf16.mxu0 %v4433_v9 }
 0x193   : > { %3185 = vmatprep.subr.bf16.mxu1 %v4436_v10 }
 0x195   : > { %3145 = vmatpush2.bf16.msra.mxu0 %v4431_v17 }
 0x196   : > { %3186 = vmatpush2.bf16.msra.mxu1 %v4434_v18 }
 0x198   : > { %v2902_v14 = vpop.f32.mrf.mxu0  ;;  %3147 = vmatmul.mubr.bf16.vlgmr.msra.gmra.mxu0 %v4772_v35 }
 0x199   : > { %v2943_v15 = vpop.f32.mrf.mxu1  ;;  %3188 = vmatmul.mubr.bf16.vlgmr.msra.gmra.mxu1 %v4776_v36  ;;  %v2903_v26 = vadd.f32 %v2902_v14, %v2862_v13 }
 0x19a   : > { %v2904_v19 = vpop.f32.mrf.mxu0 }
 0x19b   : > { %v2945_v20 = vpop.f32.mrf.mxu1  ;;  %v2944_v53 = vadd.f32 %v2943_v15, %v2903_v26  ;;  %v2905_v38 = vadd.f32 %v2904_v19, %v2864_v25 }
 0x19c   : > { %v2906_v60 = vpop.f32.mrf.mxu0 }
 0x19d   : > { %v2947_v5 = vpop.f32.mrf.mxu1  ;;  %v3196_v22 = vadd.f32 %v2944_v53, %v348_v16  ;;  %v2946_v27 = vadd.f32 %v2945_v20, %v2905_v38 }
 0x19e   : > { %v2907_v2 = vpop.f32.mrf.mxu0 }
 0x19f   : > { %v2948_v28 = vpop.f32.mrf.mxu1  ;;  %3200 = vst [vmem:[#allocation2 + $0x10] sm:$0xff] %v3196_v22  ;;  %v3197_v29 = vadd.f32 %v2946_v27, %v349_v21 }
 0x1a1   : > { %3201 = vst [vmem:[#allocation2] sm:$0xff] %v3197_v29 }
 0x1d8   : > { %v2984_v35 = vpop.f32.mrf.mxu0 }
 0x1d9   : > { %v3025_v36 = vpop.f32.mrf.mxu1 }
 0x1da   : > { %v3026_v30 = vadd.f32 %v3025_v36, %v2984_v35  ;;  %v2986_v6 = vpop.f32.mrf.mxu0 }
 0x1db   : > { %v3027_v31 = vpop.f32.mrf.mxu1 }
 0x1dc   : > { %v3028_v32 = vadd.f32 %v3027_v31, %v2986_v6  ;;  %v2988_v33 = vpop.f32.mrf.mxu0 }
 0x1dd   : > { %v3029_v34 = vpop.f32.mrf.mxu1 }
 0x1de   : > { %v2989_v39 = vpop.f32.mrf.mxu0 }
 0x1df   : > { %v3030_v40 = vpop.f32.mrf.mxu1 }
 0x218   : > { %v3066_v41 = vpop.f32.mrf.mxu0 }
 0x219   : > { %v3107_v42 = vpop.f32.mrf.mxu1  ;;  %v3067_v47 = vadd.f32 %v3066_v41, %v3026_v30 }
 0x21a   : > { %v3068_v23 = vpop.f32.mrf.mxu0 }
 0x21b   : > { %v3109_v24 = vpop.f32.mrf.mxu1  ;;  %v3069_v49 = vadd.f32 %v3068_v23, %v3028_v32  ;;  %v3108_v50 = vadd.f32 %v3107_v42, %v3067_v47 }
 0x21c   : > { %v3070_v43 = vpop.f32.mrf.mxu0 }
 0x21d   : > { %v3111_v44 = vpop.f32.mrf.mxu1  ;;  %v3110_v51 = vadd.f32 %v3109_v24, %v3069_v49 }
 0x21e   : > { %v3071_v45 = vpop.f32.mrf.mxu0 }
 0x21f   : > { %v3112_v46 = vpop.f32.mrf.mxu1 }
 0x258   : > { %v3148_v48 = vpop.f32.mrf.mxu0 }
 0x259   : > { %v3189_v52 = vpop.f32.mrf.mxu1  ;;  %v3149_v54 = vadd.f32 %v3148_v48, %v3108_v50 }
 0x25a   : > { %v3150_v56 = vpop.f32.mrf.mxu0 }
 0x25b   : > { %v3191_v57 = vpop.f32.mrf.mxu1  ;;  %v3190_v58 = vadd.f32 %v3189_v52, %v3149_v54  ;;  %v3151_v59 = vadd.f32 %v3150_v56, %v3110_v51 }
 0x25c   : > { %v3152_v8 = vpop.f32.mrf.mxu0 }
 0x25d   : > { %v3193_v61 = vpop.f32.mrf.mxu1  ;;  %v3198_v62 = vadd.f32 %v3190_v58, %v350_v55  ;;  %v3192_v63 = vadd.f32 %v3191_v57, %v3151_v59  ;;  %3207 = sbr.rel (%p3814_p7) target bundleno = 627 (0x273), region = 44 }
 0x25e   : > { %v3153_v0 = vpop.f32.mrf.mxu0 }
 0x25f   : > { %v3194_v1 = vpop.f32.mrf.mxu1  ;;  %3202 = vst [vmem:[#allocation2 + $0x18] sm:$0xff] %v3198_v62  ;;  %v3199_v37 = vadd.f32 %v3192_v63, %v351_v7 }
 0x261   : > { %3203 = vst [vmem:[#allocation2 + $0x8] sm:$0xff] %v3199_v37 }
 0x262   : > { %v3214_v3 = vlaneseq  ;;  %v3238_v9 = vld [vmem:[%s5028_s3] sm:$0xff]  ;;  %v3239_v10 = vld [vmem:[%s5028_s3 + $0x8] sm:$0xff]  ;;  %v3208_v18 = vld [vmem:[#allocation2 + $0x10] sm:$0xff] }
 0x263   : > { %v3212_v17 = vld [vmem:[%s5027_s2] sm:$0xf]  ;;  %v3240_v25 = vunpack.c.l.bf16 %v3238_v9  ;;  %v3241_v26 = vunpack.c.h.bf16 %v3238_v9  ;;  %v3242_v20 = vunpack.c.l.bf16 %v3239_v10  ;;  %v3243_v53 = vunpack.c.h.bf16 %v3239_v10 }
 0x264   : > { %v3215_v4 = vshrl.u32 %v3214_v3, 7  ;;  %v3209_v15 = vld [vmem:[#allocation2] sm:$0xff] }
 0x266   : > { %v3216_v11 = vsub.s32 0, %v3215_v4  ;;  %v3220_v12 = vsub.s32 1, %v3215_v4  ;;  %v3224_v13 = vsub.s32 2, %v3215_v4  ;;  %v3228_v14 = vsub.s32 3, %v3215_v4  ;;  %v3210_v16 = vld [vmem:[#allocation2 + $0x18] sm:$0xff] }
 0x268   : > { %v3211_v19 = vld [vmem:[#allocation2 + $0x8] sm:$0xff]  ;;  %v3217_v38 = vrot.slane %v3212_v17, %v3216_v11  ;;  %v3221_v21 = vrot.slane %v3212_v17, %v3220_v12  ;;  %v3225_v60 = vrot.slane %v3212_v17, %v3224_v13  ;;  %v3229_v5 = vrot.slane %v3212_v17, %v3228_v14 }
 0x26a   : > { %v3234_v22 = vadd.f32 %v3217_v38, %v3208_v18  ;;  %v3235_v27 = vadd.f32 %v3221_v21, %v3209_v15  ;;  %v3236_v2 = vadd.f32 %v3225_v60, %v3210_v16  ;;  %v3237_v28 = vadd.f32 %v3229_v5, %v3211_v19 }
 0x26c   : > { %v3244_v29 = vadd.f32 %v3240_v25, %v3234_v22  ;;  %v3245_v35 = vadd.f32 %v3241_v26, %v3235_v27  ;;  %v3246_v36 = vadd.f32 %v3242_v20, %v3236_v2  ;;  %v3247_v30 = vadd.f32 %v3243_v53, %v3237_v28 }
 0x26e   : > { %v3248_v6 = vmax.f32 %v3244_v29, 0.0  ;;  %v3249_v31 = vmax.f32 %v3245_v35, 0.0  ;;  %v3250_v32 = vmax.f32 %v3246_v36, 0.0  ;;  %v3251_v33 = vmax.f32 %v3247_v30, 0.0 }
 0x270   : > { %v3822_v34 = vpack.c.bf16 %v3249_v31, %v3248_v6  ;;  %v3823_v39 = vpack.c.bf16 %v3251_v33, %v3250_v32 }
 0x272   : > { %3268 = vst [vmem:[%s5029_s4] sm:$0xff] %v3822_v34  ;;  %3269 = vst [vmem:[%s5029_s4 + $0x8] sm:$0xff] %v3823_v39 }
 0x273 PF: > { %s14_s17 = sadd.s32 1, %s4459_s17   ;;  %s5030_s15 = smov %s4455_s16 }
 0x274   : > { %p11_p8 = scmp.ge.s32.totalorder %s14_s17, 5   ;;  %s5031_s16 = smov %s5033_s18 }
 0x276   :  { %13 = sbr.rel (!%p11_p8) target bundleno = 2 (0x2), region = 83 }

// kernel: model_forward.41
= control target key start
LH: loop header
LB: loop body
LE: loop exit
PB: predicated region body
PF: predicated region fallthrough
CT: control target
= control target key end

     0   :  { %s4387_s12 = smov 0   ;;  %s4389_s13 = smov 0   ;;  %s4919_s0 = inlined_call_operand.vmem [shape: bf16[8,4608], index: 0, kind: input, shape index: {}]   ;;  %s4920_s1 = inlined_call_operand.vmem [shape: bf16[4608,512], index: 1, kind: input, shape index: {}]   ;;  %s4921_s2 = inlined_call_operand.vmem [shape: f32[1,512], index: 2, kind: input, shape index: {}]   ;;  %s4922_s3 = inlined_call_operand.vmem [shape: bf16[8,512], index: 3, kind: output, shape index: {}]  }
   0x1   :  { %s4391_s14 = smov 0  }
   0x2 LB: > { %s25_s15 = sadd.s32 1, %s4360_s13  ;;  %p3318_p0 = scmp.ge.s32.totalorder %s4364_s14, 1  ;;  %s4364_s14 = sphi %s4391_s14, %s13_s14   ;;  %s4360_s13 = sphi %s4389_s13, %s4924_s13   ;;  %s4356_s12 = sphi %s4387_s12, %s4923_s12  }
   0x3   : > { %p26_p1 = scmp.ge.s32.totalorder %s25_s15, 3  ;;  %p194_p2 = scmp.lt.s32.totalorder %s4364_s14, 4 }
   0x5   : > { %s4926_s15 = smov (%p26_p1, %s25_s15), 0  ;;  %p195_p3 = pnand %p3318_p0, %p194_p2 }
   0x6   : > { %s240_s16 = smul.u32 (!%p195_p3), 12, %s4356_s12  ;;  %p3322_p6 = scmp.ne.s32.totalorder (!%p195_p3), %s4356_s12, 0 }
   0x7   : > { %198 = sbr.rel (%p195_p3) target bundleno = 625 (0x271), region = 32 }
   0x8   : > { %s250_s17 = smul.u32 (!%p195_p3), 192, %s4356_s12  ;;  %p243_p4 = scmp.lt.s32.totalorder (!%p195_p3), %s240_s16, 35 }
   0xa   : > { %p252_p5 = scmp.lt.s32.totalorder (!%p195_p3), %s250_s17, 575 }
   0xc   : > { %s4928_s16 = smov (!%p243_p4, %s240_s16), 35  ;;  %s4930_s17 = smov (!%p252_p5, %s250_s17), 575 }
   0xd   : > { %s3319_s18 = sshll.u32 %s4928_s16, 2  ;;  %s3726_s22 = sshll.u32 %s4930_s17, 4 }
   0xe   : > { %s4412_s21 = scalar_lea.vmem %s4919_s0, %s3319_s18  ;;  %s4417_s25 = scalar_lea.vmem %s4920_s1, %s3726_s22 }
   0xf   : > { %280 = sbr.rel (%p3322_p6) target bundleno = 23 (0x17), region = 36 }
  0x14   : > { %v4366_v0 = vmov 0.0  }
  0x15   : > { %281 = vst [vmem:[#allocation2 + $0x10] sm:$0xff] %v4366_v0  ;;  %282 = vst [vmem:[#allocation2] sm:$0xff] %v4366_v0 }
  0x16   : > { %283 = vst [vmem:[#allocation2 + $0x18] sm:$0xff] %v4366_v0  ;;  %284 = vst [vmem:[#allocation2 + $0x8] sm:$0xff] %v4366_v0 }
  0x17 PF: > { %v3754_v1 = vld [vmem:[%s4417_s25 + $0xe4] ss:$16 sps:$4 sm:$0xff]   ;;  %v3758_v3 = vld [vmem:[%s4417_s25 + $0xe0] ss:$16 sps:$4 sm:$0xff]   ;;  %v290_v49 = vld [vmem:[%s4412_s21 + $0x8] sm:$0xff]  ;;  %p3719_p7 = scmp.ne.s32.totalorder %s4356_s12, 2 }
  0x18   : > { %v3756_v2 = vld [vmem:[%s4417_s25 + $0x2e4] ss:$16 sps:$4 sm:$0xff]   ;;  %2641 = vmatprep.subr.bf16.mxu0 %v3754_v1  ;;  %v3759_v4 = vld [vmem:[%s4417_s25 + $0x2e0] ss:$16 sps:$4 sm:$0xff]   ;;  %v4472_v52 = vcombine.high %v290_v49, %v290_v49 }
  0x19   : > { %2682 = vmatprep.subr.bf16.mxu1 %v3756_v2  ;;  %v3760_v5 = vld [vmem:[%s4417_s25 + $0xc4] ss:$16 sps:$4 sm:$0xff]   ;;  %2642 = vmatpush1.bf16.msra.mxu0 %v3758_v3  ;;  %v3764_v7 = vld [vmem:[%s4417_s25 + $0xc0] ss:$16 sps:$4 sm:$0xff]  }
  0x1a   : > { %2683 = vmatpush1.bf16.msra.mxu1 %v3759_v4  ;;  %v3762_v6 = vld [vmem:[%s4417_s25 + $0x2c4] ss:$16 sps:$4 sm:$0xff]   ;;  %2643 = vmatprep.subr.bf16.mxu0 %v3760_v5  ;;  %v3765_v8 = vld [vmem:[%s4417_s25 + $0x2c0] ss:$16 sps:$4 sm:$0xff]  }
  0x1b   : > { %2684 = vmatprep.subr.bf16.mxu1 %v3762_v6  ;;  %v3766_v9 = vld [vmem:[%s4417_s25 + $0xa4] ss:$16 sps:$4 sm:$0xff]   ;;  %v3770_v11 = vld [vmem:[%s4417_s25 + $0xa0] ss:$16 sps:$4 sm:$0xff]   ;;  %2714 = vmatprep.mubr.bf16.mxu1 %v4472_v52 }
  0x1c   : > { %v3768_v10 = vld [vmem:[%s4417_s25 + $0x2a4] ss:$16 sps:$4 sm:$0xff]   ;;  %v3771_v12 = vld [vmem:[%s4417_s25 + $0x2a0] ss:$16 sps:$4 sm:$0xff]  }
  0x1d   : > { %2644 = vmatpush1.bf16.msra.mxu0 %v3764_v7  ;;  %v3772_v13 = vld [vmem:[%s4417_s25 + $0x84] ss:$16 sps:$4 sm:$0xff]   ;;  %v3776_v15 = vld [vmem:[%s4417_s25 + $0x80] ss:$16 sps:$4 sm:$0xff]  }
  0x1e   : > { %2685 = vmatpush1.bf16.msra.mxu1 %v3765_v8  ;;  %2645 = vmatprep.subr.bf16.mxu0 %v3766_v9  ;;  %v3774_v14 = vld [vmem:[%s4417_s25 + $0x284] ss:$16 sps:$4 sm:$0xff]   ;;  %v3777_v16 = vld [vmem:[%s4417_s25 + $0x280] ss:$16 sps:$4 sm:$0xff]   ;;  %v4496_v8 = vcombine.low %v290_v49, %v290_v49 }
  0x1f   : > { %2686 = vmatprep.subr.bf16.mxu1 %v3768_v10  ;;  %v3778_v17 = vld [vmem:[%s4417_s25 + $0x64] ss:$16 sps:$4 sm:$0xff]   ;;  %v3782_v19 = vld [vmem:[%s4417_s25 + $0x60] ss:$16 sps:$4 sm:$0xff]  }
  0x20   : > { %v3780_v18 = vld [vmem:[%s4417_s25 + $0x264] ss:$16 sps:$4 sm:$0xff]   ;;  %v3783_v20 = vld [vmem:[%s4417_s25 + $0x260] ss:$16 sps:$4 sm:$0xff]  }
  0x21   : > { %2646 = vmatpush1.bf16.msra.mxu0 %v3770_v11  ;;  %v3784_v21 = vld [vmem:[%s4417_s25 + $0x44] ss:$16 sps:$4 sm:$0xff]   ;;  %v3788_v23 = vld [vmem:[%s4417_s25 + $0x40] ss:$16 sps:$4 sm:$0xff]  }
  0x22   : > { %2687 = vmatpush1.bf16.msra.mxu1 %v3771_v12  ;;  %2647 = vmatprep.subr.bf16.mxu0 %v3772_v13  ;;  %v3786_v22 = vld [vmem:[%s4417_s25 + $0x244] ss:$16 sps:$4 sm:$0xff]   ;;  %v3789_v24 = vld [vmem:[%s4417_s25 + $0x240] ss:$16 sps:$4 sm:$0xff]  }
  0x23   : > { %2688 = vmatprep.subr.bf16.mxu1 %v3774_v14  ;;  %v3790_v25 = vld [vmem:[%s4417_s25 + $0x24] ss:$16 sps:$4 sm:$0xff]   ;;  %v3794_v27 = vld [vmem:[%s4417_s25 + $0x20] ss:$16 sps:$4 sm:$0xff]  }
  0x24   : > { %v3792_v26 = vld [vmem:[%s4417_s25 + $0x224] ss:$16 sps:$4 sm:$0xff]   ;;  %v3795_v28 = vld [vmem:[%s4417_s25 + $0x220] ss:$16 sps:$4 sm:$0xff]  }
  0x25   : > { %2648 = vmatpush1.bf16.msra.mxu0 %v3776_v15  ;;  %v3796_v29 = vld [vmem:[%s4417_s25 + $0x4] ss:$16 sps:$4 sm:$0xff]   ;;  %v3800_v31 = vld [vmem:[%s4417_s25] ss:$16 sps:$4 sm:$0xff]  }
  0x26   : > { %2689 = vmatpush1.bf16.msra.mxu1 %v3777_v16  ;;  %2649 = vmatprep.subr.bf16.mxu0 %v3778_v17  ;;  %v3798_v30 = vld [vmem:[%s4417_s25 + $0x204] ss:$16 sps:$4 sm:$0xff]   ;;  %v3801_v32 = vld [vmem:[%s4417_s25 + $0x200] ss:$16 sps:$4 sm:$0xff]  }
  0x27   : > { %2690 = vmatprep.subr.bf16.mxu1 %v3780_v18  ;;  %v3802_v33 = vld [vmem:[%s4417_s25 + $0x1e4] ss:$16 sps:$4 sm:$0xff]   ;;  %v3806_v35 = vld [vmem:[%s4417_s25 + $0x1e0] ss:$16 sps:$4 sm:$0xff]  }
  0x28   : > { %v3804_v34 = vld [vmem:[%s4417_s25 + $0x3e4] ss:$16 sps:$4 sm:$0xff]   ;;  %v3807_v36 = vld [vmem:[%s4417_s25 + $0x3e0] ss:$16 sps:$4 sm:$0xff]  }
  0x29   : > { %2650 = vmatpush1.bf16.msra.mxu0 %v3782_v19  ;;  %v3808_v37 = vld [vmem:[%s4417_s25 + $0x1c4] ss:$16 sps:$4 sm:$0xff]   ;;  %v3812_v39 = vld [vmem:[%s4417_s25 + $0x1c0] ss:$16 sps:$4 sm:$0xff]  }
  0x2a   : > { %2691 = vmatpush1.bf16.msra.mxu1 %v3783_v20  ;;  %2651 = vmatprep.subr.bf16.mxu0 %v3784_v21  ;;  %v3810_v38 = vld [vmem:[%s4417_s25 + $0x3c4] ss:$16 sps:$4 sm:$0xff]   ;;  %v3813_v40 = vld [vmem:[%s4417_s25 + $0x3c0] ss:$16 sps:$4 sm:$0xff]  }
  0x2b   : > { %2692 = vmatprep.subr.bf16.mxu1 %v3786_v22  ;;  %v3814_v41 = vld [vmem:[%s4417_s25 + $0x1a4] ss:$16 sps:$4 sm:$0xff]   ;;  %v3818_v43 = vld [vmem:[%s4417_s25 + $0x1a0] ss:$16 sps:$4 sm:$0xff]  }
  0x2c   : > { %v3816_v42 = vld [vmem:[%s4417_s25 + $0x3a4] ss:$16 sps:$4 sm:$0xff]   ;;  %v3819_v44 = vld [vmem:[%s4417_s25 + $0x3a0] ss:$16 sps:$4 sm:$0xff]  }
  0x2d   : > { %2652 = vmatpush1.bf16.msra.mxu0 %v3788_v23  ;;  %v3820_v45 = vld [vmem:[%s4417_s25 + $0x184] ss:$16 sps:$4 sm:$0xff]   ;;  %v3824_v50 = vld [vmem:[%s4417_s25 + $0x180] ss:$16 sps:$4 sm:$0xff]  }
  0x2e   : > { %2693 = vmatpush1.bf16.msra.mxu1 %v3789_v24  ;;  %2653 = vmatprep.subr.bf16.mxu0 %v3790_v25  ;;  %v3822_v46 = vld [vmem:[%s4417_s25 + $0x384] ss:$16 sps:$4 sm:$0xff]   ;;  %v3825_v51 = vld [vmem:[%s4417_s25 + $0x380] ss:$16 sps:$4 sm:$0xff]  }
  0x2f   : > { %2694 = vmatprep.subr.bf16.mxu1 %v3792_v26  ;;  %v289_v47 = vld [vmem:[%s4412_s21] sm:$0xff] }
  0x30   : > { %v4467_v48 = vcombine.high %v289_v47, %v289_v47  ;;  %v3826_v53 = vld [vmem:[%s4417_s25 + $0x164] ss:$16 sps:$4 sm:$0xff]   ;;  %v3830_v55 = vld [vmem:[%s4417_s25 + $0x160] ss:$16 sps:$4 sm:$0xff]   ;;  %v4494_v7 = vcombine.low %v289_v47, %v289_v47 }
  0x31   : > { %2654 = vmatpush1.bf16.msra.mxu0 %v3794_v27  ;;  %v3828_v54 = vld [vmem:[%s4417_s25 + $0x364] ss:$16 sps:$4 sm:$0xff]   ;;  %v3831_v56 = vld [vmem:[%s4417_s25 + $0x360] ss:$16 sps:$4 sm:$0xff]  }
  0x32   : > { %2695 = vmatpush1.bf16.msra.mxu1 %v3795_v28  ;;  %2655 = vmatprep.subr.bf16.mxu0 %v3796_v29  ;;  %v3832_v57 = vld [vmem:[%s4417_s25 + $0x144] ss:$16 sps:$4 sm:$0xff]   ;;  %v3836_v59 = vld [vmem:[%s4417_s25 + $0x140] ss:$16 sps:$4 sm:$0xff]  }
  0x33   : > { %2696 = vmatprep.subr.bf16.mxu1 %v3798_v30  ;;  %2673 = vmatprep.mubr.bf16.mxu0 %v4467_v48  ;;  %v3834_v58 = vld [vmem:[%s4417_s25 + $0x344] ss:$16 sps:$4 sm:$0xff]   ;;  %v3837_v60 = vld [vmem:[%s4417_s25 + $0x340] ss:$16 sps:$4 sm:$0xff]  }
  0x34   : > { %v3838_v61 = vld [vmem:[%s4417_s25 + $0x124] ss:$16 sps:$4 sm:$0xff]   ;;  %v3842_v63 = vld [vmem:[%s4417_s25 + $0x120] ss:$16 sps:$4 sm:$0xff]  }
  0x35   : > { %2656 = vmatpush1.bf16.msra.mxu0 %v3800_v31  ;;  %v3840_v62 = vld [vmem:[%s4417_s25 + $0x324] ss:$16 sps:$4 sm:$0xff]   ;;  %v3843_v0 = vld [vmem:[%s4417_s25 + $0x320] ss:$16 sps:$4 sm:$0xff]  }
  0x36   : > { %2697 = vmatpush1.bf16.msra.mxu1 %v3801_v32  ;;  %2657 = vmatprep.subr.bf16.mxu0 %v3802_v33  ;;  %v3844_v1 = vld [vmem:[%s4417_s25 + $0x104] ss:$16 sps:$4 sm:$0xff]   ;;  %v3848_v3 = vld [vmem:[%s4417_s25 + $0x100] ss:$16 sps:$4 sm:$0xff]  }
  0x37   : > { %2698 = vmatprep.subr.bf16.mxu1 %v3804_v34  ;;  %v3846_v2 = vld [vmem:[%s4417_s25 + $0x304] ss:$16 sps:$4 sm:$0xff]   ;;  %v3849_v4 = vld [vmem:[%s4417_s25 + $0x300] ss:$16 sps:$4 sm:$0xff]   ;;  %v4528_v34 = vld [vmem:[%s4412_s21 + $0x18] sm:$0xff] }
  0x38   : > { %v3856_v5 = vld [vmem:[%s4417_s25 + $0x4e4] ss:$16 sps:$4 sm:$0xff]   ;;  %v3854_v9 = vld [vmem:[%s4417_s25 + $0x4e0] ss:$16 sps:$4 sm:$0xff]  }
  0x39   : > { %2658 = vmatpush2.bf16.msra.mxu0 %v3806_v35  ;;  %v3859_v6 = vld [vmem:[%s4417_s25 + $0x6e4] ss:$16 sps:$4 sm:$0xff]   ;;  %v3857_v10 = vld [vmem:[%s4417_s25 + $0x6e0] ss:$16 sps:$4 sm:$0xff]  }
  0x3a   : > { %2699 = vmatpush2.bf16.msra.mxu1 %v3807_v36  ;;  %2659 = vmatprep.subr.bf16.mxu0 %v3808_v37  ;;  %v3862_v11 = vld [vmem:[%s4417_s25 + $0x4c4] ss:$16 sps:$4 sm:$0xff]   ;;  %v3860_v13 = vld [vmem:[%s4417_s25 + $0x4c0] ss:$16 sps:$4 sm:$0xff]  }
  0x3b   : > { %2700 = vmatprep.subr.bf16.mxu1 %v3810_v38  ;;  %v3865_v12 = vld [vmem:[%s4417_s25 + $0x6c4] ss:$16 sps:$4 sm:$0xff]   ;;  %v3863_v14 = vld [vmem:[%s4417_s25 + $0x6c0] ss:$16 sps:$4 sm:$0xff]   ;;  %v4538_v38 = vcombine.high %v4528_v34, %v4528_v34 }
  0x3c   : > { %v3868_v15 = vld [vmem:[%s4417_s25 + $0x4a4] ss:$16 sps:$4 sm:$0xff]   ;;  %v3866_v17 = vld [vmem:[%s4417_s25 + $0x4a0] ss:$16 sps:$4 sm:$0xff]  }
  0x3d   : > { %2660 = vmatpush2.bf16.msra.mxu0 %v3812_v39  ;;  %v3871_v16 = vld [vmem:[%s4417_s25 + $0x6a4] ss:$16 sps:$4 sm:$0xff]   ;;  %v3869_v18 = vld [vmem:[%s4417_s25 + $0x6a0] ss:$16 sps:$4 sm:$0xff]  }
  0x3e   : > { %2701 = vmatpush2.bf16.msra.mxu1 %v3813_v40  ;;  %2661 = vmatprep.subr.bf16.mxu0 %v3814_v41  ;;  %v3874_v19 = vld [vmem:[%s4417_s25 + $0x484] ss:$16 sps:$4 sm:$0xff]   ;;  %v3872_v21 = vld [vmem:[%s4417_s25 + $0x480] ss:$16 sps:$4 sm:$0xff]  }
  0x3f   : > { %2702 = vmatprep.subr.bf16.mxu1 %v3816_v42  ;;  %v3877_v20 = vld [vmem:[%s4417_s25 + $0x684] ss:$16 sps:$4 sm:$0xff]   ;;  %v3875_v22 = vld [vmem:[%s4417_s25 + $0x680] ss:$16 sps:$4 sm:$0xff]  }
  0x40   : > { %v3880_v23 = vld [vmem:[%s4417_s25 + $0x464] ss:$16 sps:$4 sm:$0xff]   ;;  %v3878_v25 = vld [vmem:[%s4417_s25 + $0x460] ss:$16 sps:$4 sm:$0xff]  }
  0x41   : > { %2662 = vmatpush2.bf16.msra.mxu0 %v3818_v43  ;;  %v3883_v24 = vld [vmem:[%s4417_s25 + $0x664] ss:$16 sps:$4 sm:$0xff]   ;;  %v3881_v26 = vld [vmem:[%s4417_s25 + $0x660] ss:$16 sps:$4 sm:$0xff]  }
  0x42   : > { %2703 = vmatpush2.bf16.msra.mxu1 %v3819_v44  ;;  %2663 = vmatprep.subr.bf16.mxu0 %v3820_v45  ;;  %v3886_v27 = vld [vmem:[%s4417_s25 + $0x444] ss:$16 sps:$4 sm:$0xff]   ;;  %v3884_v29 = vld [vmem:[%s4417_s25 + $0x440] ss:$16 sps:$4 sm:$0xff]  }
  0x43   : > { %2704 = vmatprep.subr.bf16.mxu1 %v3822_v46  ;;  %v3889_v28 = vld [vmem:[%s4417_s25 + $0x644] ss:$16 sps:$4 sm:$0xff]   ;;  %v3887_v30 = vld [vmem:[%s4417_s25 + $0x640] ss:$16 sps:$4 sm:$0xff]  }
  0x44   : > { %v3892_v31 = vld [vmem:[%s4417_s25 + $0x424] ss:$16 sps:$4 sm:$0xff]   ;;  %v3890_v35 = vld [vmem:[%s4417_s25 + $0x420] ss:$16 sps:$4 sm:$0xff]  }
  0x45   : > { %2664 = vmatpush2.bf16.msra.mxu0 %v3824_v50  ;;  %v3895_v32 = vld [vmem:[%s4417_s25 + $0x624] ss:$16 sps:$4 sm:$0xff]   ;;  %v3893_v36 = vld [vmem:[%s4417_s25 + $0x620] ss:$16 sps:$4 sm:$0xff]  }
  0x46   : > { %2705 = vmatpush2.bf16.msra.mxu1 %v3825_v51  ;;  %2665 = vmatprep.subr.bf16.mxu0 %v3826_v53  ;;  %v4525_v33 = vld [vmem:[%s4412_s21 + $0x10] sm:$0xff] }
  0x47   : > { %2706 = vmatprep.subr.bf16.mxu1 %v3828_v54  ;;  %v4534_v37 = vcombine.high %v4525_v33, %v4525_v33  ;;  %v3898_v39 = vld [vmem:[%s4417_s25 + $0x404] ss:$16 sps:$4 sm:$0xff]   ;;  %v3896_v41 = vld [vmem:[%s4417_s25 + $0x400] ss:$16 sps:$4 sm:$0xff]  }
  0x48   : > { %v3901_v40 = vld [vmem:[%s4417_s25 + $0x604] ss:$16 sps:$4 sm:$0xff]   ;;  %v3899_v42 = vld [vmem:[%s4417_s25 + $0x600] ss:$16 sps:$4 sm:$0xff]  }
  0x49   : > { %2666 = vmatpush2.bf16.msra.mxu0 %v3830_v55  ;;  %v3904_v43 = vld [vmem:[%s4417_s25 + $0x5e4] ss:$16 sps:$4 sm:$0xff]   ;;  %v3902_v45 = vld [vmem:[%s4417_s25 + $0x5e0] ss:$16 sps:$4 sm:$0xff]  }
  0x4a   : > { %2707 = vmatpush2.bf16.msra.mxu1 %v3831_v56  ;;  %2667 = vmatprep.subr.bf16.mxu0 %v3832_v57  ;;  %v3907_v44 = vld [vmem:[%s4417_s25 + $0x7e4] ss:$16 sps:$4 sm:$0xff]   ;;  %v3905_v46 = vld [vmem:[%s4417_s25 + $0x7e0] ss:$16 sps:$4 sm:$0xff]  }
  0x4b   : > { %2708 = vmatprep.subr.bf16.mxu1 %v3834_v58  ;;  %v3910_v47 = vld [vmem:[%s4417_s25 + $0x5c4] ss:$16 sps:$4 sm:$0xff]   ;;  %v3908_v50 = vld [vmem:[%s4417_s25 + $0x5c0] ss:$16 sps:$4 sm:$0xff]  }
  0x4c   : > { %v3913_v49 = vld [vmem:[%s4417_s25 + $0x7c4] ss:$16 sps:$4 sm:$0xff]   ;;  %v3911_v51 = vld [vmem:[%s4417_s25 + $0x7c0] ss:$16 sps:$4 sm:$0xff]  }
  0x4d   : > { %2668 = vmatpush2.bf16.msra.mxu0 %v3836_v59  ;;  %v3916_v53 = vld [vmem:[%s4417_s25 + $0x5a4] ss:$16 sps:$4 sm:$0xff]   ;;  %v3914_v55 = vld [vmem:[%s4417_s25 + $0x5a0] ss:$16 sps:$4 sm:$0xff]  }
  0x4e   : > { %2709 = vmatpush2.bf16.msra.mxu1 %v3837_v60  ;;  %2669 = vmatprep.subr.bf16.mxu0 %v3838_v61  ;;  %v3919_v54 = vld [vmem:[%s4417_s25 + $0x7a4] ss:$16 sps:$4 sm:$0xff]   ;;  %v3917_v56 = vld [vmem:[%s4417_s25 + $0x7a0] ss:$16 sps:$4 sm:$0xff]  }
  0x4f   : > { %2710 = vmatprep.subr.bf16.mxu1 %v3840_v62  ;;  %v3922_v57 = vld [vmem:[%s4417_s25 + $0x584] ss:$16 sps:$4 sm:$0xff]   ;;  %v3920_v59 = vld [vmem:[%s4417_s25 + $0x580] ss:$16 sps:$4 sm:$0xff]  }
  0x50   : > { %v3925_v58 = vld [vmem:[%s4417_s25 + $0x784] ss:$16 sps:$4 sm:$0xff]   ;;  %v3923_v60 = vld [vmem:[%s4417_s25 + $0x780] ss:$16 sps:$4 sm:$0xff]  }
  0x51   : > { %2670 = vmatpush2.bf16.msra.mxu0 %v3842_v63  ;;  %v3928_v61 = vld [vmem:[%s4417_s25 + $0x564] ss:$16 sps:$4 sm:$0xff]   ;;  %v3926_v63 = vld [vmem:[%s4417_s25 + $0x560] ss:$16 sps:$4 sm:$0xff]  }
  0x52   : > { %2711 = vmatpush2.bf16.msra.mxu1 %v3843_v0  ;;  %2671 = vmatprep.subr.bf16.mxu0 %v3844_v1  ;;  %v3931_v62 = vld [vmem:[%s4417_s25 + $0x764] ss:$16 sps:$4 sm:$0xff]   ;;  %v3929_v0 = vld [vmem:[%s4417_s25 + $0x760] ss:$16 sps:$4 sm:$0xff]  }
  0x53   : > { %2712 = vmatprep.subr.bf16.mxu1 %v3846_v2  ;;  %v3934_v1 = vld [vmem:[%s4417_s25 + $0x544] ss:$16 sps:$4 sm:$0xff]  }
  0x54   : > { %v3937_v2 = vld [vmem:[%s4417_s25 + $0x744] ss:$16 sps:$4 sm:$0xff]  }
  0x55   : > { %2672 = vmatpush2.bf16.msra.mxu0 %v3848_v3  ;;  %v3932_v3 = vld [vmem:[%s4417_s25 + $0x540] ss:$16 sps:$4 sm:$0xff]  }
  0x56   : > { %2713 = vmatpush2.bf16.msra.mxu1 %v3849_v4  ;;  %2723 = vmatprep.subr.bf16.mxu0 %v3856_v5  ;;  %v3935_v4 = vld [vmem:[%s4417_s25 + $0x740] ss:$16 sps:$4 sm:$0xff]   ;;  %v3940_v5 = vld [vmem:[%s4417_s25 + $0x524] ss:$16 sps:$4 sm:$0xff]  }
  0x57   : > { %2764 = vmatprep.subr.bf16.mxu1 %v3859_v6  ;;  %v3943_v6 = vld [vmem:[%s4417_s25 + $0x724] ss:$16 sps:$4 sm:$0xff]  }
  0x58   : > { %2674 = vmatmul.mubr.bf16.vlgmr.msra.gmra.mxu0 %v4494_v7 }
  0x59   : > { %2715 = vmatmul.mubr.bf16.vlgmr.msra.gmra.mxu1 %v4496_v8  ;;  %2724 = vmatpush1.bf16.msra.mxu0 %v3854_v9  ;;  %v3938_v9 = vld [vmem:[%s4417_s25 + $0x520] ss:$16 sps:$4 sm:$0xff]  }
  0x5a   : > { %2765 = vmatpush1.bf16.msra.mxu1 %v3857_v10  ;;  %2725 = vmatprep.subr.bf16.mxu0 %v3862_v11  ;;  %v3941_v10 = vld [vmem:[%s4417_s25 + $0x720] ss:$16 sps:$4 sm:$0xff]   ;;  %v3946_v11 = vld [vmem:[%s4417_s25 + $0x504] ss:$16 sps:$4 sm:$0xff]  }
  0x5b   : > { %2766 = vmatprep.subr.bf16.mxu1 %v3865_v12  ;;  %2755 = vmatprep.mubr.bf16.mxu0 %v4534_v37  ;;  %v3949_v12 = vld [vmem:[%s4417_s25 + $0x704] ss:$16 sps:$4 sm:$0xff]  }
  0x5c   : > { %2796 = vmatprep.mubr.bf16.mxu1 %v4538_v38 }
  0x5d   : > { %2726 = vmatpush1.bf16.msra.mxu0 %v3860_v13  ;;  %v3944_v13 = vld [vmem:[%s4417_s25 + $0x500] ss:$16 sps:$4 sm:$0xff]  }
  0x5e   : > { %2767 = vmatpush1.bf16.msra.mxu1 %v3863_v14  ;;  %2727 = vmatprep.subr.bf16.mxu0 %v3868_v15  ;;  %v3947_v14 = vld [vmem:[%s4417_s25 + $0x700] ss:$16 sps:$4 sm:$0xff]   ;;  %v3956_v15 = vld [vmem:[%s4417_s25 + $0x8e4] ss:$16 sps:$4 sm:$0xff]  }
  0x5f   : > { %2768 = vmatprep.subr.bf16.mxu1 %v3871_v16  ;;  %v3959_v16 = vld [vmem:[%s4417_s25 + $0xae4] ss:$16 sps:$4 sm:$0xff]  }
  0x61   : > { %2728 = vmatpush1.bf16.msra.mxu0 %v3866_v17  ;;  %v4582_v17 = vcombine.low %v4525_v33, %v4525_v33  ;;  %v3974_v33 = vld [vmem:[%s4417_s25 + $0x884] ss:$16 sps:$4 sm:$0xff]  }
  0x62   : > { %2769 = vmatpush1.bf16.msra.mxu1 %v3869_v18  ;;  %2729 = vmatprep.subr.bf16.mxu0 %v3874_v19  ;;  %v4586_v18 = vcombine.low %v4528_v34, %v4528_v34  ;;  %v3954_v19 = vld [vmem:[%s4417_s25 + $0x8e0] ss:$16 sps:$4 sm:$0xff]   ;;  %v3977_v34 = vld [vmem:[%s4417_s25 + $0xa84] ss:$16 sps:$4 sm:$0xff]  }
  0x63   : > { %2770 = vmatprep.subr.bf16.mxu1 %v3877_v20  ;;  %v3957_v20 = vld [vmem:[%s4417_s25 + $0xae0] ss:$16 sps:$4 sm:$0xff]  }
  0x65   : > { %2730 = vmatpush1.bf16.msra.mxu0 %v3872_v21  ;;  %v3962_v21 = vld [vmem:[%s4417_s25 + $0x8c4] ss:$16 sps:$4 sm:$0xff]  }
  0x66   : > { %2771 = vmatpush1.bf16.msra.mxu1 %v3875_v22  ;;  %2731 = vmatprep.subr.bf16.mxu0 %v3880_v23  ;;  %v3965_v22 = vld [vmem:[%s4417_s25 + $0xac4] ss:$16 sps:$4 sm:$0xff]  }
  0x67   : > { %2772 = vmatprep.subr.bf16.mxu1 %v3883_v24  ;;  %v4593_v23 = vld [vmem:[%s4412_s21 + $0x20] sm:$0xff]  ;;  %v4596_v24 = vld [vmem:[%s4412_s21 + $0x28] sm:$0xff] }
  0x69   : > { %2732 = vmatpush1.bf16.msra.mxu0 %v3878_v25  ;;  %v4600_v25 = vcombine.high %v4593_v23, %v4593_v23 }
  0x6a   : > { %2773 = vmatpush1.bf16.msra.mxu1 %v3881_v26  ;;  %2733 = vmatprep.subr.bf16.mxu0 %v3886_v27  ;;  %v4604_v26 = vcombine.high %v4596_v24, %v4596_v24  ;;  %v3960_v27 = vld [vmem:[%s4417_s25 + $0x8c0] ss:$16 sps:$4 sm:$0xff]  }
  0x6b   : > { %2774 = vmatprep.subr.bf16.mxu1 %v3889_v28  ;;  %v3963_v28 = vld [vmem:[%s4417_s25 + $0xac0] ss:$16 sps:$4 sm:$0xff]  }
  0x6d   : > { %2734 = vmatpush1.bf16.msra.mxu0 %v3884_v29  ;;  %v3968_v29 = vld [vmem:[%s4417_s25 + $0x8a4] ss:$16 sps:$4 sm:$0xff]  }
  0x6e   : > { %2775 = vmatpush1.bf16.msra.mxu1 %v3887_v30  ;;  %2735 = vmatprep.subr.bf16.mxu0 %v3892_v31  ;;  %v3971_v30 = vld [vmem:[%s4417_s25 + $0xaa4] ss:$16 sps:$4 sm:$0xff]   ;;  %v3966_v31 = vld [vmem:[%s4417_s25 + $0x8a0] ss:$16 sps:$4 sm:$0xff]  }
  0x6f   : > { %2776 = vmatprep.subr.bf16.mxu1 %v3895_v32  ;;  %v3969_v32 = vld [vmem:[%s4417_s25 + $0xaa0] ss:$16 sps:$4 sm:$0xff]  }
  0x71   : > { %2736 = vmatpush1.bf16.msra.mxu0 %v3890_v35  ;;  %v3972_v35 = vld [vmem:[%s4417_s25 + $0x880] ss:$16 sps:$4 sm:$0xff]  }
  0x72   : > { %2777 = vmatpush1.bf16.msra.mxu1 %v3893_v36  ;;  %2737 = vmatprep.subr.bf16.mxu0 %v3898_v39  ;;  %v3975_v36 = vld [vmem:[%s4417_s25 + $0xa80] ss:$16 sps:$4 sm:$0xff]   ;;  %v3980_v39 = vld [vmem:[%s4417_s25 + $0x864] ss:$16 sps:$4 sm:$0xff]  }
  0x73   : > { %2778 = vmatprep.subr.bf16.mxu1 %v3901_v40  ;;  %v3983_v40 = vld [vmem:[%s4417_s25 + $0xa64] ss:$16 sps:$4 sm:$0xff]  }
  0x75   : > { %2738 = vmatpush1.bf16.msra.mxu0 %v3896_v41  ;;  %v3978_v41 = vld [vmem:[%s4417_s25 + $0x860] ss:$16 sps:$4 sm:$0xff]  }
  0x76   : > { %2779 = vmatpush1.bf16.msra.mxu1 %v3899_v42  ;;  %2739 = vmatprep.subr.bf16.mxu0 %v3904_v43  ;;  %v3981_v42 = vld [vmem:[%s4417_s25 + $0xa60] ss:$16 sps:$4 sm:$0xff]   ;;  %v3986_v43 = vld [vmem:[%s4417_s25 + $0x844] ss:$16 sps:$4 sm:$0xff]  }
  0x77   : > { %2780 = vmatprep.subr.bf16.mxu1 %v3907_v44  ;;  %v3989_v44 = vld [vmem:[%s4417_s25 + $0xa44] ss:$16 sps:$4 sm:$0xff]  }
  0x79   : > { %2740 = vmatpush2.bf16.msra.mxu0 %v3902_v45  ;;  %v3984_v45 = vld [vmem:[%s4417_s25 + $0x840] ss:$16 sps:$4 sm:$0xff]  }
  0x7a   : > { %2781 = vmatpush2.bf16.msra.mxu1 %v3905_v46  ;;  %2741 = vmatprep.subr.bf16.mxu0 %v3910_v47  ;;  %v3987_v46 = vld [vmem:[%s4417_s25 + $0xa40] ss:$16 sps:$4 sm:$0xff]   ;;  %v3992_v47 = vld [vmem:[%s4417_s25 + $0x824] ss:$16 sps:$4 sm:$0xff]  }
  0x7b   : > { %2782 = vmatprep.subr.bf16.mxu1 %v3913_v49  ;;  %v3995_v49 = vld [vmem:[%s4417_s25 + $0xa24] ss:$16 sps:$4 sm:$0xff]  }
  0x7d   : > { %2742 = vmatpush2.bf16.msra.mxu0 %v3908_v50  ;;  %v3990_v50 = vld [vmem:[%s4417_s25 + $0x820] ss:$16 sps:$4 sm:$0xff]  }
  0x7e   : > { %2783 = vmatpush2.bf16.msra.mxu1 %v3911_v51  ;;  %2743 = vmatprep.subr.bf16.mxu0 %v3916_v53  ;;  %v3993_v51 = vld [vmem:[%s4417_s25 + $0xa20] ss:$16 sps:$4 sm:$0xff]   ;;  %v3998_v53 = vld [vmem:[%s4417_s25 + $0x804] ss:$16 sps:$4 sm:$0xff]  }
  0x7f   : > { %2784 = vmatprep.subr.bf16.mxu1 %v3919_v54  ;;  %v4001_v54 = vld [vmem:[%s4417_s25 + $0xa04] ss:$16 sps:$4 sm:$0xff]  }
  0x81   : > { %2744 = vmatpush2.bf16.msra.mxu0 %v3914_v55  ;;  %v3996_v55 = vld [vmem:[%s4417_s25 + $0x800] ss:$16 sps:$4 sm:$0xff]  }
  0x82   : > { %2785 = vmatpush2.bf16.msra.mxu1 %v3917_v56  ;;  %2745 = vmatprep.subr.bf16.mxu0 %v3922_v57  ;;  %v3999_v56 = vld [vmem:[%s4417_s25 + $0xa00] ss:$16 sps:$4 sm:$0xff]   ;;  %v4004_v57 = vld [vmem:[%s4417_s25 + $0x9e4] ss:$16 sps:$4 sm:$0xff]  }
  0x83   : > { %2786 = vmatprep.subr.bf16.mxu1 %v3925_v58  ;;  %v4007_v58 = vld [vmem:[%s4417_s25 + $0xbe4] ss:$16 sps:$4 sm:$0xff]  }
  0x85   : > { %2746 = vmatpush2.bf16.msra.mxu0 %v3920_v59  ;;  %v4002_v59 = vld [vmem:[%s4417_s25 + $0x9e0] ss:$16 sps:$4 sm:$0xff]  }
  0x86   : > { %2787 = vmatpush2.bf16.msra.mxu1 %v3923_v60  ;;  %2747 = vmatprep.subr.bf16.mxu0 %v3928_v61  ;;  %v4005_v60 = vld [vmem:[%s4417_s25 + $0xbe0] ss:$16 sps:$4 sm:$0xff]   ;;  %v4010_v61 = vld [vmem:[%s4417_s25 + $0x9c4] ss:$16 sps:$4 sm:$0xff]  }
  0x87   : > { %2788 = vmatprep.subr.bf16.mxu1 %v3931_v62  ;;  %v4013_v62 = vld [vmem:[%s4417_s25 + $0xbc4] ss:$16 sps:$4 sm:$0xff]  }
  0x89   : > { %2748 = vmatpush2.bf16.msra.mxu0 %v3926_v63  ;;  %v4008_v63 = vld [vmem:[%s4417_s25 + $0x9c0] ss:$16 sps:$4 sm:$0xff]  }
  0x8a   : > { %2789 = vmatpush2.bf16.msra.mxu1 %v3929_v0  ;;  %2749 = vmatprep.subr.bf16.mxu0 %v3934_v1  ;;  %v4011_v0 = vld [vmem:[%s4417_s25 + $0xbc0] ss:$16 sps:$4 sm:$0xff]   ;;  %v4016_v1 = vld [vmem:[%s4417_s25 + $0x9a4] ss:$16 sps:$4 sm:$0xff]  }
  0x8b   : > { %2790 = vmatprep.subr.bf16.mxu1 %v3937_v2  ;;  %v4019_v2 = vld [vmem:[%s4417_s25 + $0xba4] ss:$16 sps:$4 sm:$0xff]  }
  0x8d   : > { %2750 = vmatpush2.bf16.msra.mxu0 %v3932_v3  ;;  %v4014_v3 = vld [vmem:[%s4417_s25 + $0x9a0] ss:$16 sps:$4 sm:$0xff]  }
  0x8e   : > { %2791 = vmatpush2.bf16.msra.mxu1 %v3935_v4  ;;  %2751 = vmatprep.subr.bf16.mxu0 %v3940_v5  ;;  %v4017_v4 = vld [vmem:[%s4417_s25 + $0xba0] ss:$16 sps:$4 sm:$0xff]   ;;  %v4022_v5 = vld [vmem:[%s4417_s25 + $0x984] ss:$16 sps:$4 sm:$0xff]  }
  0x8f   : > { %2792 = vmatprep.subr.bf16.mxu1 %v3943_v6  ;;  %v4025_v6 = vld [vmem:[%s4417_s25 + $0xb84] ss:$16 sps:$4 sm:$0xff]  }
  0x91   : > { %2752 = vmatpush2.bf16.msra.mxu0 %v3938_v9  ;;  %v4020_v9 = vld [vmem:[%s4417_s25 + $0x980] ss:$16 sps:$4 sm:$0xff]  }
  0x92   : > { %2793 = vmatpush2.bf16.msra.mxu1 %v3941_v10  ;;  %2753 = vmatprep.subr.bf16.mxu0 %v3946_v11  ;;  %v4023_v10 = vld [vmem:[%s4417_s25 + $0xb80] ss:$16 sps:$4 sm:$0xff]   ;;  %v4028_v11 = vld [vmem:[%s4417_s25 + $0x964] ss:$16 sps:$4 sm:$0xff]  }
  0x93   : > { %2794 = vmatprep.subr.bf16.mxu1 %v3949_v12  ;;  %v4031_v12 = vld [vmem:[%s4417_s25 + $0xb64] ss:$16 sps:$4 sm:$0xff]  }
  0x95   : > { %2754 = vmatpush2.bf16.msra.mxu0 %v3944_v13  ;;  %v4026_v13 = vld [vmem:[%s4417_s25 + $0x960] ss:$16 sps:$4 sm:$0xff]  }
  0x96   : > { %2795 = vmatpush2.bf16.msra.mxu1 %v3947_v14  ;;  %2805 = vmatprep.subr.bf16.mxu0 %v3956_v15  ;;  %v4029_v14 = vld [vmem:[%s4417_s25 + $0xb60] ss:$16 sps:$4 sm:$0xff]   ;;  %v4034_v15 = vld [vmem:[%s4417_s25 + $0x944] ss:$16 sps:$4 sm:$0xff]  }
  0x97   : > { %2846 = vmatprep.subr.bf16.mxu1 %v3959_v16  ;;  %v4037_v16 = vld [vmem:[%s4417_s25 + $0xb44] ss:$16 sps:$4 sm:$0xff]  }
  0x98   : > { %2756 = vmatmul.mubr.bf16.vlgmr.msra.gmra.mxu0 %v4582_v17 }
  0x99   : > { %2797 = vmatmul.mubr.bf16.vlgmr.msra.gmra.mxu1 %v4586_v18  ;;  %2806 = vmatpush1.bf16.msra.mxu0 %v3954_v19  ;;  %v4032_v19 = vld [vmem:[%s4417_s25 + $0x940] ss:$16 sps:$4 sm:$0xff]  }
  0x9a   : > { %2847 = vmatpush1.bf16.msra.mxu1 %v3957_v20  ;;  %2807 = vmatprep.subr.bf16.mxu0 %v3962_v21  ;;  %v4035_v20 = vld [vmem:[%s4417_s25 + $0xb40] ss:$16 sps:$4 sm:$0xff]   ;;  %v4040_v21 = vld [vmem:[%s4417_s25 + $0x924] ss:$16 sps:$4 sm:$0xff]  }
  0x9b   : > { %2848 = vmatprep.subr.bf16.mxu1 %v3965_v22  ;;  %2837 = vmatprep.mubr.bf16.mxu0 %v4600_v25  ;;  %v4043_v22 = vld [vmem:[%s4417_s25 + $0xb24] ss:$16 sps:$4 sm:$0xff]  }
  0x9c   : > { %2878 = vmatprep.mubr.bf16.mxu1 %v4604_v26 }
  0x9d   : > { %2808 = vmatpush1.bf16.msra.mxu0 %v3960_v27  ;;  %v4038_v27 = vld [vmem:[%s4417_s25 + $0x920] ss:$16 sps:$4 sm:$0xff]  }
  0x9e   : > { %2849 = vmatpush1.bf16.msra.mxu1 %v3963_v28  ;;  %2809 = vmatprep.subr.bf16.mxu0 %v3968_v29  ;;  %v4041_v28 = vld [vmem:[%s4417_s25 + $0xb20] ss:$16 sps:$4 sm:$0xff]   ;;  %v4046_v29 = vld [vmem:[%s4417_s25 + $0x904] ss:$16 sps:$4 sm:$0xff]  }
  0x9f   : > { %2850 = vmatprep.subr.bf16.mxu1 %v3971_v30  ;;  %v4049_v30 = vld [vmem:[%s4417_s25 + $0xb04] ss:$16 sps:$4 sm:$0xff]  }
  0xa1   : > { %2810 = vmatpush1.bf16.msra.mxu0 %v3966_v31  ;;  %v4044_v31 = vld [vmem:[%s4417_s25 + $0x900] ss:$16 sps:$4 sm:$0xff]  }
  0xa2   : > { %2851 = vmatpush1.bf16.msra.mxu1 %v3969_v32  ;;  %2811 = vmatprep.subr.bf16.mxu0 %v3974_v33  ;;  %v4047_v32 = vld [vmem:[%s4417_s25 + $0xb00] ss:$16 sps:$4 sm:$0xff]   ;;  %v4056_v33 = vld [vmem:[%s4417_s25 + $0xec] ss:$16 sps:$4 sm:$0xff]  }
  0xa3   : > { %2852 = vmatprep.subr.bf16.mxu1 %v3977_v34  ;;  %v4059_v34 = vld [vmem:[%s4417_s25 + $0x2ec] ss:$16 sps:$4 sm:$0xff]  }
  0xa5   : > { %2812 = vmatpush1.bf16.msra.mxu0 %v3972_v35  ;;  %v4672_v35 = vcombine.low %v4593_v23, %v4593_v23  ;;  %v4060_v23 = vld [vmem:[%s4417_s25 + $0xc8] ss:$16 sps:$4 sm:$0xff]  }
  0xa6   : > { %2853 = vmatpush1.bf16.msra.mxu1 %v3975_v36  ;;  %2813 = vmatprep.subr.bf16.mxu0 %v3980_v39  ;;  %v4676_v36 = vcombine.low %v4596_v24, %v4596_v24  ;;  %v4054_v39 = vld [vmem:[%s4417_s25 + $0xe8] ss:$16 sps:$4 sm:$0xff]  }
  0xa7   : > { %2854 = vmatprep.subr.bf16.mxu1 %v3983_v40  ;;  %v4057_v40 = vld [vmem:[%s4417_s25 + $0x2e8] ss:$16 sps:$4 sm:$0xff]  }
  0xa8   : > { %v4063_v24 = vld [vmem:[%s4417_s25 + $0x2c8] ss:$16 sps:$4 sm:$0xff]  }
  0xa9   : > { %2814 = vmatpush1.bf16.msra.mxu0 %v3978_v41  ;;  %v4062_v41 = vld [vmem:[%s4417_s25 + $0xcc] ss:$16 sps:$4 sm:$0xff]  }
  0xaa   : > { %2855 = vmatpush1.bf16.msra.mxu1 %v3981_v42  ;;  %2815 = vmatprep.subr.bf16.mxu0 %v3986_v43  ;;  %v4065_v42 = vld [vmem:[%s4417_s25 + $0x2cc] ss:$16 sps:$4 sm:$0xff]  }
  0xab   : > { %2856 = vmatprep.subr.bf16.mxu1 %v3989_v44  ;;  %v4068_v43 = vld [vmem:[%s4417_s25 + $0xac] ss:$16 sps:$4 sm:$0xff]  }
  0xac   : > { %v4071_v44 = vld [vmem:[%s4417_s25 + $0x2ac] ss:$16 sps:$4 sm:$0xff]  }
  0xad   : > { %2816 = vmatpush1.bf16.msra.mxu0 %v3984_v45  ;;  %v4066_v45 = vld [vmem:[%s4417_s25 + $0xa8] ss:$16 sps:$4 sm:$0xff]  }
  0xae   : > { %2857 = vmatpush1.bf16.msra.mxu1 %v3987_v46  ;;  %2817 = vmatprep.subr.bf16.mxu0 %v3992_v47  ;;  %v4069_v46 = vld [vmem:[%s4417_s25 + $0x2a8] ss:$16 sps:$4 sm:$0xff]   ;;  %v4074_v47 = vld [vmem:[%s4417_s25 + $0x8c] ss:$16 sps:$4 sm:$0xff]  }
  0xaf   : > { %2858 = vmatprep.subr.bf16.mxu1 %v3995_v49  ;;  %v4077_v49 = vld [vmem:[%s4417_s25 + $0x28c] ss:$16 sps:$4 sm:$0xff]  }
  0xb1   : > { %2818 = vmatpush1.bf16.msra.mxu0 %v3990_v50  ;;  %v4072_v50 = vld [vmem:[%s4417_s25 + $0x88] ss:$16 sps:$4 sm:$0xff]  }
  0xb2   : > { %2859 = vmatpush1.bf16.msra.mxu1 %v3993_v51  ;;  %2819 = vmatprep.subr.bf16.mxu0 %v3998_v53  ;;  %v4083_v51 = vld [vmem:[%s4417_s25 + $0x26c] ss:$16 sps:$4 sm:$0xff]   ;;  %v4078_v53 = vld [vmem:[%s4417_s25 + $0x68] ss:$16 sps:$4 sm:$0xff]  }
  0xb3   : > { %2860 = vmatprep.subr.bf16.mxu1 %v4001_v54  ;;  %v4081_v54 = vld [vmem:[%s4417_s25 + $0x268] ss:$16 sps:$4 sm:$0xff]  }
  0xb5   : > { %2820 = vmatpush1.bf16.msra.mxu0 %v3996_v55  ;;  %v4086_v55 = vld [vmem:[%s4417_s25 + $0x4c] ss:$16 sps:$4 sm:$0xff]  }
  0xb6   : > { %2861 = vmatpush1.bf16.msra.mxu1 %v3999_v56  ;;  %2821 = vmatprep.subr.bf16.mxu0 %v4004_v57  ;;  %v4089_v56 = vld [vmem:[%s4417_s25 + $0x24c] ss:$16 sps:$4 sm:$0xff]   ;;  %v4084_v57 = vld [vmem:[%s4417_s25 + $0x48] ss:$16 sps:$4 sm:$0xff]  }
  0xb7   : > { %2862 = vmatprep.subr.bf16.mxu1 %v4007_v58  ;;  %v4087_v58 = vld [vmem:[%s4417_s25 + $0x248] ss:$16 sps:$4 sm:$0xff]  }
  0xb9   : > { %2822 = vmatpush2.bf16.msra.mxu0 %v4002_v59  ;;  %v4092_v59 = vld [vmem:[%s4417_s25 + $0x2c] ss:$16 sps:$4 sm:$0xff]  }
  0xba   : > { %2863 = vmatpush2.bf16.msra.mxu1 %v4005_v60  ;;  %2823 = vmatprep.subr.bf16.mxu0 %v4010_v61  ;;  %v4095_v60 = vld [vmem:[%s4417_s25 + $0x22c] ss:$16 sps:$4 sm:$0xff]   ;;  %v4090_v61 = vld [vmem:[%s4417_s25 + $0x28] ss:$16 sps:$4 sm:$0xff]  }
  0xbb   : > { %2864 = vmatprep.subr.bf16.mxu1 %v4013_v62  ;;  %v4093_v62 = vld [vmem:[%s4417_s25 + $0x228] ss:$16 sps:$4 sm:$0xff]  }
  0xbd   : > { %2824 = vmatpush2.bf16.msra.mxu0 %v4008_v63  ;;  %v4098_v63 = vld [vmem:[%s4417_s25 + $0xc] ss:$16 sps:$4 sm:$0xff]  }
  0xbe   : > { %2865 = vmatpush2.bf16.msra.mxu1 %v4011_v0  ;;  %2825 = vmatprep.subr.bf16.mxu0 %v4016_v1  ;;  %v4101_v0 = vld [vmem:[%s4417_s25 + $0x20c] ss:$16 sps:$4 sm:$0xff]   ;;  %v4096_v1 = vld [vmem:[%s4417_s25 + $0x8] ss:$16 sps:$4 sm:$0xff]  }
  0xbf   : > { %2866 = vmatprep.subr.bf16.mxu1 %v4019_v2  ;;  %v4099_v2 = vld [vmem:[%s4417_s25 + $0x208] ss:$16 sps:$4 sm:$0xff]  }
  0xc1   : > { %2826 = vmatpush2.bf16.msra.mxu0 %v4014_v3  ;;  %v4104_v3 = vld [vmem:[%s4417_s25 + $0x1ec] ss:$16 sps:$4 sm:$0xff]  }
  0xc2   : > { %2867 = vmatpush2.bf16.msra.mxu1 %v4017_v4  ;;  %2827 = vmatprep.subr.bf16.mxu0 %v4022_v5  ;;  %v4107_v4 = vld [vmem:[%s4417_s25 + $0x3ec] ss:$16 sps:$4 sm:$0xff]   ;;  %v4102_v5 = vld [vmem:[%s4417_s25 + $0x1e8] ss:$16 sps:$4 sm:$0xff]  }
  0xc3   : > { %2868 = vmatprep.subr.bf16.mxu1 %v4025_v6  ;;  %v4105_v6 = vld [vmem:[%s4417_s25 + $0x3e8] ss:$16 sps:$4 sm:$0xff]  }
  0xc5   : > { %2828 = vmatpush2.bf16.msra.mxu0 %v4020_v9  ;;  %v4110_v9 = vld [vmem:[%s4417_s25 + $0x1cc] ss:$16 sps:$4 sm:$0xff]  }
  0xc6   : > { %2869 = vmatpush2.bf16.msra.mxu1 %v4023_v10  ;;  %2829 = vmatprep.subr.bf16.mxu0 %v4028_v11  ;;  %v4113_v10 = vld [vmem:[%s4417_s25 + $0x3cc] ss:$16 sps:$4 sm:$0xff]   ;;  %v4108_v11 = vld [vmem:[%s4417_s25 + $0x1c8] ss:$16 sps:$4 sm:$0xff]  }
  0xc7   : > { %2870 = vmatprep.subr.bf16.mxu1 %v4031_v12  ;;  %v4111_v12 = vld [vmem:[%s4417_s25 + $0x3c8] ss:$16 sps:$4 sm:$0xff]  }
  0xc9   : > { %2830 = vmatpush2.bf16.msra.mxu0 %v4026_v13  ;;  %v4116_v13 = vld [vmem:[%s4417_s25 + $0x1ac] ss:$16 sps:$4 sm:$0xff]  }
  0xca   : > { %2871 = vmatpush2.bf16.msra.mxu1 %v4029_v14  ;;  %2831 = vmatprep.subr.bf16.mxu0 %v4034_v15  ;;  %v4119_v14 = vld [vmem:[%s4417_s25 + $0x3ac] ss:$16 sps:$4 sm:$0xff]   ;;  %v4114_v15 = vld [vmem:[%s4417_s25 + $0x1a8] ss:$16 sps:$4 sm:$0xff]  }
  0xcb   : > { %2872 = vmatprep.subr.bf16.mxu1 %v4037_v16  ;;  %v4117_v16 = vld [vmem:[%s4417_s25 + $0x3a8] ss:$16 sps:$4 sm:$0xff]  }
  0xcd   : > { %2832 = vmatpush2.bf16.msra.mxu0 %v4032_v19  ;;  %v4122_v19 = vld [vmem:[%s4417_s25 + $0x18c] ss:$16 sps:$4 sm:$0xff]  }
  0xce   : > { %2873 = vmatpush2.bf16.msra.mxu1 %v4035_v20  ;;  %2833 = vmatprep.subr.bf16.mxu0 %v4040_v21  ;;  %v4125_v20 = vld [vmem:[%s4417_s25 + $0x38c] ss:$16 sps:$4 sm:$0xff]   ;;  %v4120_v21 = vld [vmem:[%s4417_s25 + $0x188] ss:$16 sps:$4 sm:$0xff]  }
  0xcf   : > { %2874 = vmatprep.subr.bf16.mxu1 %v4043_v22  ;;  %v4123_v22 = vld [vmem:[%s4417_s25 + $0x388] ss:$16 sps:$4 sm:$0xff]  }
  0xd1   : > { %2834 = vmatpush2.bf16.msra.mxu0 %v4038_v27  ;;  %v4128_v27 = vld [vmem:[%s4417_s25 + $0x16c] ss:$16 sps:$4 sm:$0xff]  }
  0xd2   : > { %2875 = vmatpush2.bf16.msra.mxu1 %v4041_v28  ;;  %2835 = vmatprep.subr.bf16.mxu0 %v4046_v29  ;;  %v4131_v28 = vld [vmem:[%s4417_s25 + $0x36c] ss:$16 sps:$4 sm:$0xff]   ;;  %v4126_v29 = vld [vmem:[%s4417_s25 + $0x168] ss:$16 sps:$4 sm:$0xff]  }
  0xd3   : > { %2876 = vmatprep.subr.bf16.mxu1 %v4049_v30  ;;  %v4129_v30 = vld [vmem:[%s4417_s25 + $0x368] ss:$16 sps:$4 sm:$0xff]  }
  0xd5   : > { %2836 = vmatpush2.bf16.msra.mxu0 %v4044_v31  ;;  %v4134_v31 = vld [vmem:[%s4417_s25 + $0x14c] ss:$16 sps:$4 sm:$0xff]  }
  0xd6   : > { %2877 = vmatpush2.bf16.msra.mxu1 %v4047_v32  ;;  %2887 = vmatprep.subr.bf16.mxu0 %v4056_v33  ;;  %v4137_v32 = vld [vmem:[%s4417_s25 + $0x34c] ss:$16 sps:$4 sm:$0xff]   ;;  %v4132_v33 = vld [vmem:[%s4417_s25 + $0x148] ss:$16 sps:$4 sm:$0xff]  }
  0xd7   : > { %2928 = vmatprep.subr.bf16.mxu1 %v4059_v34  ;;  %v4135_v34 = vld [vmem:[%s4417_s25 + $0x348] ss:$16 sps:$4 sm:$0xff]  }
  0xd8   : > { %2838 = vmatmul.mubr.bf16.vlgmr.msra.gmra.mxu0 %v4672_v35 }
  0xd9   : > { %2879 = vmatmul.mubr.bf16.vlgmr.msra.gmra.mxu1 %v4676_v36  ;;  %2888 = vmatpush1.bf16.msra.mxu0 %v4054_v39  ;;  %v4140_v39 = vld [vmem:[%s4417_s25 + $0x12c] ss:$16 sps:$4 sm:$0xff]  }
  0xda   : > { %2929 = vmatpush1.bf16.msra.mxu1 %v4057_v40  ;;  %2889 = vmatprep.subr.bf16.mxu0 %v4062_v41  ;;  %v4143_v40 = vld [vmem:[%s4417_s25 + $0x32c] ss:$16 sps:$4 sm:$0xff]   ;;  %v4138_v41 = vld [vmem:[%s4417_s25 + $0x128] ss:$16 sps:$4 sm:$0xff]  }
  0xdb   : > { %2930 = vmatprep.subr.bf16.mxu1 %v4065_v42  ;;  %2919 = vmatprep.mubr.bf16.mxu0 %v4467_v48  ;;  %v4075_v48 = vld [vmem:[%s4417_s25 + $0x288] ss:$16 sps:$4 sm:$0xff]  }
  0xdc   : > { %2960 = vmatprep.mubr.bf16.mxu1 %v4472_v52  ;;  %v4080_v52 = vld [vmem:[%s4417_s25 + $0x6c] ss:$16 sps:$4 sm:$0xff]   ;;  %v4141_v42 = vld [vmem:[%s4417_s25 + $0x328] ss:$16 sps:$4 sm:$0xff]  }
  0xdd   : > { %2890 = vmatpush1.bf16.msra.mxu0 %v4060_v23  ;;  %v4146_v23 = vld [vmem:[%s4417_s25 + $0x10c] ss:$16 sps:$4 sm:$0xff]  }
  0xde   : > { %2931 = vmatpush1.bf16.msra.mxu1 %v4063_v24  ;;  %2891 = vmatprep.subr.bf16.mxu0 %v4068_v43  ;;  %v4149_v24 = vld [vmem:[%s4417_s25 + $0x30c] ss:$16 sps:$4 sm:$0xff]   ;;  %v4144_v43 = vld [vmem:[%s4417_s25 + $0x108] ss:$16 sps:$4 sm:$0xff]  }
  0xdf   : > { %2932 = vmatprep.subr.bf16.mxu1 %v4071_v44  ;;  %v4147_v44 = vld [vmem:[%s4417_s25 + $0x308] ss:$16 sps:$4 sm:$0xff]  }
  0xe1   : > { %2892 = vmatpush1.bf16.msra.mxu0 %v4066_v45  ;;  %v4152_v45 = vld [vmem:[%s4417_s25 + $0x4ec] ss:$16 sps:$4 sm:$0xff]  }
  0xe2   : > { %2933 = vmatpush1.bf16.msra.mxu1 %v4069_v46  ;;  %2893 = vmatprep.subr.bf16.mxu0 %v4074_v47  ;;  %v4155_v46 = vld [vmem:[%s4417_s25 + $0x6ec] ss:$16 sps:$4 sm:$0xff]   ;;  %v4150_v47 = vld [vmem:[%s4417_s25 + $0x4e8] ss:$16 sps:$4 sm:$0xff]  }
  0xe3   : > { %2934 = vmatprep.subr.bf16.mxu1 %v4077_v49  ;;  %v4153_v49 = vld [vmem:[%s4417_s25 + $0x6e8] ss:$16 sps:$4 sm:$0xff]  }
  0xe5   : > { %2894 = vmatpush1.bf16.msra.mxu0 %v4072_v50  ;;  %v4158_v50 = vld [vmem:[%s4417_s25 + $0x4cc] ss:$16 sps:$4 sm:$0xff]  }
  0xe6   : > { %2935 = vmatpush1.bf16.msra.mxu1 %v4075_v48  ;;  %2895 = vmatprep.subr.bf16.mxu0 %v4080_v52  ;;  %v4161_v48 = vld [vmem:[%s4417_s25 + $0x6cc] ss:$16 sps:$4 sm:$0xff]  }
  0xe7   : > { %2936 = vmatprep.subr.bf16.mxu1 %v4083_v51 }
  0xe9   : > { %2896 = vmatpush1.bf16.msra.mxu0 %v4078_v53 }
  0xea   : > { %2937 = vmatpush1.bf16.msra.mxu1 %v4081_v54  ;;  %2897 = vmatprep.subr.bf16.mxu0 %v4086_v55  ;;  %v4156_v54 = vld [vmem:[%s4417_s25 + $0x4c8] ss:$16 sps:$4 sm:$0xff]  }
  0xeb   : > { %2938 = vmatprep.subr.bf16.mxu1 %v4089_v56  ;;  %v4159_v55 = vld [vmem:[%s4417_s25 + $0x6c8] ss:$16 sps:$4 sm:$0xff]  }
  0xed   : > { %2898 = vmatpush1.bf16.msra.mxu0 %v4084_v57 }
  0xee   : > { %2939 = vmatpush1.bf16.msra.mxu1 %v4087_v58  ;;  %2899 = vmatprep.subr.bf16.mxu0 %v4092_v59  ;;  %v4164_v58 = vld [vmem:[%s4417_s25 + $0x4ac] ss:$16 sps:$4 sm:$0xff]  }
  0xef   : > { %2940 = vmatprep.subr.bf16.mxu1 %v4095_v60  ;;  %v4167_v59 = vld [vmem:[%s4417_s25 + $0x6ac] ss:$16 sps:$4 sm:$0xff]  }
  0xf1   : > { %2900 = vmatpush1.bf16.msra.mxu0 %v4090_v61  ;;  %v4162_v61 = vld [vmem:[%s4417_s25 + $0x4a8] ss:$16 sps:$4 sm:$0xff]  }
  0xf2   : > { %2941 = vmatpush1.bf16.msra.mxu1 %v4093_v62  ;;  %2901 = vmatprep.subr.bf16.mxu0 %v4098_v63  ;;  %v4165_v62 = vld [vmem:[%s4417_s25 + $0x6a8] ss:$16 sps:$4 sm:$0xff]  }
  0xf3   : > { %2942 = vmatprep.subr.bf16.mxu1 %v4101_v0 }
  0xf5   : > { %2902 = vmatpush1.bf16.msra.mxu0 %v4096_v1  ;;  %v4170_v1 = vld [vmem:[%s4417_s25 + $0x48c] ss:$16 sps:$4 sm:$0xff]  }
  0xf6   : > { %2943 = vmatpush1.bf16.msra.mxu1 %v4099_v2  ;;  %2903 = vmatprep.subr.bf16.mxu0 %v4104_v3  ;;  %v4171_v2 = vld [vmem:[%s4417_s25 + $0x688] ss:$16 sps:$4 sm:$0xff]   ;;  %v4176_v3 = vld [vmem:[%s4417_s25 + $0x46c] ss:$16 sps:$4 sm:$0xff]  }
  0xf7   : > { %2944 = vmatprep.subr.bf16.mxu1 %v4107_v4  ;;  %v4179_v4 = vld [vmem:[%s4417_s25 + $0x66c] ss:$16 sps:$4 sm:$0xff]  }
  0xf9   : > { %2904 = vmatpush2.bf16.msra.mxu0 %v4102_v5  ;;  %v4174_v5 = vld [vmem:[%s4417_s25 + $0x468] ss:$16 sps:$4 sm:$0xff]  }
  0xfa   : > { %2945 = vmatpush2.bf16.msra.mxu1 %v4105_v6  ;;  %2905 = vmatprep.subr.bf16.mxu0 %v4110_v9  ;;  %v4177_v6 = vld [vmem:[%s4417_s25 + $0x668] ss:$16 sps:$4 sm:$0xff]   ;;  %v4182_v9 = vld [vmem:[%s4417_s25 + $0x44c] ss:$16 sps:$4 sm:$0xff]  }
  0xfb   : > { %2946 = vmatprep.subr.bf16.mxu1 %v4113_v10  ;;  %v4185_v10 = vld [vmem:[%s4417_s25 + $0x64c] ss:$16 sps:$4 sm:$0xff]  }
  0xfd   : > { %2906 = vmatpush2.bf16.msra.mxu0 %v4108_v11  ;;  %v4180_v11 = vld [vmem:[%s4417_s25 + $0x448] ss:$16 sps:$4 sm:$0xff]  }
  0xfe   : > { %2947 = vmatpush2.bf16.msra.mxu1 %v4111_v12  ;;  %2907 = vmatprep.subr.bf16.mxu0 %v4116_v13  ;;  %v4183_v12 = vld [vmem:[%s4417_s25 + $0x648] ss:$16 sps:$4 sm:$0xff]   ;;  %v4188_v13 = vld [vmem:[%s4417_s25 + $0x42c] ss:$16 sps:$4 sm:$0xff]  }
  0xff   : > { %2948 = vmatprep.subr.bf16.mxu1 %v4119_v14  ;;  %v4191_v14 = vld [vmem:[%s4417_s25 + $0x62c] ss:$16 sps:$4 sm:$0xff]  }
 0x101   : > { %2908 = vmatpush2.bf16.msra.mxu0 %v4114_v15  ;;  %v4186_v15 = vld [vmem:[%s4417_s25 + $0x428] ss:$16 sps:$4 sm:$0xff]  }
 0x102   : > { %2949 = vmatpush2.bf16.msra.mxu1 %v4117_v16  ;;  %2909 = vmatprep.subr.bf16.mxu0 %v4122_v19  ;;  %v4189_v16 = vld [vmem:[%s4417_s25 + $0x628] ss:$16 sps:$4 sm:$0xff]   ;;  %v4194_v19 = vld [vmem:[%s4417_s25 + $0x40c] ss:$16 sps:$4 sm:$0xff]  }
 0x103   : > { %2950 = vmatprep.subr.bf16.mxu1 %v4125_v20  ;;  %v4197_v20 = vld [vmem:[%s4417_s25 + $0x60c] ss:$16 sps:$4 sm:$0xff]  }
 0x105   : > { %2910 = vmatpush2.bf16.msra.mxu0 %v4120_v21  ;;  %v4192_v21 = vld [vmem:[%s4417_s25 + $0x408] ss:$16 sps:$4 sm:$0xff]  }
 0x106   : > { %2951 = vmatpush2.bf16.msra.mxu1 %v4123_v22  ;;  %2911 = vmatprep.subr.bf16.mxu0 %v4128_v27  ;;  %v4195_v22 = vld [vmem:[%s4417_s25 + $0x608] ss:$16 sps:$4 sm:$0xff]   ;;  %v4200_v27 = vld [vmem:[%s4417_s25 + $0x5ec] ss:$16 sps:$4 sm:$0xff]  }
 0x107   : > { %2952 = vmatprep.subr.bf16.mxu1 %v4131_v28  ;;  %v4203_v28 = vld [vmem:[%s4417_s25 + $0x7ec] ss:$16 sps:$4 sm:$0xff]  }
 0x109   : > { %2912 = vmatpush2.bf16.msra.mxu0 %v4126_v29  ;;  %v4198_v29 = vld [vmem:[%s4417_s25 + $0x5e8] ss:$16 sps:$4 sm:$0xff]  }
 0x10a   : > { %2953 = vmatpush2.bf16.msra.mxu1 %v4129_v30  ;;  %2913 = vmatprep.subr.bf16.mxu0 %v4134_v31  ;;  %v4201_v30 = vld [vmem:[%s4417_s25 + $0x7e8] ss:$16 sps:$4 sm:$0xff]   ;;  %v4206_v31 = vld [vmem:[%s4417_s25 + $0x5cc] ss:$16 sps:$4 sm:$0xff]  }
 0x10b   : > { %2954 = vmatprep.subr.bf16.mxu1 %v4137_v32  ;;  %v4209_v32 = vld [vmem:[%s4417_s25 + $0x7cc] ss:$16 sps:$4 sm:$0xff]  }
 0x10d   : > { %2914 = vmatpush2.bf16.msra.mxu0 %v4132_v33  ;;  %v4204_v33 = vld [vmem:[%s4417_s25 + $0x5c8] ss:$16 sps:$4 sm:$0xff]  }
 0x10e   : > { %2955 = vmatpush2.bf16.msra.mxu1 %v4135_v34  ;;  %2915 = vmatprep.subr.bf16.mxu0 %v4140_v39  ;;  %v4207_v34 = vld [vmem:[%s4417_s25 + $0x7c8] ss:$16 sps:$4 sm:$0xff]   ;;  %v4212_v39 = vld [vmem:[%s4417_s25 + $0x5ac] ss:$16 sps:$4 sm:$0xff]  }
 0x10f   : > { %2956 = vmatprep.subr.bf16.mxu1 %v4143_v40  ;;  %v4215_v40 = vld [vmem:[%s4417_s25 + $0x7ac] ss:$16 sps:$4 sm:$0xff]  }
 0x111   : > { %2916 = vmatpush2.bf16.msra.mxu0 %v4138_v41  ;;  %v4210_v41 = vld [vmem:[%s4417_s25 + $0x5a8] ss:$16 sps:$4 sm:$0xff]  }
 0x112   : > { %2957 = vmatpush2.bf16.msra.mxu1 %v4141_v42  ;;  %2917 = vmatprep.subr.bf16.mxu0 %v4146_v23  ;;  %v4213_v42 = vld [vmem:[%s4417_s25 + $0x7a8] ss:$16 sps:$4 sm:$0xff]   ;;  %v4218_v23 = vld [vmem:[%s4417_s25 + $0x58c] ss:$16 sps:$4 sm:$0xff]  }
 0x113   : > { %2958 = vmatprep.subr.bf16.mxu1 %v4149_v24  ;;  %v4221_v24 = vld [vmem:[%s4417_s25 + $0x78c] ss:$16 sps:$4 sm:$0xff]  }
 0x115   : > { %2918 = vmatpush2.bf16.msra.mxu0 %v4144_v43  ;;  %v4216_v43 = vld [vmem:[%s4417_s25 + $0x588] ss:$16 sps:$4 sm:$0xff]  }
 0x116   : > { %2959 = vmatpush2.bf16.msra.mxu1 %v4147_v44  ;;  %2969 = vmatprep.subr.bf16.mxu0 %v4152_v45  ;;  %v4219_v44 = vld [vmem:[%s4417_s25 + $0x788] ss:$16 sps:$4 sm:$0xff]   ;;  %v4224_v45 = vld [vmem:[%s4417_s25 + $0x56c] ss:$16 sps:$4 sm:$0xff]  }
 0x117   : > { %3010 = vmatprep.subr.bf16.mxu1 %v4155_v46  ;;  %v4227_v46 = vld [vmem:[%s4417_s25 + $0x76c] ss:$16 sps:$4 sm:$0xff]  }
 0x118   : > { %v2675_v52 = vpop.f32.mrf.mxu0  ;;  %2920 = vmatmul.mubr.bf16.vlgmr.msra.gmra.mxu0 %v4494_v7 }
 0x119   : > { %v2716_v51 = vpop.f32.mrf.mxu1  ;;  %2961 = vmatmul.mubr.bf16.vlgmr.msra.gmra.mxu1 %v4496_v8  ;;  %2970 = vmatpush1.bf16.msra.mxu0 %v4150_v47  ;;  %v4222_v47 = vld [vmem:[%s4417_s25 + $0x568] ss:$16 sps:$4 sm:$0xff]  }
 0x11a   : > { %v4752_v53 = vadd.f32 %v2716_v51, %v2675_v52  ;;  %3011 = vmatpush1.bf16.msra.mxu1 %v4153_v49  ;;  %v2677_v56 = vpop.f32.mrf.mxu0  ;;  %2971 = vmatprep.subr.bf16.mxu0 %v4158_v50  ;;  %v4225_v49 = vld [vmem:[%s4417_s25 + $0x768] ss:$16 sps:$4 sm:$0xff]   ;;  %v4230_v50 = vld [vmem:[%s4417_s25 + $0x54c] ss:$16 sps:$4 sm:$0xff]  }
 0x11b   : > { %v2718_v57 = vpop.f32.mrf.mxu1  ;;  %3012 = vmatprep.subr.bf16.mxu1 %v4161_v48  ;;  %3001 = vmatprep.mubr.bf16.mxu0 %v4534_v37  ;;  %v4173_v37 = vld [vmem:[%s4417_s25 + $0x68c] ss:$16 sps:$4 sm:$0xff]   ;;  %v4228_v52 = vld [vmem:[%s4417_s25 + $0x548] ss:$16 sps:$4 sm:$0xff]  }
 0x11c   : > { %v4758_v60 = vadd.f32 %v2718_v57, %v2677_v56  ;;  %3042 = vmatprep.mubr.bf16.mxu1 %v4538_v38  ;;  %v2679_v7 = vpop.f32.mrf.mxu0  ;;  %v4168_v38 = vld [vmem:[%s4417_s25 + $0x488] ss:$16 sps:$4 sm:$0xff]   ;;  %v4233_v48 = vld [vmem:[%s4417_s25 + $0x74c] ss:$16 sps:$4 sm:$0xff]  }
 0x11d   : > { %v2720_v8 = vpop.f32.mrf.mxu1  ;;  %2972 = vmatpush1.bf16.msra.mxu0 %v4156_v54  ;;  %v4231_v51 = vld [vmem:[%s4417_s25 + $0x748] ss:$16 sps:$4 sm:$0xff]   ;;  %v4236_v54 = vld [vmem:[%s4417_s25 + $0x52c] ss:$16 sps:$4 sm:$0xff]  }
 0x11e   : > { %3013 = vmatpush1.bf16.msra.mxu1 %v4159_v55  ;;  %v2680_v63 = vpop.f32.mrf.mxu0  ;;  %2973 = vmatprep.subr.bf16.mxu0 %v4164_v58  ;;  %v4239_v55 = vld [vmem:[%s4417_s25 + $0x72c] ss:$16 sps:$4 sm:$0xff]   ;;  %v4234_v56 = vld [vmem:[%s4417_s25 + $0x528] ss:$16 sps:$4 sm:$0xff]  }
 0x11f   : > { %v2721_v0 = vpop.f32.mrf.mxu1  ;;  %3014 = vmatprep.subr.bf16.mxu1 %v4167_v59  ;;  %v4237_v57 = vld [vmem:[%s4417_s25 + $0x728] ss:$16 sps:$4 sm:$0xff]   ;;  %v4242_v58 = vld [vmem:[%s4417_s25 + $0x50c] ss:$16 sps:$4 sm:$0xff]  }
 0x120   : > { %v4245_v59 = vld [vmem:[%s4417_s25 + $0x70c] ss:$16 sps:$4 sm:$0xff]   ;;  %v4240_v7 = vld [vmem:[%s4417_s25 + $0x508] ss:$16 sps:$4 sm:$0xff]  }
 0x121   : > { %2974 = vmatpush1.bf16.msra.mxu0 %v4162_v61  ;;  %v4243_v8 = vld [vmem:[%s4417_s25 + $0x708] ss:$16 sps:$4 sm:$0xff]   ;;  %v4248_v61 = vld [vmem:[%s4417_s25 + $0x8ec] ss:$16 sps:$4 sm:$0xff]  }
 0x122   : > { %3015 = vmatpush1.bf16.msra.mxu1 %v4165_v62  ;;  %2975 = vmatprep.subr.bf16.mxu0 %v4170_v1  ;;  %v4251_v62 = vld [vmem:[%s4417_s25 + $0xaec] ss:$16 sps:$4 sm:$0xff]   ;;  %v4246_v63 = vld [vmem:[%s4417_s25 + $0x8e8] ss:$16 sps:$4 sm:$0xff]  }
 0x123   : > { %3016 = vmatprep.subr.bf16.mxu1 %v4173_v37  ;;  %v4249_v0 = vld [vmem:[%s4417_s25 + $0xae8] ss:$16 sps:$4 sm:$0xff]   ;;  %v4254_v1 = vld [vmem:[%s4417_s25 + $0x8cc] ss:$16 sps:$4 sm:$0xff]  }
 0x124   : > { %v4257_v37 = vld [vmem:[%s4417_s25 + $0xacc] ss:$16 sps:$4 sm:$0xff]  }
 0x125   : > { %2976 = vmatpush1.bf16.msra.mxu0 %v4168_v38 }
 0x126   : > { %3017 = vmatpush1.bf16.msra.mxu1 %v4171_v2  ;;  %2977 = vmatprep.subr.bf16.mxu0 %v4176_v3  ;;  %v4252_v3 = vld [vmem:[%s4417_s25 + $0x8c8] ss:$16 sps:$4 sm:$0xff]  }
 0x127   : > { %3018 = vmatprep.subr.bf16.mxu1 %v4179_v4  ;;  %v4255_v4 = vld [vmem:[%s4417_s25 + $0xac8] ss:$16 sps:$4 sm:$0xff]  }
 0x129   : > { %2978 = vmatpush1.bf16.msra.mxu0 %v4174_v5 }
 0x12a   : > { %3019 = vmatpush1.bf16.msra.mxu1 %v4177_v6  ;;  %2979 = vmatprep.subr.bf16.mxu0 %v4182_v9  ;;  %v4260_v9 = vld [vmem:[%s4417_s25 + $0x8ac] ss:$16 sps:$4 sm:$0xff]  }
 0x12b   : > { %3020 = vmatprep.subr.bf16.mxu1 %v4185_v10  ;;  %v4263_v10 = vld [vmem:[%s4417_s25 + $0xaac] ss:$16 sps:$4 sm:$0xff]  }
 0x12d   : > { %2980 = vmatpush1.bf16.msra.mxu0 %v4180_v11  ;;  %v4258_v11 = vld [vmem:[%s4417_s25 + $0x8a8] ss:$16 sps:$4 sm:$0xff]  }
 0x12e   : > { %3021 = vmatpush1.bf16.msra.mxu1 %v4183_v12  ;;  %2981 = vmatprep.subr.bf16.mxu0 %v4188_v13  ;;  %v4261_v12 = vld [vmem:[%s4417_s25 + $0xaa8] ss:$16 sps:$4 sm:$0xff]  }
 0x12f   : > { %3022 = vmatprep.subr.bf16.mxu1 %v4191_v14 }
 0x131   : > { %2982 = vmatpush1.bf16.msra.mxu0 %v4186_v15  ;;  %v4266_v15 = vld [vmem:[%s4417_s25 + $0x88c] ss:$16 sps:$4 sm:$0xff]  }
 0x132   : > { %3023 = vmatpush1.bf16.msra.mxu1 %v4189_v16  ;;  %2983 = vmatprep.subr.bf16.mxu0 %v4194_v19  ;;  %v4267_v16 = vld [vmem:[%s4417_s25 + $0xa88] ss:$16 sps:$4 sm:$0xff]   ;;  %v4272_v19 = vld [vmem:[%s4417_s25 + $0x86c] ss:$16 sps:$4 sm:$0xff]  }
 0x133   : > { %3024 = vmatprep.subr.bf16.mxu1 %v4197_v20  ;;  %v4275_v20 = vld [vmem:[%s4417_s25 + $0xa6c] ss:$16 sps:$4 sm:$0xff]  }
 0x135   : > { %2984 = vmatpush1.bf16.msra.mxu0 %v4192_v21  ;;  %v4270_v21 = vld [vmem:[%s4417_s25 + $0x868] ss:$16 sps:$4 sm:$0xff]  }
 0x136   : > { %3025 = vmatpush1.bf16.msra.mxu1 %v4195_v22  ;;  %2985 = vmatprep.subr.bf16.mxu0 %v4200_v27  ;;  %v4273_v22 = vld [vmem:[%s4417_s25 + $0xa68] ss:$16 sps:$4 sm:$0xff]   ;;  %v4278_v27 = vld [vmem:[%s4417_s25 + $0x84c] ss:$16 sps:$4 sm:$0xff]  }
 0x137   : > { %3026 = vmatprep.subr.bf16.mxu1 %v4203_v28  ;;  %v4281_v28 = vld [vmem:[%s4417_s25 + $0xa4c] ss:$16 sps:$4 sm:$0xff]  }
 0x139   : > { %2986 = vmatpush2.bf16.msra.mxu0 %v4198_v29  ;;  %v4276_v29 = vld [vmem:[%s4417_s25 + $0x848] ss:$16 sps:$4 sm:$0xff]  }
 0x13a   : > { %3027 = vmatpush2.bf16.msra.mxu1 %v4201_v30  ;;  %2987 = vmatprep.subr.bf16.mxu0 %v4206_v31  ;;  %v4279_v30 = vld [vmem:[%s4417_s25 + $0xa48] ss:$16 sps:$4 sm:$0xff]   ;;  %v4284_v31 = vld [vmem:[%s4417_s25 + $0x82c] ss:$16 sps:$4 sm:$0xff]  }
 0x13b   : > { %3028 = vmatprep.subr.bf16.mxu1 %v4209_v32  ;;  %v4287_v32 = vld [vmem:[%s4417_s25 + $0xa2c] ss:$16 sps:$4 sm:$0xff]  }
 0x13d   : > { %2988 = vmatpush2.bf16.msra.mxu0 %v4204_v33  ;;  %v4282_v33 = vld [vmem:[%s4417_s25 + $0x828] ss:$16 sps:$4 sm:$0xff]  }
 0x13e   : > { %3029 = vmatpush2.bf16.msra.mxu1 %v4207_v34  ;;  %2989 = vmatprep.subr.bf16.mxu0 %v4212_v39  ;;  %v4285_v34 = vld [vmem:[%s4417_s25 + $0xa28] ss:$16 sps:$4 sm:$0xff]   ;;  %v4290_v39 = vld [vmem:[%s4417_s25 + $0x80c] ss:$16 sps:$4 sm:$0xff]  }
 0x13f   : > { %3030 = vmatprep.subr.bf16.mxu1 %v4215_v40  ;;  %v4293_v40 = vld [vmem:[%s4417_s25 + $0xa0c] ss:$16 sps:$4 sm:$0xff]  }
 0x141   : > { %2990 = vmatpush2.bf16.msra.mxu0 %v4210_v41  ;;  %v4288_v41 = vld [vmem:[%s4417_s25 + $0x808] ss:$16 sps:$4 sm:$0xff]  }
 0x142   : > { %3031 = vmatpush2.bf16.msra.mxu1 %v4213_v42  ;;  %2991 = vmatprep.subr.bf16.mxu0 %v4218_v23  ;;  %v4291_v42 = vld [vmem:[%s4417_s25 + $0xa08] ss:$16 sps:$4 sm:$0xff]   ;;  %v4296_v23 = vld [vmem:[%s4417_s25 + $0x9ec] ss:$16 sps:$4 sm:$0xff]  }
 0x143   : > { %3032 = vmatprep.subr.bf16.mxu1 %v4221_v24  ;;  %v4299_v24 = vld [vmem:[%s4417_s25 + $0xbec] ss:$16 sps:$4 sm:$0xff]  }
 0x145   : > { %2992 = vmatpush2.bf16.msra.mxu0 %v4216_v43  ;;  %v4294_v43 = vld [vmem:[%s4417_s25 + $0x9e8] ss:$16 sps:$4 sm:$0xff]  }
 0x146   : > { %3033 = vmatpush2.bf16.msra.mxu1 %v4219_v44  ;;  %2993 = vmatprep.subr.bf16.mxu0 %v4224_v45  ;;  %v4297_v44 = vld [vmem:[%s4417_s25 + $0xbe8] ss:$16 sps:$4 sm:$0xff]   ;;  %v4302_v45 = vld [vmem:[%s4417_s25 + $0x9cc] ss:$16 sps:$4 sm:$0xff]  }
 0x147   : > { %3034 = vmatprep.subr.bf16.mxu1 %v4227_v46  ;;  %v4305_v46 = vld [vmem:[%s4417_s25 + $0xbcc] ss:$16 sps:$4 sm:$0xff]  }
 0x149   : > { %2994 = vmatpush2.bf16.msra.mxu0 %v4222_v47  ;;  %v4300_v47 = vld [vmem:[%s4417_s25 + $0x9c8] ss:$16 sps:$4 sm:$0xff]  }
 0x14a   : > { %3035 = vmatpush2.bf16.msra.mxu1 %v4225_v49  ;;  %2995 = vmatprep.subr.bf16.mxu0 %v4230_v50  ;;  %v4303_v49 = vld [vmem:[%s4417_s25 + $0xbc8] ss:$16 sps:$4 sm:$0xff]   ;;  %v4308_v50 = vld [vmem:[%s4417_s25 + $0x9ac] ss:$16 sps:$4 sm:$0xff]  }
 0x14b   : > { %3036 = vmatprep.subr.bf16.mxu1 %v4233_v48  ;;  %v4311_v48 = vld [vmem:[%s4417_s25 + $0xbac] ss:$16 sps:$4 sm:$0xff]  }
 0x14d   : > { %2996 = vmatpush2.bf16.msra.mxu0 %v4228_v52  ;;  %v4306_v52 = vld [vmem:[%s4417_s25 + $0x9a8] ss:$16 sps:$4 sm:$0xff]  }
 0x14e   : > { %3037 = vmatpush2.bf16.msra.mxu1 %v4231_v51  ;;  %2997 = vmatprep.subr.bf16.mxu0 %v4236_v54  ;;  %v4309_v51 = vld [vmem:[%s4417_s25 + $0xba8] ss:$16 sps:$4 sm:$0xff]   ;;  %v4314_v54 = vld [vmem:[%s4417_s25 + $0x98c] ss:$16 sps:$4 sm:$0xff]  }
 0x14f   : > { %3038 = vmatprep.subr.bf16.mxu1 %v4239_v55  ;;  %v4317_v55 = vld [vmem:[%s4417_s25 + $0xb8c] ss:$16 sps:$4 sm:$0xff]  }
 0x151   : > { %2998 = vmatpush2.bf16.msra.mxu0 %v4234_v56  ;;  %v4312_v56 = vld [vmem:[%s4417_s25 + $0x988] ss:$16 sps:$4 sm:$0xff]  }
 0x152   : > { %3039 = vmatpush2.bf16.msra.mxu1 %v4237_v57  ;;  %2999 = vmatprep.subr.bf16.mxu0 %v4242_v58  ;;  %v4315_v57 = vld [vmem:[%s4417_s25 + $0xb88] ss:$16 sps:$4 sm:$0xff]   ;;  %v4320_v58 = vld [vmem:[%s4417_s25 + $0x96c] ss:$16 sps:$4 sm:$0xff]  }
 0x153   : > { %3040 = vmatprep.subr.bf16.mxu1 %v4245_v59  ;;  %v4323_v59 = vld [vmem:[%s4417_s25 + $0xb6c] ss:$16 sps:$4 sm:$0xff]  }
 0x155   : > { %3000 = vmatpush2.bf16.msra.mxu0 %v4240_v7  ;;  %v4318_v7 = vld [vmem:[%s4417_s25 + $0x968] ss:$16 sps:$4 sm:$0xff]  }
 0x156   : > { %3041 = vmatpush2.bf16.msra.mxu1 %v4243_v8  ;;  %3051 = vmatprep.subr.bf16.mxu0 %v4248_v61  ;;  %v4321_v8 = vld [vmem:[%s4417_s25 + $0xb68] ss:$16 sps:$4 sm:$0xff]   ;;  %v4326_v61 = vld [vmem:[%s4417_s25 + $0x94c] ss:$16 sps:$4 sm:$0xff]  }
 0x157   : > { %3092 = vmatprep.subr.bf16.mxu1 %v4251_v62  ;;  %v4329_v62 = vld [vmem:[%s4417_s25 + $0xb4c] ss:$16 sps:$4 sm:$0xff]  }
 0x158   : > { %v4822_v38 = vpop.f32.mrf.mxu0  ;;  %3002 = vmatmul.mubr.bf16.vlgmr.msra.gmra.mxu0 %v4582_v17 }
 0x159   : > { %v4824_v2 = vpop.f32.mrf.mxu1  ;;  %3043 = vmatmul.mubr.bf16.vlgmr.msra.gmra.mxu1 %v4586_v18  ;;  %3052 = vmatpush1.bf16.msra.mxu0 %v4246_v63  ;;  %v4324_v63 = vld [vmem:[%s4417_s25 + $0x948] ss:$16 sps:$4 sm:$0xff]  }
 0x15a   : > { %3093 = vmatpush1.bf16.msra.mxu1 %v4249_v0  ;;  %v4830_v5 = vpop.f32.mrf.mxu0  ;;  %3053 = vmatprep.subr.bf16.mxu0 %v4254_v1  ;;  %v4327_v0 = vld [vmem:[%s4417_s25 + $0xb48] ss:$16 sps:$4 sm:$0xff]   ;;  %v4332_v1 = vld [vmem:[%s4417_s25 + $0x92c] ss:$16 sps:$4 sm:$0xff]  }
 0x15b   : > { %v4832_v6 = vpop.f32.mrf.mxu1  ;;  %3094 = vmatprep.subr.bf16.mxu1 %v4257_v37  ;;  %3083 = vmatprep.mubr.bf16.mxu0 %v4600_v25  ;;  %v4269_v25 = vld [vmem:[%s4417_s25 + $0xa8c] ss:$16 sps:$4 sm:$0xff]  }
 0x15c   : > { %3124 = vmatprep.mubr.bf16.mxu1 %v4604_v26  ;;  %v2761_v17 = vpop.f32.mrf.mxu0  ;;  %v4264_v26 = vld [vmem:[%s4417_s25 + $0x888] ss:$16 sps:$4 sm:$0xff]   ;;  %v4335_v37 = vld [vmem:[%s4417_s25 + $0xb2c] ss:$16 sps:$4 sm:$0xff]  }
 0x15d   : > { %v2802_v18 = vpop.f32.mrf.mxu1  ;;  %3054 = vmatpush1.bf16.msra.mxu0 %v4252_v3  ;;  %v4330_v3 = vld [vmem:[%s4417_s25 + $0x928] ss:$16 sps:$4 sm:$0xff]  }
 0x15e   : > { %3095 = vmatpush1.bf16.msra.mxu1 %v4255_v4  ;;  %v2762_v13 = vpop.f32.mrf.mxu0  ;;  %3055 = vmatprep.subr.bf16.mxu0 %v4260_v9  ;;  %v4333_v4 = vld [vmem:[%s4417_s25 + $0xb28] ss:$16 sps:$4 sm:$0xff]   ;;  %v4338_v9 = vld [vmem:[%s4417_s25 + $0x90c] ss:$16 sps:$4 sm:$0xff]  }
 0x15f   : > { %v2803_v14 = vpop.f32.mrf.mxu1  ;;  %3096 = vmatprep.subr.bf16.mxu1 %v4263_v10  ;;  %v4341_v10 = vld [vmem:[%s4417_s25 + $0xb0c] ss:$16 sps:$4 sm:$0xff]   ;;  %v4336_v17 = vld [vmem:[%s4417_s25 + $0x908] ss:$16 sps:$4 sm:$0xff]  }
 0x160   : > { %v4339_v18 = vld [vmem:[%s4417_s25 + $0xb08] ss:$16 sps:$4 sm:$0xff]  }
 0x161   : > { %3056 = vmatpush1.bf16.msra.mxu0 %v4258_v11  ;;  %v2758_v11 = vadd.f32 %v4822_v38, %v4752_v53 }
 0x162   : > { %3097 = vmatpush1.bf16.msra.mxu1 %v4261_v12  ;;  %3057 = vmatprep.subr.bf16.mxu0 %v4266_v15  ;;  %v2760_v12 = vadd.f32 %v4830_v5, %v4758_v60 }
 0x163   : > { %3098 = vmatprep.subr.bf16.mxu1 %v4269_v25  ;;  %v2799_v13 = vadd.f32 %v4824_v2, %v2758_v11 }
 0x164   : > { %v2801_v25 = vadd.f32 %v4832_v6, %v2760_v12 }
 0x165   : > { %3058 = vmatpush1.bf16.msra.mxu0 %v4264_v26 }
 0x166   : > { %3099 = vmatpush1.bf16.msra.mxu1 %v4267_v16  ;;  %3059 = vmatprep.subr.bf16.mxu0 %v4272_v19  ;;  %v285_v16 = vld [vmem:[#allocation2 + $0x10] sm:$0xff] }
 0x167   : > { %3100 = vmatprep.subr.bf16.mxu1 %v4275_v20 }
 0x169   : > { %3060 = vmatpush1.bf16.msra.mxu0 %v4270_v21  ;;  %v286_v21 = vld [vmem:[#allocation2] sm:$0xff] }
 0x16a   : > { %3101 = vmatpush1.bf16.msra.mxu1 %v4273_v22  ;;  %3061 = vmatprep.subr.bf16.mxu0 %v4278_v27 }
 0x16b   : > { %3102 = vmatprep.subr.bf16.mxu1 %v4281_v28 }
 0x16d   : > { %3062 = vmatpush1.bf16.msra.mxu0 %v4276_v29 }
 0x16e   : > { %3103 = vmatpush1.bf16.msra.mxu1 %v4279_v30  ;;  %3063 = vmatprep.subr.bf16.mxu0 %v4284_v31 }
 0x16f   : > { %3104 = vmatprep.subr.bf16.mxu1 %v4287_v32 }
 0x171   : > { %3064 = vmatpush1.bf16.msra.mxu0 %v4282_v33 }
 0x172   : > { %3105 = vmatpush1.bf16.msra.mxu1 %v4285_v34  ;;  %3065 = vmatprep.subr.bf16.mxu0 %v4290_v39 }
 0x173   : > { %3106 = vmatprep.subr.bf16.mxu1 %v4293_v40 }
 0x175   : > { %3066 = vmatpush1.bf16.msra.mxu0 %v4288_v41 }
 0x176   : > { %3107 = vmatpush1.bf16.msra.mxu1 %v4291_v42  ;;  %3067 = vmatprep.subr.bf16.mxu0 %v4296_v23 }
 0x177   : > { %3108 = vmatprep.subr.bf16.mxu1 %v4299_v24 }
 0x179   : > { %3068 = vmatpush2.bf16.msra.mxu0 %v4294_v43 }
 0x17a   : > { %3109 = vmatpush2.bf16.msra.mxu1 %v4297_v44  ;;  %3069 = vmatprep.subr.bf16.mxu0 %v4302_v45 }
 0x17b   : > { %3110 = vmatprep.subr.bf16.mxu1 %v4305_v46 }
 0x17d   : > { %3070 = vmatpush2.bf16.msra.mxu0 %v4300_v47 }
 0x17e   : > { %3111 = vmatpush2.bf16.msra.mxu1 %v4303_v49  ;;  %3071 = vmatprep.subr.bf16.mxu0 %v4308_v50 }
 0x17f   : > { %3112 = vmatprep.subr.bf16.mxu1 %v4311_v48 }
 0x181   : > { %3072 = vmatpush2.bf16.msra.mxu0 %v4306_v52 }
 0x182   : > { %3113 = vmatpush2.bf16.msra.mxu1 %v4309_v51  ;;  %3073 = vmatprep.subr.bf16.mxu0 %v4314_v54 }
 0x183   : > { %3114 = vmatprep.subr.bf16.mxu1 %v4317_v55  ;;  %v287_v55 = vld [vmem:[#allocation2 + $0x18] sm:$0xff] }
 0x185   : > { %3074 = vmatpush2.bf16.msra.mxu0 %v4312_v56 }
 0x186   : > { %3115 = vmatpush2.bf16.msra.mxu1 %v4315_v57  ;;  %3075 = vmatprep.subr.bf16.mxu0 %v4320_v58 }
 0x187   : > { %3116 = vmatprep.subr.bf16.mxu1 %v4323_v59 }
 0x189   : > { %3076 = vmatpush2.bf16.msra.mxu0 %v4318_v7  ;;  %v288_v7 = vld [vmem:[#allocation2 + $0x8] sm:$0xff] }
 0x18a   : > { %3117 = vmatpush2.bf16.msra.mxu1 %v4321_v8  ;;  %3077 = vmatprep.subr.bf16.mxu0 %v4326_v61 }
 0x18b   : > { %3118 = vmatprep.subr.bf16.mxu1 %v4329_v62 }
 0x18d   : > { %3078 = vmatpush2.bf16.msra.mxu0 %v4324_v63 }
 0x18e   : > { %3119 = vmatpush2.bf16.msra.mxu1 %v4327_v0  ;;  %3079 = vmatprep.subr.bf16.mxu0 %v4332_v1 }
 0x18f   : > { %3120 = vmatprep.subr.bf16.mxu1 %v4335_v37 }
 0x191   : > { %3080 = vmatpush2.bf16.msra.mxu0 %v4330_v3 }
 0x192   : > { %3121 = vmatpush2.bf16.msra.mxu1 %v4333_v4  ;;  %3081 = vmatprep.subr.bf16.mxu0 %v4338_v9 }
 0x193   : > { %3122 = vmatprep.subr.bf16.mxu1 %v4341_v10 }
 0x195   : > { %3082 = vmatpush2.bf16.msra.mxu0 %v4336_v17 }
 0x196   : > { %3123 = vmatpush2.bf16.msra.mxu1 %v4339_v18 }
 0x198   : > { %v2839_v14 = vpop.f32.mrf.mxu0  ;;  %3084 = vmatmul.mubr.bf16.vlgmr.msra.gmra.mxu0 %v4672_v35 }
 0x199   : > { %v2880_v15 = vpop.f32.mrf.mxu1  ;;  %3125 = vmatmul.mubr.bf16.vlgmr.msra.gmra.mxu1 %v4676_v36  ;;  %v2840_v26 = vadd.f32 %v2839_v14, %v2799_v13 }
 0x19a   : > { %v2841_v19 = vpop.f32.mrf.mxu0 }
 0x19b   : > { %v2882_v20 = vpop.f32.mrf.mxu1  ;;  %v2881_v53 = vadd.f32 %v2880_v15, %v2840_v26  ;;  %v2842_v38 = vadd.f32 %v2841_v19, %v2801_v25 }
 0x19c   : > { %v2843_v60 = vpop.f32.mrf.mxu0 }
 0x19d   : > { %v2884_v5 = vpop.f32.mrf.mxu1  ;;  %v3133_v22 = vadd.f32 %v2881_v53, %v285_v16  ;;  %v2883_v27 = vadd.f32 %v2882_v20, %v2842_v38 }
 0x19e   : > { %v2844_v2 = vpop.f32.mrf.mxu0 }
 0x19f   : > { %v2885_v28 = vpop.f32.mrf.mxu1  ;;  %3137 = vst [vmem:[#allocation2 + $0x10] sm:$0xff] %v3133_v22  ;;  %v3134_v29 = vadd.f32 %v2883_v27, %v286_v21 }
 0x1a1   : > { %3138 = vst [vmem:[#allocation2] sm:$0xff] %v3134_v29 }
 0x1d8   : > { %v2921_v35 = vpop.f32.mrf.mxu0 }
 0x1d9   : > { %v2962_v36 = vpop.f32.mrf.mxu1 }
 0x1da   : > { %v2963_v30 = vadd.f32 %v2962_v36, %v2921_v35  ;;  %v2923_v6 = vpop.f32.mrf.mxu0 }
 0x1db   : > { %v2964_v31 = vpop.f32.mrf.mxu1 }
 0x1dc   : > { %v2965_v32 = vadd.f32 %v2964_v31, %v2923_v6  ;;  %v2925_v33 = vpop.f32.mrf.mxu0 }
 0x1dd   : > { %v2966_v34 = vpop.f32.mrf.mxu1 }
 0x1de   : > { %v2926_v39 = vpop.f32.mrf.mxu0 }
 0x1df   : > { %v2967_v40 = vpop.f32.mrf.mxu1 }
 0x218   : > { %v3003_v41 = vpop.f32.mrf.mxu0 }
 0x219   : > { %v3044_v42 = vpop.f32.mrf.mxu1  ;;  %v3004_v47 = vadd.f32 %v3003_v41, %v2963_v30 }
 0x21a   : > { %v3005_v23 = vpop.f32.mrf.mxu0 }
 0x21b   : > { %v3046_v24 = vpop.f32.mrf.mxu1  ;;  %v3006_v49 = vadd.f32 %v3005_v23, %v2965_v32  ;;  %v3045_v50 = vadd.f32 %v3044_v42, %v3004_v47 }
 0x21c   : > { %v3007_v43 = vpop.f32.mrf.mxu0 }
 0x21d   : > { %v3048_v44 = vpop.f32.mrf.mxu1  ;;  %v3047_v51 = vadd.f32 %v3046_v24, %v3006_v49 }
 0x21e   : > { %v3008_v45 = vpop.f32.mrf.mxu0 }
 0x21f   : > { %v3049_v46 = vpop.f32.mrf.mxu1 }
 0x258   : > { %v3085_v48 = vpop.f32.mrf.mxu0 }
 0x259   : > { %v3126_v52 = vpop.f32.mrf.mxu1  ;;  %v3086_v54 = vadd.f32 %v3085_v48, %v3045_v50 }
 0x25a   : > { %v3087_v56 = vpop.f32.mrf.mxu0 }
 0x25b   : > { %v3128_v57 = vpop.f32.mrf.mxu1  ;;  %v3127_v58 = vadd.f32 %v3126_v52, %v3086_v54  ;;  %v3088_v59 = vadd.f32 %v3087_v56, %v3047_v51 }
 0x25c   : > { %v3089_v8 = vpop.f32.mrf.mxu0 }
 0x25d   : > { %v3130_v61 = vpop.f32.mrf.mxu1  ;;  %v3135_v62 = vadd.f32 %v3127_v58, %v287_v55  ;;  %v3129_v63 = vadd.f32 %v3128_v57, %v3088_v59  ;;  %3144 = sbr.rel (%p3719_p7) target bundleno = 625 (0x271), region = 40 }
 0x25e   : > { %v3090_v0 = vpop.f32.mrf.mxu0 }
 0x25f   : > { %v3131_v1 = vpop.f32.mrf.mxu1  ;;  %3139 = vst [vmem:[#allocation2 + $0x18] sm:$0xff] %v3135_v62  ;;  %v3136_v37 = vadd.f32 %v3129_v63, %v288_v7 }
 0x261   : > { %3140 = vst [vmem:[#allocation2 + $0x8] sm:$0xff] %v3136_v37 }
 0x262   : > { %v3151_v3 = vlaneseq  ;;  %v3149_v9 = vld [vmem:[%s4921_s2] sm:$0xf]  ;;  %v3145_v10 = vld [vmem:[#allocation2 + $0x10] sm:$0xff] }
 0x263   : > { %v3146_v13 = vld [vmem:[#allocation2] sm:$0xff] }
 0x264   : > { %v3152_v4 = vshrl.u32 %v3151_v3, 7 }
 0x266   : > { %v3153_v17 = vsub.s32 0, %v3152_v4  ;;  %v3157_v18 = vsub.s32 1, %v3152_v4  ;;  %v3161_v11 = vsub.s32 2, %v3152_v4  ;;  %v3165_v12 = vsub.s32 3, %v3152_v4  ;;  %v3147_v14 = vld [vmem:[#allocation2 + $0x18] sm:$0xff] }
 0x268   : > { %v3148_v15 = vld [vmem:[#allocation2 + $0x8] sm:$0xff]  ;;  %v3154_v25 = vrot.slane %v3149_v9, %v3153_v17  ;;  %v3158_v26 = vrot.slane %v3149_v9, %v3157_v18  ;;  %v3162_v16 = vrot.slane %v3149_v9, %v3161_v11  ;;  %v3166_v19 = vrot.slane %v3149_v9, %v3165_v12 }
 0x26a   : > { %v3171_v20 = vadd.f32 %v3154_v25, %v3145_v10  ;;  %v3172_v53 = vadd.f32 %v3158_v26, %v3146_v13  ;;  %v3173_v38 = vadd.f32 %v3162_v16, %v3147_v14  ;;  %v3174_v21 = vadd.f32 %v3166_v19, %v3148_v15 }
 0x26c   : > { %v3175_v60 = vmax.f32 %v3171_v20, 0.0  ;;  %v3176_v5 = vmax.f32 %v3172_v53, 0.0  ;;  %v3177_v22 = vmax.f32 %v3173_v38, 0.0  ;;  %v3178_v27 = vmax.f32 %v3174_v21, 0.0 }
 0x26e   : > { %v3727_v2 = vpack.c.bf16 %v3176_v5, %v3175_v60  ;;  %v3728_v28 = vpack.c.bf16 %v3178_v27, %v3177_v22 }
 0x270   : > { %3195 = vst [vmem:[%s4922_s3] sm:$0xff] %v3727_v2  ;;  %3196 = vst [vmem:[%s4922_s3 + $0x8] sm:$0xff] %v3728_v28 }
 0x271 PF: > { %s13_s14 = sadd.s32 1, %s4364_s14   ;;  %s4923_s12 = smov %s4360_s13 }
 0x272   : > { %p10_p8 = scmp.ge.s32.totalorder %s13_s14, 5   ;;  %s4924_s13 = smov %s4926_s15 }
 0x274   :  { %12 = sbr.rel (!%p10_p8) target bundleno = 2 (0x2), region = 76 }

</bundles_post_ra>
